<compile_context>
chip_gen: v5e
topology: v5e:2x2
jax: 0.10.0
libtpu: 0.0.40
codegen_flags: <defaults>
</compile_context>

<pallas_src>
import functools

import jax
import jax.numpy as jnp
from jax.experimental import pallas as pl
from jax.experimental.pallas import tpu as pltpu


_NUM_LAYERS = 10  # input_fc, 3 x (res_fc1, res_fc2), fc1, fc2, fc3
# Per-layer output widths (layer 9 is zero-padded 5 -> 128 for lane-dense store)
_OUT_DIMS = (512, 512, 512, 512, 512, 512, 512, 256, 128, 128)
_SHIFT_PAD = 512  # all shifts packed into a single (10, 512) f32 operand


# ------------------------- shared forward math ------------------------------ #
# Used both inside the Pallas kernel (get_w waits on the DMA then loads VMEM)
# and as the pure-JAX reference (get_w just returns the host weight), so the
# kernel and the reference perform bit-identical math.

def _forward_math(x_bf16, get_w, shifts, out_dims):
    def layer(h_bf16, i, relu=True):
        od = out_dims[i]
        y = jnp.dot(h_bf16, get_w(i), preferred_element_type=jnp.float32)
        y = y + shifts[i:i + 1, :od]            # folded-BN shift (+ bias), f32
        return jnp.maximum(y, 0.0) if relu else y

    h = layer(x_bf16, 0)                         # input_fc + bn_input + relu
    li = 1
    for _ in range(3):                           # res1..res3
        identity = h                             # residual kept in f32
        t = layer(h.astype(jnp.bfloat16), li)          # fc1 + bn1 + relu
        h = layer(t.astype(jnp.bfloat16), li + 1) + identity  # fc2+bn2+relu, +id
        li += 2
    h = layer(h.astype(jnp.bfloat16), 7)         # fc1 + bn1 + relu
    h = layer(h.astype(jnp.bfloat16), 8)         # fc2 + bn2 + relu
    return layer(h.astype(jnp.bfloat16), 9, relu=False)   # fc3 (f32 out)


# ------------------------------ Pallas kernel ------------------------------- #

def _mlp_kernel(*refs, out_dims):
    x_ref, shifts_ref = refs[0], refs[1]
    w_hbm = refs[2:2 + _NUM_LAYERS]                       # raw HBM refs (pl.ANY)
    o_ref = refs[2 + _NUM_LAYERS]
    w_vmem = refs[3 + _NUM_LAYERS:3 + 2 * _NUM_LAYERS]    # per-layer VMEM scratch
    sem = refs[3 + 2 * _NUM_LAYERS]                       # DMA sems, one/layer

    # Kick off every weight DMA immediately; compute layer i as soon as its own
    # weight has landed (overlaps later-layer DMA with earlier-layer compute).
    copies = [pltpu.make_async_copy(w_hbm[i], w_vmem[i], sem.at[i])
              for i in range(_NUM_LAYERS)]
    for cp in copies:
        cp.start()

    def get_w(i):
        copies[i].wait()
        return w_vmem[i][...]

    o_ref[...] = _forward_math(x_ref[...], get_w, shifts_ref[...], out_dims)


@functools.partial(jax.jit, static_argnames=("input_dim", "output_dim", "input_dim_pad"))
def simple_model_forward(x, ws, shifts_packed, *, input_dim, output_dim, input_dim_pad):
    batch = x.shape[0]
    x_pad = jnp.pad(x, ((0, 0), (0, input_dim_pad - input_dim))).astype(jnp.bfloat16)
    out_pad_dim = ws[-1].shape[1]
    out_dims = tuple(int(w.shape[1]) for w in ws)

    # Roofline: 2*M*K*N summed over layers ~= 35.4 MFLOP; bf16 weights + x +
    # shifts + f32 out ~= 4.46 MB accessed; no transcendentals.
    cost = pl.CostEstimate(flops=35_400_000, bytes_accessed=4_470_000,
                           transcendentals=0)

    out = pl.pallas_call(
        functools.partial(_mlp_kernel, out_dims=out_dims),
        out_shape=jax.ShapeDtypeStruct((batch, out_pad_dim), jnp.float32),
        in_specs=(
            [pl.BlockSpec(x_pad.shape, lambda *_: (0, 0)),            # x (VMEM)
             pl.BlockSpec(shifts_packed.shape, lambda *_: (0, 0))]    # shifts
            + [pl.BlockSpec(memory_space=pl.ANY) for _ in ws]         # weights (HBM)
        ),
        out_specs=pl.BlockSpec((batch, out_pad_dim), lambda *_: (0, 0)),
        scratch_shapes=(
            [pltpu.VMEM(w.shape, jnp.bfloat16) for w in ws]           # weight bufs
            + [pltpu.SemaphoreType.DMA((_NUM_LAYERS,))]
        ),
        compiler_params=pltpu.CompilerParams(vmem_limit_bytes=16 * 1024 * 1024),
        cost_estimate=cost,
    )(x_pad, shifts_packed, *ws)
    return out[:, :output_dim]


# ------------------------ parameters (deterministic) ------------------------ #

def _init_linear(key, in_dim, out_dim):
    kw, kb = jax.random.split(key)
    bound = 1.0 / jnp.sqrt(jnp.float32(in_dim))
    w = jax.random.uniform(kw, (in_dim, out_dim), jnp.float32, -bound, bound)
    b = jax.random.uniform(kb, (out_dim,), jnp.float32, -bound, bound)
    return w, b


def _fold_bn_into_linear(w, b, gamma, beta, mean, var, eps=1e-5):
    scale = gamma / jnp.sqrt(var + eps)
    w_folded = w * scale[None, :]                 # fold BN scale into the weight
    shift = (b - mean) * scale + beta             # remaining per-channel add
    return w_folded, shift


def init_params(key, input_dim, hidden_dim, output_dim, input_dim_pad, output_dim_pad):
    keys = iter(jax.random.split(key, 16))
    ws, shift_rows = [], []

    def add_shift(shift):
        shift_rows.append(jnp.pad(shift, (0, _SHIFT_PAD - shift.shape[0])))

    def linear_bn(in_d, out_d, pad_in=None):
        w, b = _init_linear(next(keys), in_d, out_d)
        gamma = jnp.ones((out_d,), jnp.float32)   # BN weight at init
        beta = jnp.zeros((out_d,), jnp.float32)   # BN bias at init
        mean = jnp.zeros((out_d,), jnp.float32)   # running_mean
        var = jnp.ones((out_d,), jnp.float32)     # running_var
        w, shift = _fold_bn_into_linear(w, b, gamma, beta, mean, var)
        if pad_in is not None and pad_in > in_d:  # zero rows contribute nothing
            w = jnp.pad(w, ((0, pad_in - in_d), (0, 0)))
        ws.append(w.astype(jnp.bfloat16))
        add_shift(shift)

    linear_bn(input_dim, hidden_dim, pad_in=input_dim_pad)   # input_fc + bn_input
    for _ in range(3):                                       # res1, res2, res3
        linear_bn(hidden_dim, hidden_dim)                    # fc1 + bn1
        linear_bn(hidden_dim, hidden_dim)                    # fc2 + bn2
    linear_bn(hidden_dim, 256)                               # fc1 + bn1
    linear_bn(256, 128)                                      # fc2 + bn2

    # fc3: no BN; zero-pad out_dim -> output_dim_pad for a lane-dense store.
    w, b = _init_linear(next(keys), 128, output_dim)
    w = jnp.pad(w, ((0, 0), (0, output_dim_pad - output_dim)))
    ws.append(w.astype(jnp.bfloat16))
    add_shift(jnp.pad(b, (0, output_dim_pad - output_dim)))

    shifts_packed = jnp.stack(shift_rows, axis=0).astype(jnp.float32)  # (10, 512)
    return ws, shifts_packed


# -------------------------- f32-activation reference ------------------------ #

def reference_forward_f32(x_pad, ws, shifts_packed):
    ws32 = [w.astype(jnp.float32) for w in ws]

    def layer(h, i, relu=True):
        od = _OUT_DIMS[i]
        y = h @ ws32[i] + shifts_packed[i:i + 1, :od]
        return jnp.maximum(y, 0.0) if relu else y

    h = layer(x_pad, 0)
    li = 1
    for _ in range(3):
        identity = h
        t = layer(h, li)
        h = layer(t, li + 1) + identity
        li += 2
    h = layer(h, 7)
    h = layer(h, 8)
    return layer(h, 9, relu=False)


# ----------------------------------- main ----------------------------------- #

if __name__ == "__main__":
    BATCH, INPUT_DIM, HIDDEN_DIM, OUTPUT_DIM = 8, 812, 512, 5
    INPUT_DIM_PAD = 896     # next multiple of 128 (lane-aligned K of first matmul)
    OUTPUT_DIM_PAD = 128    # lane-dense final store; sliced back to 5 in wrapper

    key = jax.random.PRNGKey(0)
    kx, kp = jax.random.split(key)
    x = jax.random.normal(kx, (BATCH, INPUT_DIM), jnp.float32)
    ws, shifts_packed = init_params(kp, INPUT_DIM, HIDDEN_DIM, OUTPUT_DIM,
                                    INPUT_DIM_PAD, OUTPUT_DIM_PAD)

    out = jax.block_until_ready(
        simple_model_forward(x, ws, shifts_packed, input_dim=INPUT_DIM,
                             output_dim=OUTPUT_DIM, input_dim_pad=INPUT_DIM_PAD))
    assert out.shape == (BATCH, OUTPUT_DIM), out.shape

    # 1) Exact-math reference: identical bf16-in / f32-accumulate ops as the kernel.
    x_pad_bf16 = jnp.pad(x, ((0, 0), (0, INPUT_DIM_PAD - INPUT_DIM))).astype(jnp.bfloat16)
    ref = _forward_math(x_pad_bf16, lambda i: ws[i], shifts_packed,
                        _OUT_DIMS)[:, :OUTPUT_DIM]
    assert jnp.allclose(out, ref, atol=1e-2, rtol=1e-2), float(jnp.abs(out - ref).max())

    # 2) Loose check vs f32-activation reference (only bf16 rounding differs).
    x_pad_f32 = jnp.pad(x, ((0, 0), (0, INPUT_DIM_PAD - INPUT_DIM)))
    ref32 = reference_forward_f32(x_pad_f32, ws, shifts_packed)[:, :OUTPUT_DIM]
    assert jnp.allclose(out, ref32, atol=1e-1, rtol=1e-1), float(jnp.abs(out - ref32).max())

    print("KERNEL_OK")
</pallas_src>

<mosaic_0001>
module attributes {stable_mosaic.version = 11 : i64} {
  func.func @_mlp_kernel(%arg0: memref<8x896xbf16, #tpu.memory_space<vmem>>, %arg1: memref<10x512xf32, #tpu.memory_space<vmem>>, %arg2: memref<896x512xbf16, #tpu.memory_space<any>>, %arg3: memref<512x512xbf16, #tpu.memory_space<any>>, %arg4: memref<512x512xbf16, #tpu.memory_space<any>>, %arg5: memref<512x512xbf16, #tpu.memory_space<any>>, %arg6: memref<512x512xbf16, #tpu.memory_space<any>>, %arg7: memref<512x512xbf16, #tpu.memory_space<any>>, %arg8: memref<512x512xbf16, #tpu.memory_space<any>>, %arg9: memref<512x256xbf16, #tpu.memory_space<any>>, %arg10: memref<256x128xbf16, #tpu.memory_space<any>>, %arg11: memref<128x128xbf16, #tpu.memory_space<any>>, %arg12: memref<8x128xf32, #tpu.memory_space<vmem>>, %arg13: memref<896x512xbf16, #tpu.memory_space<vmem>>, %arg14: memref<512x512xbf16, #tpu.memory_space<vmem>>, %arg15: memref<512x512xbf16, #tpu.memory_space<vmem>>, %arg16: memref<512x512xbf16, #tpu.memory_space<vmem>>, %arg17: memref<512x512xbf16, #tpu.memory_space<vmem>>, %arg18: memref<512x512xbf16, #tpu.memory_space<vmem>>, %arg19: memref<512x512xbf16, #tpu.memory_space<vmem>>, %arg20: memref<512x256xbf16, #tpu.memory_space<vmem>>, %arg21: memref<256x128xbf16, #tpu.memory_space<vmem>>, %arg22: memref<128x128xbf16, #tpu.memory_space<vmem>>, %arg23: memref<10x!tpu.dma_semaphore, #tpu.memory_space<semaphore_mem>>) attributes {dimension_semantics = [], scalar_prefetch = 0 : i64, scratch_operands = 11 : i64, tpu.core_type = #tpu.core_type<tc>} {
    %c0_i32 = arith.constant 0 : i32
    %0 = tpu.memref_slice %arg23[%c0_i32] : memref<10x!tpu.dma_semaphore, #tpu.memory_space<semaphore_mem>> -> memref<1x!tpu.dma_semaphore, #tpu.memory_space<semaphore_mem>>
    %1 = tpu.memref_squeeze %0 : memref<1x!tpu.dma_semaphore, #tpu.memory_space<semaphore_mem>> -> memref<!tpu.dma_semaphore, #tpu.memory_space<semaphore_mem>>
    tpu.enqueue_dma source(%arg2 : memref<896x512xbf16, #tpu.memory_space<any>>) target(%arg13 : memref<896x512xbf16, #tpu.memory_space<vmem>>) target_semaphore(%1 : memref<!tpu.dma_semaphore, #tpu.memory_space<semaphore_mem>>)
    %c1_i32 = arith.constant 1 : i32
    %2 = tpu.memref_slice %arg23[%c1_i32] : memref<10x!tpu.dma_semaphore, #tpu.memory_space<semaphore_mem>> -> memref<1x!tpu.dma_semaphore, #tpu.memory_space<semaphore_mem>>
    %3 = tpu.memref_squeeze %2 : memref<1x!tpu.dma_semaphore, #tpu.memory_space<semaphore_mem>> -> memref<!tpu.dma_semaphore, #tpu.memory_space<semaphore_mem>>
    tpu.enqueue_dma source(%arg3 : memref<512x512xbf16, #tpu.memory_space<any>>) target(%arg14 : memref<512x512xbf16, #tpu.memory_space<vmem>>) target_semaphore(%3 : memref<!tpu.dma_semaphore, #tpu.memory_space<semaphore_mem>>)
    %c2_i32 = arith.constant 2 : i32
    %4 = tpu.memref_slice %arg23[%c2_i32] : memref<10x!tpu.dma_semaphore, #tpu.memory_space<semaphore_mem>> -> memref<1x!tpu.dma_semaphore, #tpu.memory_space<semaphore_mem>>
    %5 = tpu.memref_squeeze %4 : memref<1x!tpu.dma_semaphore, #tpu.memory_space<semaphore_mem>> -> memref<!tpu.dma_semaphore, #tpu.memory_space<semaphore_mem>>
    tpu.enqueue_dma source(%arg4 : memref<512x512xbf16, #tpu.memory_space<any>>) target(%arg15 : memref<512x512xbf16, #tpu.memory_space<vmem>>) target_semaphore(%5 : memref<!tpu.dma_semaphore, #tpu.memory_space<semaphore_mem>>)
    %c3_i32 = arith.constant 3 : i32
    %6 = tpu.memref_slice %arg23[%c3_i32] : memref<10x!tpu.dma_semaphore, #tpu.memory_space<semaphore_mem>> -> memref<1x!tpu.dma_semaphore, #tpu.memory_space<semaphore_mem>>
    %7 = tpu.memref_squeeze %6 : memref<1x!tpu.dma_semaphore, #tpu.memory_space<semaphore_mem>> -> memref<!tpu.dma_semaphore, #tpu.memory_space<semaphore_mem>>
    tpu.enqueue_dma source(%arg5 : memref<512x512xbf16, #tpu.memory_space<any>>) target(%arg16 : memref<512x512xbf16, #tpu.memory_space<vmem>>) target_semaphore(%7 : memref<!tpu.dma_semaphore, #tpu.memory_space<semaphore_mem>>)
    %c4_i32 = arith.constant 4 : i32
    %8 = tpu.memref_slice %arg23[%c4_i32] : memref<10x!tpu.dma_semaphore, #tpu.memory_space<semaphore_mem>> -> memref<1x!tpu.dma_semaphore, #tpu.memory_space<semaphore_mem>>
    %9 = tpu.memref_squeeze %8 : memref<1x!tpu.dma_semaphore, #tpu.memory_space<semaphore_mem>> -> memref<!tpu.dma_semaphore, #tpu.memory_space<semaphore_mem>>
    tpu.enqueue_dma source(%arg6 : memref<512x512xbf16, #tpu.memory_space<any>>) target(%arg17 : memref<512x512xbf16, #tpu.memory_space<vmem>>) target_semaphore(%9 : memref<!tpu.dma_semaphore, #tpu.memory_space<semaphore_mem>>)
    %c5_i32 = arith.constant 5 : i32
    %10 = tpu.memref_slice %arg23[%c5_i32] : memref<10x!tpu.dma_semaphore, #tpu.memory_space<semaphore_mem>> -> memref<1x!tpu.dma_semaphore, #tpu.memory_space<semaphore_mem>>
    %11 = tpu.memref_squeeze %10 : memref<1x!tpu.dma_semaphore, #tpu.memory_space<semaphore_mem>> -> memref<!tpu.dma_semaphore, #tpu.memory_space<semaphore_mem>>
    tpu.enqueue_dma source(%arg7 : memref<512x512xbf16, #tpu.memory_space<any>>) target(%arg18 : memref<512x512xbf16, #tpu.memory_space<vmem>>) target_semaphore(%11 : memref<!tpu.dma_semaphore, #tpu.memory_space<semaphore_mem>>)
    %c6_i32 = arith.constant 6 : i32
    %12 = tpu.memref_slice %arg23[%c6_i32] : memref<10x!tpu.dma_semaphore, #tpu.memory_space<semaphore_mem>> -> memref<1x!tpu.dma_semaphore, #tpu.memory_space<semaphore_mem>>
    %13 = tpu.memref_squeeze %12 : memref<1x!tpu.dma_semaphore, #tpu.memory_space<semaphore_mem>> -> memref<!tpu.dma_semaphore, #tpu.memory_space<semaphore_mem>>
    tpu.enqueue_dma source(%arg8 : memref<512x512xbf16, #tpu.memory_space<any>>) target(%arg19 : memref<512x512xbf16, #tpu.memory_space<vmem>>) target_semaphore(%13 : memref<!tpu.dma_semaphore, #tpu.memory_space<semaphore_mem>>)
    %c7_i32 = arith.constant 7 : i32
    %14 = tpu.memref_slice %arg23[%c7_i32] : memref<10x!tpu.dma_semaphore, #tpu.memory_space<semaphore_mem>> -> memref<1x!tpu.dma_semaphore, #tpu.memory_space<semaphore_mem>>
    %15 = tpu.memref_squeeze %14 : memref<1x!tpu.dma_semaphore, #tpu.memory_space<semaphore_mem>> -> memref<!tpu.dma_semaphore, #tpu.memory_space<semaphore_mem>>
    tpu.enqueue_dma source(%arg9 : memref<512x256xbf16, #tpu.memory_space<any>>) target(%arg20 : memref<512x256xbf16, #tpu.memory_space<vmem>>) target_semaphore(%15 : memref<!tpu.dma_semaphore, #tpu.memory_space<semaphore_mem>>)
    %c8_i32 = arith.constant 8 : i32
    %16 = tpu.memref_slice %arg23[%c8_i32] : memref<10x!tpu.dma_semaphore, #tpu.memory_space<semaphore_mem>> -> memref<1x!tpu.dma_semaphore, #tpu.memory_space<semaphore_mem>>
    %17 = tpu.memref_squeeze %16 : memref<1x!tpu.dma_semaphore, #tpu.memory_space<semaphore_mem>> -> memref<!tpu.dma_semaphore, #tpu.memory_space<semaphore_mem>>
    tpu.enqueue_dma source(%arg10 : memref<256x128xbf16, #tpu.memory_space<any>>) target(%arg21 : memref<256x128xbf16, #tpu.memory_space<vmem>>) target_semaphore(%17 : memref<!tpu.dma_semaphore, #tpu.memory_space<semaphore_mem>>)
    %c9_i32 = arith.constant 9 : i32
    %18 = tpu.memref_slice %arg23[%c9_i32] : memref<10x!tpu.dma_semaphore, #tpu.memory_space<semaphore_mem>> -> memref<1x!tpu.dma_semaphore, #tpu.memory_space<semaphore_mem>>
    %19 = tpu.memref_squeeze %18 : memref<1x!tpu.dma_semaphore, #tpu.memory_space<semaphore_mem>> -> memref<!tpu.dma_semaphore, #tpu.memory_space<semaphore_mem>>
    tpu.enqueue_dma source(%arg11 : memref<128x128xbf16, #tpu.memory_space<any>>) target(%arg22 : memref<128x128xbf16, #tpu.memory_space<vmem>>) target_semaphore(%19 : memref<!tpu.dma_semaphore, #tpu.memory_space<semaphore_mem>>)
    %c0 = arith.constant 0 : index
    %c0_0 = arith.constant 0 : index
    %20 = vector.load %arg0[%c0, %c0_0] : memref<8x896xbf16, #tpu.memory_space<vmem>>, vector<8x896xbf16>
    %c0_1 = arith.constant 0 : index
    %c0_2 = arith.constant 0 : index
    %21 = vector.load %arg1[%c0_1, %c0_2] : memref<10x512xf32, #tpu.memory_space<vmem>>, vector<10x512xf32>
    %c0_i32_3 = arith.constant 0 : i32
    %22 = tpu.memref_slice %arg23[%c0_i32_3] : memref<10x!tpu.dma_semaphore, #tpu.memory_space<semaphore_mem>> -> memref<1x!tpu.dma_semaphore, #tpu.memory_space<semaphore_mem>>
    %23 = tpu.memref_squeeze %22 : memref<1x!tpu.dma_semaphore, #tpu.memory_space<semaphore_mem>> -> memref<!tpu.dma_semaphore, #tpu.memory_space<semaphore_mem>>
    tpu.wait_dma2 semaphore(%23 : memref<!tpu.dma_semaphore, #tpu.memory_space<semaphore_mem>>) src(%arg2 : memref<896x512xbf16, #tpu.memory_space<any>>) dst(%arg13 : memref<896x512xbf16, #tpu.memory_space<vmem>>)
    %c0_4 = arith.constant 0 : index
    %c0_5 = arith.constant 0 : index
    %24 = vector.load %arg13[%c0_4, %c0_5] : memref<896x512xbf16, #tpu.memory_space<vmem>>, vector<896x512xbf16>
    %cst = arith.constant dense<0.000000e+00> : vector<8x512xf32>
    %25 = tpu.matmul %20, %24, %cst {dimension_numbers = #tpu.dot_dimension_numbers<[1], [0], [0], [1], [0, 0, 1, 1], [], []>} : vector<8x896xbf16>, vector<896x512xbf16>, vector<8x512xf32> -> vector<8x512xf32>
    %26 = vector.extract_strided_slice %21 {offsets = [0, 0], sizes = [1, 512], strides = [1, 1]} : vector<10x512xf32> to vector<1x512xf32>
    %27 = vector.broadcast %26 : vector<1x512xf32> to vector<8x512xf32>
    %28 = arith.addf %25, %27 : vector<8x512xf32>
    %cst_6 = arith.constant 0.000000e+00 : f32
    %29 = vector.broadcast %cst_6 : f32 to vector<8x512xf32>
    %30 = arith.maximumf %28, %29 : vector<8x512xf32>
    %31 = arith.truncf %30 : vector<8x512xf32> to vector<8x512xbf16>
    %c1_i32_7 = arith.constant 1 : i32
    %32 = tpu.memref_slice %arg23[%c1_i32_7] : memref<10x!tpu.dma_semaphore, #tpu.memory_space<semaphore_mem>> -> memref<1x!tpu.dma_semaphore, #tpu.memory_space<semaphore_mem>>
    %33 = tpu.memref_squeeze %32 : memref<1x!tpu.dma_semaphore, #tpu.memory_space<semaphore_mem>> -> memref<!tpu.dma_semaphore, #tpu.memory_space<semaphore_mem>>
    tpu.wait_dma2 semaphore(%33 : memref<!tpu.dma_semaphore, #tpu.memory_space<semaphore_mem>>) src(%arg3 : memref<512x512xbf16, #tpu.memory_space<any>>) dst(%arg14 : memref<512x512xbf16, #tpu.memory_space<vmem>>)
    %c0_8 = arith.constant 0 : index
    %c0_9 = arith.constant 0 : index
    %34 = vector.load %arg14[%c0_8, %c0_9] : memref<512x512xbf16, #tpu.memory_space<vmem>>, vector<512x512xbf16>
    %cst_10 = arith.constant dense<0.000000e+00> : vector<8x512xf32>
    %35 = tpu.matmul %31, %34, %cst_10 {dimension_numbers = #tpu.dot_dimension_numbers<[1], [0], [0], [1], [0, 0, 1, 1], [], []>} : vector<8x512xbf16>, vector<512x512xbf16>, vector<8x512xf32> -> vector<8x512xf32>
    %36 = vector.extract_strided_slice %21 {offsets = [1, 0], sizes = [1, 512], strides = [1, 1]} : vector<10x512xf32> to vector<1x512xf32>
    %37 = vector.broadcast %36 : vector<1x512xf32> to vector<8x512xf32>
    %38 = arith.addf %35, %37 : vector<8x512xf32>
    %cst_11 = arith.constant 0.000000e+00 : f32
    %39 = vector.broadcast %cst_11 : f32 to vector<8x512xf32>
    %40 = arith.maximumf %38, %39 : vector<8x512xf32>
    %41 = arith.truncf %40 : vector<8x512xf32> to vector<8x512xbf16>
    %c2_i32_12 = arith.constant 2 : i32
    %42 = tpu.memref_slice %arg23[%c2_i32_12] : memref<10x!tpu.dma_semaphore, #tpu.memory_space<semaphore_mem>> -> memref<1x!tpu.dma_semaphore, #tpu.memory_space<semaphore_mem>>
    %43 = tpu.memref_squeeze %42 : memref<1x!tpu.dma_semaphore, #tpu.memory_space<semaphore_mem>> -> memref<!tpu.dma_semaphore, #tpu.memory_space<semaphore_mem>>
    tpu.wait_dma2 semaphore(%43 : memref<!tpu.dma_semaphore, #tpu.memory_space<semaphore_mem>>) src(%arg4 : memref<512x512xbf16, #tpu.memory_space<any>>) dst(%arg15 : memref<512x512xbf16, #tpu.memory_space<vmem>>)
    %c0_13 = arith.constant 0 : index
    %c0_14 = arith.constant 0 : index
    %44 = vector.load %arg15[%c0_13, %c0_14] : memref<512x512xbf16, #tpu.memory_space<vmem>>, vector<512x512xbf16>
    %cst_15 = arith.constant dense<0.000000e+00> : vector<8x512xf32>
    %45 = tpu.matmul %41, %44, %cst_15 {dimension_numbers = #tpu.dot_dimension_numbers<[1], [0], [0], [1], [0, 0, 1, 1], [], []>} : vector<8x512xbf16>, vector<512x512xbf16>, vector<8x512xf32> -> vector<8x512xf32>
    %46 = vector.extract_strided_slice %21 {offsets = [2, 0], sizes = [1, 512], strides = [1, 1]} : vector<10x512xf32> to vector<1x512xf32>
    %47 = vector.broadcast %46 : vector<1x512xf32> to vector<8x512xf32>
    %48 = arith.addf %45, %47 : vector<8x512xf32>
    %cst_16 = arith.constant 0.000000e+00 : f32
    %49 = vector.broadcast %cst_16 : f32 to vector<8x512xf32>
    %50 = arith.maximumf %48, %49 : vector<8x512xf32>
    %51 = arith.addf %50, %30 : vector<8x512xf32>
    %52 = arith.truncf %51 : vector<8x512xf32> to vector<8x512xbf16>
    %c3_i32_17 = arith.constant 3 : i32
    %53 = tpu.memref_slice %arg23[%c3_i32_17] : memref<10x!tpu.dma_semaphore, #tpu.memory_space<semaphore_mem>> -> memref<1x!tpu.dma_semaphore, #tpu.memory_space<semaphore_mem>>
    %54 = tpu.memref_squeeze %53 : memref<1x!tpu.dma_semaphore, #tpu.memory_space<semaphore_mem>> -> memref<!tpu.dma_semaphore, #tpu.memory_space<semaphore_mem>>
    tpu.wait_dma2 semaphore(%54 : memref<!tpu.dma_semaphore, #tpu.memory_space<semaphore_mem>>) src(%arg5 : memref<512x512xbf16, #tpu.memory_space<any>>) dst(%arg16 : memref<512x512xbf16, #tpu.memory_space<vmem>>)
    %c0_18 = arith.constant 0 : index
    %c0_19 = arith.constant 0 : index
    %55 = vector.load %arg16[%c0_18, %c0_19] : memref<512x512xbf16, #tpu.memory_space<vmem>>, vector<512x512xbf16>
    %cst_20 = arith.constant dense<0.000000e+00> : vector<8x512xf32>
    %56 = tpu.matmul %52, %55, %cst_20 {dimension_numbers = #tpu.dot_dimension_numbers<[1], [0], [0], [1], [0, 0, 1, 1], [], []>} : vector<8x512xbf16>, vector<512x512xbf16>, vector<8x512xf32> -> vector<8x512xf32>
    %57 = vector.extract_strided_slice %21 {offsets = [3, 0], sizes = [1, 512], strides = [1, 1]} : vector<10x512xf32> to vector<1x512xf32>
    %58 = vector.broadcast %57 : vector<1x512xf32> to vector<8x512xf32>
    %59 = arith.addf %56, %58 : vector<8x512xf32>
    %cst_21 = arith.constant 0.000000e+00 : f32
    %60 = vector.broadcast %cst_21 : f32 to vector<8x512xf32>
    %61 = arith.maximumf %59, %60 : vector<8x512xf32>
    %62 = arith.truncf %61 : vector<8x512xf32> to vector<8x512xbf16>
    %c4_i32_22 = arith.constant 4 : i32
    %63 = tpu.memref_slice %arg23[%c4_i32_22] : memref<10x!tpu.dma_semaphore, #tpu.memory_space<semaphore_mem>> -> memref<1x!tpu.dma_semaphore, #tpu.memory_space<semaphore_mem>>
    %64 = tpu.memref_squeeze %63 : memref<1x!tpu.dma_semaphore, #tpu.memory_space<semaphore_mem>> -> memref<!tpu.dma_semaphore, #tpu.memory_space<semaphore_mem>>
    tpu.wait_dma2 semaphore(%64 : memref<!tpu.dma_semaphore, #tpu.memory_space<semaphore_mem>>) src(%arg6 : memref<512x512xbf16, #tpu.memory_space<any>>) dst(%arg17 : memref<512x512xbf16, #tpu.memory_space<vmem>>)
    %c0_23 = arith.constant 0 : index
    %c0_24 = arith.constant 0 : index
    %65 = vector.load %arg17[%c0_23, %c0_24] : memref<512x512xbf16, #tpu.memory_space<vmem>>, vector<512x512xbf16>
    %cst_25 = arith.constant dense<0.000000e+00> : vector<8x512xf32>
    %66 = tpu.matmul %62, %65, %cst_25 {dimension_numbers = #tpu.dot_dimension_numbers<[1], [0], [0], [1], [0, 0, 1, 1], [], []>} : vector<8x512xbf16>, vector<512x512xbf16>, vector<8x512xf32> -> vector<8x512xf32>
    %67 = vector.extract_strided_slice %21 {offsets = [4, 0], sizes = [1, 512], strides = [1, 1]} : vector<10x512xf32> to vector<1x512xf32>
    %68 = vector.broadcast %67 : vector<1x512xf32> to vector<8x512xf32>
    %69 = arith.addf %66, %68 : vector<8x512xf32>
    %cst_26 = arith.constant 0.000000e+00 : f32
    %70 = vector.broadcast %cst_26 : f32 to vector<8x512xf32>
    %71 = arith.maximumf %69, %70 : vector<8x512xf32>
    %72 = arith.addf %71, %51 : vector<8x512xf32>
    %73 = arith.truncf %72 : vector<8x512xf32> to vector<8x512xbf16>
    %c5_i32_27 = arith.constant 5 : i32
    %74 = tpu.memref_slice %arg23[%c5_i32_27] : memref<10x!tpu.dma_semaphore, #tpu.memory_space<semaphore_mem>> -> memref<1x!tpu.dma_semaphore, #tpu.memory_space<semaphore_mem>>
    %75 = tpu.memref_squeeze %74 : memref<1x!tpu.dma_semaphore, #tpu.memory_space<semaphore_mem>> -> memref<!tpu.dma_semaphore, #tpu.memory_space<semaphore_mem>>
    tpu.wait_dma2 semaphore(%75 : memref<!tpu.dma_semaphore, #tpu.memory_space<semaphore_mem>>) src(%arg7 : memref<512x512xbf16, #tpu.memory_space<any>>) dst(%arg18 : memref<512x512xbf16, #tpu.memory_space<vmem>>)
    %c0_28 = arith.constant 0 : index
    %c0_29 = arith.constant 0 : index
    %76 = vector.load %arg18[%c0_28, %c0_29] : memref<512x512xbf16, #tpu.memory_space<vmem>>, vector<512x512xbf16>
    %cst_30 = arith.constant dense<0.000000e+00> : vector<8x512xf32>
    %77 = tpu.matmul %73, %76, %cst_30 {dimension_numbers = #tpu.dot_dimension_numbers<[1], [0], [0], [1], [0, 0, 1, 1], [], []>} : vector<8x512xbf16>, vector<512x512xbf16>, vector<8x512xf32> -> vector<8x512xf32>
    %78 = vector.extract_strided_slice %21 {offsets = [5, 0], sizes = [1, 512], strides = [1, 1]} : vector<10x512xf32> to vector<1x512xf32>
    %79 = vector.broadcast %78 : vector<1x512xf32> to vector<8x512xf32>
    %80 = arith.addf %77, %79 : vector<8x512xf32>
    %cst_31 = arith.constant 0.000000e+00 : f32
    %81 = vector.broadcast %cst_31 : f32 to vector<8x512xf32>
    %82 = arith.maximumf %80, %81 : vector<8x512xf32>
    %83 = arith.truncf %82 : vector<8x512xf32> to vector<8x512xbf16>
    %c6_i32_32 = arith.constant 6 : i32
    %84 = tpu.memref_slice %arg23[%c6_i32_32] : memref<10x!tpu.dma_semaphore, #tpu.memory_space<semaphore_mem>> -> memref<1x!tpu.dma_semaphore, #tpu.memory_space<semaphore_mem>>
    %85 = tpu.memref_squeeze %84 : memref<1x!tpu.dma_semaphore, #tpu.memory_space<semaphore_mem>> -> memref<!tpu.dma_semaphore, #tpu.memory_space<semaphore_mem>>
    tpu.wait_dma2 semaphore(%85 : memref<!tpu.dma_semaphore, #tpu.memory_space<semaphore_mem>>) src(%arg8 : memref<512x512xbf16, #tpu.memory_space<any>>) dst(%arg19 : memref<512x512xbf16, #tpu.memory_space<vmem>>)
    %c0_33 = arith.constant 0 : index
    %c0_34 = arith.constant 0 : index
    %86 = vector.load %arg19[%c0_33, %c0_34] : memref<512x512xbf16, #tpu.memory_space<vmem>>, vector<512x512xbf16>
    %cst_35 = arith.constant dense<0.000000e+00> : vector<8x512xf32>
    %87 = tpu.matmul %83, %86, %cst_35 {dimension_numbers = #tpu.dot_dimension_numbers<[1], [0], [0], [1], [0, 0, 1, 1], [], []>} : vector<8x512xbf16>, vector<512x512xbf16>, vector<8x512xf32> -> vector<8x512xf32>
    %88 = vector.extract_strided_slice %21 {offsets = [6, 0], sizes = [1, 512], strides = [1, 1]} : vector<10x512xf32> to vector<1x512xf32>
    %89 = vector.broadcast %88 : vector<1x512xf32> to vector<8x512xf32>
    %90 = arith.addf %87, %89 : vector<8x512xf32>
    %cst_36 = arith.constant 0.000000e+00 : f32
    %91 = vector.broadcast %cst_36 : f32 to vector<8x512xf32>
    %92 = arith.maximumf %90, %91 : vector<8x512xf32>
    %93 = arith.addf %92, %72 : vector<8x512xf32>
    %94 = arith.truncf %93 : vector<8x512xf32> to vector<8x512xbf16>
    %c7_i32_37 = arith.constant 7 : i32
    %95 = tpu.memref_slice %arg23[%c7_i32_37] : memref<10x!tpu.dma_semaphore, #tpu.memory_space<semaphore_mem>> -> memref<1x!tpu.dma_semaphore, #tpu.memory_space<semaphore_mem>>
    %96 = tpu.memref_squeeze %95 : memref<1x!tpu.dma_semaphore, #tpu.memory_space<semaphore_mem>> -> memref<!tpu.dma_semaphore, #tpu.memory_space<semaphore_mem>>
    tpu.wait_dma2 semaphore(%96 : memref<!tpu.dma_semaphore, #tpu.memory_space<semaphore_mem>>) src(%arg9 : memref<512x256xbf16, #tpu.memory_space<any>>) dst(%arg20 : memref<512x256xbf16, #tpu.memory_space<vmem>>)
    %c0_38 = arith.constant 0 : index
    %c0_39 = arith.constant 0 : index
    %97 = vector.load %arg20[%c0_38, %c0_39] : memref<512x256xbf16, #tpu.memory_space<vmem>>, vector<512x256xbf16>
    %cst_40 = arith.constant dense<0.000000e+00> : vector<8x256xf32>
    %98 = tpu.matmul %94, %97, %cst_40 {dimension_numbers = #tpu.dot_dimension_numbers<[1], [0], [0], [1], [0, 0, 1, 1], [], []>} : vector<8x512xbf16>, vector<512x256xbf16>, vector<8x256xf32> -> vector<8x256xf32>
    %99 = vector.extract_strided_slice %21 {offsets = [7, 0], sizes = [1, 256], strides = [1, 1]} : vector<10x512xf32> to vector<1x256xf32>
    %100 = vector.broadcast %99 : vector<1x256xf32> to vector<8x256xf32>
    %101 = arith.addf %98, %100 : vector<8x256xf32>
    %cst_41 = arith.constant 0.000000e+00 : f32
    %102 = vector.broadcast %cst_41 : f32 to vector<8x256xf32>
    %103 = arith.maximumf %101, %102 : vector<8x256xf32>
    %104 = arith.truncf %103 : vector<8x256xf32> to vector<8x256xbf16>
    %c8_i32_42 = arith.constant 8 : i32
    %105 = tpu.memref_slice %arg23[%c8_i32_42] : memref<10x!tpu.dma_semaphore, #tpu.memory_space<semaphore_mem>> -> memref<1x!tpu.dma_semaphore, #tpu.memory_space<semaphore_mem>>
    %106 = tpu.memref_squeeze %105 : memref<1x!tpu.dma_semaphore, #tpu.memory_space<semaphore_mem>> -> memref<!tpu.dma_semaphore, #tpu.memory_space<semaphore_mem>>
    tpu.wait_dma2 semaphore(%106 : memref<!tpu.dma_semaphore, #tpu.memory_space<semaphore_mem>>) src(%arg10 : memref<256x128xbf16, #tpu.memory_space<any>>) dst(%arg21 : memref<256x128xbf16, #tpu.memory_space<vmem>>)
    %c0_43 = arith.constant 0 : index
    %c0_44 = arith.constant 0 : index
    %107 = vector.load %arg21[%c0_43, %c0_44] : memref<256x128xbf16, #tpu.memory_space<vmem>>, vector<256x128xbf16>
    %cst_45 = arith.constant dense<0.000000e+00> : vector<8x128xf32>
    %108 = tpu.matmul %104, %107, %cst_45 {dimension_numbers = #tpu.dot_dimension_numbers<[1], [0], [0], [1], [0, 0, 1, 1], [], []>} : vector<8x256xbf16>, vector<256x128xbf16>, vector<8x128xf32> -> vector<8x128xf32>
    %109 = vector.extract_strided_slice %21 {offsets = [8, 0], sizes = [1, 128], strides = [1, 1]} : vector<10x512xf32> to vector<1x128xf32>
    %110 = vector.broadcast %109 : vector<1x128xf32> to vector<8x128xf32>
    %111 = arith.addf %108, %110 : vector<8x128xf32>
    %cst_46 = arith.constant 0.000000e+00 : f32
    %112 = vector.broadcast %cst_46 : f32 to vector<8x128xf32>
    %113 = arith.maximumf %111, %112 : vector<8x128xf32>
    %114 = arith.truncf %113 : vector<8x128xf32> to vector<8x128xbf16>
    %c9_i32_47 = arith.constant 9 : i32
    %115 = tpu.memref_slice %arg23[%c9_i32_47] : memref<10x!tpu.dma_semaphore, #tpu.memory_space<semaphore_mem>> -> memref<1x!tpu.dma_semaphore, #tpu.memory_space<semaphore_mem>>
    %116 = tpu.memref_squeeze %115 : memref<1x!tpu.dma_semaphore, #tpu.memory_space<semaphore_mem>> -> memref<!tpu.dma_semaphore, #tpu.memory_space<semaphore_mem>>
    tpu.wait_dma2 semaphore(%116 : memref<!tpu.dma_semaphore, #tpu.memory_space<semaphore_mem>>) src(%arg11 : memref<128x128xbf16, #tpu.memory_space<any>>) dst(%arg22 : memref<128x128xbf16, #tpu.memory_space<vmem>>)
    %c0_48 = arith.constant 0 : index
    %c0_49 = arith.constant 0 : index
    %117 = vector.load %arg22[%c0_48, %c0_49] : memref<128x128xbf16, #tpu.memory_space<vmem>>, vector<128x128xbf16>
    %cst_50 = arith.constant dense<0.000000e+00> : vector<8x128xf32>
    %118 = tpu.matmul %114, %117, %cst_50 {dimension_numbers = #tpu.dot_dimension_numbers<[1], [0], [0], [1], [0, 0, 1, 1], [], []>} : vector<8x128xbf16>, vector<128x128xbf16>, vector<8x128xf32> -> vector<8x128xf32>
    %119 = vector.extract_strided_slice %21 {offsets = [9, 0], sizes = [1, 128], strides = [1, 1]} : vector<10x512xf32> to vector<1x128xf32>
    %120 = vector.broadcast %119 : vector<1x128xf32> to vector<8x128xf32>
    %121 = arith.addf %118, %120 : vector<8x128xf32>
    %c0_51 = arith.constant 0 : index
    %c0_52 = arith.constant 0 : index
    %122 = vector.load %arg12[%c0_51, %c0_52] : memref<8x128xf32, #tpu.memory_space<vmem>>, vector<8x128xf32>
    tpu.vector_store %arg12[%c0_51, %c0_52], %121 {strides = array<i32>} : memref<8x128xf32, #tpu.memory_space<vmem>>, vector<8x128xf32>,
    return
  }
}

</mosaic_0001>

<bundles_post_ra>
// kernel: simple_model_forward.1
= control target key start
LH: loop header
LB: loop body
LE: loop exit
PB: predicated region body
PF: predicated region fallthrough
CT: control target
= control target key end

     0   :  { %17 = vsyncpa [#allocation14], 0  ;;  %s14959_s0 = inlined_call_operand.vmem [shape: bf16[8,896], index: 0, kind: input, shape index: {}]   ;;  %s14960_s1 = inlined_call_operand.hbm [shape: f32[10,512], index: 1, kind: input, shape index: {}]   ;;  %s14961_s2 = inlined_call_operand.hbm [shape: bf16[896,512], index: 2, kind: input, shape index: {}]   ;;  %s14962_s3 = inlined_call_operand.hbm [shape: bf16[512,512], index: 3, kind: input, shape index: {}]   ;;  %s14963_s4 = inlined_call_operand.hbm [shape: bf16[512,512], index: 4, kind: input, shape index: {}]   ;;  %s14964_s5 = inlined_call_operand.hbm [shape: bf16[512,512], index: 5, kind: input, shape index: {}]   ;;  %s14965_s6 = inlined_call_operand.hbm [shape: bf16[512,512], index: 6, kind: input, shape index: {}]   ;;  %s14966_s7 = inlined_call_operand.hbm [shape: bf16[512,512], index: 7, kind: input, shape index: {}]   ;;  %s14967_s8 = inlined_call_operand.hbm [shape: bf16[512,512], index: 8, kind: input, shape index: {}]   ;;  %s14968_s9 = inlined_call_operand.hbm [shape: bf16[512,256], index: 9, kind: input, shape index: {}]   ;;  %s14969_s10 = inlined_call_operand.vmem [shape: bf16[256,128], index: 10, kind: input, shape index: {}]   ;;  %s14970_s11 = inlined_call_operand.hbm [shape: bf16[128,128], index: 11, kind: input, shape index: {}]   ;;  %s14971_s12 = inlined_call_operand.hbm [shape: f32[8,128], index: 12, kind: output, shape index: {}]  }
   0x1   :  { %18 = vsyncpa [#allocation15], 0  ;;  %s25_s23 = sshll.u32 %s14960_s1, 4  ;;  %s14466_s24 = smov [#allocation13]   ;;  %s26_s23 = int_to_ptr.hbm [resolvable:$true] %s25_s23 }
   0x2   :  { %s27_s25 = sshll.u32 %s14466_s24, 4  ;;  %s14467_s26 = smov 512   ;;  %s28_s25 = int_to_ptr.vmem [resolvable:$true] %s27_s25 }
   0x3   :  { %s14468_s27 = smov 32  }
   0x4   :  { %33 = dma.hbm_to_vmem [thread:$0]  %s26_s23, 1024, %s28_s25, [#allocation14], %s14467_s26, %s14467_s26, %s14468_s27  }
   0x5   :  { %14442 = dma.done.wait [#allocation14], 1024  }
   0x6   :  { %14443 = vsyncadd [#allocation14], 4294966272  ;;  %s45_s30 = sshll.u32 %s14961_s2, 4  ;;  %s14469_s13 = smov [#allocation2]   ;;  %v160_v0 = vld [vmem:[%s14969_s10] sm:$0xff]  ;;  %v162_v1 = vld [vmem:[%s14969_s10 + $0x8] sm:$0xff]  ;;  %s46_s30 = int_to_ptr.hbm [resolvable:$true] %s45_s30 }
   0x7   :  { %s47_s14 = sshll.u32 %s14469_s13, 4  ;;  %s59_s1 = sshll.u32 %s14962_s3, 4  ;;  %v164_v2 = vld [vmem:[%s14969_s10 + $0x10] sm:$0xff]  ;;  %161 = vst [vmem:[#allocation10 + $0x30] sm:$0xff] %v160_v0  ;;  %v166_v3 = vld [vmem:[%s14969_s10 + $0x18] sm:$0xff]  ;;  %v168_v4 = vld [vmem:[%s14969_s10 + $0x20] sm:$0xff]  ;;  %s48_s14 = int_to_ptr.vmem [resolvable:$true] %s47_s14  ;;  %s60_s1 = int_to_ptr.hbm [resolvable:$true] %s59_s1 }
   0x8   :  { %50 = dma.hbm_to_vmem [thread:$0]  %s46_s30, 28672, %s48_s14, [#allocation12]  ;;  %163 = vst [vmem:[#allocation10] sm:$0xff] %v162_v1  ;;  %v170_v5 = vld [vmem:[%s14969_s10 + $0x28] sm:$0xff]  ;;  %v172_v6 = vld [vmem:[%s14969_s10 + $0x30] sm:$0xff]  ;;  %v174_v7 = vld [vmem:[%s14969_s10 + $0x38] sm:$0xff] }
   0x9   :  { %s14470_s17 = smov [#allocation3]   ;;  %s73_s21 = sshll.u32 %s14963_s4, 4  ;;  %165 = vst [vmem:[#allocation10 + $0x58] sm:$0xff] %v164_v2  ;;  %v176_v8 = vld [vmem:[%s14969_s10 + $0x40] sm:$0xff]  ;;  %v178_v9 = vld [vmem:[%s14969_s10 + $0x48] sm:$0xff]  ;;  %v180_v10 = vld [vmem:[%s14969_s10 + $0x50] sm:$0xff]  ;;  %s74_s21 = int_to_ptr.hbm [resolvable:$true] %s73_s21 }
   0xa   :  { %s61_s18 = sshll.u32 %s14470_s17, 4  ;;  %s87_s28 = sshll.u32 %s14964_s5, 4  ;;  %167 = vst [vmem:[#allocation10 + $0x18] sm:$0xff] %v166_v3  ;;  %v182_v11 = vld [vmem:[%s14969_s10 + $0x58] sm:$0xff]  ;;  %v184_v12 = vld [vmem:[%s14969_s10 + $0x60] sm:$0xff]  ;;  %v186_v13 = vld [vmem:[%s14969_s10 + $0x68] sm:$0xff]  ;;  %s62_s18 = int_to_ptr.vmem [resolvable:$true] %s61_s18  ;;  %s88_s28 = int_to_ptr.hbm [resolvable:$true] %s87_s28 }
   0xb   :  { %64 = dma.hbm_to_vmem [thread:$0]  %s60_s1, 16384, %s62_s18, [#allocation12 + $0x1]  ;;  %169 = vst [vmem:[#allocation10 + $0x50] sm:$0xff] %v168_v4  ;;  %v188_v14 = vld [vmem:[%s14969_s10 + $0x70] sm:$0xff]  ;;  %v190_v15 = vld [vmem:[%s14969_s10 + $0x78] sm:$0xff] }
   0xc   :  { %s14471_s30 = smov [#allocation4]   ;;  %s14472_s18 = smov [#allocation5]   ;;  %171 = vst [vmem:[#allocation10 + $0x68] sm:$0xff] %v170_v5 }
   0xd   :  { %s75_s13 = sshll.u32 %s14471_s30, 4  ;;  %s89_s19 = sshll.u32 %s14472_s18, 4  ;;  %173 = vst [vmem:[#allocation10 + $0x8] sm:$0xff] %v172_v6  ;;  %s76_s13 = int_to_ptr.vmem [resolvable:$true] %s75_s13  ;;  %s90_s19 = int_to_ptr.vmem [resolvable:$true] %s89_s19 }
   0xe   :  { %78 = dma.hbm_to_vmem [thread:$0]  %s74_s21, 16384, %s76_s13, [#allocation12 + $0x2]  ;;  %175 = vst [vmem:[#allocation10 + $0x48] sm:$0xff] %v174_v7 }
   0xf   :  { %s101_s22 = sshll.u32 %s14965_s6, 4  ;;  %s115_s4 = sshll.u32 %s14966_s7, 4  ;;  %177 = vst [vmem:[#allocation10 + $0x40] sm:$0xff] %v176_v8  ;;  %s102_s22 = int_to_ptr.hbm [resolvable:$true] %s101_s22  ;;  %s116_s4 = int_to_ptr.hbm [resolvable:$true] %s115_s4 }
  0x10   :  { %92 = dma.hbm_to_vmem [thread:$0]  %s88_s28, 16384, %s90_s19, [#allocation12 + $0x3]  ;;  %179 = vst [vmem:[#allocation10 + $0x20] sm:$0xff] %v178_v9 }
  0x11   :  { %s14473_s13 = smov [#allocation6]   ;;  %181 = vst [vmem:[#allocation10 + $0x10] sm:$0xff] %v180_v10  ;;  %s14474_s17 = smov [#allocation7]  }
  0x12   :  { %s103_s14 = sshll.u32 %s14473_s13, 4  ;;  %s117_s18 = sshll.u32 %s14474_s17, 4  ;;  %183 = vst [vmem:[#allocation10 + $0x38] sm:$0xff] %v182_v11  ;;  %s104_s14 = int_to_ptr.vmem [resolvable:$true] %s103_s14  ;;  %s118_s18 = int_to_ptr.vmem [resolvable:$true] %s117_s18 }
  0x13   :  { %106 = dma.hbm_to_vmem [thread:$0]  %s102_s22, 16384, %s104_s14, [#allocation12 + $0x4]  ;;  %185 = vst [vmem:[#allocation10 + $0x60] sm:$0xff] %v184_v12 }
  0x14   :  { %s129_s2 = sshll.u32 %s14967_s8, 4  ;;  %187 = vst [vmem:[#allocation10 + $0x70] sm:$0xff] %v186_v13  ;;  %s143_s26 = sshll.u32 %s14968_s9, 4  ;;  %s130_s2 = int_to_ptr.hbm [resolvable:$true] %s129_s2  ;;  %s144_s26 = int_to_ptr.hbm [resolvable:$true] %s143_s26 }
  0x15   :  { %120 = dma.hbm_to_vmem [thread:$0]  %s116_s4, 16384, %s118_s18, [#allocation12 + $0x5]  ;;  %189 = vst [vmem:[#allocation10 + $0x78] sm:$0xff] %v188_v14 }
  0x16   :  { %s14475_s8 = smov [#allocation8]   ;;  %191 = vst [vmem:[#allocation10 + $0x28] sm:$0xff] %v190_v15  ;;  %s14476_s6 = smov [#allocation9]  }
  0x17   :  { %s131_s27 = sshll.u32 %s14475_s8, 4  ;;  %s145_s29 = sshll.u32 %s14476_s6, 4  ;;  %s132_s27 = int_to_ptr.vmem [resolvable:$true] %s131_s27  ;;  %s146_s29 = int_to_ptr.vmem [resolvable:$true] %s145_s29 }
  0x18   :  { %134 = dma.hbm_to_vmem [thread:$0]  %s130_s2, 16384, %s132_s27, [#allocation12 + $0x6] }
  0x19   :  { %148 = dma.hbm_to_vmem [thread:$0]  %s144_s26, 8192, %s146_s29, [#allocation12 + $0x7] }
  0x1a   :  { %197 = vsyncadd [#allocation12 + $0x8], 2048  ;;  %s206_s4 = sshll.u32 %s14970_s11, 4  ;;  %v14625_v16 = vld [vmem:[%s14959_s0] sm:$0xff]  ;;  %v14630_v17 = vld [vmem:[%s14959_s0 + $0x8] sm:$0xff]  ;;  %s14477_s28 = smov [#allocation11]   ;;  %s207_s4 = int_to_ptr.hbm [resolvable:$true] %s206_s4 }
  0x1b   :  { %s208_s16 = sshll.u32 %s14477_s28, 4  ;;  %v14635_v18 = vld [vmem:[%s14959_s0 + $0x10] sm:$0xff]  ;;  %v14640_v19 = vld [vmem:[%s14959_s0 + $0x18] sm:$0xf]  ;;  %v14642_v20 = vld [vmem:[#allocation13] sm:$0xff]  ;;  %s209_s16 = int_to_ptr.vmem [resolvable:$true] %s208_s16 }
  0x1c   :  { %v14644_v21 = vld [vmem:[#allocation13 + $0x8] sm:$0xff]  ;;  %v14646_v22 = vld [vmem:[#allocation13 + $0x10] sm:$0xff]  ;;  %v14648_v23 = vld [vmem:[#allocation13 + $0x18] sm:$0xff]  ;;  %211 = dma.hbm_to_vmem [thread:$0]  %s207_s4, 1024, %s209_s16, [#allocation12 + $0x9] }
  0x1d   :  { %v14650_v24 = vld [vmem:[#allocation13 + $0x20] sm:$0x3] }
  0x1e   :  { %14444 = dma.done.wait [#allocation12], 28672 }
  0x1f   :  { %14445 = vsyncadd [#allocation12], 4294938624  ;;  %v8869_v25 = vld [vmem:[#allocation2 + $0xe0] sm:$0xf]  ;;  %v13115_v26 = vld [vmem:[#allocation2 + $0xec] sm:$0xf0] }
  0x20   :  { %v8997_v27 = vld [vmem:[#allocation2 + $0x1e0] sm:$0xf]  ;;  %v8870_v28 = vor.u32 %v13115_v26, %v8869_v25  ;;  %v13147_v29 = vld [vmem:[#allocation2 + $0x1ec] sm:$0xf0] }
  0x21   :  { %v9125_v30 = vld [vmem:[#allocation2 + $0x2e0] sm:$0xf]  ;;  %v13179_v31 = vld [vmem:[#allocation2 + $0x2ec] sm:$0xf0]  ;;  %v8998_v32 = vor.u32 %v13147_v29, %v8997_v27 }
  0x22   :  { %v9126_v33 = vor.u32 %v13179_v31, %v9125_v30  ;;  %v9253_v34 = vld [vmem:[#allocation2 + $0x3e0] sm:$0xf]  ;;  %v13211_v35 = vld [vmem:[#allocation2 + $0x3ec] sm:$0xf0]  ;;  %1598 = vmatpush.bf16.msra.mxu0 %v8870_v28 }
  0x23   :  { %v8853_v36 = vld [vmem:[#allocation2 + $0xc0] sm:$0xf]  ;;  %v9254_v37 = vor.u32 %v13211_v35, %v9253_v34  ;;  %v13111_v38 = vld [vmem:[#allocation2 + $0xcc] sm:$0xf0]  ;;  %1611 = vmatpush.bf16.msra.mxu1 %v8998_v32 }
  0x24   :  { %v8981_v39 = vld [vmem:[#allocation2 + $0x1c0] sm:$0xf]  ;;  %v13143_v40 = vld [vmem:[#allocation2 + $0x1cc] sm:$0xf0]  ;;  %1624 = vmatpush.bf16.msra.mxu2 %v9126_v33  ;;  %v8854_v41 = vor.u32 %v13111_v38, %v8853_v36 }
  0x25   :  { %v8982_v42 = vor.u32 %v13143_v40, %v8981_v39  ;;  %v9109_v43 = vld [vmem:[#allocation2 + $0x2c0] sm:$0xf]  ;;  %v13175_v44 = vld [vmem:[#allocation2 + $0x2cc] sm:$0xf0]  ;;  %1637 = vmatpush.bf16.msra.mxu3 %v9254_v37 }
  0x26   :  { %v9237_v45 = vld [vmem:[#allocation2 + $0x3c0] sm:$0xf]  ;;  %v9110_v46 = vor.u32 %v13175_v44, %v9109_v43  ;;  %v13207_v47 = vld [vmem:[#allocation2 + $0x3cc] sm:$0xf0]  ;;  %1599 = vmatpush.bf16.msra.mxu0 %v8854_v41 }
  0x27   :  { %v8837_v48 = vld [vmem:[#allocation2 + $0xa0] sm:$0xf]  ;;  %v13107_v49 = vld [vmem:[#allocation2 + $0xac] sm:$0xf0]  ;;  %v9238_v50 = vor.u32 %v13207_v47, %v9237_v45  ;;  %1612 = vmatpush.bf16.msra.mxu1 %v8982_v42 }
  0x28   :  { %v8965_v51 = vld [vmem:[#allocation2 + $0x1a0] sm:$0xf]  ;;  %v13139_v52 = vld [vmem:[#allocation2 + $0x1ac] sm:$0xf0]  ;;  %v8838_v54 = vor.u32 %v13107_v49, %v8837_v48  ;;  %1625 = vmatpush.bf16.msra.mxu2 %v9110_v46 }
  0x29   :  { %v9093_v53 = vld [vmem:[#allocation2 + $0x2a0] sm:$0xf]  ;;  %v13171_v55 = vld [vmem:[#allocation2 + $0x2ac] sm:$0xf0]  ;;  %v8966_v58 = vor.u32 %v13139_v52, %v8965_v51  ;;  %1638 = vmatpush.bf16.msra.mxu3 %v9238_v50 }
  0x2a   :  { %v9221_v56 = vld [vmem:[#allocation2 + $0x3a0] sm:$0xf]  ;;  %v13203_v57 = vld [vmem:[#allocation2 + $0x3ac] sm:$0xf0]  ;;  %v9094_v59 = vor.u32 %v13171_v55, %v9093_v53  ;;  %1600 = vmatpush.bf16.msra.mxu0 %v8838_v54 }
  0x2b   :  { %v8821_v60 = vld [vmem:[#allocation2 + $0x80] sm:$0xf]  ;;  %v13103_v61 = vld [vmem:[#allocation2 + $0x8c] sm:$0xf0]  ;;  %v9222_v63 = vor.u32 %v13203_v57, %v9221_v56  ;;  %1613 = vmatpush.bf16.msra.mxu1 %v8966_v58 }
  0x2c   :  { %v8949_v62 = vld [vmem:[#allocation2 + $0x180] sm:$0xf]  ;;  %v13135_v0 = vld [vmem:[#allocation2 + $0x18c] sm:$0xf0]  ;;  %v8822_v5 = vor.u32 %v13103_v61, %v8821_v60  ;;  %1626 = vmatpush.bf16.msra.mxu2 %v9094_v59 }
  0x2d   :  { %v9077_v1 = vld [vmem:[#allocation2 + $0x280] sm:$0xf]  ;;  %v13167_v2 = vld [vmem:[#allocation2 + $0x28c] sm:$0xf0]  ;;  %v8950_v6 = vor.u32 %v13135_v0, %v8949_v62  ;;  %1639 = vmatpush.bf16.msra.mxu3 %v9222_v63 }
  0x2e   :  { %v9205_v3 = vld [vmem:[#allocation2 + $0x380] sm:$0xf]  ;;  %v13199_v4 = vld [vmem:[#allocation2 + $0x38c] sm:$0xf0]  ;;  %v9078_v7 = vor.u32 %v13167_v2, %v9077_v1  ;;  %1601 = vmatpush.bf16.msra.mxu0 %v8822_v5  ;;  %v459_v5 = vunpack.c.l.b16 %v14630_v17 }
  0x2f   :  { %v8805_v8 = vld [vmem:[#allocation2 + $0x60] sm:$0xf]  ;;  %v13099_v9 = vld [vmem:[#allocation2 + $0x6c] sm:$0xf0]  ;;  %v9206_v11 = vor.u32 %v13199_v4, %v9205_v3  ;;  %1614 = vmatpush.bf16.msra.mxu1 %v8950_v6 }
  0x30   :  { %v8933_v10 = vld [vmem:[#allocation2 + $0x160] sm:$0xf]  ;;  %v13131_v12 = vld [vmem:[#allocation2 + $0x16c] sm:$0xf0]  ;;  %v8806_v26 = vor.u32 %v13099_v9, %v8805_v8  ;;  %1627 = vmatpush.bf16.msra.mxu2 %v9078_v7  ;;  %v13113_v8 = vld [vmem:[#allocation2 + $0xe4] sm:$0xf] }
  0x31   :  { %v9061_v13 = vld [vmem:[#allocation2 + $0x260] sm:$0xf]  ;;  %v13163_v14 = vld [vmem:[#allocation2 + $0x26c] sm:$0xf0]  ;;  %v8934_v27 = vor.u32 %v13131_v12, %v8933_v10  ;;  %1640 = vmatpush.bf16.msra.mxu3 %v9206_v11  ;;  %v8871_v9 = vld [vmem:[#allocation2 + $0xf0] sm:$0xf0]  ;;  %v457_v10 = vunpack.c.l.b16 %v14625_v16  ;;  %v460_v11 = vunpack.c.h.b16 %v14630_v17 }
  0x32   :  { %v9189_v15 = vld [vmem:[#allocation2 + $0x360] sm:$0xf]  ;;  %v13195_v25 = vld [vmem:[#allocation2 + $0x36c] sm:$0xf0]  ;;  %v9062_v28 = vor.u32 %v13163_v14, %v9061_v13  ;;  %1602 = vmatpush.bf16.msra.mxu0 %v8806_v26  ;;  %v458_v14 = vunpack.c.h.b16 %v14625_v16  ;;  %v13109_v17 = vld [vmem:[#allocation2 + $0xc4] sm:$0xf] }
  0x33   :  { %v8789_v29 = vld [vmem:[#allocation2 + $0x40] sm:$0xf]  ;;  %v13095_v30 = vld [vmem:[#allocation2 + $0x4c] sm:$0xf0]  ;;  %v9190_v32 = vor.u32 %v13195_v25, %v9189_v15  ;;  %1615 = vmatpush.bf16.msra.mxu1 %v8934_v27 }
  0x34   :  { %v8917_v31 = vld [vmem:[#allocation2 + $0x140] sm:$0xf]  ;;  %v13127_v33 = vld [vmem:[#allocation2 + $0x14c] sm:$0xf0]  ;;  %v8790_v38 = vor.u32 %v13095_v30, %v8789_v29  ;;  %1628 = vmatpush.bf16.msra.mxu2 %v9062_v28  ;;  %v8874_v29 = vor.u32 %v13113_v8, %v8871_v9  ;;  %v8807_v8 = vld [vmem:[#allocation2 + $0x70] sm:$0xf0] }
  0x35   :  { %v9045_v34 = vld [vmem:[#allocation2 + $0x240] sm:$0xf]  ;;  %v13159_v35 = vld [vmem:[#allocation2 + $0x24c] sm:$0xf0]  ;;  %v8918_v39 = vor.u32 %v13127_v33, %v8917_v31  ;;  %1641 = vmatpush.bf16.msra.mxu3 %v9190_v32  ;;  %v14656_v33 = vpack.c.b16 %v459_v5, %v459_v5 }
  0x36   :  { %v9173_v36 = vld [vmem:[#allocation2 + $0x340] sm:$0xf]  ;;  %v13191_v37 = vld [vmem:[#allocation2 + $0x34c] sm:$0xf0]  ;;  %v9046_v40 = vor.u32 %v13159_v35, %v9045_v34  ;;  %1603 = vmatpush.bf16.msra.mxu0 %v8790_v38  ;;  %v8855_v34 = vld [vmem:[#allocation2 + $0xd0] sm:$0xf0]  ;;  %v14658_v35 = vpack.c.b16 %v457_v10, %v457_v10 }
  0x37   :  { %v8773_v41 = vld [vmem:[#allocation2 + $0x20] sm:$0xf]  ;;  %v13091_v42 = vld [vmem:[#allocation2 + $0x2c] sm:$0xf0]  ;;  %v9174_v44 = vor.u32 %v13191_v37, %v9173_v36  ;;  %1616 = vmatpush.bf16.msra.mxu1 %v8918_v39  ;;  %v14660_v36 = vpack.c.b16 %v460_v11, %v460_v11  ;;  %v14662_v37 = vpack.c.b16 %v458_v14, %v458_v14 }
  0x38   :  { %v8901_v43 = vld [vmem:[#allocation2 + $0x120] sm:$0xf]  ;;  %v13123_v45 = vld [vmem:[#allocation2 + $0x12c] sm:$0xf0]  ;;  %v8774_v50 = vor.u32 %v13091_v42, %v8773_v41  ;;  %1629 = vmatpush.bf16.msra.mxu2 %v9046_v40 }
  0x39   :  { %v9029_v46 = vld [vmem:[#allocation2 + $0x220] sm:$0xf]  ;;  %v13155_v47 = vld [vmem:[#allocation2 + $0x22c] sm:$0xf0]  ;;  %v8902_v53 = vor.u32 %v13123_v45, %v8901_v43  ;;  %1642 = vmatpush.bf16.msra.mxu3 %v9174_v44  ;;  %v8858_v43 = vor.u32 %v13109_v17, %v8855_v34 }
  0x3a   :  { %v9157_v48 = vld [vmem:[#allocation2 + $0x320] sm:$0xf]  ;;  %v13187_v49 = vld [vmem:[#allocation2 + $0x32c] sm:$0xf0]  ;;  %v9030_v54 = vor.u32 %v13155_v47, %v9029_v46  ;;  %1604 = vmatpush.bf16.msra.mxu0 %v8774_v50  ;;  %v13105_v47 = vld [vmem:[#allocation2 + $0xa4] sm:$0xf] }
  0x3b   :  { %v8757_v51 = vld [vmem:[#allocation2] sm:$0xf]  ;;  %v13087_v52 = vld [vmem:[#allocation2 + $0xc] sm:$0xf0]  ;;  %v9158_v58 = vor.u32 %v13187_v49, %v9157_v48  ;;  %1617 = vmatpush.bf16.msra.mxu1 %v8902_v53  ;;  %v8839_v48 = vld [vmem:[#allocation2 + $0xb0] sm:$0xf0] }
  0x3c   :  { %v8885_v55 = vld [vmem:[#allocation2 + $0x100] sm:$0xf]  ;;  %v13119_v56 = vld [vmem:[#allocation2 + $0x10c] sm:$0xf0]  ;;  %v8758_v1 = vor.u32 %v13087_v52, %v8757_v51  ;;  %1630 = vmatpush.bf16.msra.mxu2 %v9030_v54 }
  0x3d   :  { %v9013_v57 = vld [vmem:[#allocation2 + $0x200] sm:$0xf]  ;;  %v13151_v59 = vld [vmem:[#allocation2 + $0x20c] sm:$0xf0]  ;;  %v8886_v6 = vor.u32 %v13119_v56, %v8885_v55  ;;  %1643 = vmatpush.bf16.msra.mxu3 %v9158_v58  ;;  %v8842_v55 = vor.u32 %v13105_v47, %v8839_v48 }
  0x3e   :  { %v9141_v60 = vld [vmem:[#allocation2 + $0x300] sm:$0xf]  ;;  %v13183_v61 = vld [vmem:[#allocation2 + $0x30c] sm:$0xf0]  ;;  %v9014_v7 = vor.u32 %v13151_v59, %v9013_v57  ;;  %1605 = vmatpush.bf16.msra.mxu0 %v8758_v1  ;;  %v13101_v59 = vld [vmem:[#allocation2 + $0x84] sm:$0xf] }
  0x3f   :  { %v9381_v62 = vld [vmem:[#allocation2 + $0x4e0] sm:$0xf]  ;;  %v13243_v63 = vld [vmem:[#allocation2 + $0x4ec] sm:$0xf0]  ;;  %v9142_v12 = vor.u32 %v13183_v61, %v9141_v60  ;;  %1618 = vmatpush.bf16.msra.mxu1 %v8886_v6  ;;  %v8823_v60 = vld [vmem:[#allocation2 + $0x90] sm:$0xf0] }
  0x40   :  { %v9509_v0 = vld [vmem:[#allocation2 + $0x5e0] sm:$0xf]  ;;  %v13275_v2 = vld [vmem:[#allocation2 + $0x5ec] sm:$0xf0]  ;;  %v9382_v13 = vor.u32 %v13243_v63, %v9381_v62  ;;  %1631 = vmatpush.bf16.msra.mxu2 %v9014_v7  ;;  %v13097_v7 = vld [vmem:[#allocation2 + $0x64] sm:$0xf] }
  0x41   :  { %v9637_v3 = vld [vmem:[#allocation2 + $0x6e0] sm:$0xf]  ;;  %v13307_v4 = vld [vmem:[#allocation2 + $0x6ec] sm:$0xf0]  ;;  %v9510_v15 = vor.u32 %v13275_v2, %v9509_v0  ;;  %1644 = vmatpush.bf16.msra.mxu3 %v9142_v12  ;;  %1606 = vmatmul.bf16.vlgmr.msra.gmra.mxu0 %v14658_v35 }
  0x42   :  { %v9638_v25 = vor.u32 %v13307_v4, %v9637_v3  ;;  %v9365_v26 = vld [vmem:[#allocation2 + $0x4c0] sm:$0xf]  ;;  %v13239_v27 = vld [vmem:[#allocation2 + $0x4cc] sm:$0xf0]  ;;  %1650 = vmatpush.bf16.msrb.mxu0 %v9382_v13  ;;  %1619 = vmatmul.bf16.vlgmr.msra.gmra.mxu1 %v14662_v37  ;;  %v8826_v3 = vor.u32 %v13101_v59, %v8823_v60  ;;  %v9127_v60 = vld [vmem:[#allocation2 + $0x2f0] sm:$0xf0] }
  0x43   :  { %v9493_v28 = vld [vmem:[#allocation2 + $0x5c0] sm:$0xf]  ;;  %v13271_v30 = vld [vmem:[#allocation2 + $0x5cc] sm:$0xf0]  ;;  %v9366_v16 = vor.u32 %v13239_v27, %v9365_v26  ;;  %1663 = vmatpush.bf16.msrb.mxu1 %v9510_v15  ;;  %1632 = vmatmul.bf16.vlgmr.msra.gmra.mxu2 %v14656_v33  ;;  %v8810_v15 = vor.u32 %v13097_v7, %v8807_v8 }
  0x44   :  { %v9621_v31 = vld [vmem:[#allocation2 + $0x6c0] sm:$0xf]  ;;  %v13303_v32 = vld [vmem:[#allocation2 + $0x6cc] sm:$0xf0]  ;;  %1676 = vmatpush.bf16.msrb.mxu2 %v9638_v25  ;;  %v9494_v38 = vor.u32 %v13271_v30, %v9493_v28  ;;  %1645 = vmatmul.bf16.vlgmr.msra.gmra.mxu3 %v14660_v36  ;;  %v13093_v28 = vld [vmem:[#allocation2 + $0x44] sm:$0xf] }
  0x45   :  { %v9622_v39 = vor.u32 %v13303_v32, %v9621_v31  ;;  %v9349_v40 = vld [vmem:[#allocation2 + $0x4a0] sm:$0xf]  ;;  %v13235_v41 = vld [vmem:[#allocation2 + $0x4ac] sm:$0xf0]  ;;  %1689 = vmatpush.bf16.msrb.mxu3 %v8874_v29  ;;  %v8791_v29 = vld [vmem:[#allocation2 + $0x50] sm:$0xf0] }
  0x46   :  { %v9477_v42 = vld [vmem:[#allocation2 + $0x5a0] sm:$0xf]  ;;  %v13267_v44 = vld [vmem:[#allocation2 + $0x5ac] sm:$0xf0]  ;;  %1651 = vmatpush.bf16.msrb.mxu0 %v9366_v16  ;;  %v9350_v49 = vor.u32 %v13235_v41, %v9349_v40 }
  0x47   :  { %v9605_v45 = vld [vmem:[#allocation2 + $0x6a0] sm:$0xf]  ;;  %v13299_v46 = vld [vmem:[#allocation2 + $0x6ac] sm:$0xf0]  ;;  %1664 = vmatpush.bf16.msrb.mxu1 %v9494_v38  ;;  %v9478_v50 = vor.u32 %v13267_v44, %v9477_v42  ;;  %v8794_v38 = vor.u32 %v13093_v28, %v8791_v29  ;;  %v13089_v42 = vld [vmem:[#allocation2 + $0x24] sm:$0xf] }
  0x48   :  { %1677 = vmatpush.bf16.msrb.mxu2 %v9622_v39  ;;  %v9606_v51 = vor.u32 %v13299_v46, %v9605_v45  ;;  %v9333_v52 = vld [vmem:[#allocation2 + $0x480] sm:$0xf]  ;;  %v13231_v53 = vld [vmem:[#allocation2 + $0x48c] sm:$0xf0] }
  0x49   :  { %v9461_v54 = vld [vmem:[#allocation2 + $0x580] sm:$0xf]  ;;  %1690 = vmatpush.bf16.msrb.mxu3 %v8858_v43  ;;  %v13263_v56 = vld [vmem:[#allocation2 + $0x58c] sm:$0xf0]  ;;  %v9334_v61 = vor.u32 %v13231_v53, %v9333_v52  ;;  %v8775_v43 = vld [vmem:[#allocation2 + $0x30] sm:$0xf0] }
  0x4a   :  { %v9589_v57 = vld [vmem:[#allocation2 + $0x680] sm:$0xf]  ;;  %v13295_v58 = vld [vmem:[#allocation2 + $0x68c] sm:$0xf0]  ;;  %1652 = vmatpush.bf16.msrb.mxu0 %v9350_v49  ;;  %v9462_v62 = vor.u32 %v13263_v56, %v9461_v54  ;;  %v8778_v52 = vor.u32 %v13089_v42, %v8775_v43  ;;  %v13085_v54 = vld [vmem:[#allocation2 + $0x4] sm:$0xf] }
  0x4b   :  { %1665 = vmatpush.bf16.msrb.mxu1 %v9478_v50  ;;  %v9590_v63 = vor.u32 %v13295_v58, %v9589_v57  ;;  %v9317_v0 = vld [vmem:[#allocation2 + $0x460] sm:$0xf]  ;;  %v13227_v1 = vld [vmem:[#allocation2 + $0x46c] sm:$0xf0]  ;;  %v13145_v56 = vld [vmem:[#allocation2 + $0x1e4] sm:$0xf] }
  0x4c   :  { %1678 = vmatpush.bf16.msrb.mxu2 %v9606_v51  ;;  %v9445_v2 = vld [vmem:[#allocation2 + $0x560] sm:$0xf]  ;;  %v13259_v4 = vld [vmem:[#allocation2 + $0x56c] sm:$0xf0]  ;;  %v9318_v9 = vor.u32 %v13227_v1, %v9317_v0  ;;  %v8999_v57 = vld [vmem:[#allocation2 + $0x1f0] sm:$0xf0] }
  0x4d   :  { %1691 = vmatpush.bf16.msrb.mxu3 %v8842_v55  ;;  %v9573_v5 = vld [vmem:[#allocation2 + $0x660] sm:$0xf]  ;;  %v13291_v6 = vld [vmem:[#allocation2 + $0x66c] sm:$0xf0]  ;;  %v9446_v10 = vor.u32 %v13259_v4, %v9445_v2  ;;  %v8759_v55 = vld [vmem:[#allocation2 + $0x10] sm:$0xf0]  ;;  %v461_v4 = vunpack.c.l.b16 %v14635_v18  ;;  %v9002_v7 = vor.u32 %v13145_v56, %v8999_v57 }
  0x4e   :  { %1653 = vmatpush.bf16.msrb.mxu0 %v9334_v61  ;;  %v9574_v11 = vor.u32 %v13291_v6, %v9573_v5  ;;  %v9301_v12 = vld [vmem:[#allocation2 + $0x440] sm:$0xf]  ;;  %v13223_v13 = vld [vmem:[#allocation2 + $0x44c] sm:$0xf0]  ;;  %v13177_v58 = vld [vmem:[#allocation2 + $0x2e4] sm:$0xf]  ;;  %v462_v5 = vunpack.c.h.b16 %v14635_v18  ;;  %v8762_v6 = vor.u32 %v13085_v54, %v8759_v55 }
  0x4f   :  { %1666 = vmatpush.bf16.msrb.mxu1 %v9462_v62  ;;  %v9429_v14 = vld [vmem:[#allocation2 + $0x540] sm:$0xf]  ;;  %v13255_v25 = vld [vmem:[#allocation2 + $0x54c] sm:$0xf0]  ;;  %v9302_v30 = vor.u32 %v13223_v13, %v9301_v12  ;;  %v13209_v61 = vld [vmem:[#allocation2 + $0x3e4] sm:$0xf]  ;;  %v9130_v8 = vor.u32 %v13177_v58, %v9127_v60  ;;  %v14673_v18 = vpack.c.b16 %v461_v4, %v461_v4 }
  0x50   :  { %1679 = vmatpush.bf16.msrb.mxu2 %v9590_v63  ;;  %v9557_v26 = vld [vmem:[#allocation2 + $0x640] sm:$0xf]  ;;  %v13287_v27 = vld [vmem:[#allocation2 + $0x64c] sm:$0xf0]  ;;  %v9430_v31 = vor.u32 %v13255_v25, %v9429_v14  ;;  %v9255_v62 = vld [vmem:[#allocation2 + $0x3f0] sm:$0xf0]  ;;  %v463_v63 = vunpack.c.l.b16 %v14640_v19  ;;  %v14675_v28 = vpack.c.b16 %v462_v5, %v462_v5 }
  0x51   :  { %1692 = vmatpush.bf16.msrb.mxu3 %v8826_v3  ;;  %v9558_v32 = vor.u32 %v13287_v27, %v9557_v26  ;;  %v9285_v17 = vld [vmem:[#allocation2 + $0x420] sm:$0xf]  ;;  %v13219_v34 = vld [vmem:[#allocation2 + $0x42c] sm:$0xf0]  ;;  %v13241_v2 = vld [vmem:[#allocation2 + $0x4e4] sm:$0xf] }
  0x52   :  { %1654 = vmatpush.bf16.msrb.mxu0 %v9318_v9  ;;  %v9413_v16 = vld [vmem:[#allocation2 + $0x520] sm:$0xf]  ;;  %v13251_v39 = vld [vmem:[#allocation2 + $0x52c] sm:$0xf0]  ;;  %v9286_v44 = vor.u32 %v13219_v34, %v9285_v17  ;;  %v9383_v3 = vld [vmem:[#allocation2 + $0x4f0] sm:$0xf0]  ;;  %v9258_v9 = vor.u32 %v13209_v61, %v9255_v62  ;;  %v14671_v25 = vpack.c.b16 %v463_v63, %v463_v63 }
  0x53   :  { %1667 = vmatpush.bf16.msrb.mxu1 %v9446_v10  ;;  %v9541_v40 = vld [vmem:[#allocation2 + $0x620] sm:$0xf]  ;;  %v13283_v41 = vld [vmem:[#allocation2 + $0x62c] sm:$0xf0]  ;;  %v9414_v47 = vor.u32 %v13251_v39, %v9413_v16  ;;  %v13141_v10 = vld [vmem:[#allocation2 + $0x1c4] sm:$0xf]  ;;  %v9386_v19 = vor.u32 %v13241_v2, %v9383_v3 }
  0x54   :  { %1680 = vmatpush.bf16.msrb.mxu2 %v9574_v11  ;;  %v9269_v45 = vld [vmem:[#allocation2 + $0x400] sm:$0xf]  ;;  %v13215_v46 = vld [vmem:[#allocation2 + $0x40c] sm:$0xf0]  ;;  %v9542_v48 = vor.u32 %v13283_v41, %v9541_v40  ;;  %v8983_v11 = vld [vmem:[#allocation2 + $0x1d0] sm:$0xf0] }
  0x55   :  { %1693 = vmatpush.bf16.msrb.mxu3 %v8810_v15  ;;  %v9397_v49 = vld [vmem:[#allocation2 + $0x500] sm:$0xf]  ;;  %v13247_v50 = vld [vmem:[#allocation2 + $0x50c] sm:$0xf0]  ;;  %v9270_v59 = vor.u32 %v13215_v46, %v9269_v45  ;;  %v13173_v12 = vld [vmem:[#allocation2 + $0x2c4] sm:$0xf]  ;;  %v8986_v29 = vor.u32 %v13141_v10, %v8983_v11 }
  0x56   :  { %1655 = vmatpush.bf16.msrb.mxu0 %v9302_v30  ;;  %v9525_v51 = vld [vmem:[#allocation2 + $0x600] sm:$0xf]  ;;  %v13279_v53 = vld [vmem:[#allocation2 + $0x60c] sm:$0xf0]  ;;  %v9398_v0 = vor.u32 %v13247_v50, %v9397_v49  ;;  %v9111_v13 = vld [vmem:[#allocation2 + $0x2d0] sm:$0xf0] }
  0x57   :  { %1668 = vmatpush.bf16.msrb.mxu1 %v9430_v31  ;;  %v9526_v1 = vor.u32 %v13279_v53, %v9525_v51  ;;  %v13205_v14 = vld [vmem:[#allocation2 + $0x3c4] sm:$0xf]  ;;  %v9239_v15 = vld [vmem:[#allocation2 + $0x3d0] sm:$0xf0]  ;;  %v9114_v30 = vor.u32 %v13173_v12, %v9111_v13 }
  0x58   :  { %1681 = vmatpush.bf16.msrb.mxu2 %v9558_v32  ;;  %v13237_v26 = vld [vmem:[#allocation2 + $0x4c4] sm:$0xf]  ;;  %v9367_v27 = vld [vmem:[#allocation2 + $0x4d0] sm:$0xf0]  ;;  %v9242_v31 = vor.u32 %v13205_v14, %v9239_v15 }
  0x59   :  { %1694 = vmatpush.bf16.msrb.mxu3 %v8794_v38  ;;  %v13137_v32 = vld [vmem:[#allocation2 + $0x1a4] sm:$0xf]  ;;  %v8967_v17 = vld [vmem:[#allocation2 + $0x1b0] sm:$0xf0]  ;;  %v9370_v16 = vor.u32 %v13237_v26, %v9367_v27 }
  0x5a   :  { %1656 = vmatpush.bf16.msrb.mxu0 %v9286_v44  ;;  %v13169_v34 = vld [vmem:[#allocation2 + $0x2a4] sm:$0xf]  ;;  %v9095_v38 = vld [vmem:[#allocation2 + $0x2b0] sm:$0xf0]  ;;  %v8970_v43 = vor.u32 %v13137_v32, %v8967_v17 }
  0x5b   :  { %1669 = vmatpush.bf16.msrb.mxu1 %v9414_v47  ;;  %v13201_v39 = vld [vmem:[#allocation2 + $0x3a4] sm:$0xf]  ;;  %v9223_v40 = vld [vmem:[#allocation2 + $0x3b0] sm:$0xf0]  ;;  %v9098_v44 = vor.u32 %v13169_v34, %v9095_v38 }
  0x5c   :  { %1682 = vmatpush.bf16.msrb.mxu2 %v9542_v48  ;;  %v13233_v41 = vld [vmem:[#allocation2 + $0x4a4] sm:$0xf]  ;;  %v9351_v42 = vld [vmem:[#allocation2 + $0x4b0] sm:$0xf0]  ;;  %v9226_v45 = vor.u32 %v13201_v39, %v9223_v40 }
  0x5d   :  { %1695 = vmatpush.bf16.msrb.mxu3 %v8778_v52  ;;  %v13133_v46 = vld [vmem:[#allocation2 + $0x184] sm:$0xf]  ;;  %v8951_v47 = vld [vmem:[#allocation2 + $0x190] sm:$0xf0]  ;;  %v9354_v49 = vor.u32 %v13233_v41, %v9351_v42 }
  0x5e   :  { %1657 = vmatpush.bf16.msrb.mxu0 %v9270_v59  ;;  %v13165_v48 = vld [vmem:[#allocation2 + $0x284] sm:$0xf]  ;;  %v9079_v50 = vld [vmem:[#allocation2 + $0x290] sm:$0xf0]  ;;  %v8954_v55 = vor.u32 %v13133_v46, %v8951_v47 }
  0x5f   :  { %1670 = vmatpush.bf16.msrb.mxu1 %v9398_v0  ;;  %v13197_v51 = vld [vmem:[#allocation2 + $0x384] sm:$0xf]  ;;  %v9207_v52 = vld [vmem:[#allocation2 + $0x390] sm:$0xf0]  ;;  %v9082_v56 = vor.u32 %v13165_v48, %v9079_v50 }
  0x60   :  { %1683 = vmatpush.bf16.msrb.mxu2 %v9526_v1  ;;  %v13229_v53 = vld [vmem:[#allocation2 + $0x484] sm:$0xf]  ;;  %v9335_v54 = vld [vmem:[#allocation2 + $0x490] sm:$0xf0]  ;;  %v9210_v57 = vor.u32 %v13197_v51, %v9207_v52 }
  0x61   :  { %1696 = vmatpush.bf16.msrb.mxu3 %v8762_v6  ;;  %1658 = vmatmul.bf16.vlgmr.msrb.gmra.mxu0 %v14673_v18  ;;  %v13129_v58 = vld [vmem:[#allocation2 + $0x164] sm:$0xf]  ;;  %v8935_v59 = vld [vmem:[#allocation2 + $0x170] sm:$0xf0]  ;;  %v9338_v61 = vor.u32 %v13229_v53, %v9335_v54 }
  0x62   :  { %1702 = vmatpush.bf16.msra.mxu0 %v9002_v7  ;;  %1671 = vmatmul.bf16.vlgmr.msrb.gmra.mxu1 %v14675_v28  ;;  %v13161_v60 = vld [vmem:[#allocation2 + $0x264] sm:$0xf]  ;;  %v9063_v62 = vld [vmem:[#allocation2 + $0x270] sm:$0xf0]  ;;  %v8938_v3 = vor.u32 %v13129_v58, %v8935_v59 }
  0x63   :  { %1715 = vmatpush.bf16.msra.mxu1 %v9130_v8  ;;  %1684 = vmatmul.bf16.vlgmr.msrb.gmra.mxu2 %v14671_v25  ;;  %v13193_v63 = vld [vmem:[#allocation2 + $0x364] sm:$0xf]  ;;  %v9191_v0 = vld [vmem:[#allocation2 + $0x370] sm:$0xf0]  ;;  %v9066_v4 = vor.u32 %v13161_v60, %v9063_v62  ;;  %v9005_v60 = vld [vmem:[#allocation2 + $0x1e8] sm:$0xf] }
  0x64   :  { %1728 = vmatpush.bf16.msra.mxu2 %v9258_v9  ;;  %1697 = vmatmul.bf16.vlgmr.msrb.gmra.mxu3 %v14658_v35  ;;  %v13225_v1 = vld [vmem:[#allocation2 + $0x464] sm:$0xf]  ;;  %v9319_v2 = vld [vmem:[#allocation2 + $0x470] sm:$0xf0]  ;;  %v9194_v5 = vor.u32 %v13193_v63, %v9191_v0 }
  0x65   :  { %1741 = vmatpush.bf16.msra.mxu3 %v9386_v19  ;;  %v13125_v6 = vld [vmem:[#allocation2 + $0x144] sm:$0xf]  ;;  %v8919_v7 = vld [vmem:[#allocation2 + $0x150] sm:$0xf0]  ;;  %v9322_v9 = vor.u32 %v13225_v1, %v9319_v2 }
  0x66   :  { %1703 = vmatpush.bf16.msra.mxu0 %v8986_v29  ;;  %v13157_v8 = vld [vmem:[#allocation2 + $0x244] sm:$0xf]  ;;  %v9047_v10 = vld [vmem:[#allocation2 + $0x250] sm:$0xf0]  ;;  %v8922_v14 = vor.u32 %v13125_v6, %v8919_v7  ;;  %v8861_v7 = vld [vmem:[#allocation2 + $0xc8] sm:$0xf] }
  0x67   :  { %1716 = vmatpush.bf16.msra.mxu1 %v9114_v30  ;;  %v13189_v11 = vld [vmem:[#allocation2 + $0x344] sm:$0xf]  ;;  %v9175_v12 = vld [vmem:[#allocation2 + $0x350] sm:$0xf0]  ;;  %v9050_v15 = vor.u32 %v13157_v8, %v9047_v10  ;;  %v13112_v8 = vld [vmem:[#allocation2 + $0xd4] sm:$0xf0] }
  0x68   :  { %1729 = vmatpush.bf16.msra.mxu2 %v9242_v31  ;;  %v13221_v19 = vld [vmem:[#allocation2 + $0x444] sm:$0xf]  ;;  %v9303_v13 = vld [vmem:[#allocation2 + $0x450] sm:$0xf0]  ;;  %v9178_v26 = vor.u32 %v13189_v11, %v9175_v12  ;;  %v13144_v10 = vld [vmem:[#allocation2 + $0x1d4] sm:$0xf0] }
  0x69   :  { %1742 = vmatpush.bf16.msra.mxu3 %v9370_v16  ;;  %v13121_v27 = vld [vmem:[#allocation2 + $0x124] sm:$0xf]  ;;  %v8903_v29 = vld [vmem:[#allocation2 + $0x130] sm:$0xf0]  ;;  %v9306_v31 = vor.u32 %v13221_v19, %v9303_v13  ;;  %v8862_v19 = vor.u32 %v13112_v8, %v8861_v7 }
  0x6a   :  { %1704 = vmatpush.bf16.msra.mxu0 %v8970_v43  ;;  %v13153_v30 = vld [vmem:[#allocation2 + $0x224] sm:$0xf]  ;;  %v9031_v32 = vld [vmem:[#allocation2 + $0x230] sm:$0xf0]  ;;  %v8906_v39 = vor.u32 %v13121_v27, %v8903_v29  ;;  %v8845_v29 = vld [vmem:[#allocation2 + $0xa8] sm:$0xf] }
  0x6b   :  { %1717 = vmatpush.bf16.msra.mxu1 %v9098_v44  ;;  %v13185_v17 = vld [vmem:[#allocation2 + $0x324] sm:$0xf]  ;;  %v9159_v34 = vld [vmem:[#allocation2 + $0x330] sm:$0xf0]  ;;  %v9034_v42 = vor.u32 %v13153_v30, %v9031_v32  ;;  %v13108_v30 = vld [vmem:[#allocation2 + $0xb4] sm:$0xf0] }
  0x6c   :  { %1730 = vmatpush.bf16.msra.mxu2 %v9226_v45  ;;  %v13217_v16 = vld [vmem:[#allocation2 + $0x424] sm:$0xf]  ;;  %v9287_v38 = vld [vmem:[#allocation2 + $0x430] sm:$0xf0]  ;;  %v9162_v43 = vor.u32 %v13185_v17, %v9159_v34  ;;  %v13140_v32 = vld [vmem:[#allocation2 + $0x1b4] sm:$0xf0] }
  0x6d   :  { %1743 = vmatpush.bf16.msra.mxu3 %v9354_v49  ;;  %v13117_v40 = vld [vmem:[#allocation2 + $0x104] sm:$0xf]  ;;  %v8887_v41 = vld [vmem:[#allocation2 + $0x110] sm:$0xf0]  ;;  %v9290_v47 = vor.u32 %v13217_v16, %v9287_v38  ;;  %v8846_v16 = vor.u32 %v13108_v30, %v8845_v29 }
  0x6e   :  { %1705 = vmatpush.bf16.msra.mxu0 %v8954_v55  ;;  %v13149_v44 = vld [vmem:[#allocation2 + $0x204] sm:$0xf]  ;;  %v9015_v45 = vld [vmem:[#allocation2 + $0x210] sm:$0xf0]  ;;  %v8890_v54 = vor.u32 %v13117_v40, %v8887_v41 }
  0x6f   :  { %1718 = vmatpush.bf16.msra.mxu1 %v9082_v56  ;;  %v13181_v46 = vld [vmem:[#allocation2 + $0x304] sm:$0xf]  ;;  %v9143_v48 = vld [vmem:[#allocation2 + $0x310] sm:$0xf0]  ;;  %v8877_v56 = vld [vmem:[#allocation2 + $0xe8] sm:$0xf]  ;;  %v9018_v58 = vor.u32 %v13149_v44, %v9015_v45 }
  0x70   :  { %1731 = vmatpush.bf16.msra.mxu2 %v9210_v57  ;;  %v13213_v49 = vld [vmem:[#allocation2 + $0x404] sm:$0xf]  ;;  %v9271_v50 = vld [vmem:[#allocation2 + $0x410] sm:$0xf0]  ;;  %v13116_v57 = vld [vmem:[#allocation2 + $0xf4] sm:$0xf0]  ;;  %v9146_v59 = vor.u32 %v13181_v46, %v9143_v48 }
  0x71   :  { %1744 = vmatpush.bf16.msra.mxu3 %v9338_v61  ;;  %v13273_v51 = vld [vmem:[#allocation2 + $0x5e4] sm:$0xf]  ;;  %v9511_v52 = vld [vmem:[#allocation2 + $0x5f0] sm:$0xf0]  ;;  %v13148_v61 = vld [vmem:[#allocation2 + $0x1f4] sm:$0xf0]  ;;  %v9274_v62 = vor.u32 %v13213_v49, %v9271_v50  ;;  %v8878_v1 = vor.u32 %v13116_v57, %v8877_v56 }
  0x72   :  { %1706 = vmatpush.bf16.msra.mxu0 %v8938_v3  ;;  %v13305_v53 = vld [vmem:[#allocation2 + $0x6e4] sm:$0xf]  ;;  %v9639_v55 = vld [vmem:[#allocation2 + $0x6f0] sm:$0xf0]  ;;  %v9514_v63 = vor.u32 %v13273_v51, %v9511_v52  ;;  %v13104_v44 = vld [vmem:[#allocation2 + $0x94] sm:$0xf0] }
  0x73   :  { %1719 = vmatpush.bf16.msra.mxu1 %v9066_v4  ;;  %v9642_v0 = vor.u32 %v13305_v53, %v9639_v55  ;;  %v13269_v2 = vld [vmem:[#allocation2 + $0x5c4] sm:$0xf]  ;;  %v9495_v3 = vld [vmem:[#allocation2 + $0x5d0] sm:$0xf0]  ;;  %v8957_v45 = vld [vmem:[#allocation2 + $0x188] sm:$0xf] }
  0x74   :  { %1732 = vmatpush.bf16.msra.mxu2 %v9194_v5  ;;  %v13301_v4 = vld [vmem:[#allocation2 + $0x6c4] sm:$0xf]  ;;  %v9006_v5 = vor.u32 %v13148_v61, %v9005_v60  ;;  %v9623_v6 = vld [vmem:[#allocation2 + $0x6d0] sm:$0xf0]  ;;  %v9498_v11 = vor.u32 %v13269_v2, %v9495_v3  ;;  %v13136_v46 = vld [vmem:[#allocation2 + $0x194] sm:$0xf0] }
  0x75   :  { %1745 = vmatpush.bf16.msra.mxu3 %v9322_v9  ;;  %v8989_v9 = vld [vmem:[#allocation2 + $0x1c8] sm:$0xf]  ;;  %v9626_v12 = vor.u32 %v13301_v4, %v9623_v6  ;;  %v13265_v13 = vld [vmem:[#allocation2 + $0x5a4] sm:$0xf]  ;;  %v9607_v27 = vld [vmem:[#allocation2 + $0x6b0] sm:$0xf0]  ;;  %v8958_v53 = vor.u32 %v13136_v46, %v8957_v45 }
  0x76   :  { %1707 = vmatpush.bf16.msra.mxu0 %v8922_v14  ;;  %v9479_v14 = vld [vmem:[#allocation2 + $0x5b0] sm:$0xf0]  ;;  %v13261_v38 = vld [vmem:[#allocation2 + $0x584] sm:$0xf]  ;;  %v8813_v55 = vld [vmem:[#allocation2 + $0x68] sm:$0xf] }
  0x77   :  { %1720 = vmatpush.bf16.msra.mxu1 %v9050_v15  ;;  %v13297_v15 = vld [vmem:[#allocation2 + $0x6a4] sm:$0xf]  ;;  %v9482_v17 = vor.u32 %v13265_v13, %v9479_v14  ;;  %v9447_v51 = vld [vmem:[#allocation2 + $0x570] sm:$0xf0]  ;;  %v13100_v56 = vld [vmem:[#allocation2 + $0x74] sm:$0xf0] }
  0x78   :  { %1733 = vmatpush.bf16.msra.mxu2 %v9178_v26  ;;  %v8990_v26 = vor.u32 %v13144_v10, %v8989_v9  ;;  %v9610_v34 = vor.u32 %v13297_v15, %v9607_v27  ;;  %v13293_v40 = vld [vmem:[#allocation2 + $0x684] sm:$0xf]  ;;  %v8941_v57 = vld [vmem:[#allocation2 + $0x168] sm:$0xf]  ;;  %v8814_v61 = vor.u32 %v13100_v56, %v8813_v55  ;;  %v9559_v2 = vld [vmem:[#allocation2 + $0x650] sm:$0xf0] }
  0x79   :  { %1746 = vmatpush.bf16.msra.mxu3 %v9306_v31  ;;  %v8973_v31 = vld [vmem:[#allocation2 + $0x1a8] sm:$0xf]  ;;  %v13257_v50 = vld [vmem:[#allocation2 + $0x564] sm:$0xf]  ;;  %v13096_v4 = vld [vmem:[#allocation2 + $0x54] sm:$0xf0] }
  0x7a   :  { %1708 = vmatpush.bf16.msra.mxu0 %v8906_v39  ;;  %v9463_v39 = vld [vmem:[#allocation2 + $0x590] sm:$0xf0]  ;;  %v8974_v41 = vor.u32 %v13140_v32, %v8973_v31  ;;  %v13289_v52 = vld [vmem:[#allocation2 + $0x664] sm:$0xf]  ;;  %v8797_v3 = vld [vmem:[#allocation2 + $0x48] sm:$0xf] }
  0x7b   :  { %1721 = vmatpush.bf16.msra.mxu1 %v9034_v42  ;;  %v9591_v42 = vld [vmem:[#allocation2 + $0x690] sm:$0xf0]  ;;  %v13128_v6 = vld [vmem:[#allocation2 + $0x154] sm:$0xf0]  ;;  %v8798_v9 = vor.u32 %v13096_v4, %v8797_v3  ;;  %v13249_v10 = vld [vmem:[#allocation2 + $0x524] sm:$0xf] }
  0x7c   :  { %1734 = vmatpush.bf16.msra.mxu2 %v9162_v43  ;;  %v8829_v43 = vld [vmem:[#allocation2 + $0x88] sm:$0xf]  ;;  %v9594_v48 = vor.u32 %v13293_v40, %v9591_v42  ;;  %v9543_v13 = vld [vmem:[#allocation2 + $0x630] sm:$0xf0]  ;;  %v13092_v15 = vld [vmem:[#allocation2 + $0x34] sm:$0xf0] }
  0x7d   :  { %1747 = vmatpush.bf16.msra.mxu3 %v9290_v47  ;;  %v9466_v47 = vor.u32 %v13261_v38, %v9463_v39  ;;  %v8830_v49 = vor.u32 %v13104_v44, %v8829_v43  ;;  %v8781_v14 = vld [vmem:[#allocation2 + $0x28] sm:$0xf]  ;;  %v13124_v27 = vld [vmem:[#allocation2 + $0x134] sm:$0xf0]  ;;  %v13245_v30 = vld [vmem:[#allocation2 + $0x504] sm:$0xf] }
  0x7e   :  { %1709 = vmatpush.bf16.msra.mxu0 %v8890_v54  ;;  %v9575_v54 = vld [vmem:[#allocation2 + $0x670] sm:$0xf0]  ;;  %v8765_v38 = vld [vmem:[#allocation2 + $0x8] sm:$0xf]  ;;  %v13088_v40 = vld [vmem:[#allocation2 + $0x14] sm:$0xf0] }
  0x7f   :  { %1722 = vmatpush.bf16.msra.mxu1 %v9018_v58  ;;  %v13132_v58 = vld [vmem:[#allocation2 + $0x174] sm:$0xf0]  ;;  %v9578_v60 = vor.u32 %v13289_v52, %v9575_v54  ;;  %v9399_v31 = vld [vmem:[#allocation2 + $0x510] sm:$0xf0]  ;;  %v9133_v43 = vld [vmem:[#allocation2 + $0x2e8] sm:$0xf] }
  0x80   :  { %1735 = vmatpush.bf16.msra.mxu2 %v9146_v59  ;;  %v9450_v59 = vor.u32 %v13257_v50, %v9447_v51  ;;  %v13120_v42 = vld [vmem:[#allocation2 + $0x114] sm:$0xf0]  ;;  %v9261_v45 = vld [vmem:[#allocation2 + $0x3e8] sm:$0xf]  ;;  %v9402_v46 = vor.u32 %v13245_v30, %v9399_v31  ;;  %v8766_v51 = vor.u32 %v13088_v40, %v8765_v38 }
  0x81   :  { %1748 = vmatpush.bf16.msra.mxu3 %v9274_v62  ;;  %1710 = vmatmul.bf16.vlgmr.msra.gmra.mxu0 %v14662_v37  ;;  %v13253_v62 = vld [vmem:[#allocation2 + $0x544] sm:$0xf]  ;;  %v13180_v44 = vld [vmem:[#allocation2 + $0x2f4] sm:$0xf0]  ;;  %v9517_v52 = vld [vmem:[#allocation2 + $0x5e8] sm:$0xf] }
  0x82   :  { %1754 = vmatpush.bf16.msrb.mxu0 %v9514_v63  ;;  %1723 = vmatmul.bf16.vlgmr.msra.gmra.mxu1 %v14656_v33  ;;  %v9431_v63 = vld [vmem:[#allocation2 + $0x550] sm:$0xf0]  ;;  %v9134_v55 = vor.u32 %v13180_v44, %v9133_v43  ;;  %v9213_v30 = vld [vmem:[#allocation2 + $0x388] sm:$0xf]  ;;  %v13264_v38 = vld [vmem:[#allocation2 + $0x594] sm:$0xf0] }
  0x83   :  { %1767 = vmatpush.bf16.msrb.mxu1 %v9642_v0  ;;  %1736 = vmatmul.bf16.vlgmr.msra.gmra.mxu2 %v14660_v36  ;;  %v13285_v0 = vld [vmem:[#allocation2 + $0x644] sm:$0xf]  ;;  %v9434_v7 = vor.u32 %v13253_v62, %v9431_v63  ;;  %v13208_v62 = vld [vmem:[#allocation2 + $0x3d4] sm:$0xf0]  ;;  %v9373_v63 = vld [vmem:[#allocation2 + $0x4c8] sm:$0xf] }
  0x84   :  { %1780 = vmatpush.bf16.msrb.mxu2 %v8878_v1  ;;  %1749 = vmatmul.bf16.vlgmr.msra.gmra.mxu3 %v14673_v18  ;;  %v8942_v1 = vor.u32 %v13132_v58, %v8941_v57  ;;  %v9562_v8 = vor.u32 %v13285_v0, %v9559_v2  ;;  %v9117_v58 = vld [vmem:[#allocation2 + $0x2c8] sm:$0xf]  ;;  %v13240_v0 = vld [vmem:[#allocation2 + $0x4d4] sm:$0xf0] }
  0x85   :  { %1793 = vmatpush.bf16.msrb.mxu3 %v9006_v5  ;;  %v8925_v5 = vld [vmem:[#allocation2 + $0x148] sm:$0xf]  ;;  %v13272_v2 = vld [vmem:[#allocation2 + $0x5d4] sm:$0xf0] }
  0x86   :  { %1755 = vmatpush.bf16.msrb.mxu0 %v9498_v11  ;;  %v9415_v11 = vld [vmem:[#allocation2 + $0x530] sm:$0xf0]  ;;  %v13164_v43 = vld [vmem:[#allocation2 + $0x274] sm:$0xf0]  ;;  %v9197_v44 = vld [vmem:[#allocation2 + $0x368] sm:$0xf] }
  0x87   :  { %1768 = vmatpush.bf16.msrb.mxu1 %v9626_v12  ;;  %v13281_v12 = vld [vmem:[#allocation2 + $0x624] sm:$0xf]  ;;  %v9418_v29 = vor.u32 %v13249_v10, %v9415_v11  ;;  %v13204_v10 = vld [vmem:[#allocation2 + $0x3b4] sm:$0xf0]  ;;  %v9357_v11 = vld [vmem:[#allocation2 + $0x4a8] sm:$0xf] }
  0x88   :  { %1781 = vmatpush.bf16.msrb.mxu2 %v8862_v19  ;;  %v8926_v19 = vor.u32 %v13128_v6, %v8925_v5  ;;  %v9546_v32 = vor.u32 %v13281_v12, %v9543_v13  ;;  %v9374_v5 = vor.u32 %v13240_v0, %v9373_v63  ;;  %v9101_v6 = vld [vmem:[#allocation2 + $0x2a8] sm:$0xf]  ;;  %v13236_v12 = vld [vmem:[#allocation2 + $0x4b4] sm:$0xf0] }
  0x89   :  { %1794 = vmatpush.bf16.msrb.mxu3 %v8990_v26  ;;  %v8909_v26 = vld [vmem:[#allocation2 + $0x128] sm:$0xf]  ;;  %v13268_v13 = vld [vmem:[#allocation2 + $0x5b4] sm:$0xf0] }
  0x8a   :  { %1756 = vmatpush.bf16.msrb.mxu0 %v9482_v17  ;;  %v8782_v17 = vor.u32 %v13092_v15, %v8781_v14  ;;  %v8910_v39 = vor.u32 %v13124_v27, %v8909_v26  ;;  %v9358_v26 = vor.u32 %v13236_v12, %v9357_v11  ;;  %v9085_v27 = vld [vmem:[#allocation2 + $0x288] sm:$0xf] }
  0x8b   :  { %1769 = vmatpush.bf16.msrb.mxu1 %v9610_v34  ;;  %v13277_v34 = vld [vmem:[#allocation2 + $0x604] sm:$0xf]  ;;  %v9021_v12 = vld [vmem:[#allocation2 + $0x208] sm:$0xf] }
  0x8c   :  { %1782 = vmatpush.bf16.msrb.mxu2 %v8846_v16  ;;  %v9527_v16 = vld [vmem:[#allocation2 + $0x610] sm:$0xf0] }
  0x8d   :  { %1795 = vmatpush.bf16.msrb.mxu3 %v8974_v41  ;;  %v8893_v41 = vld [vmem:[#allocation2 + $0x108] sm:$0xf]  ;;  %v9530_v50 = vor.u32 %v13277_v34, %v9527_v16  ;;  %v13232_v34 = vld [vmem:[#allocation2 + $0x494] sm:$0xf0] }
  0x8e   :  { %1757 = vmatpush.bf16.msrb.mxu0 %v9466_v47  ;;  %v13212_v47 = vld [vmem:[#allocation2 + $0x3f4] sm:$0xf0]  ;;  %v8894_v54 = vor.u32 %v13120_v42, %v8893_v41  ;;  %v9469_v16 = vld [vmem:[#allocation2 + $0x588] sm:$0xf] }
  0x8f   :  { %1770 = vmatpush.bf16.msrb.mxu1 %v9594_v48  ;;  %v9389_v48 = vld [vmem:[#allocation2 + $0x4e8] sm:$0xf]  ;;  %v9262_v56 = vor.u32 %v13212_v47, %v9261_v45  ;;  %v9470_v45 = vor.u32 %v13264_v38, %v9469_v16  ;;  %v13114_v16 = vld [vmem:[#allocation2 + $0xec] sm:$0xf] }
  0x90   :  { %1783 = vmatpush.bf16.msrb.mxu2 %v8830_v49  ;;  %v13244_v49 = vld [vmem:[#allocation2 + $0x4f4] sm:$0xf0]  ;;  %v9069_v42 = vld [vmem:[#allocation2 + $0x268] sm:$0xf] }
  0x91   :  { %1796 = vmatpush.bf16.msrb.mxu3 %v8958_v53  ;;  %v13276_v53 = vld [vmem:[#allocation2 + $0x5f4] sm:$0xf0]  ;;  %v9390_v57 = vor.u32 %v13244_v49, %v9389_v48  ;;  %v9325_v47 = vld [vmem:[#allocation2 + $0x468] sm:$0xf] }
  0x92   :  { %1758 = vmatpush.bf16.msrb.mxu0 %v9450_v59  ;;  %v13176_v59 = vld [vmem:[#allocation2 + $0x2d4] sm:$0xf0]  ;;  %v9453_v49 = vld [vmem:[#allocation2 + $0x568] sm:$0xf] }
  0x93   :  { %1771 = vmatpush.bf16.msrb.mxu1 %v9578_v60  ;;  %v9245_v60 = vld [vmem:[#allocation2 + $0x3c8] sm:$0xf]  ;;  %v9118_v3 = vor.u32 %v13176_v59, %v9117_v58  ;;  %v13228_v48 = vld [vmem:[#allocation2 + $0x474] sm:$0xf0] }
  0x94   :  { %1784 = vmatpush.bf16.msrb.mxu2 %v8814_v61  ;;  %v9518_v61 = vor.u32 %v13276_v53, %v9517_v52  ;;  %v9246_v4 = vor.u32 %v13208_v62, %v9245_v60  ;;  %v9326_v53 = vor.u32 %v13228_v48, %v9325_v47  ;;  %v13192_v58 = vld [vmem:[#allocation2 + $0x354] sm:$0xf0]  ;;  %v9309_v59 = vld [vmem:[#allocation2 + $0x448] sm:$0xf] }
  0x95   :  { %1797 = vmatpush.bf16.msrb.mxu3 %v8942_v1  ;;  %v9501_v1 = vld [vmem:[#allocation2 + $0x5c8] sm:$0xf]  ;;  %v13224_v60 = vld [vmem:[#allocation2 + $0x454] sm:$0xf0] }
  0x96   :  { %1759 = vmatpush.bf16.msrb.mxu0 %v9434_v7  ;;  %v13172_v7 = vld [vmem:[#allocation2 + $0x2b4] sm:$0xf0] }
  0x97   :  { %1772 = vmatpush.bf16.msrb.mxu1 %v9562_v8  ;;  %v9229_v8 = vld [vmem:[#allocation2 + $0x3a8] sm:$0xf]  ;;  %v9102_v14 = vor.u32 %v13172_v7, %v9101_v6  ;;  %v13256_v62 = vld [vmem:[#allocation2 + $0x554] sm:$0xf0] }
  0x98   :  { %1785 = vmatpush.bf16.msrb.mxu2 %v8798_v9  ;;  %v9502_v9 = vor.u32 %v13272_v2, %v9501_v1  ;;  %v9230_v15 = vor.u32 %v13204_v10, %v9229_v8  ;;  %v9310_v1 = vor.u32 %v13224_v60, %v9309_v59  ;;  %v9037_v2 = vld [vmem:[#allocation2 + $0x228] sm:$0xf]  ;;  %v13188_v6 = vld [vmem:[#allocation2 + $0x334] sm:$0xf0] }
  0x99   :  { %1798 = vmatpush.bf16.msrb.mxu3 %v8926_v19  ;;  %v9485_v19 = vld [vmem:[#allocation2 + $0x5a8] sm:$0xf]  ;;  %v13220_v8 = vld [vmem:[#allocation2 + $0x434] sm:$0xf0] }
  0x9a   :  { %1760 = vmatpush.bf16.msrb.mxu0 %v9418_v29  ;;  %v13168_v29 = vld [vmem:[#allocation2 + $0x294] sm:$0xf0]  ;;  %v9486_v31 = vor.u32 %v13268_v13, %v9485_v19  ;;  %v9293_v7 = vld [vmem:[#allocation2 + $0x428] sm:$0xf] }
  0x9b   :  { %1773 = vmatpush.bf16.msrb.mxu1 %v9546_v32  ;;  %v13200_v32 = vld [vmem:[#allocation2 + $0x394] sm:$0xf0] }
  0x9c   :  { %1786 = vmatpush.bf16.msrb.mxu2 %v8782_v17  ;;  %v9341_v17 = vld [vmem:[#allocation2 + $0x488] sm:$0xf]  ;;  %v9214_v40 = vor.u32 %v13200_v32, %v9213_v30  ;;  %v13252_v10 = vld [vmem:[#allocation2 + $0x534] sm:$0xf0] }
  0x9d   :  { %1799 = vmatpush.bf16.msrb.mxu3 %v8910_v39  ;;  %v9086_v39 = vor.u32 %v13168_v29, %v9085_v27  ;;  %v9342_v41 = vor.u32 %v13232_v34, %v9341_v17  ;;  %v13152_v19 = vld [vmem:[#allocation2 + $0x214] sm:$0xf0]  ;;  %v9277_v27 = vld [vmem:[#allocation2 + $0x408] sm:$0xf] }
  0x9e   :  { %1761 = vmatpush.bf16.msrb.mxu0 %v9402_v46  ;;  %v13196_v46 = vld [vmem:[#allocation2 + $0x374] sm:$0xf0]  ;;  %v9645_v17 = vld [vmem:[#allocation2 + $0x6e8] sm:$0xf]  ;;  %v9022_v38 = vor.u32 %v13152_v19, %v9021_v12  ;;  %v13102_v12 = vld [vmem:[#allocation2 + $0x8c] sm:$0xf] }
  0x9f   :  { %1774 = vmatpush.bf16.msrb.mxu1 %v9530_v50  ;;  %v13260_v50 = vld [vmem:[#allocation2 + $0x574] sm:$0xf0]  ;;  %v9198_v52 = vor.u32 %v13196_v46, %v9197_v44  ;;  %v13178_v44 = vld [vmem:[#allocation2 + $0x2ec] sm:$0xf]  ;;  %v449_v19 = vperm.slane %v14642_v20, 0 }
  0xa0   :  { %1787 = vmatpush.bf16.msrb.mxu2 %v8766_v51  ;;  %v9070_v51 = vor.u32 %v13164_v43, %v9069_v42  ;;  %v13216_v30 = vld [vmem:[#allocation2 + $0x414] sm:$0xf0] }
  0xa1   :  { %1800 = vmatpush.bf16.msrb.mxu3 %v8894_v54  ;;  %1762 = vmatmul.bf16.vlgmr.msrb.gmra.mxu0 %v14675_v28  ;;  %v9053_v54 = vld [vmem:[#allocation2 + $0x248] sm:$0xf]  ;;  %v13248_v32 = vld [vmem:[#allocation2 + $0x514] sm:$0xf0]  ;;  %v9278_v43 = vor.u32 %v13216_v30, %v9277_v27  ;;  %v13166_v27 = vld [vmem:[#allocation2 + $0x28c] sm:$0xf] }
  0xa2   :  { %1806 = vmatpush.bf16.msra.mxu0 %v9134_v55  ;;  %1775 = vmatmul.bf16.vlgmr.msrb.gmra.mxu1 %v14671_v25  ;;  %v13160_v55 = vld [vmem:[#allocation2 + $0x254] sm:$0xf0] }
  0xa3   :  { %1819 = vmatpush.bf16.msra.mxu1 %v9262_v56  ;;  %1788 = vmatmul.bf16.vlgmr.msrb.gmra.mxu2 %v14658_v35  ;;  %v9181_v56 = vld [vmem:[#allocation2 + $0x348] sm:$0xf]  ;;  %v9054_v63 = vor.u32 %v13160_v55, %v9053_v54  ;;  %v13308_v34 = vld [vmem:[#allocation2 + $0x6f4] sm:$0xf0]  ;;  %v8863_v54 = vld [vmem:[#allocation2 + $0xd8] sm:$0xf0] }
  0xa4   :  { %1832 = vmatpush.bf16.msra.mxu2 %v9390_v57  ;;  %1801 = vmatmul.bf16.vlgmr.msrb.gmra.mxu3 %v14662_v37  ;;  %v9454_v57 = vor.u32 %v13260_v50, %v9453_v49  ;;  %v9182_v0 = vor.u32 %v13192_v58, %v9181_v56  ;;  %v9646_v47 = vor.u32 %v13308_v34, %v9645_v17  ;;  %v9629_v50 = vld [vmem:[#allocation2 + $0x6c8] sm:$0xf]  ;;  %v13142_v55 = vld [vmem:[#allocation2 + $0x1cc] sm:$0xf]  ;;  %v8991_v56 = vld [vmem:[#allocation2 + $0x1d8] sm:$0xf0] }
  0xa5   :  { %1845 = vmatpush.bf16.msra.mxu3 %v9518_v61  ;;  %v9437_v61 = vld [vmem:[#allocation2 + $0x548] sm:$0xf]  ;;  %v9119_v58 = vld [vmem:[#allocation2 + $0x2d8] sm:$0xf0] }
  0xa6   :  { %1807 = vmatpush.bf16.msra.mxu0 %v9118_v3  ;;  %v13156_v3 = vld [vmem:[#allocation2 + $0x234] sm:$0xf0]  ;;  %v9581_v34 = vld [vmem:[#allocation2 + $0x668] sm:$0xf] }
  0xa7   :  { %1820 = vmatpush.bf16.msra.mxu1 %v9246_v4  ;;  %v9165_v4 = vld [vmem:[#allocation2 + $0x328] sm:$0xf]  ;;  %v9038_v11 = vor.u32 %v13156_v3, %v9037_v2  ;;  %v8847_v2 = vld [vmem:[#allocation2 + $0xb8] sm:$0xf0]  ;;  %v13138_v3 = vld [vmem:[#allocation2 + $0x1ac] sm:$0xf] }
  0xa8   :  { %1833 = vmatpush.bf16.msra.mxu2 %v9374_v5  ;;  %v9438_v5 = vor.u32 %v13256_v62, %v9437_v61  ;;  %v9166_v13 = vor.u32 %v13188_v6, %v9165_v4  ;;  %v8994_v61 = vor.u32 %v13142_v55, %v8991_v56  ;;  %v9613_v62 = vld [vmem:[#allocation2 + $0x6a8] sm:$0xf]  ;;  %v8975_v4 = vld [vmem:[#allocation2 + $0x1b8] sm:$0xf0] }
  0xa9   :  { %1846 = vmatpush.bf16.msra.mxu3 %v9502_v9  ;;  %v9421_v9 = vld [vmem:[#allocation2 + $0x528] sm:$0xf]  ;;  %v9103_v6 = vld [vmem:[#allocation2 + $0x2b8] sm:$0xf0] }
  0xaa   :  { %1808 = vmatpush.bf16.msra.mxu0 %v9102_v14  ;;  %v9294_v14 = vor.u32 %v13220_v8, %v9293_v7  ;;  %v9422_v29 = vor.u32 %v13252_v10, %v9421_v9  ;;  %v9597_v8 = vld [vmem:[#allocation2 + $0x688] sm:$0xf]  ;;  %v8978_v10 = vor.u32 %v13138_v3, %v8975_v4  ;;  %v8799_v56 = vld [vmem:[#allocation2 + $0x58] sm:$0xf0] }
  0xab   :  { %1821 = vmatpush.bf16.msra.mxu1 %v9230_v15  ;;  %v9149_v15 = vld [vmem:[#allocation2 + $0x308] sm:$0xf] }
  0xac   :  { %1834 = vmatpush.bf16.msra.mxu2 %v9358_v26  ;;  %v13184_v26 = vld [vmem:[#allocation2 + $0x314] sm:$0xf0]  ;;  %v9549_v4 = vld [vmem:[#allocation2 + $0x628] sm:$0xf] }
  0xad   :  { %1847 = vmatpush.bf16.msra.mxu3 %v9486_v31  ;;  %v9405_v31 = vld [vmem:[#allocation2 + $0x508] sm:$0xf]  ;;  %v9150_v42 = vor.u32 %v13184_v26, %v9149_v15  ;;  %v13134_v15 = vld [vmem:[#allocation2 + $0x18c] sm:$0xf]  ;;  %v8959_v26 = vld [vmem:[#allocation2 + $0x198] sm:$0xf0] }
  0xae   :  { %1809 = vmatpush.bf16.msra.mxu0 %v9086_v39  ;;  %v8879_v39 = vld [vmem:[#allocation2 + $0xf8] sm:$0xf0]  ;;  %v9406_v46 = vor.u32 %v13248_v32, %v9405_v31  ;;  %v8962_v17 = vor.u32 %v13134_v15, %v8959_v26  ;;  %v13280_v15 = vld [vmem:[#allocation2 + $0x614] sm:$0xf0] }
  0xaf   :  { %1822 = vmatpush.bf16.msra.mxu1 %v9214_v40  ;;  %v13146_v40 = vld [vmem:[#allocation2 + $0x1ec] sm:$0xf]  ;;  %v8882_v48 = vor.u32 %v13114_v16, %v8879_v39  ;;  %v13292_v16 = vld [vmem:[#allocation2 + $0x674] sm:$0xf0] }
  0xb0   :  { %1835 = vmatpush.bf16.msra.mxu2 %v9342_v41  ;;  %v9007_v41 = vld [vmem:[#allocation2 + $0x1f8] sm:$0xf0] }
  0xb1   :  { %1848 = vmatpush.bf16.msra.mxu3 %v9470_v45  ;;  %v9135_v45 = vld [vmem:[#allocation2 + $0x2f8] sm:$0xf0]  ;;  %v9010_v49 = vor.u32 %v13146_v40, %v9007_v41 }
  0xb2   :  { %1810 = vmatpush.bf16.msra.mxu0 %v9070_v51  ;;  %v13304_v51 = vld [vmem:[#allocation2 + $0x6d4] sm:$0xf0] }
  0xb3   :  { %1823 = vmatpush.bf16.msra.mxu1 %v9198_v52  ;;  %v13110_v52 = vld [vmem:[#allocation2 + $0xcc] sm:$0xf]  ;;  %v9630_v59 = vor.u32 %v13304_v51, %v9629_v50  ;;  %v9565_v51 = vld [vmem:[#allocation2 + $0x648] sm:$0xf] }
  0xb4   :  { %1836 = vmatpush.bf16.msra.mxu2 %v9326_v53  ;;  %v9138_v53 = vor.u32 %v13178_v44, %v9135_v45  ;;  %v8866_v60 = vor.u32 %v13110_v52, %v8863_v54  ;;  %v8943_v44 = vld [vmem:[#allocation2 + $0x178] sm:$0xf0]  ;;  %v13162_v45 = vld [vmem:[#allocation2 + $0x26c] sm:$0xf]  ;;  %v13288_v52 = vld [vmem:[#allocation2 + $0x654] sm:$0xf0] }
  0xb5   :  { %1849 = vmatpush.bf16.msra.mxu3 %v9454_v57  ;;  %v13174_v57 = vld [vmem:[#allocation2 + $0x2cc] sm:$0xf] }
  0xb6   :  { %1811 = vmatpush.bf16.msra.mxu0 %v9054_v63  ;;  %v13300_v63 = vld [vmem:[#allocation2 + $0x6b4] sm:$0xf0] }
  0xb7   :  { %1824 = vmatpush.bf16.msra.mxu1 %v9182_v0  ;;  %v13106_v0 = vld [vmem:[#allocation2 + $0xac] sm:$0xf]  ;;  %v9614_v7 = vor.u32 %v13300_v63, %v9613_v62  ;;  %v9055_v62 = vld [vmem:[#allocation2 + $0x258] sm:$0xf0]  ;;  %v9566_v63 = vor.u32 %v13288_v52, %v9565_v51 }
  0xb8   :  { %1837 = vmatpush.bf16.msra.mxu2 %v9310_v1  ;;  %v9122_v1 = vor.u32 %v13174_v57, %v9119_v58  ;;  %v8850_v9 = vor.u32 %v13106_v0, %v8847_v2  ;;  %v13126_v57 = vld [vmem:[#allocation2 + $0x14c] sm:$0xf]  ;;  %v8927_v58 = vld [vmem:[#allocation2 + $0x158] sm:$0xf0] }
  0xb9   :  { %1850 = vmatpush.bf16.msra.mxu3 %v9438_v5  ;;  %v13170_v5 = vld [vmem:[#allocation2 + $0x2ac] sm:$0xf]  ;;  %v8930_v3 = vor.u32 %v13126_v57, %v8927_v58 }
  0xba   :  { %1812 = vmatpush.bf16.msra.mxu0 %v9038_v11  ;;  %v13296_v11 = vld [vmem:[#allocation2 + $0x694] sm:$0xf0]  ;;  %v13238_v57 = vld [vmem:[#allocation2 + $0x4cc] sm:$0xf] }
  0xbb   :  { %1825 = vmatpush.bf16.msra.mxu1 %v9166_v13  ;;  %v9106_v13 = vor.u32 %v13170_v5, %v9103_v6  ;;  %v9598_v30 = vor.u32 %v13296_v11, %v9597_v8  ;;  %v13284_v5 = vld [vmem:[#allocation2 + $0x634] sm:$0xf0]  ;;  %v13090_v6 = vld [vmem:[#allocation2 + $0x2c] sm:$0xf]  ;;  %v8911_v11 = vld [vmem:[#allocation2 + $0x138] sm:$0xf0] }
  0xbc   :  { %1838 = vmatpush.bf16.msra.mxu2 %v9294_v14  ;;  %v8831_v14 = vld [vmem:[#allocation2 + $0x98] sm:$0xf0] }
  0xbd   :  { %1851 = vmatpush.bf16.msra.mxu3 %v9422_v29  ;;  %v9087_v29 = vld [vmem:[#allocation2 + $0x298] sm:$0xf0]  ;;  %v8834_v32 = vor.u32 %v13102_v12, %v8831_v14  ;;  %v13154_v12 = vld [vmem:[#allocation2 + $0x22c] sm:$0xf]  ;;  %v9533_v14 = vld [vmem:[#allocation2 + $0x608] sm:$0xf] }
  0xbe   :  { %1813 = vmatpush.bf16.msra.mxu0 %v9022_v38  ;;  %v1607_v31 = vpop.f32.mrf.mxu0  ;;  %v13098_v38 = vld [vmem:[#allocation2 + $0x6c] sm:$0xf]  ;;  %v9090_v41 = vor.u32 %v13166_v27, %v9087_v29 }
  0xbf   :  { %1826 = vmatpush.bf16.msra.mxu1 %v9150_v42  ;;  %v1608_v39 = vadd.f32 %v1607_v31, %v449_v19  ;;  %v1620_v40 = vpop.f32.mrf.mxu1  ;;  %v8815_v42 = vld [vmem:[#allocation2 + $0x78] sm:$0xf0]  ;;  %v13086_v29 = vld [vmem:[#allocation2 + $0xc] sm:$0xf] }
  0xc0   :  { %1839 = vmatpush.bf16.msra.mxu2 %v9278_v43  ;;  %v13130_v43 = vld [vmem:[#allocation2 + $0x16c] sm:$0xf]  ;;  %v9039_v19 = vld [vmem:[#allocation2 + $0x238] sm:$0xf0] }
  0xc1   :  { %1852 = vmatpush.bf16.msra.mxu3 %v9406_v46  ;;  %1814 = vmatmul.bf16.vlgmr.msra.gmra.mxu0 %v14656_v33  ;;  %v9071_v46 = vld [vmem:[#allocation2 + $0x278] sm:$0xf0]  ;;  %v8946_v50 = vor.u32 %v13130_v43, %v8943_v44  ;;  %v13118_v31 = vld [vmem:[#allocation2 + $0x10c] sm:$0xf]  ;;  %v9534_v43 = vor.u32 %v13280_v15, %v9533_v14 }
  0xc2   :  { %1858 = vmatpush.bf16.msrb.mxu0 %v9646_v47  ;;  %1827 = vmatmul.bf16.vlgmr.msra.gmra.mxu1 %v14660_v36  ;;  %v1621_v47 = vadd.f32 %v1620_v40, %v1608_v39  ;;  %v9074_v55 = vor.u32 %v13162_v45, %v9071_v46  ;;  %v13210_v40 = vld [vmem:[#allocation2 + $0x3ec] sm:$0xf]  ;;  %v9391_v44 = vld [vmem:[#allocation2 + $0x4f8] sm:$0xf0] }
  0xc3   :  { %1871 = vmatpush.bf16.msrb.mxu1 %v8882_v48  ;;  %1840 = vmatmul.bf16.vlgmr.msra.gmra.mxu2 %v14673_v18  ;;  %v9582_v48 = vor.u32 %v13292_v16, %v9581_v34  ;;  %v8895_v34 = vld [vmem:[#allocation2 + $0x118] sm:$0xf0]  ;;  %v13150_v16 = vld [vmem:[#allocation2 + $0x20c] sm:$0xf] }
  0xc4   :  { %1884 = vmatpush.bf16.msrb.mxu2 %v9010_v49  ;;  %1853 = vmatmul.bf16.vlgmr.msra.gmra.mxu3 %v14675_v28  ;;  %v8818_v49 = vor.u32 %v13098_v38, %v8815_v42  ;;  %v9023_v38 = vld [vmem:[#allocation2 + $0x218] sm:$0xf0]  ;;  %v13242_v42 = vld [vmem:[#allocation2 + $0x4ec] sm:$0xf] }
  0xc5   :  { %1897 = vmatpush.bf16.msrb.mxu3 %v9138_v53  ;;  %v13094_v53 = vld [vmem:[#allocation2 + $0x4c] sm:$0xf]  ;;  %v9519_v46 = vld [vmem:[#allocation2 + $0x5f8] sm:$0xf0]  ;;  %v9026_v51 = vor.u32 %v13150_v16, %v9023_v38 }
  0xc6   :  { %1859 = vmatpush.bf16.msrb.mxu0 %v9630_v59  ;;  %v1633_v54 = vpop.f32.mrf.mxu2  ;;  %v8802_v2 = vor.u32 %v13094_v53, %v8799_v56  ;;  %v13274_v45 = vld [vmem:[#allocation2 + $0x5ec] sm:$0xf]  ;;  %v9394_v53 = vor.u32 %v13242_v42, %v9391_v44  ;;  %v9247_v56 = vld [vmem:[#allocation2 + $0x3d8] sm:$0xf0] }
  0xc7   :  { %1872 = vmatpush.bf16.msrb.mxu1 %v8866_v60  ;;  %v1634_v59 = vadd.f32 %v1633_v54, %v1621_v47  ;;  %v1646_v60 = vpop.f32.mrf.mxu3  ;;  %v9522_v54 = vor.u32 %v13274_v45, %v9519_v46  ;;  %v13198_v15 = vld [vmem:[#allocation2 + $0x38c] sm:$0xf]  ;;  %v9327_v44 = vld [vmem:[#allocation2 + $0x478] sm:$0xf0] }
  0xc8   :  { %1885 = vmatpush.bf16.msrb.mxu2 %v8994_v61  ;;  %v13158_v61 = vld [vmem:[#allocation2 + $0x24c] sm:$0xf]  ;;  %v9455_v46 = vld [vmem:[#allocation2 + $0x578] sm:$0xf0] }
  0xc9   :  { %1898 = vmatpush.bf16.msrb.mxu3 %v9122_v1  ;;  %v14694_v0 = vadd.f32 %v1646_v60, %v1634_v59  ;;  %v1609_v1 = vpop.f32.mrf.mxu0  ;;  %v9058_v8 = vor.u32 %v13158_v61, %v9055_v62  ;;  %v9375_v59 = vld [vmem:[#allocation2 + $0x4d8] sm:$0xf0]  ;;  %v13270_v60 = vld [vmem:[#allocation2 + $0x5cc] sm:$0xf] }
  0xca   :  { %1860 = vmatpush.bf16.msrb.mxu0 %v9614_v7  ;;  %v1622_v7 = vpop.f32.mrf.mxu1  ;;  %v9503_v61 = vld [vmem:[#allocation2 + $0x5d8] sm:$0xf0]  ;;  %v13302_v62 = vld [vmem:[#allocation2 + $0x6cc] sm:$0xf] }
  0xcb   :  { %1873 = vmatpush.bf16.msrb.mxu1 %v8850_v9  ;;  %v8783_v9 = vld [vmem:[#allocation2 + $0x38] sm:$0xf0]  ;;  %v13258_v45 = vld [vmem:[#allocation2 + $0x56c] sm:$0xf] }
  0xcc   :  { %1886 = vmatpush.bf16.msrb.mxu2 %v8978_v10  ;;  %v13122_v10 = vld [vmem:[#allocation2 + $0x12c] sm:$0xf]  ;;  %v8786_v26 = vor.u32 %v13090_v6, %v8783_v9 }
  0xcd   :  { %1899 = vmatpush.bf16.msrb.mxu3 %v9106_v13  ;;  %v9550_v13 = vor.u32 %v13284_v5, %v9549_v4  ;;  %v8914_v27 = vor.u32 %v13122_v10, %v8911_v11  ;;  %v13202_v4 = vld [vmem:[#allocation2 + $0x3ac] sm:$0xf]  ;;  %v9231_v5 = vld [vmem:[#allocation2 + $0x3b8] sm:$0xf0] }
  0xce   :  { %1861 = vmatpush.bf16.msrb.mxu0 %v9598_v30  ;;  %v8767_v30 = vld [vmem:[#allocation2 + $0x18] sm:$0xf0]  ;;  %v13234_v6 = vld [vmem:[#allocation2 + $0x4ac] sm:$0xf] }
  0xcf   :  { %1874 = vmatpush.bf16.msrb.mxu1 %v8834_v32  ;;  %v1635_v32 = vpop.f32.mrf.mxu2  ;;  %v1648_v39 = vpop.f32.mrf.mxu3  ;;  %v8770_v47 = vor.u32 %v13086_v29, %v8767_v30  ;;  %v13266_v9 = vld [vmem:[#allocation2 + $0x5ac] sm:$0xf]  ;;  %v9487_v10 = vld [vmem:[#allocation2 + $0x5b8] sm:$0xf0] }
  0xd0   :  { %1887 = vmatpush.bf16.msrb.mxu2 %v8962_v17  ;;  %v9042_v17 = vor.u32 %v13154_v12, %v9039_v19  ;;  %v13298_v11 = vld [vmem:[#allocation2 + $0x6ac] sm:$0xf]  ;;  %v9615_v12 = vld [vmem:[#allocation2 + $0x6b8] sm:$0xf0]  ;;  %v9234_v19 = vor.u32 %v13202_v4, %v9231_v5  ;;  %v9490_v14 = vor.u32 %v13266_v9, %v9487_v10 }
  0xd1   :  { %1900 = vmatpush.bf16.msrb.mxu3 %v9090_v41  ;;  %v9263_v41 = vld [vmem:[#allocation2 + $0x3f8] sm:$0xf0]  ;;  %v9618_v29 = vor.u32 %v13298_v11, %v9615_v12  ;;  %v13294_v32 = vld [vmem:[#allocation2 + $0x68c] sm:$0xf] }
  0xd2   :  { %1862 = vmatpush.bf16.msrb.mxu0 %v9582_v48  ;;  %v8898_v48 = vor.u32 %v13118_v31, %v8895_v34  ;;  %v9266_v52 = vor.u32 %v13210_v40, %v9263_v41  ;;  %v9343_v30 = vld [vmem:[#allocation2 + $0x498] sm:$0xf0]  ;;  %v13262_v31 = vld [vmem:[#allocation2 + $0x58c] sm:$0xf] }
  0xd3   :  { %1875 = vmatpush.bf16.msrb.mxu1 %v8818_v49  ;;  %v13306_v49 = vld [vmem:[#allocation2 + $0x6ec] sm:$0xf]  ;;  %v9199_v40 = vld [vmem:[#allocation2 + $0x378] sm:$0xf0] }
  0xd4   :  { %1888 = vmatpush.bf16.msrb.mxu2 %v8946_v50  ;;  %v9647_v50 = vld [vmem:[#allocation2 + $0x6f8] sm:$0xf0]  ;;  %v13194_v39 = vld [vmem:[#allocation2 + $0x36c] sm:$0xf] }
  0xd5   :  { %1901 = vmatpush.bf16.msrb.mxu3 %v9074_v55  ;;  %v13206_v55 = vld [vmem:[#allocation2 + $0x3cc] sm:$0xf]  ;;  %v9650_v58 = vor.u32 %v13306_v49, %v9647_v50  ;;  %v9202_v50 = vor.u32 %v13194_v39, %v9199_v40  ;;  %v9295_v12 = vld [vmem:[#allocation2 + $0x438] sm:$0xf0] }
  0xd6   :  { %1863 = vmatpush.bf16.msrb.mxu0 %v9566_v63  ;;  %v9631_v63 = vld [vmem:[#allocation2 + $0x6d8] sm:$0xf0]  ;;  %v9250_v1 = vor.u32 %v13206_v55, %v9247_v56  ;;  %v13226_v41 = vld [vmem:[#allocation2 + $0x46c] sm:$0xf] }
  0xd7   :  { %1876 = vmatpush.bf16.msrb.mxu1 %v8802_v2  ;;  %v9378_v2 = vor.u32 %v13238_v57, %v9375_v59  ;;  %v9634_v7 = vor.u32 %v13302_v62, %v9631_v63  ;;  %v13222_v55 = vld [vmem:[#allocation2 + $0x44c] sm:$0xf]  ;;  %v9311_v57 = vld [vmem:[#allocation2 + $0x458] sm:$0xf0] }
  0xd8   :  { %1889 = vmatpush.bf16.msrb.mxu2 %v8930_v3  ;;  %v9506_v3 = vor.u32 %v13270_v60, %v9503_v61  ;;  %v9439_v59 = vld [vmem:[#allocation2 + $0x558] sm:$0xf0]  ;;  %v13286_v61 = vld [vmem:[#allocation2 + $0x64c] sm:$0xf]  ;;  %v9314_v5 = vor.u32 %v13222_v55, %v9311_v57 }
  0xd9   :  { %1902 = vmatpush.bf16.msrb.mxu3 %v9058_v8  ;;  %v9359_v8 = vld [vmem:[#allocation2 + $0x4b8] sm:$0xf0]  ;;  %v13218_v9 = vld [vmem:[#allocation2 + $0x42c] sm:$0xf] }
  0xda   :  { %1864 = vmatpush.bf16.msrb.mxu0 %v9550_v13  ;;  %v9362_v13 = vor.u32 %v13234_v6, %v9359_v8  ;;  %v9567_v62 = vld [vmem:[#allocation2 + $0x658] sm:$0xf0] }
  0xdb   :  { %1877 = vmatpush.bf16.msrb.mxu1 %v8786_v26  ;;  %v9215_v26 = vld [vmem:[#allocation2 + $0x398] sm:$0xf0]  ;;  %v9570_v10 = vor.u32 %v13286_v61, %v9567_v62 }
  0xdc   :  { %1890 = vmatpush.bf16.msrb.mxu2 %v8914_v27  ;;  %v13230_v27 = vld [vmem:[#allocation2 + $0x48c] sm:$0xf]  ;;  %v9167_v8 = vld [vmem:[#allocation2 + $0x338] sm:$0xf0] }
  0xdd   :  { %1903 = vmatpush.bf16.msrb.mxu3 %v9042_v17  ;;  %v9218_v17 = vor.u32 %v13198_v15, %v9215_v26  ;;  %v9551_v15 = vld [vmem:[#allocation2 + $0x638] sm:$0xf0] }
  0xde   :  { %1865 = vmatpush.bf16.msrb.mxu0 %v9534_v43  ;;  %v1659_v34 = vpop.f32.mrf.mxu0 }
  0xdf   :  { %1878 = vmatpush.bf16.msrb.mxu1 %v8770_v47  ;;  %v1672_v16 = vpop.f32.mrf.mxu1  ;;  %v1660_v42 = vadd.f32 %v1659_v34, %v14694_v0  ;;  %v13290_v47 = vld [vmem:[#allocation2 + $0x66c] sm:$0xf] }
  0xe0   :  { %1891 = vmatpush.bf16.msrb.mxu2 %v8898_v48  ;;  %v9583_v48 = vld [vmem:[#allocation2 + $0x678] sm:$0xf0]  ;;  %v13246_v34 = vld [vmem:[#allocation2 + $0x50c] sm:$0xf] }
  0xe1   :  { %1904 = vmatpush.bf16.msrb.mxu3 %v9026_v51  ;;  %1866 = vmatmul.bf16.vlgmr.msrb.gmra.mxu0 %v14671_v25  ;;  %v1673_v49 = vadd.f32 %v1672_v16, %v1660_v42  ;;  %v9330_v51 = vor.u32 %v13226_v41, %v9327_v44  ;;  %v9586_v0 = vor.u32 %v13290_v47, %v9583_v48  ;;  %v9407_v16 = vld [vmem:[#allocation2 + $0x518] sm:$0xf0]  ;;  %v450_v44 = vperm.slane %v14644_v21, 0 }
  0xe2   :  { %1910 = vmatpush.bf16.msra.mxu0 %v9266_v52  ;;  %1879 = vmatmul.bf16.vlgmr.msrb.gmra.mxu1 %v14658_v35  ;;  %v9346_v35 = vor.u32 %v13230_v27, %v9343_v30  ;;  %v9458_v52 = vor.u32 %v13258_v45, %v9455_v46  ;;  %v9298_v27 = vor.u32 %v13218_v9, %v9295_v12  ;;  %v13182_v30 = vld [vmem:[#allocation2 + $0x30c] sm:$0xf] }
  0xe3   :  { %1923 = vmatpush.bf16.msra.mxu1 %v9394_v53  ;;  %1892 = vmatmul.bf16.vlgmr.msrb.gmra.mxu2 %v14662_v37  ;;  %v9471_v37 = vld [vmem:[#allocation2 + $0x598] sm:$0xf0]  ;;  %v13190_v53 = vld [vmem:[#allocation2 + $0x34c] sm:$0xf]  ;;  %v9410_v42 = vor.u32 %v13246_v34, %v9407_v16 }
  0xe4   :  { %1936 = vmatpush.bf16.msra.mxu2 %v9522_v54  ;;  %1905 = vmatmul.bf16.vlgmr.msrb.gmra.mxu3 %v14656_v33  ;;  %v9599_v33 = vld [vmem:[#allocation2 + $0x698] sm:$0xf0]  ;;  %v9474_v38 = vor.u32 %v13262_v31, %v9471_v37  ;;  %v13214_v37 = vld [vmem:[#allocation2 + $0x40c] sm:$0xf] }
  0xe5   :  { %1949 = vmatpush.bf16.msra.mxu3 %v9650_v58  ;;  %v9602_v43 = vor.u32 %v13294_v32, %v9599_v33  ;;  %v9183_v54 = vld [vmem:[#allocation2 + $0x358] sm:$0xf0]  ;;  %v13254_v58 = vld [vmem:[#allocation2 + $0x54c] sm:$0xf] }
  0xe6   :  { %1911 = vmatpush.bf16.msra.mxu0 %v9250_v1  ;;  %v1685_v56 = vpop.f32.mrf.mxu2  ;;  %v9186_v1 = vor.u32 %v13190_v53, %v9183_v54  ;;  %v9442_v6 = vor.u32 %v13254_v58, %v9439_v59  ;;  %v9151_v31 = vld [vmem:[#allocation2 + $0x318] sm:$0xf0] }
  0xe7   :  { %1924 = vmatpush.bf16.msra.mxu1 %v9378_v2  ;;  %v1686_v60 = vadd.f32 %v1685_v56, %v1673_v49  ;;  %v1698_v63 = vpop.f32.mrf.mxu3  ;;  %v1674_v4 = vpop.f32.mrf.mxu1  ;;  %v9154_v40 = vor.u32 %v13182_v30, %v9151_v31 }
  0xe8   :  { %1937 = vmatpush.bf16.msra.mxu2 %v9506_v3  ;;  %v1661_v3 = vpop.f32.mrf.mxu0  ;;  %v1699_v45 = vadd.f32 %v1698_v63, %v450_v44 }
  0xe9   :  { %1950 = vmatpush.bf16.msra.mxu3 %v9634_v7  ;;  %v14701_v2 = vmax.f32 %v1686_v60, 0.0  ;;  %v13186_v7 = vld [vmem:[#allocation2 + $0x32c] sm:$0xf] }
  0xea   :  { %1912 = vmatpush.bf16.msra.mxu0 %v9234_v19  ;;  %v13250_v19 = vld [vmem:[#allocation2 + $0x52c] sm:$0xf]  ;;  %v9170_v26 = vor.u32 %v13186_v7, %v9167_v8 }
  0xeb   :  { %1925 = vmatpush.bf16.msra.mxu1 %v9362_v13  ;;  %v14705_v11 = vpack.c.bf16 %v14701_v2, %v14701_v2  ;;  %v9423_v13 = vld [vmem:[#allocation2 + $0x538] sm:$0xf0] }
  0xec   :  { %1938 = vmatpush.bf16.msra.mxu2 %v9490_v14  ;;  %v13282_v14 = vld [vmem:[#allocation2 + $0x62c] sm:$0xf] }
  0xed   :  { %1951 = vmatpush.bf16.msra.mxu3 %v9618_v29  ;;  %v9426_v29 = vor.u32 %v13250_v19, %v9423_v13  ;;  %v9554_v33 = vor.u32 %v13282_v14, %v9551_v15 }
  0xee   :  { %1913 = vmatpush.bf16.msra.mxu0 %v9218_v17  ;;  %v1687_v32 = vpop.f32.mrf.mxu2  ;;  %v9279_v17 = vld [vmem:[#allocation2 + $0x418] sm:$0xf0] }
  0xef   :  { %1926 = vmatpush.bf16.msra.mxu1 %v9346_v35  ;;  %v13278_v35 = vld [vmem:[#allocation2 + $0x60c] sm:$0xf]  ;;  %v1700_v39 = vpop.f32.mrf.mxu3  ;;  %v9282_v41 = vor.u32 %v13214_v37, %v9279_v17 }
  0xf0   :  { %1939 = vmatpush.bf16.msra.mxu2 %v9474_v38  ;;  %v9535_v38 = vld [vmem:[#allocation2 + $0x618] sm:$0xf0]  ;;  %v452_v39 = vperm.slane %v14648_v23, 0 }
  0xf1   :  { %1952 = vmatpush.bf16.msra.mxu3 %v9602_v43  ;;  %v9538_v43 = vor.u32 %v13278_v35, %v9535_v38 }
  0xf2   :  { %1914 = vmatpush.bf16.msra.mxu0 %v9202_v50 }
  0xf3   :  { %1927 = vmatpush.bf16.msra.mxu1 %v9330_v51 }
  0xf4   :  { %1940 = vmatpush.bf16.msra.mxu2 %v9458_v52 }
  0xf5   :  { %1953 = vmatpush.bf16.msra.mxu3 %v9586_v0 }
  0xf6   :  { %1915 = vmatpush.bf16.msra.mxu0 %v9186_v1 }
  0xf7   :  { %1928 = vmatpush.bf16.msra.mxu1 %v9314_v5 }
  0xf8   :  { %1941 = vmatpush.bf16.msra.mxu2 %v9442_v6 }
  0xf9   :  { %1954 = vmatpush.bf16.msra.mxu3 %v9570_v10 }
  0xfa   :  { %1916 = vmatpush.bf16.msra.mxu0 %v9170_v26 }
  0xfb   :  { %1929 = vmatpush.bf16.msra.mxu1 %v9298_v27 }
  0xfc   :  { %1942 = vmatpush.bf16.msra.mxu2 %v9426_v29 }
  0xfd   :  { %1955 = vmatpush.bf16.msra.mxu3 %v9554_v33 }
  0xfe   :  { %1917 = vmatpush.bf16.msra.mxu0 %v9154_v40  ;;  %v1711_v46 = vpop.f32.mrf.mxu0 }
  0xff   :  { %1930 = vmatpush.bf16.msra.mxu1 %v9282_v41  ;;  %v1712_v47 = vadd.f32 %v1711_v46, %v1699_v45  ;;  %v1724_v48 = vpop.f32.mrf.mxu1 }
 0x100   :  { %1943 = vmatpush.bf16.msra.mxu2 %v9410_v42 }
 0x101   :  { %1956 = vmatpush.bf16.msra.mxu3 %v9538_v43  ;;  %1918 = vmatmul.bf16.vlgmr.msra.gmra.mxu0 %v14660_v36  ;;  %v1725_v49 = vadd.f32 %v1724_v48, %v1712_v47 }
 0x102   :  { %1931 = vmatmul.bf16.vlgmr.msra.gmra.mxu1 %v14673_v18 }
 0x103   :  { %1944 = vmatmul.bf16.vlgmr.msra.gmra.mxu2 %v14675_v28  ;;  %v451_v28 = vperm.slane %v14646_v22, 0 }
 0x104   :  { %1957 = vmatmul.bf16.vlgmr.msra.gmra.mxu3 %v14671_v25 }
 0x106   :  { %v1737_v50 = vpop.f32.mrf.mxu2  ;;  %v1713_v54 = vpop.f32.mrf.mxu0 }
 0x107   :  { %v1738_v51 = vadd.f32 %v1737_v50, %v1725_v49  ;;  %v1750_v52 = vpop.f32.mrf.mxu3  ;;  %v1726_v55 = vpop.f32.mrf.mxu1 }
 0x109   :  { %v1751_v53 = vadd.f32 %v1750_v52, %v1738_v51 }
 0x10e   :  { %v1739_v36 = vpop.f32.mrf.mxu2 }
 0x10f   :  { %v1752_v56 = vpop.f32.mrf.mxu3 }
 0x11e   :  { %v1763_v0 = vpop.f32.mrf.mxu0 }
 0x11f   :  { %v1764_v57 = vadd.f32 %v1763_v0, %v1751_v53  ;;  %v1776_v18 = vpop.f32.mrf.mxu1 }
 0x121   :  { %v1777_v58 = vadd.f32 %v1776_v18, %v1764_v57 }
 0x123   :  { %v14713_v25 = vmax.f32 %v1777_v58, 0.0 }
 0x125   :  { %v14717_v59 = vpack.c.bf16 %v14713_v25, %v14713_v25 }
 0x126   :  { %v1789_v60 = vpop.f32.mrf.mxu2  ;;  %v1765_v63 = vpop.f32.mrf.mxu0 }
 0x127   :  { %v1790_v61 = vadd.f32 %v1789_v60, %v451_v28  ;;  %v1802_v62 = vpop.f32.mrf.mxu3  ;;  %v1778_v1 = vpop.f32.mrf.mxu1 }
 0x129   :  { %v1803_v3 = vadd.f32 %v1802_v62, %v1790_v61 }
 0x12e   :  { %v1791_v4 = vpop.f32.mrf.mxu2 }
 0x12f   :  { %v1804_v5 = vpop.f32.mrf.mxu3 }
 0x13e   :  { %v1815_v6 = vpop.f32.mrf.mxu0 }
 0x13f   :  { %v1828_v7 = vpop.f32.mrf.mxu1  ;;  %v1816_v14 = vadd.f32 %v1815_v6, %v1803_v3 }
 0x141   :  { %v1829_v15 = vadd.f32 %v1828_v7, %v1816_v14 }
 0x146   :  { %v1841_v8 = vpop.f32.mrf.mxu2  ;;  %v1817_v10 = vpop.f32.mrf.mxu0 }
 0x147   :  { %v1854_v9 = vpop.f32.mrf.mxu3  ;;  %v1830_v12 = vpop.f32.mrf.mxu1  ;;  %v1842_v26 = vadd.f32 %v1841_v8, %v1829_v15 }
 0x149   :  { %v1855_v27 = vadd.f32 %v1854_v9, %v1842_v26 }
 0x14e   :  { %v1843_v19 = vpop.f32.mrf.mxu2 }
 0x14f   :  { %v1856_v13 = vpop.f32.mrf.mxu3 }
 0x15e   :  { %v1867_v29 = vpop.f32.mrf.mxu0 }
 0x15f   :  { %v1868_v30 = vadd.f32 %v1867_v29, %v1855_v27  ;;  %v1880_v31 = vpop.f32.mrf.mxu1 }
 0x160   :  { %v1881_v40 = vadd.f32 %v1880_v31, %v452_v39 }
 0x161   :  { %v14719_v37 = vmax.f32 %v1868_v30, 0.0 }
 0x163   :  { %v14723_v32 = vpack.c.bf16 %v14719_v37, %v14719_v37 }
 0x166   :  { %v1893_v33 = vpop.f32.mrf.mxu2  ;;  %v1869_v34 = vpop.f32.mrf.mxu0 }
 0x167   :  { %v1906_v17 = vpop.f32.mrf.mxu3  ;;  %v1882_v16 = vpop.f32.mrf.mxu1  ;;  %v1894_v41 = vadd.f32 %v1893_v33, %v1881_v40 }
 0x169   :  { %v1907_v42 = vadd.f32 %v1906_v17, %v1894_v41 }
 0x16e   :  { %v1895_v35 = vpop.f32.mrf.mxu2 }
 0x16f   :  { %v1908_v38 = vpop.f32.mrf.mxu3 }
 0x17e   :  { %v1919_v43 = vpop.f32.mrf.mxu0 }
 0x17f   :  { %v1932_v44 = vpop.f32.mrf.mxu1  ;;  %v1920_v45 = vadd.f32 %v1919_v43, %v1907_v42 }
 0x181   :  { %v1933_v46 = vadd.f32 %v1932_v44, %v1920_v45 }
 0x186   :  { %v1945_v47 = vpop.f32.mrf.mxu2  ;;  %v1921_v50 = vpop.f32.mrf.mxu0 }
 0x187   :  { %v1946_v48 = vadd.f32 %v1945_v47, %v1933_v46  ;;  %v1958_v49 = vpop.f32.mrf.mxu3  ;;  %v1934_v51 = vpop.f32.mrf.mxu1 }
 0x189   :  { %v1959_v52 = vadd.f32 %v1958_v49, %v1946_v48 }
 0x18b   :  { %v14726_v53 = vmax.f32 %v1959_v52, 0.0 }
 0x18d   :  { %v14730_v54 = vpack.c.bf16 %v14726_v53, %v14726_v53 }
 0x18e   :  { %v1947_v55 = vpop.f32.mrf.mxu2 }
 0x18f   :  { %v1960_v36 = vpop.f32.mrf.mxu3 }
 0x190   :  { %14446 = dma.done.wait [#allocation12 + $0x1], 16384 }
 0x191   :  { %14447 = vsyncadd [#allocation12 + $0x1], 4294950912  ;;  %v9765_v56 = vld [vmem:[#allocation3 + $0xe0] sm:$0xf]  ;;  %v13339_v0 = vld [vmem:[#allocation3 + $0xec] sm:$0xf0] }
 0x192   :  { %v9893_v57 = vld [vmem:[#allocation3 + $0x1e0] sm:$0xf]  ;;  %v9766_v18 = vor.u32 %v13339_v0, %v9765_v56  ;;  %v13371_v58 = vld [vmem:[#allocation3 + $0x1ec] sm:$0xf0] }
 0x193   :  { %v10021_v28 = vld [vmem:[#allocation3 + $0x2e0] sm:$0xf]  ;;  %v13403_v60 = vld [vmem:[#allocation3 + $0x2ec] sm:$0xf0]  ;;  %v9894_v61 = vor.u32 %v13371_v58, %v9893_v57 }
 0x194   :  { %v10022_v62 = vor.u32 %v13403_v60, %v10021_v28  ;;  %v10149_v63 = vld [vmem:[#allocation3 + $0x3e0] sm:$0xf]  ;;  %v13435_v1 = vld [vmem:[#allocation3 + $0x3ec] sm:$0xf0]  ;;  %2746 = vmatpush.bf16.msrb.mxu0 %v9766_v18 }
 0x195   :  { %v9749_v3 = vld [vmem:[#allocation3 + $0xc0] sm:$0xf]  ;;  %v10150_v4 = vor.u32 %v13435_v1, %v10149_v63  ;;  %v13335_v5 = vld [vmem:[#allocation3 + $0xcc] sm:$0xf0]  ;;  %2759 = vmatpush.bf16.msrb.mxu1 %v9894_v61 }
 0x196   :  { %v9877_v6 = vld [vmem:[#allocation3 + $0x1c0] sm:$0xf]  ;;  %v13367_v7 = vld [vmem:[#allocation3 + $0x1cc] sm:$0xf0]  ;;  %2772 = vmatpush.bf16.msrb.mxu2 %v10022_v62  ;;  %v9750_v8 = vor.u32 %v13335_v5, %v9749_v3 }
 0x197   :  { %v9878_v9 = vor.u32 %v13367_v7, %v9877_v6  ;;  %v10005_v10 = vld [vmem:[#allocation3 + $0x2c0] sm:$0xf]  ;;  %v13399_v12 = vld [vmem:[#allocation3 + $0x2cc] sm:$0xf0]  ;;  %2785 = vmatpush.bf16.msrb.mxu3 %v10150_v4 }
 0x198   :  { %v10133_v19 = vld [vmem:[#allocation3 + $0x3c0] sm:$0xf]  ;;  %v10006_v13 = vor.u32 %v13399_v12, %v10005_v10  ;;  %v13431_v14 = vld [vmem:[#allocation3 + $0x3cc] sm:$0xf0]  ;;  %2747 = vmatpush.bf16.msrb.mxu0 %v9750_v8 }
 0x199   :  { %v9733_v15 = vld [vmem:[#allocation3 + $0xa0] sm:$0xf]  ;;  %v13331_v26 = vld [vmem:[#allocation3 + $0xac] sm:$0xf0]  ;;  %v10134_v27 = vor.u32 %v13431_v14, %v10133_v19  ;;  %2760 = vmatpush.bf16.msrb.mxu1 %v9878_v9 }
 0x19a   :  { %v9861_v29 = vld [vmem:[#allocation3 + $0x1a0] sm:$0xf]  ;;  %v13363_v30 = vld [vmem:[#allocation3 + $0x1ac] sm:$0xf0]  ;;  %v9734_v33 = vor.u32 %v13331_v26, %v9733_v15  ;;  %2773 = vmatpush.bf16.msrb.mxu2 %v10006_v13 }
 0x19b   :  { %v9989_v31 = vld [vmem:[#allocation3 + $0x2a0] sm:$0xf]  ;;  %v13395_v17 = vld [vmem:[#allocation3 + $0x2ac] sm:$0xf0]  ;;  %v9862_v35 = vor.u32 %v13363_v30, %v9861_v29  ;;  %2786 = vmatpush.bf16.msrb.mxu3 %v10134_v27 }
 0x19c   :  { %v10117_v34 = vld [vmem:[#allocation3 + $0x3a0] sm:$0xf]  ;;  %v13427_v16 = vld [vmem:[#allocation3 + $0x3ac] sm:$0xf0]  ;;  %v9990_v38 = vor.u32 %v13395_v17, %v9989_v31  ;;  %2748 = vmatpush.bf16.msrb.mxu0 %v9734_v33 }
 0x19d   :  { %v9717_v39 = vld [vmem:[#allocation3 + $0x80] sm:$0xf]  ;;  %v13327_v40 = vld [vmem:[#allocation3 + $0x8c] sm:$0xf0]  ;;  %v10118_v42 = vor.u32 %v13427_v16, %v10117_v34  ;;  %2761 = vmatpush.bf16.msrb.mxu1 %v9862_v35 }
 0x19e   :  { %v9845_v41 = vld [vmem:[#allocation3 + $0x180] sm:$0xf]  ;;  %v13359_v43 = vld [vmem:[#allocation3 + $0x18c] sm:$0xf0]  ;;  %v9718_v48 = vor.u32 %v13327_v40, %v9717_v39  ;;  %2774 = vmatpush.bf16.msrb.mxu2 %v9990_v38 }
 0x19f   :  { %v9973_v44 = vld [vmem:[#allocation3 + $0x280] sm:$0xf]  ;;  %v13391_v45 = vld [vmem:[#allocation3 + $0x28c] sm:$0xf0]  ;;  %v9846_v49 = vor.u32 %v13359_v43, %v9845_v41  ;;  %2787 = vmatpush.bf16.msrb.mxu3 %v10118_v42 }
 0x1a0   :  { %v10101_v46 = vld [vmem:[#allocation3 + $0x380] sm:$0xf]  ;;  %v13423_v47 = vld [vmem:[#allocation3 + $0x38c] sm:$0xf0]  ;;  %v9974_v50 = vor.u32 %v13391_v45, %v9973_v44  ;;  %2749 = vmatpush.bf16.msrb.mxu0 %v9718_v48  ;;  %v13337_v45 = vld [vmem:[#allocation3 + $0xe4] sm:$0xf] }
 0x1a1   :  { %v9701_v51 = vld [vmem:[#allocation3 + $0x60] sm:$0xf]  ;;  %v13323_v52 = vld [vmem:[#allocation3 + $0x6c] sm:$0xf0]  ;;  %v10102_v36 = vor.u32 %v13423_v47, %v10101_v46  ;;  %2762 = vmatpush.bf16.msrb.mxu1 %v9846_v49  ;;  %v9767_v46 = vld [vmem:[#allocation3 + $0xf0] sm:$0xf0] }
 0x1a2   :  { %v9829_v55 = vld [vmem:[#allocation3 + $0x160] sm:$0xf]  ;;  %v13355_v56 = vld [vmem:[#allocation3 + $0x16c] sm:$0xf0]  ;;  %v9702_v28 = vor.u32 %v13323_v52, %v9701_v51  ;;  %2775 = vmatpush.bf16.msrb.mxu2 %v9974_v50  ;;  %v13369_v47 = vld [vmem:[#allocation3 + $0x1e4] sm:$0xf] }
 0x1a3   :  { %v9957_v0 = vld [vmem:[#allocation3 + $0x260] sm:$0xf]  ;;  %v13387_v57 = vld [vmem:[#allocation3 + $0x26c] sm:$0xf0]  ;;  %v9830_v60 = vor.u32 %v13355_v56, %v9829_v55  ;;  %2788 = vmatpush.bf16.msrb.mxu3 %v10102_v36  ;;  %v9895_v49 = vld [vmem:[#allocation3 + $0x1f0] sm:$0xf0] }
 0x1a4   :  { %v10085_v18 = vld [vmem:[#allocation3 + $0x360] sm:$0xf]  ;;  %v13419_v58 = vld [vmem:[#allocation3 + $0x36c] sm:$0xf0]  ;;  %v9958_v61 = vor.u32 %v13387_v57, %v9957_v0  ;;  %2750 = vmatpush.bf16.msrb.mxu0 %v9702_v28  ;;  %v13401_v50 = vld [vmem:[#allocation3 + $0x2e4] sm:$0xf]  ;;  %v9770_v57 = vor.u32 %v13337_v45, %v9767_v46 }
 0x1a5   :  { %v9685_v62 = vld [vmem:[#allocation3 + $0x40] sm:$0xf]  ;;  %v13319_v63 = vld [vmem:[#allocation3 + $0x4c] sm:$0xf0]  ;;  %v10086_v3 = vor.u32 %v13419_v58, %v10085_v18  ;;  %2763 = vmatpush.bf16.msrb.mxu1 %v9830_v60  ;;  %v10023_v51 = vld [vmem:[#allocation3 + $0x2f0] sm:$0xf0]  ;;  %v9898_v18 = vor.u32 %v13369_v47, %v9895_v49 }
 0x1a6   :  { %v9813_v1 = vld [vmem:[#allocation3 + $0x140] sm:$0xf]  ;;  %v13351_v4 = vld [vmem:[#allocation3 + $0x14c] sm:$0xf0]  ;;  %v9686_v9 = vor.u32 %v13319_v63, %v9685_v62  ;;  %2776 = vmatpush.bf16.msrb.mxu2 %v9958_v61  ;;  %v13433_v36 = vld [vmem:[#allocation3 + $0x3e4] sm:$0xf]  ;;  %v10026_v58 = vor.u32 %v13401_v50, %v10023_v51 }
 0x1a7   :  { %v9941_v5 = vld [vmem:[#allocation3 + $0x240] sm:$0xf]  ;;  %v13383_v6 = vld [vmem:[#allocation3 + $0x24c] sm:$0xf0]  ;;  %v9814_v10 = vor.u32 %v13351_v4, %v9813_v1  ;;  %2789 = vmatpush.bf16.msrb.mxu3 %v10086_v3  ;;  %v10151_v56 = vld [vmem:[#allocation3 + $0x3f0] sm:$0xf0] }
 0x1a8   :  { %v10069_v7 = vld [vmem:[#allocation3 + $0x340] sm:$0xf]  ;;  %v13415_v8 = vld [vmem:[#allocation3 + $0x34c] sm:$0xf0]  ;;  %v9942_v12 = vor.u32 %v13383_v6, %v9941_v5  ;;  %2751 = vmatpush.bf16.msrb.mxu0 %v9686_v9  ;;  %v13333_v28 = vld [vmem:[#allocation3 + $0xc4] sm:$0xf]  ;;  %v10154_v62 = vor.u32 %v13433_v36, %v10151_v56 }
 0x1a9   :  { %v9669_v19 = vld [vmem:[#allocation3 + $0x20] sm:$0xf]  ;;  %v13315_v13 = vld [vmem:[#allocation3 + $0x2c] sm:$0xf0]  ;;  %v10070_v15 = vor.u32 %v13415_v8, %v10069_v7  ;;  %2764 = vmatpush.bf16.msrb.mxu1 %v9814_v10  ;;  %v9751_v60 = vld [vmem:[#allocation3 + $0xd0] sm:$0xf0] }
 0x1aa   :  { %v9797_v14 = vld [vmem:[#allocation3 + $0x120] sm:$0xf]  ;;  %v13347_v26 = vld [vmem:[#allocation3 + $0x12c] sm:$0xf0]  ;;  %v9670_v33 = vor.u32 %v13315_v13, %v9669_v19  ;;  %2777 = vmatpush.bf16.msrb.mxu2 %v9942_v12  ;;  %v13365_v61 = vld [vmem:[#allocation3 + $0x1c4] sm:$0xf]  ;;  %v9754_v6 = vor.u32 %v13333_v28, %v9751_v60 }
 0x1ab   :  { %v9925_v27 = vld [vmem:[#allocation3 + $0x220] sm:$0xf]  ;;  %v13379_v29 = vld [vmem:[#allocation3 + $0x22c] sm:$0xf0]  ;;  %v9798_v16 = vor.u32 %v13347_v26, %v9797_v14  ;;  %2790 = vmatpush.bf16.msrb.mxu3 %v10070_v15  ;;  %v9879_v63 = vld [vmem:[#allocation3 + $0x1d0] sm:$0xf0] }
 0x1ac   :  { %v10053_v30 = vld [vmem:[#allocation3 + $0x320] sm:$0xf]  ;;  %v13411_v31 = vld [vmem:[#allocation3 + $0x32c] sm:$0xf0]  ;;  %v9926_v35 = vor.u32 %v13379_v29, %v9925_v27  ;;  %2752 = vmatpush.bf16.msrb.mxu0 %v9670_v33  ;;  %v13397_v1 = vld [vmem:[#allocation3 + $0x2c4] sm:$0xf]  ;;  %v9882_v7 = vor.u32 %v13365_v61, %v9879_v63 }
 0x1ad   :  { %v9653_v17 = vld [vmem:[#allocation3] sm:$0xf]  ;;  %v13311_v34 = vld [vmem:[#allocation3 + $0xc] sm:$0xf0]  ;;  %v10054_v41 = vor.u32 %v13411_v31, %v10053_v30  ;;  %2765 = vmatpush.bf16.msrb.mxu1 %v9798_v16  ;;  %v10007_v3 = vld [vmem:[#allocation3 + $0x2d0] sm:$0xf0] }
 0x1ae   :  { %v9781_v38 = vld [vmem:[#allocation3 + $0x100] sm:$0xf]  ;;  %v13343_v39 = vld [vmem:[#allocation3 + $0x10c] sm:$0xf0]  ;;  %v9654_v48 = vor.u32 %v13311_v34, %v9653_v17  ;;  %2778 = vmatpush.bf16.msrb.mxu2 %v9926_v35  ;;  %v13429_v4 = vld [vmem:[#allocation3 + $0x3c4] sm:$0xf]  ;;  %v10010_v8 = vor.u32 %v13397_v1, %v10007_v3 }
 0x1af   :  { %v9909_v40 = vld [vmem:[#allocation3 + $0x200] sm:$0xf]  ;;  %v13375_v42 = vld [vmem:[#allocation3 + $0x20c] sm:$0xf0]  ;;  %v9782_v52 = vor.u32 %v13343_v39, %v9781_v38  ;;  %2791 = vmatpush.bf16.msrb.mxu3 %v10054_v41  ;;  %v10135_v5 = vld [vmem:[#allocation3 + $0x3d0] sm:$0xf0] }
 0x1b0   :  { %v10037_v43 = vld [vmem:[#allocation3 + $0x300] sm:$0xf]  ;;  %v13407_v44 = vld [vmem:[#allocation3 + $0x30c] sm:$0xf0]  ;;  %v9910_v55 = vor.u32 %v13375_v42, %v9909_v40  ;;  %2753 = vmatpush.bf16.msrb.mxu0 %v9654_v48  ;;  %v13329_v9 = vld [vmem:[#allocation3 + $0xa4] sm:$0xf]  ;;  %v10138_v19 = vor.u32 %v13429_v4, %v10135_v5 }
 0x1b1   :  { %v10038_v0 = vor.u32 %v13407_v44, %v10037_v43  ;;  %2766 = vmatpush.bf16.msrb.mxu1 %v9782_v52  ;;  %v9735_v10 = vld [vmem:[#allocation3 + $0xb0] sm:$0xf0]  ;;  %v13361_v12 = vld [vmem:[#allocation3 + $0x1a4] sm:$0xf] }
 0x1b2   :  { %2779 = vmatpush.bf16.msrb.mxu2 %v9910_v55  ;;  %v9863_v13 = vld [vmem:[#allocation3 + $0x1b0] sm:$0xf0]  ;;  %v13393_v14 = vld [vmem:[#allocation3 + $0x2a4] sm:$0xf]  ;;  %v9738_v29 = vor.u32 %v13329_v9, %v9735_v10 }
 0x1b3   :  { %2792 = vmatpush.bf16.msrb.mxu3 %v10038_v0  ;;  %v9991_v15 = vld [vmem:[#allocation3 + $0x2b0] sm:$0xf0]  ;;  %v13425_v26 = vld [vmem:[#allocation3 + $0x3a4] sm:$0xf]  ;;  %2754 = vmatmul.bf16.vlgmr.msrb.gmra.mxu0 %v14705_v11  ;;  %v9866_v30 = vor.u32 %v13361_v12, %v9863_v13 }
 0x1b4   :  { %2798 = vmatpush.bf16.msra.mxu0 %v9770_v57  ;;  %v10119_v27 = vld [vmem:[#allocation3 + $0x3b0] sm:$0xf0]  ;;  %2767 = vmatmul.bf16.vlgmr.msrb.gmra.mxu1 %v14717_v59  ;;  %v9994_v31 = vor.u32 %v13393_v14, %v9991_v15  ;;  %v13325_v33 = vld [vmem:[#allocation3 + $0x84] sm:$0xf] }
 0x1b5   :  { %2811 = vmatpush.bf16.msra.mxu1 %v9898_v18  ;;  %2780 = vmatmul.bf16.vlgmr.msrb.gmra.mxu2 %v14723_v32  ;;  %v9719_v17 = vld [vmem:[#allocation3 + $0x90] sm:$0xf0]  ;;  %v13357_v34 = vld [vmem:[#allocation3 + $0x184] sm:$0xf]  ;;  %v10122_v16 = vor.u32 %v13425_v26, %v10119_v27 }
 0x1b6   :  { %2824 = vmatpush.bf16.msra.mxu2 %v10026_v58  ;;  %2793 = vmatmul.bf16.vlgmr.msrb.gmra.mxu3 %v14730_v54  ;;  %v9847_v35 = vld [vmem:[#allocation3 + $0x190] sm:$0xf0]  ;;  %v13389_v38 = vld [vmem:[#allocation3 + $0x284] sm:$0xf]  ;;  %v9722_v42 = vor.u32 %v13325_v33, %v9719_v17 }
 0x1b7   :  { %2837 = vmatpush.bf16.msra.mxu3 %v10154_v62  ;;  %v9975_v39 = vld [vmem:[#allocation3 + $0x290] sm:$0xf0]  ;;  %v13421_v40 = vld [vmem:[#allocation3 + $0x384] sm:$0xf]  ;;  %v9850_v43 = vor.u32 %v13357_v34, %v9847_v35 }
 0x1b8   :  { %2799 = vmatpush.bf16.msra.mxu0 %v9754_v6  ;;  %v10103_v41 = vld [vmem:[#allocation3 + $0x390] sm:$0xf0]  ;;  %v9978_v44 = vor.u32 %v13389_v38, %v9975_v39  ;;  %v13321_v45 = vld [vmem:[#allocation3 + $0x64] sm:$0xf]  ;;  %v9773_v39 = vld [vmem:[#allocation3 + $0xe8] sm:$0xf] }
 0x1b9   :  { %2812 = vmatpush.bf16.msra.mxu1 %v9882_v7  ;;  %v9703_v46 = vld [vmem:[#allocation3 + $0x70] sm:$0xf0]  ;;  %v13353_v47 = vld [vmem:[#allocation3 + $0x164] sm:$0xf]  ;;  %v10106_v48 = vor.u32 %v13421_v40, %v10103_v41  ;;  %v13340_v40 = vld [vmem:[#allocation3 + $0xf4] sm:$0xf0] }
 0x1ba   :  { %2825 = vmatpush.bf16.msra.mxu2 %v10010_v8  ;;  %v9831_v49 = vld [vmem:[#allocation3 + $0x170] sm:$0xf0]  ;;  %v13385_v50 = vld [vmem:[#allocation3 + $0x264] sm:$0xf]  ;;  %v9706_v36 = vor.u32 %v13321_v45, %v9703_v46  ;;  %v9901_v41 = vld [vmem:[#allocation3 + $0x1e8] sm:$0xf] }
 0x1bb   :  { %2838 = vmatpush.bf16.msra.mxu3 %v10138_v19  ;;  %v9959_v51 = vld [vmem:[#allocation3 + $0x270] sm:$0xf0]  ;;  %v13417_v52 = vld [vmem:[#allocation3 + $0x364] sm:$0xf]  ;;  %v9834_v56 = vor.u32 %v13353_v47, %v9831_v49  ;;  %v13404_v45 = vld [vmem:[#allocation3 + $0x2f4] sm:$0xf0] }
 0x1bc   :  { %2800 = vmatpush.bf16.msra.mxu0 %v9738_v29  ;;  %v10087_v55 = vld [vmem:[#allocation3 + $0x370] sm:$0xf0]  ;;  %v9962_v0 = vor.u32 %v13385_v50, %v9959_v51  ;;  %v13317_v57 = vld [vmem:[#allocation3 + $0x44] sm:$0xf]  ;;  %v13436_v49 = vld [vmem:[#allocation3 + $0x3f4] sm:$0xf0]  ;;  %v9774_v51 = vor.u32 %v13340_v40, %v9773_v39 }
 0x1bd   :  { %2813 = vmatpush.bf16.msra.mxu1 %v9866_v30  ;;  %v9687_v18 = vld [vmem:[#allocation3 + $0x50] sm:$0xf0]  ;;  %v13349_v58 = vld [vmem:[#allocation3 + $0x144] sm:$0xf]  ;;  %v10090_v28 = vor.u32 %v13417_v52, %v10087_v55  ;;  %v9709_v39 = vld [vmem:[#allocation3 + $0x68] sm:$0xf] }
 0x1be   :  { %2826 = vmatpush.bf16.msra.mxu2 %v9994_v31  ;;  %v9815_v60 = vld [vmem:[#allocation3 + $0x150] sm:$0xf0]  ;;  %v13381_v61 = vld [vmem:[#allocation3 + $0x244] sm:$0xf]  ;;  %v9690_v3 = vor.u32 %v13317_v57, %v9687_v18  ;;  %v13368_v18 = vld [vmem:[#allocation3 + $0x1d4] sm:$0xf0] }
 0x1bf   :  { %2839 = vmatpush.bf16.msra.mxu3 %v10122_v16  ;;  %v9943_v62 = vld [vmem:[#allocation3 + $0x250] sm:$0xf0]  ;;  %v13413_v63 = vld [vmem:[#allocation3 + $0x344] sm:$0xf]  ;;  %v9818_v4 = vor.u32 %v13349_v58, %v9815_v60  ;;  %v10013_v58 = vld [vmem:[#allocation3 + $0x2c8] sm:$0xf] }
 0x1c0   :  { %2801 = vmatpush.bf16.msra.mxu0 %v9722_v42  ;;  %v10071_v1 = vld [vmem:[#allocation3 + $0x350] sm:$0xf0]  ;;  %v9946_v5 = vor.u32 %v13381_v61, %v9943_v62  ;;  %v13313_v6 = vld [vmem:[#allocation3 + $0x24] sm:$0xf]  ;;  %v10141_v60 = vld [vmem:[#allocation3 + $0x3c8] sm:$0xf] }
 0x1c1   :  { %2814 = vmatpush.bf16.msra.mxu1 %v9850_v43  ;;  %v9671_v7 = vld [vmem:[#allocation3 + $0x30] sm:$0xf0]  ;;  %v13345_v8 = vld [vmem:[#allocation3 + $0x124] sm:$0xf]  ;;  %v10074_v9 = vor.u32 %v13413_v63, %v10071_v1  ;;  %v13372_v43 = vld [vmem:[#allocation3 + $0x1f4] sm:$0xf0] }
 0x1c2   :  { %2827 = vmatpush.bf16.msra.mxu2 %v9978_v44  ;;  %v9799_v10 = vld [vmem:[#allocation3 + $0x130] sm:$0xf0]  ;;  %v13377_v12 = vld [vmem:[#allocation3 + $0x224] sm:$0xf]  ;;  %v9674_v15 = vor.u32 %v13313_v6, %v9671_v7  ;;  %v10029_v44 = vld [vmem:[#allocation3 + $0x2e8] sm:$0xf]  ;;  %v9902_v52 = vor.u32 %v13372_v43, %v9901_v41 }
 0x1c3   :  { %2840 = vmatpush.bf16.msra.mxu3 %v10106_v48  ;;  %v9927_v19 = vld [vmem:[#allocation3 + $0x230] sm:$0xf0]  ;;  %v13409_v13 = vld [vmem:[#allocation3 + $0x324] sm:$0xf]  ;;  %v9802_v29 = vor.u32 %v13345_v8, %v9799_v10  ;;  %v10157_v48 = vld [vmem:[#allocation3 + $0x3e8] sm:$0xf]  ;;  %v10030_v55 = vor.u32 %v13404_v45, %v10029_v44 }
 0x1c4   :  { %2802 = vmatpush.bf16.msra.mxu0 %v9706_v36  ;;  %v10055_v14 = vld [vmem:[#allocation3 + $0x330] sm:$0xf0]  ;;  %v13309_v26 = vld [vmem:[#allocation3 + $0x4] sm:$0xf]  ;;  %v9930_v30 = vor.u32 %v13377_v12, %v9927_v19  ;;  %v9757_v36 = vld [vmem:[#allocation3 + $0xc8] sm:$0xf]  ;;  %v10158_v57 = vor.u32 %v13436_v49, %v10157_v48 }
 0x1c5   :  { %2815 = vmatpush.bf16.msra.mxu1 %v9834_v56  ;;  %v9655_v27 = vld [vmem:[#allocation3 + $0x10] sm:$0xf0]  ;;  %v13341_v31 = vld [vmem:[#allocation3 + $0x104] sm:$0xf]  ;;  %v10058_v34 = vor.u32 %v13409_v13, %v10055_v14  ;;  %v13336_v56 = vld [vmem:[#allocation3 + $0xd4] sm:$0xf0] }
 0x1c6   :  { %2828 = vmatpush.bf16.msra.mxu2 %v9962_v0  ;;  %v9783_v33 = vld [vmem:[#allocation3 + $0x110] sm:$0xf0]  ;;  %v13373_v17 = vld [vmem:[#allocation3 + $0x204] sm:$0xf]  ;;  %v9658_v42 = vor.u32 %v13309_v26, %v9655_v27  ;;  %v9885_v0 = vld [vmem:[#allocation3 + $0x1c8] sm:$0xf]  ;;  %v9758_v62 = vor.u32 %v13336_v56, %v9757_v36 }
 0x1c7   :  { %2841 = vmatpush.bf16.msra.mxu3 %v10090_v28  ;;  %v9911_v16 = vld [vmem:[#allocation3 + $0x210] sm:$0xf0]  ;;  %v13405_v35 = vld [vmem:[#allocation3 + $0x304] sm:$0xf]  ;;  %v9786_v46 = vor.u32 %v13341_v31, %v9783_v33  ;;  %v13400_v28 = vld [vmem:[#allocation3 + $0x2d4] sm:$0xf0]  ;;  %v9886_v63 = vor.u32 %v13368_v18, %v9885_v0 }
 0x1c8   :  { %2803 = vmatpush.bf16.msra.mxu0 %v9690_v3  ;;  %v10039_v38 = vld [vmem:[#allocation3 + $0x310] sm:$0xf0]  ;;  %v9914_v47 = vor.u32 %v13373_v17, %v9911_v16  ;;  %v13432_v61 = vld [vmem:[#allocation3 + $0x3d4] sm:$0xf0]  ;;  %v10014_v1 = vor.u32 %v13400_v28, %v10013_v58  ;;  %v9741_v3 = vld [vmem:[#allocation3 + $0xa8] sm:$0xf] }
 0x1c9   :  { %2816 = vmatpush.bf16.msra.mxu1 %v9818_v4  ;;  %v10042_v50 = vor.u32 %v13405_v35, %v10039_v38  ;;  %v13332_v4 = vld [vmem:[#allocation3 + $0xb4] sm:$0xf0]  ;;  %v10142_v6 = vor.u32 %v13432_v61, %v10141_v60  ;;  %v9997_v8 = vld [vmem:[#allocation3 + $0x2a8] sm:$0xf] }
 0x1ca   :  { %2829 = vmatpush.bf16.msra.mxu2 %v9946_v5  ;;  %v9869_v5 = vld [vmem:[#allocation3 + $0x1a8] sm:$0xf]  ;;  %v13364_v7 = vld [vmem:[#allocation3 + $0x1b4] sm:$0xf0]  ;;  %v9742_v19 = vor.u32 %v13332_v4, %v9741_v3 }
 0x1cb   :  { %2842 = vmatpush.bf16.msra.mxu3 %v10074_v9  ;;  %v13396_v9 = vld [vmem:[#allocation3 + $0x2b4] sm:$0xf0]  ;;  %v10125_v10 = vld [vmem:[#allocation3 + $0x3a8] sm:$0xf]  ;;  %v9870_v13 = vor.u32 %v13364_v7, %v9869_v5 }
 0x1cc   :  { %2804 = vmatpush.bf16.msra.mxu0 %v9674_v15  ;;  %v13428_v12 = vld [vmem:[#allocation3 + $0x3b4] sm:$0xf0]  ;;  %v9998_v14 = vor.u32 %v13396_v9, %v9997_v8  ;;  %v9725_v15 = vld [vmem:[#allocation3 + $0x88] sm:$0xf] }
 0x1cd   :  { %2817 = vmatpush.bf16.msra.mxu1 %v9802_v29  ;;  %v13328_v26 = vld [vmem:[#allocation3 + $0x94] sm:$0xf0]  ;;  %v9853_v27 = vld [vmem:[#allocation3 + $0x188] sm:$0xf]  ;;  %v10126_v29 = vor.u32 %v13428_v12, %v10125_v10 }
 0x1ce   :  { %2830 = vmatpush.bf16.msra.mxu2 %v9930_v30  ;;  %v13360_v30 = vld [vmem:[#allocation3 + $0x194] sm:$0xf0]  ;;  %v9981_v31 = vld [vmem:[#allocation3 + $0x288] sm:$0xf]  ;;  %v9726_v16 = vor.u32 %v13328_v26, %v9725_v15 }
 0x1cf   :  { %2843 = vmatpush.bf16.msra.mxu3 %v10058_v34  ;;  %v13392_v33 = vld [vmem:[#allocation3 + $0x294] sm:$0xf0]  ;;  %v10109_v17 = vld [vmem:[#allocation3 + $0x388] sm:$0xf]  ;;  %v9854_v35 = vor.u32 %v13360_v30, %v9853_v27 }
 0x1d0   :  { %2805 = vmatpush.bf16.msra.mxu0 %v9658_v42  ;;  %v13424_v34 = vld [vmem:[#allocation3 + $0x394] sm:$0xf0]  ;;  %v9982_v38 = vor.u32 %v13392_v33, %v9981_v31  ;;  %v9837_v41 = vld [vmem:[#allocation3 + $0x168] sm:$0xf]  ;;  %v13338_v33 = vld [vmem:[#allocation3 + $0xec] sm:$0xf] }
 0x1d1   :  { %2818 = vmatpush.bf16.msra.mxu1 %v9786_v46  ;;  %v13324_v40 = vld [vmem:[#allocation3 + $0x74] sm:$0xf0]  ;;  %v10110_v42 = vor.u32 %v13424_v34, %v10109_v17  ;;  %v9965_v44 = vld [vmem:[#allocation3 + $0x268] sm:$0xf]  ;;  %v9775_v17 = vld [vmem:[#allocation3 + $0xf8] sm:$0xf0] }
 0x1d2   :  { %2831 = vmatpush.bf16.msra.mxu2 %v9914_v47  ;;  %v13356_v43 = vld [vmem:[#allocation3 + $0x174] sm:$0xf0]  ;;  %v10093_v46 = vld [vmem:[#allocation3 + $0x368] sm:$0xf]  ;;  %v9710_v48 = vor.u32 %v13324_v40, %v9709_v39  ;;  %v13370_v34 = vld [vmem:[#allocation3 + $0x1ec] sm:$0xf] }
 0x1d3   :  { %2844 = vmatpush.bf16.msra.mxu3 %v10042_v50  ;;  %2806 = vmatmul.bf16.vlgmr.msra.gmra.mxu0 %v14705_v11  ;;  %v13388_v45 = vld [vmem:[#allocation3 + $0x274] sm:$0xf0]  ;;  %v9838_v49 = vor.u32 %v13356_v43, %v9837_v41  ;;  %v9949_v0 = vld [vmem:[#allocation3 + $0x248] sm:$0xf]  ;;  %v10031_v39 = vld [vmem:[#allocation3 + $0x2f8] sm:$0xf0] }
 0x1d4   :  { %2850 = vmatpush.bf16.msrb.mxu0 %v9774_v51  ;;  %2819 = vmatmul.bf16.vlgmr.msra.gmra.mxu1 %v14717_v59  ;;  %v13420_v47 = vld [vmem:[#allocation3 + $0x374] sm:$0xf0]  ;;  %v9966_v50 = vor.u32 %v13388_v45, %v9965_v44  ;;  %v9693_v51 = vld [vmem:[#allocation3 + $0x48] sm:$0xf]  ;;  %v10159_v43 = vld [vmem:[#allocation3 + $0x3f8] sm:$0xf0]  ;;  %v9778_v45 = vor.u32 %v13338_v33, %v9775_v17 }
 0x1d5   :  { %2863 = vmatpush.bf16.msrb.mxu1 %v9902_v52  ;;  %2832 = vmatmul.bf16.vlgmr.msra.gmra.mxu2 %v14723_v32  ;;  %v13320_v52 = vld [vmem:[#allocation3 + $0x54] sm:$0xf0]  ;;  %v10094_v36 = vor.u32 %v13420_v47, %v10093_v46  ;;  %v10077_v18 = vld [vmem:[#allocation3 + $0x348] sm:$0xf]  ;;  %v13322_v33 = vld [vmem:[#allocation3 + $0x6c] sm:$0xf] }
 0x1d6   :  { %2876 = vmatpush.bf16.msrb.mxu2 %v10030_v55  ;;  %2845 = vmatmul.bf16.vlgmr.msra.gmra.mxu3 %v14730_v54  ;;  %v9821_v55 = vld [vmem:[#allocation3 + $0x148] sm:$0xf]  ;;  %v13352_v56 = vld [vmem:[#allocation3 + $0x154] sm:$0xf0]  ;;  %v9694_v28 = vor.u32 %v13320_v52, %v9693_v51  ;;  %v9887_v52 = vld [vmem:[#allocation3 + $0x1d8] sm:$0xf0] }
 0x1d7   :  { %2889 = vmatpush.bf16.msrb.mxu3 %v10158_v57  ;;  %v13384_v57 = vld [vmem:[#allocation3 + $0x254] sm:$0xf0]  ;;  %v9822_v60 = vor.u32 %v13352_v56, %v9821_v55  ;;  %v9933_v5 = vld [vmem:[#allocation3 + $0x228] sm:$0xf]  ;;  %v13398_v55 = vld [vmem:[#allocation3 + $0x2cc] sm:$0xf] }
 0x1d8   :  { %2851 = vmatpush.bf16.msrb.mxu0 %v9758_v62  ;;  %v13416_v58 = vld [vmem:[#allocation3 + $0x354] sm:$0xf0]  ;;  %v9950_v61 = vor.u32 %v13384_v57, %v9949_v0  ;;  %v9677_v62 = vld [vmem:[#allocation3 + $0x28] sm:$0xf]  ;;  %v13430_v56 = vld [vmem:[#allocation3 + $0x3cc] sm:$0xf] }
 0x1d9   :  { %2864 = vmatpush.bf16.msrb.mxu1 %v9886_v63  ;;  %v13316_v63 = vld [vmem:[#allocation3 + $0x34] sm:$0xf0]  ;;  %v10078_v3 = vor.u32 %v13416_v58, %v10077_v18  ;;  %v10061_v7 = vld [vmem:[#allocation3 + $0x328] sm:$0xf]  ;;  %v10143_v0 = vld [vmem:[#allocation3 + $0x3d8] sm:$0xf0] }
 0x1da   :  { %2877 = vmatpush.bf16.msrb.mxu2 %v10014_v1  ;;  %v9805_v1 = vld [vmem:[#allocation3 + $0x128] sm:$0xf]  ;;  %v13348_v4 = vld [vmem:[#allocation3 + $0x134] sm:$0xf0]  ;;  %v9678_v9 = vor.u32 %v13316_v63, %v9677_v62  ;;  %v10146_v62 = vor.u32 %v13430_v56, %v10143_v0  ;;  %v9871_v63 = vld [vmem:[#allocation3 + $0x1b8] sm:$0xf0] }
 0x1db   :  { %2890 = vmatpush.bf16.msrb.mxu3 %v10142_v6  ;;  %v13380_v6 = vld [vmem:[#allocation3 + $0x234] sm:$0xf0]  ;;  %v9661_v10 = vld [vmem:[#allocation3 + $0x8] sm:$0xf]  ;;  %v9711_v17 = vld [vmem:[#allocation3 + $0x78] sm:$0xf0] }
 0x1dc   :  { %2852 = vmatpush.bf16.msrb.mxu0 %v9742_v19  ;;  %v13412_v8 = vld [vmem:[#allocation3 + $0x334] sm:$0xf0]  ;;  %v9806_v19 = vor.u32 %v13348_v4, %v9805_v1  ;;  %v9917_v26 = vld [vmem:[#allocation3 + $0x208] sm:$0xf]  ;;  %v13394_v1 = vld [vmem:[#allocation3 + $0x2ac] sm:$0xf] }
 0x1dd   :  { %2865 = vmatpush.bf16.msrb.mxu1 %v9870_v13  ;;  %v13312_v12 = vld [vmem:[#allocation3 + $0x14] sm:$0xf0]  ;;  %v9934_v13 = vor.u32 %v13380_v6, %v9933_v5  ;;  %v10062_v27 = vor.u32 %v13412_v8, %v10061_v7  ;;  %v10045_v30 = vld [vmem:[#allocation3 + $0x308] sm:$0xf]  ;;  %v13426_v4 = vld [vmem:[#allocation3 + $0x3ac] sm:$0xf] }
 0x1de   :  { %2878 = vmatpush.bf16.msrb.mxu2 %v9998_v14  ;;  %v9789_v14 = vld [vmem:[#allocation3 + $0x108] sm:$0xf]  ;;  %v13344_v15 = vld [vmem:[#allocation3 + $0x114] sm:$0xf0]  ;;  %v10127_v5 = vld [vmem:[#allocation3 + $0x3b8] sm:$0xf0] }
 0x1df   :  { %2891 = vmatpush.bf16.msrb.mxu3 %v10126_v29  ;;  %v13376_v29 = vld [vmem:[#allocation3 + $0x214] sm:$0xf0]  ;;  %v9790_v40 = vor.u32 %v13344_v15, %v9789_v14  ;;  %v13390_v14 = vld [vmem:[#allocation3 + $0x28c] sm:$0xf]  ;;  %v9983_v15 = vld [vmem:[#allocation3 + $0x298] sm:$0xf0] }
 0x1e0   :  { %2853 = vmatpush.bf16.msrb.mxu0 %v9726_v16  ;;  %v13408_v31 = vld [vmem:[#allocation3 + $0x314] sm:$0xf0]  ;;  %v9662_v16 = vor.u32 %v13312_v12, %v9661_v10  ;;  %v9918_v41 = vor.u32 %v13376_v29, %v9917_v26  ;;  %v9727_v10 = vld [vmem:[#allocation3 + $0x98] sm:$0xf0]  ;;  %v13358_v12 = vld [vmem:[#allocation3 + $0x18c] sm:$0xf] }
 0x1e1   :  { %2866 = vmatpush.bf16.msrb.mxu1 %v9854_v35  ;;  %v9903_v35 = vld [vmem:[#allocation3 + $0x1f8] sm:$0xf0]  ;;  %v10046_v44 = vor.u32 %v13408_v31, %v10045_v30  ;;  %v13422_v26 = vld [vmem:[#allocation3 + $0x38c] sm:$0xf]  ;;  %v9986_v31 = vor.u32 %v13390_v14, %v9983_v15 }
 0x1e2   :  { %2879 = vmatpush.bf16.msrb.mxu2 %v9982_v38  ;;  %v13402_v38 = vld [vmem:[#allocation3 + $0x2ec] sm:$0xf]  ;;  %v9906_v46 = vor.u32 %v13370_v34, %v9903_v35  ;;  %v9839_v35 = vld [vmem:[#allocation3 + $0x178] sm:$0xf0] }
 0x1e3   :  { %2892 = vmatpush.bf16.msrb.mxu3 %v10110_v42  ;;  %v13434_v42 = vld [vmem:[#allocation3 + $0x3ec] sm:$0xf]  ;;  %v10034_v47 = vor.u32 %v13402_v38, %v10031_v39  ;;  %v9967_v39 = vld [vmem:[#allocation3 + $0x278] sm:$0xf0] }
 0x1e4   :  { %2854 = vmatpush.bf16.msrb.mxu0 %v9710_v48  ;;  %v13334_v48 = vld [vmem:[#allocation3 + $0xcc] sm:$0xf]  ;;  %v10162_v51 = vor.u32 %v13434_v42, %v10159_v43  ;;  %v9714_v42 = vor.u32 %v13322_v33, %v9711_v17  ;;  %v10047_v14 = vld [vmem:[#allocation3 + $0x318] sm:$0xf0] }
 0x1e5   :  { %2867 = vmatpush.bf16.msrb.mxu1 %v9838_v49  ;;  %v9759_v49 = vld [vmem:[#allocation3 + $0xd8] sm:$0xf0]  ;;  %v13354_v34 = vld [vmem:[#allocation3 + $0x16c] sm:$0xf] }
 0x1e6   :  { %2880 = vmatpush.bf16.msrb.mxu2 %v9966_v50  ;;  %v13366_v50 = vld [vmem:[#allocation3 + $0x1cc] sm:$0xf]  ;;  %v9762_v57 = vor.u32 %v13334_v48, %v9759_v49  ;;  %v9842_v43 = vor.u32 %v13354_v34, %v9839_v35  ;;  %v9823_v49 = vld [vmem:[#allocation3 + $0x158] sm:$0xf0] }
 0x1e7   :  { %2893 = vmatpush.bf16.msrb.mxu3 %v10094_v36  ;;  %v10015_v36 = vld [vmem:[#allocation3 + $0x2d8] sm:$0xf0]  ;;  %v9890_v18 = vor.u32 %v13366_v50, %v9887_v52  ;;  %v13386_v38 = vld [vmem:[#allocation3 + $0x26c] sm:$0xf] }
 0x1e8   :  { %2855 = vmatpush.bf16.msrb.mxu0 %v9694_v28  ;;  %v10018_v58 = vor.u32 %v13398_v55, %v10015_v36  ;;  %v13330_v28 = vld [vmem:[#allocation3 + $0xac] sm:$0xf]  ;;  %v10079_v55 = vld [vmem:[#allocation3 + $0x358] sm:$0xf0] }
 0x1e9   :  { %2868 = vmatpush.bf16.msrb.mxu1 %v9822_v60  ;;  %v9743_v60 = vld [vmem:[#allocation3 + $0xb8] sm:$0xf0]  ;;  %v13382_v50 = vld [vmem:[#allocation3 + $0x24c] sm:$0xf] }
 0x1ea   :  { %2881 = vmatpush.bf16.msrb.mxu2 %v9950_v61  ;;  %v13362_v61 = vld [vmem:[#allocation3 + $0x1ac] sm:$0xf]  ;;  %v9746_v6 = vor.u32 %v13330_v28, %v9743_v60  ;;  %v9807_v60 = vld [vmem:[#allocation3 + $0x138] sm:$0xf0] }
 0x1eb   :  { %2894 = vmatpush.bf16.msrb.mxu3 %v10078_v3  ;;  %v9999_v3 = vld [vmem:[#allocation3 + $0x2b8] sm:$0xf0]  ;;  %v9874_v7 = vor.u32 %v13362_v61, %v9871_v63  ;;  %v13414_v52 = vld [vmem:[#allocation3 + $0x34c] sm:$0xf] }
 0x1ec   :  { %2856 = vmatpush.bf16.msrb.mxu0 %v9678_v9  ;;  %v10002_v8 = vor.u32 %v13394_v1, %v9999_v3  ;;  %v13326_v9 = vld [vmem:[#allocation3 + $0x8c] sm:$0xf]  ;;  %v10082_v28 = vor.u32 %v13414_v52, %v10079_v55  ;;  %v10063_v1 = vld [vmem:[#allocation3 + $0x338] sm:$0xf0] }
 0x1ed   :  { %2869 = vmatpush.bf16.msrb.mxu1 %v9806_v19  ;;  %v10130_v19 = vor.u32 %v13426_v4, %v10127_v5  ;;  %v9730_v29 = vor.u32 %v13326_v9, %v9727_v10  ;;  %v13378_v61 = vld [vmem:[#allocation3 + $0x22c] sm:$0xf]  ;;  %v9791_v10 = vld [vmem:[#allocation3 + $0x118] sm:$0xf0] }
 0x1ee   :  { %2882 = vmatpush.bf16.msrb.mxu2 %v9934_v13  ;;  %v9855_v13 = vld [vmem:[#allocation3 + $0x198] sm:$0xf0]  ;;  %v13410_v63 = vld [vmem:[#allocation3 + $0x32c] sm:$0xf] }
 0x1ef   :  { %2895 = vmatpush.bf16.msrb.mxu3 %v10062_v27  ;;  %v10111_v27 = vld [vmem:[#allocation3 + $0x398] sm:$0xf0]  ;;  %v9858_v30 = vor.u32 %v13358_v12, %v9855_v13  ;;  %v10066_v9 = vor.u32 %v13410_v63, %v10063_v1  ;;  %v13374_v12 = vld [vmem:[#allocation3 + $0x20c] sm:$0xf] }
 0x1f0   :  { %2857 = vmatpush.bf16.msrb.mxu0 %v9662_v16  ;;  %v10114_v16 = vor.u32 %v13422_v26, %v10111_v27  ;;  %v13406_v13 = vld [vmem:[#allocation3 + $0x30c] sm:$0xf] }
 0x1f1   :  { %2870 = vmatpush.bf16.msrb.mxu1 %v9790_v40  ;;  %v13418_v40 = vld [vmem:[#allocation3 + $0x36c] sm:$0xf] }
 0x1f2   :  { %2883 = vmatpush.bf16.msrb.mxu2 %v9918_v41  ;;  %v10095_v41 = vld [vmem:[#allocation3 + $0x378] sm:$0xf0] }
 0x1f3   :  { %2896 = vmatpush.bf16.msrb.mxu3 %v10046_v44  ;;  %2858 = vmatmul.bf16.vlgmr.msrb.gmra.mxu0 %v14705_v11  ;;  %v9970_v44 = vor.u32 %v13386_v38, %v9967_v39  ;;  %v10098_v48 = vor.u32 %v13418_v40, %v10095_v41 }
 0x1f4   :  { %2902 = vmatpush.bf16.msra.mxu0 %v9778_v45  ;;  %2871 = vmatmul.bf16.vlgmr.msrb.gmra.mxu1 %v14717_v59  ;;  %v13318_v45 = vld [vmem:[#allocation3 + $0x4c] sm:$0xf] }
 0x1f5   :  { %2915 = vmatpush.bf16.msra.mxu1 %v9906_v46  ;;  %2884 = vmatmul.bf16.vlgmr.msrb.gmra.mxu2 %v14723_v32  ;;  %v9695_v46 = vld [vmem:[#allocation3 + $0x58] sm:$0xf0] }
 0x1f6   :  { %2928 = vmatpush.bf16.msra.mxu2 %v10034_v47  ;;  %2897 = vmatmul.bf16.vlgmr.msrb.gmra.mxu3 %v14730_v54  ;;  %v13350_v47 = vld [vmem:[#allocation3 + $0x14c] sm:$0xf]  ;;  %v9698_v36 = vor.u32 %v13318_v45, %v9695_v46 }
 0x1f7   :  { %2941 = vmatpush.bf16.msra.mxu3 %v10162_v51  ;;  %v9951_v51 = vld [vmem:[#allocation3 + $0x258] sm:$0xf0]  ;;  %v9826_v56 = vor.u32 %v13350_v47, %v9823_v49 }
 0x1f8   :  { %2903 = vmatpush.bf16.msra.mxu0 %v9762_v57  ;;  %v9954_v0 = vor.u32 %v13382_v50, %v9951_v51  ;;  %v13314_v57 = vld [vmem:[#allocation3 + $0x2c] sm:$0xf] }
 0x1f9   :  { %2916 = vmatpush.bf16.msra.mxu1 %v9890_v18  ;;  %v9679_v18 = vld [vmem:[#allocation3 + $0x38] sm:$0xf0] }
 0x1fa   :  { %2929 = vmatpush.bf16.msra.mxu2 %v10018_v58  ;;  %v13346_v58 = vld [vmem:[#allocation3 + $0x12c] sm:$0xf]  ;;  %v9682_v3 = vor.u32 %v13314_v57, %v9679_v18  ;;  %v2104_v57 = vperm.slane %v14646_v22, 1 }
 0x1fb   :  { %2942 = vmatpush.bf16.msra.mxu3 %v10146_v62  ;;  %v9935_v62 = vld [vmem:[#allocation3 + $0x238] sm:$0xf0]  ;;  %v9810_v4 = vor.u32 %v13346_v58, %v9807_v60 }
 0x1fc   :  { %2904 = vmatpush.bf16.msra.mxu0 %v9746_v6  ;;  %v9938_v5 = vor.u32 %v13378_v61, %v9935_v62  ;;  %v13310_v6 = vld [vmem:[#allocation3 + $0xc] sm:$0xf] }
 0x1fd   :  { %2917 = vmatpush.bf16.msra.mxu1 %v9874_v7  ;;  %v9663_v7 = vld [vmem:[#allocation3 + $0x18] sm:$0xf0] }
 0x1fe   :  { %2930 = vmatpush.bf16.msra.mxu2 %v10002_v8  ;;  %v13342_v8 = vld [vmem:[#allocation3 + $0x10c] sm:$0xf]  ;;  %v9666_v15 = vor.u32 %v13310_v6, %v9663_v7 }
 0x1ff   :  { %2943 = vmatpush.bf16.msra.mxu3 %v10130_v19  ;;  %v9919_v19 = vld [vmem:[#allocation3 + $0x218] sm:$0xf0]  ;;  %v9794_v26 = vor.u32 %v13342_v8, %v9791_v10 }
 0x200   :  { %2905 = vmatpush.bf16.msra.mxu0 %v9730_v29  ;;  %v9922_v27 = vor.u32 %v13374_v12, %v9919_v19  ;;  %v10050_v29 = vor.u32 %v13406_v13, %v10047_v14 }
 0x201   :  { %2918 = vmatpush.bf16.msra.mxu1 %v9858_v30  ;;  %v2102_v30 = vperm.slane %v14642_v20, 1 }
 0x202   :  { %2931 = vmatpush.bf16.msra.mxu2 %v9986_v31 }
 0x203   :  { %2944 = vmatpush.bf16.msra.mxu3 %v10114_v16 }
 0x204   :  { %2906 = vmatpush.bf16.msra.mxu0 %v9714_v42 }
 0x205   :  { %2919 = vmatpush.bf16.msra.mxu1 %v9842_v43 }
 0x206   :  { %2932 = vmatpush.bf16.msra.mxu2 %v9970_v44 }
 0x207   :  { %2945 = vmatpush.bf16.msra.mxu3 %v10098_v48 }
 0x208   :  { %2907 = vmatpush.bf16.msra.mxu0 %v9698_v36 }
 0x209   :  { %2920 = vmatpush.bf16.msra.mxu1 %v9826_v56 }
 0x20a   :  { %2933 = vmatpush.bf16.msra.mxu2 %v9954_v0 }
 0x20b   :  { %2946 = vmatpush.bf16.msra.mxu3 %v10082_v28 }
 0x20c   :  { %2908 = vmatpush.bf16.msra.mxu0 %v9682_v3 }
 0x20d   :  { %2921 = vmatpush.bf16.msra.mxu1 %v9810_v4 }
 0x20e   :  { %2934 = vmatpush.bf16.msra.mxu2 %v9938_v5 }
 0x20f   :  { %2947 = vmatpush.bf16.msra.mxu3 %v10066_v9  ;;  %v2105_v9 = vperm.slane %v14648_v23, 1 }
 0x210   :  { %2909 = vmatpush.bf16.msra.mxu0 %v9666_v15 }
 0x211   :  { %2922 = vmatpush.bf16.msra.mxu1 %v9794_v26 }
 0x212   :  { %2935 = vmatpush.bf16.msra.mxu2 %v9922_v27 }
 0x213   :  { %2948 = vmatpush.bf16.msra.mxu3 %v10050_v29  ;;  %2910 = vmatmul.bf16.vlgmr.msra.gmra.mxu0 %v14705_v11 }
 0x214   :  { %2923 = vmatmul.bf16.vlgmr.msra.gmra.mxu1 %v14717_v59 }
 0x215   :  { %2936 = vmatmul.bf16.vlgmr.msra.gmra.mxu2 %v14723_v32  ;;  %v2103_v32 = vperm.slane %v14644_v21, 1 }
 0x216   :  { %2949 = vmatmul.bf16.vlgmr.msra.gmra.mxu3 %v14730_v54 }
 0x230   :  { %v2755_v31 = vpop.f32.mrf.mxu0 }
 0x231   :  { %v2756_v33 = vadd.f32 %v2755_v31, %v2102_v30  ;;  %v2768_v17 = vpop.f32.mrf.mxu1 }
 0x233   :  { %v2769_v34 = vadd.f32 %v2768_v17, %v2756_v33 }
 0x238   :  { %v2781_v16 = vpop.f32.mrf.mxu2  ;;  %v2757_v40 = vpop.f32.mrf.mxu0 }
 0x239   :  { %v2782_v35 = vadd.f32 %v2781_v16, %v2769_v34  ;;  %v2794_v38 = vpop.f32.mrf.mxu3  ;;  %v2770_v41 = vpop.f32.mrf.mxu1 }
 0x23b   :  { %v2795_v39 = vadd.f32 %v2794_v38, %v2782_v35 }
 0x23d   :  { %v2954_v42 = vmax.f32 %v2795_v39, 0.0 }
 0x23f   :  { %v14749_v11 = vpack.c.bf16 %v2954_v42, %v2954_v42 }
 0x240   :  { %v2783_v59 = vpop.f32.mrf.mxu2 }
 0x241   :  { %v2796_v43 = vpop.f32.mrf.mxu3 }
 0x250   :  { %v2807_v54 = vpop.f32.mrf.mxu0 }
 0x251   :  { %v2808_v44 = vadd.f32 %v2807_v54, %v2103_v32  ;;  %v2820_v45 = vpop.f32.mrf.mxu1 }
 0x253   :  { %v2821_v46 = vadd.f32 %v2820_v45, %v2808_v44 }
 0x258   :  { %v2833_v47 = vpop.f32.mrf.mxu2  ;;  %v2809_v51 = vpop.f32.mrf.mxu0 }
 0x259   :  { %v2834_v48 = vadd.f32 %v2833_v47, %v2821_v46  ;;  %v2846_v49 = vpop.f32.mrf.mxu3  ;;  %v2822_v52 = vpop.f32.mrf.mxu1 }
 0x25b   :  { %v2847_v50 = vadd.f32 %v2846_v49, %v2834_v48 }
 0x25d   :  { %v2955_v55 = vmax.f32 %v2847_v50, 0.0 }
 0x25f   :  { %v14752_v36 = vpack.c.bf16 %v2955_v55, %v2955_v55 }
 0x260   :  { %v2835_v56 = vpop.f32.mrf.mxu2 }
 0x261   :  { %v2848_v0 = vpop.f32.mrf.mxu3 }
 0x270   :  { %v2859_v18 = vpop.f32.mrf.mxu0 }
 0x271   :  { %v2860_v58 = vadd.f32 %v2859_v18, %v2104_v57  ;;  %v2872_v28 = vpop.f32.mrf.mxu1 }
 0x273   :  { %v2873_v60 = vadd.f32 %v2872_v28, %v2860_v58 }
 0x278   :  { %v2885_v61 = vpop.f32.mrf.mxu2  ;;  %v2861_v3 = vpop.f32.mrf.mxu0 }
 0x279   :  { %v2886_v62 = vadd.f32 %v2885_v61, %v2873_v60  ;;  %v2898_v63 = vpop.f32.mrf.mxu3  ;;  %v2874_v4 = vpop.f32.mrf.mxu1 }
 0x27b   :  { %v2899_v1 = vadd.f32 %v2898_v63, %v2886_v62 }
 0x27d   :  { %v2956_v5 = vmax.f32 %v2899_v1, 0.0 }
 0x27f   :  { %v14755_v6 = vpack.c.bf16 %v2956_v5, %v2956_v5 }
 0x280   :  { %v2887_v7 = vpop.f32.mrf.mxu2 }
 0x281   :  { %v2900_v8 = vpop.f32.mrf.mxu3 }
 0x290   :  { %v2911_v10 = vpop.f32.mrf.mxu0 }
 0x291   :  { %v2912_v12 = vadd.f32 %v2911_v10, %v2105_v9  ;;  %v2924_v19 = vpop.f32.mrf.mxu1 }
 0x293   :  { %v2925_v13 = vadd.f32 %v2924_v19, %v2912_v12 }
 0x298   :  { %v2937_v14 = vpop.f32.mrf.mxu2  ;;  %v2913_v27 = vpop.f32.mrf.mxu0 }
 0x299   :  { %v2938_v15 = vadd.f32 %v2937_v14, %v2925_v13  ;;  %v2950_v26 = vpop.f32.mrf.mxu3  ;;  %v2926_v29 = vpop.f32.mrf.mxu1 }
 0x29b   :  { %v2951_v30 = vadd.f32 %v2950_v26, %v2938_v15 }
 0x29d   :  { %v2957_v31 = vmax.f32 %v2951_v30, 0.0 }
 0x29f   :  { %v14758_v33 = vpack.c.bf16 %v2957_v31, %v2957_v31 }
 0x2a0   :  { %v2939_v17 = vpop.f32.mrf.mxu2 }
 0x2a1   :  { %v2952_v34 = vpop.f32.mrf.mxu3 }
 0x2a2   :  { %14448 = dma.done.wait [#allocation12 + $0x2], 16384 }
 0x2a3   :  { %14449 = vsyncadd [#allocation12 + $0x2], 4294950912  ;;  %v10277_v16 = vld [vmem:[#allocation4 + $0xe0] sm:$0xf]  ;;  %v13467_v35 = vld [vmem:[#allocation4 + $0xec] sm:$0xf0] }
 0x2a4   :  { %v10405_v38 = vld [vmem:[#allocation4 + $0x1e0] sm:$0xf]  ;;  %v10278_v39 = vor.u32 %v13467_v35, %v10277_v16  ;;  %v13499_v40 = vld [vmem:[#allocation4 + $0x1ec] sm:$0xf0] }
 0x2a5   :  { %v10533_v41 = vld [vmem:[#allocation4 + $0x2e0] sm:$0xf]  ;;  %v13531_v42 = vld [vmem:[#allocation4 + $0x2ec] sm:$0xf0]  ;;  %v10406_v59 = vor.u32 %v13499_v40, %v10405_v38 }
 0x2a6   :  { %v10534_v43 = vor.u32 %v13531_v42, %v10533_v41  ;;  %v10661_v32 = vld [vmem:[#allocation4 + $0x3e0] sm:$0xf]  ;;  %v13563_v54 = vld [vmem:[#allocation4 + $0x3ec] sm:$0xf0]  ;;  %3736 = vmatpush.bf16.msrb.mxu0 %v10278_v39 }
 0x2a7   :  { %v10261_v44 = vld [vmem:[#allocation4 + $0xc0] sm:$0xf]  ;;  %v10662_v45 = vor.u32 %v13563_v54, %v10661_v32  ;;  %v13463_v46 = vld [vmem:[#allocation4 + $0xcc] sm:$0xf0]  ;;  %3749 = vmatpush.bf16.msrb.mxu1 %v10406_v59 }
 0x2a8   :  { %v10389_v47 = vld [vmem:[#allocation4 + $0x1c0] sm:$0xf]  ;;  %v13495_v48 = vld [vmem:[#allocation4 + $0x1cc] sm:$0xf0]  ;;  %3762 = vmatpush.bf16.msrb.mxu2 %v10534_v43  ;;  %v10262_v49 = vor.u32 %v13463_v46, %v10261_v44 }
 0x2a9   :  { %v10390_v50 = vor.u32 %v13495_v48, %v10389_v47  ;;  %v10517_v51 = vld [vmem:[#allocation4 + $0x2c0] sm:$0xf]  ;;  %v13527_v52 = vld [vmem:[#allocation4 + $0x2cc] sm:$0xf0]  ;;  %3775 = vmatpush.bf16.msrb.mxu3 %v10662_v45 }
 0x2aa   :  { %v10645_v55 = vld [vmem:[#allocation4 + $0x3c0] sm:$0xf]  ;;  %v10518_v56 = vor.u32 %v13527_v52, %v10517_v51  ;;  %v13559_v0 = vld [vmem:[#allocation4 + $0x3cc] sm:$0xf0]  ;;  %3737 = vmatpush.bf16.msrb.mxu0 %v10262_v49 }
 0x2ab   :  { %v10245_v57 = vld [vmem:[#allocation4 + $0xa0] sm:$0xf]  ;;  %v13459_v18 = vld [vmem:[#allocation4 + $0xac] sm:$0xf0]  ;;  %v10646_v58 = vor.u32 %v13559_v0, %v10645_v55  ;;  %3750 = vmatpush.bf16.msrb.mxu1 %v10390_v50 }
 0x2ac   :  { %v10373_v28 = vld [vmem:[#allocation4 + $0x1a0] sm:$0xf]  ;;  %v13491_v60 = vld [vmem:[#allocation4 + $0x1ac] sm:$0xf0]  ;;  %v10246_v62 = vor.u32 %v13459_v18, %v10245_v57  ;;  %3763 = vmatpush.bf16.msrb.mxu2 %v10518_v56 }
 0x2ad   :  { %v10501_v61 = vld [vmem:[#allocation4 + $0x2a0] sm:$0xf]  ;;  %v13523_v63 = vld [vmem:[#allocation4 + $0x2ac] sm:$0xf0]  ;;  %v10374_v4 = vor.u32 %v13491_v60, %v10373_v28  ;;  %3776 = vmatpush.bf16.msrb.mxu3 %v10646_v58 }
 0x2ae   :  { %v10629_v1 = vld [vmem:[#allocation4 + $0x3a0] sm:$0xf]  ;;  %v13555_v3 = vld [vmem:[#allocation4 + $0x3ac] sm:$0xf0]  ;;  %v10502_v5 = vor.u32 %v13523_v63, %v10501_v61  ;;  %3738 = vmatpush.bf16.msrb.mxu0 %v10246_v62 }
 0x2af   :  { %v10229_v7 = vld [vmem:[#allocation4 + $0x80] sm:$0xf]  ;;  %v13455_v8 = vld [vmem:[#allocation4 + $0x8c] sm:$0xf0]  ;;  %v10630_v10 = vor.u32 %v13555_v3, %v10629_v1  ;;  %3751 = vmatpush.bf16.msrb.mxu1 %v10374_v4 }
 0x2b0   :  { %v10357_v9 = vld [vmem:[#allocation4 + $0x180] sm:$0xf]  ;;  %v13487_v12 = vld [vmem:[#allocation4 + $0x18c] sm:$0xf0]  ;;  %v10230_v26 = vor.u32 %v13455_v8, %v10229_v7  ;;  %3764 = vmatpush.bf16.msrb.mxu2 %v10502_v5 }
 0x2b1   :  { %v10485_v19 = vld [vmem:[#allocation4 + $0x280] sm:$0xf]  ;;  %v13519_v13 = vld [vmem:[#allocation4 + $0x28c] sm:$0xf0]  ;;  %v10358_v27 = vor.u32 %v13487_v12, %v10357_v9  ;;  %3777 = vmatpush.bf16.msrb.mxu3 %v10630_v10 }
 0x2b2   :  { %v10613_v14 = vld [vmem:[#allocation4 + $0x380] sm:$0xf]  ;;  %v13551_v15 = vld [vmem:[#allocation4 + $0x38c] sm:$0xf0]  ;;  %v10486_v29 = vor.u32 %v13519_v13, %v10485_v19  ;;  %3739 = vmatpush.bf16.msrb.mxu0 %v10230_v26  ;;  %v13465_v13 = vld [vmem:[#allocation4 + $0xe4] sm:$0xf] }
 0x2b3   :  { %v10213_v30 = vld [vmem:[#allocation4 + $0x60] sm:$0xf]  ;;  %v13451_v31 = vld [vmem:[#allocation4 + $0x6c] sm:$0xf0]  ;;  %v10614_v34 = vor.u32 %v13551_v15, %v10613_v14  ;;  %3752 = vmatpush.bf16.msrb.mxu1 %v10358_v27  ;;  %v10279_v14 = vld [vmem:[#allocation4 + $0xf0] sm:$0xf0] }
 0x2b4   :  { %v10341_v17 = vld [vmem:[#allocation4 + $0x160] sm:$0xf]  ;;  %v13483_v16 = vld [vmem:[#allocation4 + $0x16c] sm:$0xf0]  ;;  %v10214_v41 = vor.u32 %v13451_v31, %v10213_v30  ;;  %3765 = vmatpush.bf16.msrb.mxu2 %v10486_v29  ;;  %v13497_v15 = vld [vmem:[#allocation4 + $0x1e4] sm:$0xf] }
 0x2b5   :  { %v10469_v35 = vld [vmem:[#allocation4 + $0x260] sm:$0xf]  ;;  %v13515_v38 = vld [vmem:[#allocation4 + $0x26c] sm:$0xf0]  ;;  %v10342_v42 = vor.u32 %v13483_v16, %v10341_v17  ;;  %3778 = vmatpush.bf16.msrb.mxu3 %v10614_v34  ;;  %v10407_v27 = vld [vmem:[#allocation4 + $0x1f0] sm:$0xf0] }
 0x2b6   :  { %v10597_v39 = vld [vmem:[#allocation4 + $0x360] sm:$0xf]  ;;  %v13547_v40 = vld [vmem:[#allocation4 + $0x36c] sm:$0xf0]  ;;  %v10470_v59 = vor.u32 %v13515_v38, %v10469_v35  ;;  %3740 = vmatpush.bf16.msrb.mxu0 %v10214_v41  ;;  %v13529_v29 = vld [vmem:[#allocation4 + $0x2e4] sm:$0xf]  ;;  %v10282_v38 = vor.u32 %v13465_v13, %v10279_v14 }
 0x2b7   :  { %v10197_v43 = vld [vmem:[#allocation4 + $0x40] sm:$0xf]  ;;  %v13447_v32 = vld [vmem:[#allocation4 + $0x4c] sm:$0xf0]  ;;  %v10598_v44 = vor.u32 %v13547_v40, %v10597_v39  ;;  %3753 = vmatpush.bf16.msrb.mxu1 %v10342_v42  ;;  %v10535_v30 = vld [vmem:[#allocation4 + $0x2f0] sm:$0xf0]  ;;  %v10410_v39 = vor.u32 %v13497_v15, %v10407_v27 }
 0x2b8   :  { %v10325_v54 = vld [vmem:[#allocation4 + $0x140] sm:$0xf]  ;;  %v13479_v45 = vld [vmem:[#allocation4 + $0x14c] sm:$0xf0]  ;;  %v10198_v50 = vor.u32 %v13447_v32, %v10197_v43  ;;  %3766 = vmatpush.bf16.msrb.mxu2 %v10470_v59  ;;  %v13561_v34 = vld [vmem:[#allocation4 + $0x3e4] sm:$0xf]  ;;  %v10538_v40 = vor.u32 %v13529_v29, %v10535_v30 }
 0x2b9   :  { %v10453_v46 = vld [vmem:[#allocation4 + $0x240] sm:$0xf]  ;;  %v13511_v47 = vld [vmem:[#allocation4 + $0x24c] sm:$0xf0]  ;;  %v10326_v51 = vor.u32 %v13479_v45, %v10325_v54  ;;  %3779 = vmatpush.bf16.msrb.mxu3 %v10598_v44  ;;  %v10663_v16 = vld [vmem:[#allocation4 + $0x3f0] sm:$0xf0] }
 0x2ba   :  { %v10581_v48 = vld [vmem:[#allocation4 + $0x340] sm:$0xf]  ;;  %v13543_v49 = vld [vmem:[#allocation4 + $0x34c] sm:$0xf0]  ;;  %v10454_v52 = vor.u32 %v13511_v47, %v10453_v46  ;;  %3741 = vmatpush.bf16.msrb.mxu0 %v10198_v50  ;;  %v13461_v41 = vld [vmem:[#allocation4 + $0xc4] sm:$0xf]  ;;  %v10666_v43 = vor.u32 %v13561_v34, %v10663_v16 }
 0x2bb   :  { %v10181_v55 = vld [vmem:[#allocation4 + $0x20] sm:$0xf]  ;;  %v13443_v56 = vld [vmem:[#allocation4 + $0x2c] sm:$0xf0]  ;;  %v10582_v57 = vor.u32 %v13543_v49, %v10581_v48  ;;  %3754 = vmatpush.bf16.msrb.mxu1 %v10326_v51  ;;  %v10263_v42 = vld [vmem:[#allocation4 + $0xd0] sm:$0xf0] }
 0x2bc   :  { %v10309_v0 = vld [vmem:[#allocation4 + $0x120] sm:$0xf]  ;;  %v13475_v18 = vld [vmem:[#allocation4 + $0x12c] sm:$0xf0]  ;;  %v10182_v62 = vor.u32 %v13443_v56, %v10181_v55  ;;  %3767 = vmatpush.bf16.msrb.mxu2 %v10454_v52  ;;  %v13493_v59 = vld [vmem:[#allocation4 + $0x1c4] sm:$0xf]  ;;  %v10266_v47 = vor.u32 %v13461_v41, %v10263_v42 }
 0x2bd   :  { %v10437_v58 = vld [vmem:[#allocation4 + $0x220] sm:$0xf]  ;;  %v13507_v28 = vld [vmem:[#allocation4 + $0x22c] sm:$0xf0]  ;;  %v10310_v3 = vor.u32 %v13475_v18, %v10309_v0  ;;  %3780 = vmatpush.bf16.msrb.mxu3 %v10582_v57  ;;  %v10391_v32 = vld [vmem:[#allocation4 + $0x1d0] sm:$0xf0] }
 0x2be   :  { %v10565_v60 = vld [vmem:[#allocation4 + $0x320] sm:$0xf]  ;;  %v13539_v61 = vld [vmem:[#allocation4 + $0x32c] sm:$0xf0]  ;;  %v10438_v4 = vor.u32 %v13507_v28, %v10437_v58  ;;  %3742 = vmatpush.bf16.msrb.mxu0 %v10182_v62  ;;  %v13525_v54 = vld [vmem:[#allocation4 + $0x2c4] sm:$0xf]  ;;  %v10394_v48 = vor.u32 %v13493_v59, %v10391_v32 }
 0x2bf   :  { %v10165_v63 = vld [vmem:[#allocation4] sm:$0xf]  ;;  %v13439_v1 = vld [vmem:[#allocation4 + $0xc] sm:$0xf0]  ;;  %v10566_v9 = vor.u32 %v13539_v61, %v10565_v60  ;;  %3755 = vmatpush.bf16.msrb.mxu1 %v10310_v3  ;;  %v10519_v44 = vld [vmem:[#allocation4 + $0x2d0] sm:$0xf0] }
 0x2c0   :  { %v10293_v5 = vld [vmem:[#allocation4 + $0x100] sm:$0xf]  ;;  %v13471_v7 = vld [vmem:[#allocation4 + $0x10c] sm:$0xf0]  ;;  %v10166_v26 = vor.u32 %v13439_v1, %v10165_v63  ;;  %3768 = vmatpush.bf16.msrb.mxu2 %v10438_v4  ;;  %v13557_v45 = vld [vmem:[#allocation4 + $0x3c4] sm:$0xf]  ;;  %v10522_v49 = vor.u32 %v13525_v54, %v10519_v44 }
 0x2c1   :  { %v10421_v8 = vld [vmem:[#allocation4 + $0x200] sm:$0xf]  ;;  %v13503_v10 = vld [vmem:[#allocation4 + $0x20c] sm:$0xf0]  ;;  %v10294_v31 = vor.u32 %v13471_v7, %v10293_v5  ;;  %3781 = vmatpush.bf16.msrb.mxu3 %v10566_v9  ;;  %v10647_v46 = vld [vmem:[#allocation4 + $0x3d0] sm:$0xf0] }
 0x2c2   :  { %v10549_v12 = vld [vmem:[#allocation4 + $0x300] sm:$0xf]  ;;  %v13535_v19 = vld [vmem:[#allocation4 + $0x30c] sm:$0xf0]  ;;  %v10422_v17 = vor.u32 %v13503_v10, %v10421_v8  ;;  %3743 = vmatpush.bf16.msrb.mxu0 %v10166_v26  ;;  %v13457_v50 = vld [vmem:[#allocation4 + $0xa4] sm:$0xf]  ;;  %v10650_v55 = vor.u32 %v13557_v45, %v10647_v46 }
 0x2c3   :  { %v10550_v35 = vor.u32 %v13535_v19, %v10549_v12  ;;  %3756 = vmatpush.bf16.msrb.mxu1 %v10294_v31  ;;  %v10247_v51 = vld [vmem:[#allocation4 + $0xb0] sm:$0xf0]  ;;  %v13489_v52 = vld [vmem:[#allocation4 + $0x1a4] sm:$0xf] }
 0x2c4   :  { %3769 = vmatpush.bf16.msrb.mxu2 %v10422_v17  ;;  %v10375_v56 = vld [vmem:[#allocation4 + $0x1b0] sm:$0xf0]  ;;  %v13521_v0 = vld [vmem:[#allocation4 + $0x2a4] sm:$0xf]  ;;  %v10250_v28 = vor.u32 %v13457_v50, %v10247_v51 }
 0x2c5   :  { %3782 = vmatpush.bf16.msrb.mxu3 %v10550_v35  ;;  %v10503_v57 = vld [vmem:[#allocation4 + $0x2b0] sm:$0xf0]  ;;  %v13553_v18 = vld [vmem:[#allocation4 + $0x3a4] sm:$0xf]  ;;  %3744 = vmatmul.bf16.vlgmr.msrb.gmra.mxu0 %v14749_v11  ;;  %v10378_v60 = vor.u32 %v13489_v52, %v10375_v56 }
 0x2c6   :  { %3788 = vmatpush.bf16.msra.mxu0 %v10282_v38  ;;  %v10631_v58 = vld [vmem:[#allocation4 + $0x3b0] sm:$0xf0]  ;;  %3757 = vmatmul.bf16.vlgmr.msrb.gmra.mxu1 %v14752_v36  ;;  %v10506_v61 = vor.u32 %v13521_v0, %v10503_v57  ;;  %v13453_v62 = vld [vmem:[#allocation4 + $0x84] sm:$0xf] }
 0x2c7   :  { %3801 = vmatpush.bf16.msra.mxu1 %v10410_v39  ;;  %3770 = vmatmul.bf16.vlgmr.msrb.gmra.mxu2 %v14755_v6  ;;  %v10231_v63 = vld [vmem:[#allocation4 + $0x90] sm:$0xf0]  ;;  %v13485_v1 = vld [vmem:[#allocation4 + $0x184] sm:$0xf]  ;;  %v10634_v3 = vor.u32 %v13553_v18, %v10631_v58 }
 0x2c8   :  { %3814 = vmatpush.bf16.msra.mxu2 %v10538_v40  ;;  %3783 = vmatmul.bf16.vlgmr.msrb.gmra.mxu3 %v14758_v33  ;;  %v10359_v4 = vld [vmem:[#allocation4 + $0x190] sm:$0xf0]  ;;  %v13517_v5 = vld [vmem:[#allocation4 + $0x284] sm:$0xf]  ;;  %v10234_v10 = vor.u32 %v13453_v62, %v10231_v63 }
 0x2c9   :  { %3827 = vmatpush.bf16.msra.mxu3 %v10666_v43  ;;  %v10487_v7 = vld [vmem:[#allocation4 + $0x290] sm:$0xf0]  ;;  %v13549_v8 = vld [vmem:[#allocation4 + $0x384] sm:$0xf]  ;;  %v10362_v12 = vor.u32 %v13485_v1, %v10359_v4 }
 0x2ca   :  { %3789 = vmatpush.bf16.msra.mxu0 %v10266_v47  ;;  %v10615_v9 = vld [vmem:[#allocation4 + $0x390] sm:$0xf0]  ;;  %v10490_v19 = vor.u32 %v13517_v5, %v10487_v7  ;;  %v13449_v13 = vld [vmem:[#allocation4 + $0x64] sm:$0xf]  ;;  %v10285_v7 = vld [vmem:[#allocation4 + $0xe8] sm:$0xf] }
 0x2cb   :  { %3802 = vmatpush.bf16.msra.mxu1 %v10394_v48  ;;  %v10215_v14 = vld [vmem:[#allocation4 + $0x70] sm:$0xf0]  ;;  %v13481_v15 = vld [vmem:[#allocation4 + $0x164] sm:$0xf]  ;;  %v10618_v26 = vor.u32 %v13549_v8, %v10615_v9  ;;  %v13468_v8 = vld [vmem:[#allocation4 + $0xf4] sm:$0xf0] }
 0x2cc   :  { %3815 = vmatpush.bf16.msra.mxu2 %v10522_v49  ;;  %v10343_v27 = vld [vmem:[#allocation4 + $0x170] sm:$0xf0]  ;;  %v13513_v29 = vld [vmem:[#allocation4 + $0x264] sm:$0xf]  ;;  %v10218_v34 = vor.u32 %v13449_v13, %v10215_v14  ;;  %v10413_v9 = vld [vmem:[#allocation4 + $0x1e8] sm:$0xf] }
 0x2cd   :  { %3828 = vmatpush.bf16.msra.mxu3 %v10650_v55  ;;  %v10471_v30 = vld [vmem:[#allocation4 + $0x270] sm:$0xf0]  ;;  %v13545_v31 = vld [vmem:[#allocation4 + $0x364] sm:$0xf]  ;;  %v10346_v16 = vor.u32 %v13481_v15, %v10343_v27  ;;  %v13532_v13 = vld [vmem:[#allocation4 + $0x2f4] sm:$0xf0] }
 0x2ce   :  { %3790 = vmatpush.bf16.msra.mxu0 %v10250_v28  ;;  %v10599_v17 = vld [vmem:[#allocation4 + $0x370] sm:$0xf0]  ;;  %v10474_v35 = vor.u32 %v13513_v29, %v10471_v30  ;;  %v13445_v38 = vld [vmem:[#allocation4 + $0x44] sm:$0xf]  ;;  %v13564_v27 = vld [vmem:[#allocation4 + $0x3f4] sm:$0xf0]  ;;  %v10286_v30 = vor.u32 %v13468_v8, %v10285_v7 }
 0x2cf   :  { %3803 = vmatpush.bf16.msra.mxu1 %v10378_v60  ;;  %v10199_v39 = vld [vmem:[#allocation4 + $0x50] sm:$0xf0]  ;;  %v13477_v40 = vld [vmem:[#allocation4 + $0x144] sm:$0xf]  ;;  %v10602_v41 = vor.u32 %v13545_v31, %v10599_v17  ;;  %v10221_v7 = vld [vmem:[#allocation4 + $0x68] sm:$0xf] }
 0x2d0   :  { %3816 = vmatpush.bf16.msra.mxu2 %v10506_v61  ;;  %v10327_v42 = vld [vmem:[#allocation4 + $0x150] sm:$0xf0]  ;;  %v13509_v59 = vld [vmem:[#allocation4 + $0x244] sm:$0xf]  ;;  %v10202_v44 = vor.u32 %v13445_v38, %v10199_v39  ;;  %v13496_v39 = vld [vmem:[#allocation4 + $0x1d4] sm:$0xf0] }
 0x2d1   :  { %3829 = vmatpush.bf16.msra.mxu3 %v10634_v3  ;;  %v10455_v43 = vld [vmem:[#allocation4 + $0x250] sm:$0xf0]  ;;  %v13541_v32 = vld [vmem:[#allocation4 + $0x344] sm:$0xf]  ;;  %v10330_v45 = vor.u32 %v13477_v40, %v10327_v42  ;;  %v10525_v40 = vld [vmem:[#allocation4 + $0x2c8] sm:$0xf] }
 0x2d2   :  { %3791 = vmatpush.bf16.msra.mxu0 %v10234_v10  ;;  %v10583_v54 = vld [vmem:[#allocation4 + $0x350] sm:$0xf0]  ;;  %v10458_v46 = vor.u32 %v13509_v59, %v10455_v43  ;;  %v13441_v47 = vld [vmem:[#allocation4 + $0x24] sm:$0xf]  ;;  %v10653_v42 = vld [vmem:[#allocation4 + $0x3c8] sm:$0xf] }
 0x2d3   :  { %3804 = vmatpush.bf16.msra.mxu1 %v10362_v12  ;;  %v10183_v48 = vld [vmem:[#allocation4 + $0x30] sm:$0xf0]  ;;  %v13473_v49 = vld [vmem:[#allocation4 + $0x124] sm:$0xf]  ;;  %v10586_v50 = vor.u32 %v13541_v32, %v10583_v54  ;;  %v13500_v12 = vld [vmem:[#allocation4 + $0x1f4] sm:$0xf0] }
 0x2d4   :  { %3817 = vmatpush.bf16.msra.mxu2 %v10490_v19  ;;  %v10311_v51 = vld [vmem:[#allocation4 + $0x130] sm:$0xf0]  ;;  %v13505_v52 = vld [vmem:[#allocation4 + $0x224] sm:$0xf]  ;;  %v10186_v57 = vor.u32 %v13441_v47, %v10183_v48  ;;  %v10541_v19 = vld [vmem:[#allocation4 + $0x2e8] sm:$0xf]  ;;  %v10414_v31 = vor.u32 %v13500_v12, %v10413_v9 }
 0x2d5   :  { %3830 = vmatpush.bf16.msra.mxu3 %v10618_v26  ;;  %v10439_v55 = vld [vmem:[#allocation4 + $0x230] sm:$0xf0]  ;;  %v13537_v56 = vld [vmem:[#allocation4 + $0x324] sm:$0xf]  ;;  %v10314_v28 = vor.u32 %v13473_v49, %v10311_v51  ;;  %v10669_v26 = vld [vmem:[#allocation4 + $0x3e8] sm:$0xf]  ;;  %v10542_v17 = vor.u32 %v13532_v13, %v10541_v19 }
 0x2d6   :  { %3792 = vmatpush.bf16.msra.mxu0 %v10218_v34  ;;  %v10567_v0 = vld [vmem:[#allocation4 + $0x330] sm:$0xf0]  ;;  %v13437_v18 = vld [vmem:[#allocation4 + $0x4] sm:$0xf]  ;;  %v10442_v60 = vor.u32 %v13505_v52, %v10439_v55  ;;  %v10269_v34 = vld [vmem:[#allocation4 + $0xc8] sm:$0xf]  ;;  %v10670_v38 = vor.u32 %v13564_v27, %v10669_v26 }
 0x2d7   :  { %3805 = vmatpush.bf16.msra.mxu1 %v10346_v16  ;;  %v10167_v58 = vld [vmem:[#allocation4 + $0x10] sm:$0xf0]  ;;  %v13469_v61 = vld [vmem:[#allocation4 + $0x104] sm:$0xf]  ;;  %v10570_v1 = vor.u32 %v13537_v56, %v10567_v0  ;;  %v13464_v16 = vld [vmem:[#allocation4 + $0xd4] sm:$0xf0] }
 0x2d8   :  { %3818 = vmatpush.bf16.msra.mxu2 %v10474_v35  ;;  %v10295_v62 = vld [vmem:[#allocation4 + $0x110] sm:$0xf0]  ;;  %v13501_v63 = vld [vmem:[#allocation4 + $0x204] sm:$0xf]  ;;  %v10170_v10 = vor.u32 %v13437_v18, %v10167_v58  ;;  %v10397_v35 = vld [vmem:[#allocation4 + $0x1c8] sm:$0xf]  ;;  %v10270_v43 = vor.u32 %v13464_v16, %v10269_v34 }
 0x2d9   :  { %3831 = vmatpush.bf16.msra.mxu3 %v10602_v41  ;;  %v10423_v3 = vld [vmem:[#allocation4 + $0x210] sm:$0xf0]  ;;  %v13533_v4 = vld [vmem:[#allocation4 + $0x304] sm:$0xf]  ;;  %v10298_v14 = vor.u32 %v13469_v61, %v10295_v62  ;;  %v13528_v41 = vld [vmem:[#allocation4 + $0x2d4] sm:$0xf0]  ;;  %v10398_v32 = vor.u32 %v13496_v39, %v10397_v35 }
 0x2da   :  { %3793 = vmatpush.bf16.msra.mxu0 %v10202_v44  ;;  %v10551_v5 = vld [vmem:[#allocation4 + $0x310] sm:$0xf0]  ;;  %v10426_v15 = vor.u32 %v13501_v63, %v10423_v3  ;;  %v13560_v59 = vld [vmem:[#allocation4 + $0x3d4] sm:$0xf0]  ;;  %v10526_v54 = vor.u32 %v13528_v41, %v10525_v40  ;;  %v10253_v44 = vld [vmem:[#allocation4 + $0xa8] sm:$0xf] }
 0x2db   :  { %3806 = vmatpush.bf16.msra.mxu1 %v10330_v45  ;;  %v10554_v29 = vor.u32 %v13533_v4, %v10551_v5  ;;  %v13460_v45 = vld [vmem:[#allocation4 + $0xb4] sm:$0xf0]  ;;  %v10654_v47 = vor.u32 %v13560_v59, %v10653_v42  ;;  %v10509_v49 = vld [vmem:[#allocation4 + $0x2a8] sm:$0xf] }
 0x2dc   :  { %3819 = vmatpush.bf16.msra.mxu2 %v10458_v46  ;;  %v10381_v46 = vld [vmem:[#allocation4 + $0x1a8] sm:$0xf]  ;;  %v13492_v48 = vld [vmem:[#allocation4 + $0x1b4] sm:$0xf0]  ;;  %v10254_v55 = vor.u32 %v13460_v45, %v10253_v44 }
 0x2dd   :  { %3832 = vmatpush.bf16.msra.mxu3 %v10586_v50  ;;  %v13524_v50 = vld [vmem:[#allocation4 + $0x2b4] sm:$0xf0]  ;;  %v10637_v51 = vld [vmem:[#allocation4 + $0x3a8] sm:$0xf]  ;;  %v10382_v56 = vor.u32 %v13492_v48, %v10381_v46 }
 0x2de   :  { %3794 = vmatpush.bf16.msra.mxu0 %v10186_v57  ;;  %v13556_v52 = vld [vmem:[#allocation4 + $0x3b4] sm:$0xf0]  ;;  %v10510_v0 = vor.u32 %v13524_v50, %v10509_v49  ;;  %v10237_v57 = vld [vmem:[#allocation4 + $0x88] sm:$0xf] }
 0x2df   :  { %3807 = vmatpush.bf16.msra.mxu1 %v10314_v28  ;;  %v13456_v18 = vld [vmem:[#allocation4 + $0x94] sm:$0xf0]  ;;  %v10365_v58 = vld [vmem:[#allocation4 + $0x188] sm:$0xf]  ;;  %v10638_v28 = vor.u32 %v13556_v52, %v10637_v51 }
 0x2e0   :  { %3820 = vmatpush.bf16.msra.mxu2 %v10442_v60  ;;  %v13488_v60 = vld [vmem:[#allocation4 + $0x194] sm:$0xf0]  ;;  %v10493_v61 = vld [vmem:[#allocation4 + $0x288] sm:$0xf]  ;;  %v10238_v3 = vor.u32 %v13456_v18, %v10237_v57 }
 0x2e1   :  { %3833 = vmatpush.bf16.msra.mxu3 %v10570_v1  ;;  %v13520_v62 = vld [vmem:[#allocation4 + $0x294] sm:$0xf0]  ;;  %v10621_v63 = vld [vmem:[#allocation4 + $0x388] sm:$0xf]  ;;  %v10366_v4 = vor.u32 %v13488_v60, %v10365_v58 }
 0x2e2   :  { %3795 = vmatpush.bf16.msra.mxu0 %v10170_v10  ;;  %v13552_v1 = vld [vmem:[#allocation4 + $0x394] sm:$0xf0]  ;;  %v10494_v5 = vor.u32 %v13520_v62, %v10493_v61  ;;  %v10349_v9 = vld [vmem:[#allocation4 + $0x168] sm:$0xf]  ;;  %v13466_v62 = vld [vmem:[#allocation4 + $0xec] sm:$0xf] }
 0x2e3   :  { %3808 = vmatpush.bf16.msra.mxu1 %v10298_v14  ;;  %v13452_v8 = vld [vmem:[#allocation4 + $0x74] sm:$0xf0]  ;;  %v10622_v10 = vor.u32 %v13552_v1, %v10621_v63  ;;  %v10477_v19 = vld [vmem:[#allocation4 + $0x268] sm:$0xf]  ;;  %v10287_v63 = vld [vmem:[#allocation4 + $0xf8] sm:$0xf0] }
 0x2e4   :  { %3821 = vmatpush.bf16.msra.mxu2 %v10426_v15  ;;  %v13484_v12 = vld [vmem:[#allocation4 + $0x174] sm:$0xf0]  ;;  %v10605_v14 = vld [vmem:[#allocation4 + $0x368] sm:$0xf]  ;;  %v10222_v26 = vor.u32 %v13452_v8, %v10221_v7  ;;  %v13498_v1 = vld [vmem:[#allocation4 + $0x1ec] sm:$0xf] }
 0x2e5   :  { %3834 = vmatpush.bf16.msra.mxu3 %v10554_v29  ;;  %3796 = vmatmul.bf16.vlgmr.msra.gmra.mxu0 %v14749_v11  ;;  %v13516_v13 = vld [vmem:[#allocation4 + $0x274] sm:$0xf0]  ;;  %v10350_v27 = vor.u32 %v13484_v12, %v10349_v9  ;;  %v10461_v35 = vld [vmem:[#allocation4 + $0x248] sm:$0xf]  ;;  %v10543_v7 = vld [vmem:[#allocation4 + $0x2f8] sm:$0xf0] }
 0x2e6   :  { %3840 = vmatpush.bf16.msrb.mxu0 %v10286_v30  ;;  %3809 = vmatmul.bf16.vlgmr.msra.gmra.mxu1 %v14752_v36  ;;  %v13548_v15 = vld [vmem:[#allocation4 + $0x374] sm:$0xf0]  ;;  %v10478_v29 = vor.u32 %v13516_v13, %v10477_v19  ;;  %v10205_v30 = vld [vmem:[#allocation4 + $0x48] sm:$0xf]  ;;  %v10671_v12 = vld [vmem:[#allocation4 + $0x3f8] sm:$0xf0]  ;;  %v10290_v13 = vor.u32 %v13466_v62, %v10287_v63 }
 0x2e7   :  { %3853 = vmatpush.bf16.msrb.mxu1 %v10414_v31  ;;  %3822 = vmatmul.bf16.vlgmr.msra.gmra.mxu2 %v14755_v6  ;;  %v13448_v31 = vld [vmem:[#allocation4 + $0x54] sm:$0xf0]  ;;  %v10606_v34 = vor.u32 %v13548_v15, %v10605_v14  ;;  %v10589_v39 = vld [vmem:[#allocation4 + $0x348] sm:$0xf]  ;;  %v13450_v62 = vld [vmem:[#allocation4 + $0x6c] sm:$0xf] }
 0x2e8   :  { %3866 = vmatpush.bf16.msrb.mxu2 %v10542_v17  ;;  %3835 = vmatmul.bf16.vlgmr.msra.gmra.mxu3 %v14758_v33  ;;  %v10333_v17 = vld [vmem:[#allocation4 + $0x148] sm:$0xf]  ;;  %v13480_v16 = vld [vmem:[#allocation4 + $0x154] sm:$0xf0]  ;;  %v10206_v41 = vor.u32 %v13448_v31, %v10205_v30  ;;  %v10399_v31 = vld [vmem:[#allocation4 + $0x1d8] sm:$0xf0] }
 0x2e9   :  { %3879 = vmatpush.bf16.msrb.mxu3 %v10670_v38  ;;  %v13512_v38 = vld [vmem:[#allocation4 + $0x254] sm:$0xf0]  ;;  %v10334_v42 = vor.u32 %v13480_v16, %v10333_v17  ;;  %v10445_v46 = vld [vmem:[#allocation4 + $0x228] sm:$0xf]  ;;  %v13526_v17 = vld [vmem:[#allocation4 + $0x2cc] sm:$0xf] }
 0x2ea   :  { %3841 = vmatpush.bf16.msrb.mxu0 %v10270_v43  ;;  %v13544_v40 = vld [vmem:[#allocation4 + $0x354] sm:$0xf0]  ;;  %v10462_v59 = vor.u32 %v13512_v38, %v10461_v35  ;;  %v10189_v43 = vld [vmem:[#allocation4 + $0x28] sm:$0xf]  ;;  %v13558_v16 = vld [vmem:[#allocation4 + $0x3cc] sm:$0xf] }
 0x2eb   :  { %3854 = vmatpush.bf16.msrb.mxu1 %v10398_v32  ;;  %v13444_v32 = vld [vmem:[#allocation4 + $0x34] sm:$0xf0]  ;;  %v10590_v44 = vor.u32 %v13544_v40, %v10589_v39  ;;  %v10573_v48 = vld [vmem:[#allocation4 + $0x328] sm:$0xf]  ;;  %v10655_v35 = vld [vmem:[#allocation4 + $0x3d8] sm:$0xf0] }
 0x2ec   :  { %3867 = vmatpush.bf16.msrb.mxu2 %v10526_v54  ;;  %v10317_v54 = vld [vmem:[#allocation4 + $0x128] sm:$0xf]  ;;  %v13476_v45 = vld [vmem:[#allocation4 + $0x134] sm:$0xf0]  ;;  %v10190_v50 = vor.u32 %v13444_v32, %v10189_v43  ;;  %v10658_v43 = vor.u32 %v13558_v16, %v10655_v35  ;;  %v10383_v32 = vld [vmem:[#allocation4 + $0x1b8] sm:$0xf0] }
 0x2ed   :  { %3880 = vmatpush.bf16.msrb.mxu3 %v10654_v47  ;;  %v13508_v47 = vld [vmem:[#allocation4 + $0x234] sm:$0xf0]  ;;  %v10173_v51 = vld [vmem:[#allocation4 + $0x8] sm:$0xf]  ;;  %v10223_v63 = vld [vmem:[#allocation4 + $0x78] sm:$0xf0] }
 0x2ee   :  { %3842 = vmatpush.bf16.msrb.mxu0 %v10254_v55  ;;  %v13540_v49 = vld [vmem:[#allocation4 + $0x334] sm:$0xf0]  ;;  %v10318_v55 = vor.u32 %v13476_v45, %v10317_v54  ;;  %v10429_v18 = vld [vmem:[#allocation4 + $0x208] sm:$0xf]  ;;  %v13522_v54 = vld [vmem:[#allocation4 + $0x2ac] sm:$0xf] }
 0x2ef   :  { %3855 = vmatpush.bf16.msrb.mxu1 %v10382_v56  ;;  %v13440_v52 = vld [vmem:[#allocation4 + $0x14] sm:$0xf0]  ;;  %v10446_v56 = vor.u32 %v13508_v47, %v10445_v46  ;;  %v10574_v58 = vor.u32 %v13540_v49, %v10573_v48  ;;  %v10557_v60 = vld [vmem:[#allocation4 + $0x308] sm:$0xf]  ;;  %v13554_v45 = vld [vmem:[#allocation4 + $0x3ac] sm:$0xf] }
 0x2f0   :  { %3868 = vmatpush.bf16.msrb.mxu2 %v10510_v0  ;;  %v10301_v0 = vld [vmem:[#allocation4 + $0x108] sm:$0xf]  ;;  %v13472_v57 = vld [vmem:[#allocation4 + $0x114] sm:$0xf0]  ;;  %v10639_v46 = vld [vmem:[#allocation4 + $0x3b8] sm:$0xf0] }
 0x2f1   :  { %3881 = vmatpush.bf16.msrb.mxu3 %v10638_v28  ;;  %v13504_v28 = vld [vmem:[#allocation4 + $0x214] sm:$0xf0]  ;;  %v10302_v8 = vor.u32 %v13472_v57, %v10301_v0  ;;  %v13518_v0 = vld [vmem:[#allocation4 + $0x28c] sm:$0xf]  ;;  %v10495_v57 = vld [vmem:[#allocation4 + $0x298] sm:$0xf0] }
 0x2f2   :  { %3843 = vmatpush.bf16.msrb.mxu0 %v10238_v3  ;;  %v13536_v61 = vld [vmem:[#allocation4 + $0x314] sm:$0xf0]  ;;  %v10174_v3 = vor.u32 %v13440_v52, %v10173_v51  ;;  %v10430_v9 = vor.u32 %v13504_v28, %v10429_v18  ;;  %v10239_v51 = vld [vmem:[#allocation4 + $0x98] sm:$0xf0]  ;;  %v13486_v52 = vld [vmem:[#allocation4 + $0x18c] sm:$0xf] }
 0x2f3   :  { %3856 = vmatpush.bf16.msrb.mxu1 %v10366_v4  ;;  %v10415_v4 = vld [vmem:[#allocation4 + $0x1f8] sm:$0xf0]  ;;  %v10558_v19 = vor.u32 %v13536_v61, %v10557_v60  ;;  %v13550_v18 = vld [vmem:[#allocation4 + $0x38c] sm:$0xf]  ;;  %v10498_v61 = vor.u32 %v13518_v0, %v10495_v57 }
 0x2f4   :  { %3869 = vmatpush.bf16.msrb.mxu2 %v10494_v5  ;;  %v13530_v5 = vld [vmem:[#allocation4 + $0x2ec] sm:$0xf]  ;;  %v10418_v14 = vor.u32 %v13498_v1, %v10415_v4  ;;  %v10351_v4 = vld [vmem:[#allocation4 + $0x178] sm:$0xf0] }
 0x2f5   :  { %3882 = vmatpush.bf16.msrb.mxu3 %v10622_v10  ;;  %v13562_v10 = vld [vmem:[#allocation4 + $0x3ec] sm:$0xf]  ;;  %v10546_v15 = vor.u32 %v13530_v5, %v10543_v7  ;;  %v10479_v7 = vld [vmem:[#allocation4 + $0x278] sm:$0xf0] }
 0x2f6   :  { %3844 = vmatpush.bf16.msrb.mxu0 %v10222_v26  ;;  %v13462_v26 = vld [vmem:[#allocation4 + $0xcc] sm:$0xf]  ;;  %v10674_v30 = vor.u32 %v13562_v10, %v10671_v12  ;;  %v10226_v10 = vor.u32 %v13450_v62, %v10223_v63  ;;  %v10559_v0 = vld [vmem:[#allocation4 + $0x318] sm:$0xf0] }
 0x2f7   :  { %3857 = vmatpush.bf16.msrb.mxu1 %v10350_v27  ;;  %v10271_v27 = vld [vmem:[#allocation4 + $0xd8] sm:$0xf0]  ;;  %v13482_v1 = vld [vmem:[#allocation4 + $0x16c] sm:$0xf] }
 0x2f8   :  { %3870 = vmatpush.bf16.msrb.mxu2 %v10478_v29  ;;  %v13494_v29 = vld [vmem:[#allocation4 + $0x1cc] sm:$0xf]  ;;  %v10274_v38 = vor.u32 %v13462_v26, %v10271_v27  ;;  %v10354_v12 = vor.u32 %v13482_v1, %v10351_v4  ;;  %v10335_v27 = vld [vmem:[#allocation4 + $0x158] sm:$0xf0] }
 0x2f9   :  { %3883 = vmatpush.bf16.msrb.mxu3 %v10606_v34  ;;  %v10527_v34 = vld [vmem:[#allocation4 + $0x2d8] sm:$0xf0]  ;;  %v10402_v39 = vor.u32 %v13494_v29, %v10399_v31  ;;  %v13514_v5 = vld [vmem:[#allocation4 + $0x26c] sm:$0xf] }
 0x2fa   :  { %3845 = vmatpush.bf16.msrb.mxu0 %v10206_v41  ;;  %v10530_v40 = vor.u32 %v13526_v17, %v10527_v34  ;;  %v13458_v41 = vld [vmem:[#allocation4 + $0xac] sm:$0xf]  ;;  %v10591_v17 = vld [vmem:[#allocation4 + $0x358] sm:$0xf0] }
 0x2fb   :  { %3858 = vmatpush.bf16.msrb.mxu1 %v10334_v42  ;;  %v10255_v42 = vld [vmem:[#allocation4 + $0xb8] sm:$0xf0]  ;;  %v13510_v29 = vld [vmem:[#allocation4 + $0x24c] sm:$0xf] }
 0x2fc   :  { %3871 = vmatpush.bf16.msrb.mxu2 %v10462_v59  ;;  %v13490_v59 = vld [vmem:[#allocation4 + $0x1ac] sm:$0xf]  ;;  %v10258_v47 = vor.u32 %v13458_v41, %v10255_v42  ;;  %v10319_v42 = vld [vmem:[#allocation4 + $0x138] sm:$0xf0] }
 0x2fd   :  { %3884 = vmatpush.bf16.msrb.mxu3 %v10590_v44  ;;  %v10511_v44 = vld [vmem:[#allocation4 + $0x2b8] sm:$0xf0]  ;;  %v10386_v48 = vor.u32 %v13490_v59, %v10383_v32  ;;  %v13542_v31 = vld [vmem:[#allocation4 + $0x34c] sm:$0xf] }
 0x2fe   :  { %3846 = vmatpush.bf16.msrb.mxu0 %v10190_v50  ;;  %v10514_v49 = vor.u32 %v13522_v54, %v10511_v44  ;;  %v13454_v50 = vld [vmem:[#allocation4 + $0x8c] sm:$0xf]  ;;  %v10594_v41 = vor.u32 %v13542_v31, %v10591_v17  ;;  %v10575_v54 = vld [vmem:[#allocation4 + $0x338] sm:$0xf0] }
 0x2ff   :  { %3859 = vmatpush.bf16.msrb.mxu1 %v10318_v55  ;;  %v10642_v55 = vor.u32 %v13554_v45, %v10639_v46  ;;  %v10242_v28 = vor.u32 %v13454_v50, %v10239_v51  ;;  %v13506_v59 = vld [vmem:[#allocation4 + $0x22c] sm:$0xf]  ;;  %v10303_v51 = vld [vmem:[#allocation4 + $0x118] sm:$0xf0] }
 0x300   :  { %3872 = vmatpush.bf16.msrb.mxu2 %v10446_v56  ;;  %v10367_v56 = vld [vmem:[#allocation4 + $0x198] sm:$0xf0]  ;;  %v13538_v32 = vld [vmem:[#allocation4 + $0x32c] sm:$0xf] }
 0x301   :  { %3885 = vmatpush.bf16.msrb.mxu3 %v10574_v58  ;;  %v10623_v58 = vld [vmem:[#allocation4 + $0x398] sm:$0xf0]  ;;  %v10370_v60 = vor.u32 %v13486_v52, %v10367_v56  ;;  %v10578_v50 = vor.u32 %v13538_v32, %v10575_v54  ;;  %v13502_v52 = vld [vmem:[#allocation4 + $0x20c] sm:$0xf] }
 0x302   :  { %3847 = vmatpush.bf16.msrb.mxu0 %v10174_v3  ;;  %v10626_v3 = vor.u32 %v13550_v18, %v10623_v58  ;;  %v13534_v56 = vld [vmem:[#allocation4 + $0x30c] sm:$0xf] }
 0x303   :  { %3860 = vmatpush.bf16.msrb.mxu1 %v10302_v8  ;;  %v13546_v8 = vld [vmem:[#allocation4 + $0x36c] sm:$0xf] }
 0x304   :  { %3873 = vmatpush.bf16.msrb.mxu2 %v10430_v9  ;;  %v10607_v9 = vld [vmem:[#allocation4 + $0x378] sm:$0xf0] }
 0x305   :  { %3886 = vmatpush.bf16.msrb.mxu3 %v10558_v19  ;;  %3848 = vmatmul.bf16.vlgmr.msrb.gmra.mxu0 %v14749_v11  ;;  %v10482_v19 = vor.u32 %v13514_v5, %v10479_v7  ;;  %v10610_v26 = vor.u32 %v13546_v8, %v10607_v9 }
 0x306   :  { %3892 = vmatpush.bf16.msra.mxu0 %v10290_v13  ;;  %3861 = vmatmul.bf16.vlgmr.msrb.gmra.mxu1 %v14752_v36  ;;  %v13446_v13 = vld [vmem:[#allocation4 + $0x4c] sm:$0xf] }
 0x307   :  { %3905 = vmatpush.bf16.msra.mxu1 %v10418_v14  ;;  %3874 = vmatmul.bf16.vlgmr.msrb.gmra.mxu2 %v14755_v6  ;;  %v10207_v14 = vld [vmem:[#allocation4 + $0x58] sm:$0xf0] }
 0x308   :  { %3918 = vmatpush.bf16.msra.mxu2 %v10546_v15  ;;  %3887 = vmatmul.bf16.vlgmr.msrb.gmra.mxu3 %v14758_v33  ;;  %v13478_v15 = vld [vmem:[#allocation4 + $0x14c] sm:$0xf]  ;;  %v10210_v34 = vor.u32 %v13446_v13, %v10207_v14 }
 0x309   :  { %3931 = vmatpush.bf16.msra.mxu3 %v10674_v30  ;;  %v10463_v30 = vld [vmem:[#allocation4 + $0x258] sm:$0xf0]  ;;  %v10338_v16 = vor.u32 %v13478_v15, %v10335_v27 }
 0x30a   :  { %3893 = vmatpush.bf16.msra.mxu0 %v10274_v38  ;;  %v10466_v35 = vor.u32 %v13510_v29, %v10463_v30  ;;  %v13442_v38 = vld [vmem:[#allocation4 + $0x2c] sm:$0xf] }
 0x30b   :  { %3906 = vmatpush.bf16.msra.mxu1 %v10402_v39  ;;  %v10191_v39 = vld [vmem:[#allocation4 + $0x38] sm:$0xf0] }
 0x30c   :  { %3919 = vmatpush.bf16.msra.mxu2 %v10530_v40  ;;  %v13474_v40 = vld [vmem:[#allocation4 + $0x12c] sm:$0xf]  ;;  %v10194_v44 = vor.u32 %v13442_v38, %v10191_v39  ;;  %v3094_v39 = vperm.slane %v14646_v22, 2 }
 0x30d   :  { %3932 = vmatpush.bf16.msra.mxu3 %v10658_v43  ;;  %v10447_v43 = vld [vmem:[#allocation4 + $0x238] sm:$0xf0]  ;;  %v10322_v45 = vor.u32 %v13474_v40, %v10319_v42 }
 0x30e   :  { %3894 = vmatpush.bf16.msra.mxu0 %v10258_v47  ;;  %v10450_v46 = vor.u32 %v13506_v59, %v10447_v43  ;;  %v13438_v47 = vld [vmem:[#allocation4 + $0xc] sm:$0xf] }
 0x30f   :  { %3907 = vmatpush.bf16.msra.mxu1 %v10386_v48  ;;  %v10175_v48 = vld [vmem:[#allocation4 + $0x18] sm:$0xf0] }
 0x310   :  { %3920 = vmatpush.bf16.msra.mxu2 %v10514_v49  ;;  %v13470_v49 = vld [vmem:[#allocation4 + $0x10c] sm:$0xf]  ;;  %v10178_v57 = vor.u32 %v13438_v47, %v10175_v48 }
 0x311   :  { %3933 = vmatpush.bf16.msra.mxu3 %v10642_v55  ;;  %v10431_v55 = vld [vmem:[#allocation4 + $0x218] sm:$0xf0]  ;;  %v10306_v18 = vor.u32 %v13470_v49, %v10303_v51  ;;  %v3095_v51 = vperm.slane %v14648_v23, 2 }
 0x312   :  { %3895 = vmatpush.bf16.msra.mxu0 %v10242_v28  ;;  %v10434_v58 = vor.u32 %v13502_v52, %v10431_v55  ;;  %v10562_v28 = vor.u32 %v13534_v56, %v10559_v0 }
 0x313   :  { %3908 = vmatpush.bf16.msra.mxu1 %v10370_v60  ;;  %v3092_v60 = vperm.slane %v14642_v20, 2 }
 0x314   :  { %3921 = vmatpush.bf16.msra.mxu2 %v10498_v61 }
 0x315   :  { %3934 = vmatpush.bf16.msra.mxu3 %v10626_v3 }
 0x316   :  { %3896 = vmatpush.bf16.msra.mxu0 %v10226_v10 }
 0x317   :  { %3909 = vmatpush.bf16.msra.mxu1 %v10354_v12  ;;  %v3093_v12 = vperm.slane %v14644_v21, 2 }
 0x318   :  { %3922 = vmatpush.bf16.msra.mxu2 %v10482_v19 }
 0x319   :  { %3935 = vmatpush.bf16.msra.mxu3 %v10610_v26 }
 0x31a   :  { %3897 = vmatpush.bf16.msra.mxu0 %v10210_v34 }
 0x31b   :  { %3910 = vmatpush.bf16.msra.mxu1 %v10338_v16 }
 0x31c   :  { %3923 = vmatpush.bf16.msra.mxu2 %v10466_v35 }
 0x31d   :  { %3936 = vmatpush.bf16.msra.mxu3 %v10594_v41 }
 0x31e   :  { %3898 = vmatpush.bf16.msra.mxu0 %v10194_v44 }
 0x31f   :  { %3911 = vmatpush.bf16.msra.mxu1 %v10322_v45 }
 0x320   :  { %3924 = vmatpush.bf16.msra.mxu2 %v10450_v46 }
 0x321   :  { %3937 = vmatpush.bf16.msra.mxu3 %v10578_v50 }
 0x322   :  { %3899 = vmatpush.bf16.msra.mxu0 %v10178_v57 }
 0x323   :  { %3912 = vmatpush.bf16.msra.mxu1 %v10306_v18 }
 0x324   :  { %3925 = vmatpush.bf16.msra.mxu2 %v10434_v58 }
 0x325   :  { %3938 = vmatpush.bf16.msra.mxu3 %v10562_v28  ;;  %3900 = vmatmul.bf16.vlgmr.msra.gmra.mxu0 %v14749_v11 }
 0x326   :  { %3913 = vmatmul.bf16.vlgmr.msra.gmra.mxu1 %v14752_v36 }
 0x327   :  { %3926 = vmatmul.bf16.vlgmr.msra.gmra.mxu2 %v14755_v6 }
 0x328   :  { %3939 = vmatmul.bf16.vlgmr.msra.gmra.mxu3 %v14758_v33 }
 0x342   :  { %v3745_v61 = vpop.f32.mrf.mxu0 }
 0x343   :  { %v3746_v62 = vadd.f32 %v3745_v61, %v3092_v60  ;;  %v3758_v63 = vpop.f32.mrf.mxu1 }
 0x345   :  { %v3759_v1 = vadd.f32 %v3758_v63, %v3746_v62 }
 0x34a   :  { %v3771_v3 = vpop.f32.mrf.mxu2  ;;  %v3747_v8 = vpop.f32.mrf.mxu0 }
 0x34b   :  { %v3772_v4 = vadd.f32 %v3771_v3, %v3759_v1  ;;  %v3784_v5 = vpop.f32.mrf.mxu3  ;;  %v3760_v9 = vpop.f32.mrf.mxu1 }
 0x34d   :  { %v3785_v7 = vadd.f32 %v3784_v5, %v3772_v4 }
 0x34f   :  { %v3944_v10 = vmax.f32 %v3785_v7, 0.0 }
 0x351   :  { %v14778_v11 = vadd.f32 %v3944_v10, %v14701_v2 }
 0x352   :  { %v3773_v36 = vpop.f32.mrf.mxu2 }
 0x353   :  { %v14782_v6 = vpack.c.bf16 %v14778_v11, %v14778_v11  ;;  %v3786_v33 = vpop.f32.mrf.mxu3 }
 0x362   :  { %v3797_v19 = vpop.f32.mrf.mxu0 }
 0x363   :  { %v3798_v13 = vadd.f32 %v3797_v19, %v3093_v12  ;;  %v3810_v14 = vpop.f32.mrf.mxu1 }
 0x365   :  { %v3811_v15 = vadd.f32 %v3810_v14, %v3798_v13 }
 0x36a   :  { %v3823_v26 = vpop.f32.mrf.mxu2  ;;  %v3799_v31 = vpop.f32.mrf.mxu0 }
 0x36b   :  { %v3824_v27 = vadd.f32 %v3823_v26, %v3811_v15  ;;  %v3836_v29 = vpop.f32.mrf.mxu3  ;;  %v3812_v17 = vpop.f32.mrf.mxu1 }
 0x36d   :  { %v3837_v30 = vadd.f32 %v3836_v29, %v3824_v27 }
 0x36f   :  { %v3945_v2 = vmax.f32 %v3837_v30, 0.0 }
 0x371   :  { %v14786_v34 = vadd.f32 %v3945_v2, %v14713_v25 }
 0x372   :  { %v3825_v16 = vpop.f32.mrf.mxu2 }
 0x373   :  { %v14790_v35 = vpack.c.bf16 %v14786_v34, %v14786_v34  ;;  %v3838_v38 = vpop.f32.mrf.mxu3 }
 0x382   :  { %v3849_v40 = vpop.f32.mrf.mxu0 }
 0x383   :  { %v3850_v41 = vadd.f32 %v3849_v40, %v3094_v39  ;;  %v3862_v42 = vpop.f32.mrf.mxu1 }
 0x385   :  { %v3863_v59 = vadd.f32 %v3862_v42, %v3850_v41 }
 0x38a   :  { %v3875_v43 = vpop.f32.mrf.mxu2  ;;  %v3851_v45 = vpop.f32.mrf.mxu0 }
 0x38b   :  { %v3876_v32 = vadd.f32 %v3875_v43, %v3863_v59  ;;  %v3888_v54 = vpop.f32.mrf.mxu3  ;;  %v3864_v46 = vpop.f32.mrf.mxu1 }
 0x38d   :  { %v3889_v44 = vadd.f32 %v3888_v54, %v3876_v32 }
 0x38f   :  { %v3946_v25 = vmax.f32 %v3889_v44, 0.0 }
 0x391   :  { %v14794_v47 = vadd.f32 %v3946_v25, %v14719_v37 }
 0x392   :  { %v3877_v48 = vpop.f32.mrf.mxu2 }
 0x393   :  { %v14798_v49 = vpack.c.bf16 %v14794_v47, %v14794_v47  ;;  %v3890_v50 = vpop.f32.mrf.mxu3 }
 0x3a2   :  { %v3901_v52 = vpop.f32.mrf.mxu0 }
 0x3a3   :  { %v3902_v55 = vadd.f32 %v3901_v52, %v3095_v51  ;;  %v3914_v56 = vpop.f32.mrf.mxu1 }
 0x3a5   :  { %v3915_v0 = vadd.f32 %v3914_v56, %v3902_v55 }
 0x3aa   :  { %v3927_v57 = vpop.f32.mrf.mxu2  ;;  %v3903_v28 = vpop.f32.mrf.mxu0 }
 0x3ab   :  { %v3928_v18 = vadd.f32 %v3927_v57, %v3915_v0  ;;  %v3940_v58 = vpop.f32.mrf.mxu3  ;;  %v3916_v60 = vpop.f32.mrf.mxu1 }
 0x3ad   :  { %v3941_v61 = vadd.f32 %v3940_v58, %v3928_v18 }
 0x3af   :  { %v3947_v37 = vmax.f32 %v3941_v61, 0.0 }
 0x3b1   :  { %v14802_v62 = vadd.f32 %v3947_v37, %v14726_v53 }
 0x3b2   :  { %v3929_v63 = vpop.f32.mrf.mxu2 }
 0x3b3   :  { %v14806_v1 = vpack.c.bf16 %v14802_v62, %v14802_v62  ;;  %v3942_v3 = vpop.f32.mrf.mxu3 }
 0x3b4   :  { %14450 = dma.done.wait [#allocation12 + $0x3], 16384 }
 0x3b5   :  { %14451 = vsyncadd [#allocation12 + $0x3], 4294950912  ;;  %v10789_v4 = vld [vmem:[#allocation5 + $0xe0] sm:$0xf]  ;;  %v13595_v5 = vld [vmem:[#allocation5 + $0xec] sm:$0xf0] }
 0x3b6   :  { %v10917_v7 = vld [vmem:[#allocation5 + $0x1e0] sm:$0xf]  ;;  %v10790_v8 = vor.u32 %v13595_v5, %v10789_v4  ;;  %v13627_v9 = vld [vmem:[#allocation5 + $0x1ec] sm:$0xf0] }
 0x3b7   :  { %v11045_v10 = vld [vmem:[#allocation5 + $0x2e0] sm:$0xf]  ;;  %v13659_v36 = vld [vmem:[#allocation5 + $0x2ec] sm:$0xf0]  ;;  %v10918_v33 = vor.u32 %v13627_v9, %v10917_v7 }
 0x3b8   :  { %v11046_v12 = vor.u32 %v13659_v36, %v11045_v10  ;;  %v11173_v19 = vld [vmem:[#allocation5 + $0x3e0] sm:$0xf]  ;;  %v13691_v53 = vld [vmem:[#allocation5 + $0x3ec] sm:$0xf0]  ;;  %4730 = vmatpush.bf16.msrb.mxu0 %v10790_v8 }
 0x3b9   :  { %v10773_v13 = vld [vmem:[#allocation5 + $0xc0] sm:$0xf]  ;;  %v11174_v14 = vor.u32 %v13691_v53, %v11173_v19  ;;  %v13591_v15 = vld [vmem:[#allocation5 + $0xcc] sm:$0xf0]  ;;  %4743 = vmatpush.bf16.msrb.mxu1 %v10918_v33 }
 0x3ba   :  { %v10901_v26 = vld [vmem:[#allocation5 + $0x1c0] sm:$0xf]  ;;  %v13623_v27 = vld [vmem:[#allocation5 + $0x1cc] sm:$0xf0]  ;;  %4756 = vmatpush.bf16.msrb.mxu2 %v11046_v12  ;;  %v10774_v29 = vor.u32 %v13591_v15, %v10773_v13 }
 0x3bb   :  { %v10902_v30 = vor.u32 %v13623_v27, %v10901_v26  ;;  %v11029_v31 = vld [vmem:[#allocation5 + $0x2c0] sm:$0xf]  ;;  %v13655_v17 = vld [vmem:[#allocation5 + $0x2cc] sm:$0xf0]  ;;  %4769 = vmatpush.bf16.msrb.mxu3 %v11174_v14 }
 0x3bc   :  { %v11157_v2 = vld [vmem:[#allocation5 + $0x3c0] sm:$0xf]  ;;  %v11030_v16 = vor.u32 %v13655_v17, %v11029_v31  ;;  %v13687_v38 = vld [vmem:[#allocation5 + $0x3cc] sm:$0xf0]  ;;  %4731 = vmatpush.bf16.msrb.mxu0 %v10774_v29 }
 0x3bd   :  { %v10757_v39 = vld [vmem:[#allocation5 + $0xa0] sm:$0xf]  ;;  %v13587_v40 = vld [vmem:[#allocation5 + $0xac] sm:$0xf0]  ;;  %v11158_v41 = vor.u32 %v13687_v38, %v11157_v2  ;;  %4744 = vmatpush.bf16.msrb.mxu1 %v10902_v30 }
 0x3be   :  { %v10885_v42 = vld [vmem:[#allocation5 + $0x1a0] sm:$0xf]  ;;  %v13619_v59 = vld [vmem:[#allocation5 + $0x1ac] sm:$0xf0]  ;;  %v10758_v32 = vor.u32 %v13587_v40, %v10757_v39  ;;  %4757 = vmatpush.bf16.msrb.mxu2 %v11030_v16 }
 0x3bf   :  { %v11013_v43 = vld [vmem:[#allocation5 + $0x2a0] sm:$0xf]  ;;  %v13651_v54 = vld [vmem:[#allocation5 + $0x2ac] sm:$0xf0]  ;;  %v10886_v46 = vor.u32 %v13619_v59, %v10885_v42  ;;  %4770 = vmatpush.bf16.msrb.mxu3 %v11158_v41 }
 0x3c0   :  { %v11141_v44 = vld [vmem:[#allocation5 + $0x3a0] sm:$0xf]  ;;  %v13683_v45 = vld [vmem:[#allocation5 + $0x3ac] sm:$0xf0]  ;;  %v11014_v25 = vor.u32 %v13651_v54, %v11013_v43  ;;  %4732 = vmatpush.bf16.msrb.mxu0 %v10758_v32 }
 0x3c1   :  { %v10741_v48 = vld [vmem:[#allocation5 + $0x80] sm:$0xf]  ;;  %v13583_v50 = vld [vmem:[#allocation5 + $0x8c] sm:$0xf0]  ;;  %v11142_v52 = vor.u32 %v13683_v45, %v11141_v44  ;;  %4745 = vmatpush.bf16.msrb.mxu1 %v10886_v46 }
 0x3c2   :  { %v10869_v51 = vld [vmem:[#allocation5 + $0x180] sm:$0xf]  ;;  %v13615_v55 = vld [vmem:[#allocation5 + $0x18c] sm:$0xf0]  ;;  %v10742_v58 = vor.u32 %v13583_v50, %v10741_v48  ;;  %4758 = vmatpush.bf16.msrb.mxu2 %v11014_v25 }
 0x3c3   :  { %v10997_v56 = vld [vmem:[#allocation5 + $0x280] sm:$0xf]  ;;  %v13647_v0 = vld [vmem:[#allocation5 + $0x28c] sm:$0xf0]  ;;  %v10870_v28 = vor.u32 %v13615_v55, %v10869_v51  ;;  %4771 = vmatpush.bf16.msrb.mxu3 %v11142_v52 }
 0x3c4   :  { %v11125_v57 = vld [vmem:[#allocation5 + $0x380] sm:$0xf]  ;;  %v13679_v18 = vld [vmem:[#allocation5 + $0x38c] sm:$0xf0]  ;;  %v10998_v60 = vor.u32 %v13647_v0, %v10997_v56  ;;  %4733 = vmatpush.bf16.msrb.mxu0 %v10742_v58  ;;  %v13593_v0 = vld [vmem:[#allocation5 + $0xe4] sm:$0xf] }
 0x3c5   :  { %v10725_v61 = vld [vmem:[#allocation5 + $0x60] sm:$0xf]  ;;  %v13579_v37 = vld [vmem:[#allocation5 + $0x6c] sm:$0xf0]  ;;  %v11126_v3 = vor.u32 %v13679_v18, %v11125_v57  ;;  %4746 = vmatpush.bf16.msrb.mxu1 %v10870_v28  ;;  %v10791_v57 = vld [vmem:[#allocation5 + $0xf0] sm:$0xf0] }
 0x3c6   :  { %v10853_v63 = vld [vmem:[#allocation5 + $0x160] sm:$0xf]  ;;  %v13611_v4 = vld [vmem:[#allocation5 + $0x16c] sm:$0xf0]  ;;  %v10726_v10 = vor.u32 %v13579_v37, %v10725_v61  ;;  %4759 = vmatpush.bf16.msrb.mxu2 %v10998_v60  ;;  %v13625_v18 = vld [vmem:[#allocation5 + $0x1e4] sm:$0xf] }
 0x3c7   :  { %v10981_v5 = vld [vmem:[#allocation5 + $0x260] sm:$0xf]  ;;  %v13643_v7 = vld [vmem:[#allocation5 + $0x26c] sm:$0xf0]  ;;  %v10854_v36 = vor.u32 %v13611_v4, %v10853_v63  ;;  %4772 = vmatpush.bf16.msrb.mxu3 %v11126_v3  ;;  %v10919_v28 = vld [vmem:[#allocation5 + $0x1f0] sm:$0xf0] }
 0x3c8   :  { %v11109_v8 = vld [vmem:[#allocation5 + $0x360] sm:$0xf]  ;;  %v13675_v9 = vld [vmem:[#allocation5 + $0x36c] sm:$0xf0]  ;;  %v10982_v33 = vor.u32 %v13643_v7, %v10981_v5  ;;  %4734 = vmatpush.bf16.msrb.mxu0 %v10726_v10  ;;  %v13657_v60 = vld [vmem:[#allocation5 + $0x2e4] sm:$0xf]  ;;  %v10794_v7 = vor.u32 %v13593_v0, %v10791_v57 }
 0x3c9   :  { %v10709_v12 = vld [vmem:[#allocation5 + $0x40] sm:$0xf]  ;;  %v13575_v19 = vld [vmem:[#allocation5 + $0x4c] sm:$0xf0]  ;;  %v11110_v13 = vor.u32 %v13675_v9, %v11109_v8  ;;  %4747 = vmatpush.bf16.msrb.mxu1 %v10854_v36  ;;  %v11047_v61 = vld [vmem:[#allocation5 + $0x2f0] sm:$0xf0]  ;;  %v10922_v8 = vor.u32 %v13625_v18, %v10919_v28 }
 0x3ca   :  { %v10837_v53 = vld [vmem:[#allocation5 + $0x140] sm:$0xf]  ;;  %v13607_v14 = vld [vmem:[#allocation5 + $0x14c] sm:$0xf0]  ;;  %v10710_v30 = vor.u32 %v13575_v19, %v10709_v12  ;;  %4760 = vmatpush.bf16.msrb.mxu2 %v10982_v33  ;;  %v13689_v3 = vld [vmem:[#allocation5 + $0x3e4] sm:$0xf]  ;;  %v11050_v9 = vor.u32 %v13657_v60, %v11047_v61 }
 0x3cb   :  { %v10965_v15 = vld [vmem:[#allocation5 + $0x240] sm:$0xf]  ;;  %v13639_v26 = vld [vmem:[#allocation5 + $0x24c] sm:$0xf0]  ;;  %v10838_v31 = vor.u32 %v13607_v14, %v10837_v53  ;;  %4773 = vmatpush.bf16.msrb.mxu3 %v11110_v13  ;;  %v11175_v4 = vld [vmem:[#allocation5 + $0x3f0] sm:$0xf0] }
 0x3cc   :  { %v11093_v27 = vld [vmem:[#allocation5 + $0x340] sm:$0xf]  ;;  %v13671_v29 = vld [vmem:[#allocation5 + $0x34c] sm:$0xf0]  ;;  %v10966_v17 = vor.u32 %v13639_v26, %v10965_v15  ;;  %4735 = vmatpush.bf16.msrb.mxu0 %v10710_v30  ;;  %v13589_v10 = vld [vmem:[#allocation5 + $0xc4] sm:$0xf]  ;;  %v11178_v12 = vor.u32 %v13689_v3, %v11175_v4 }
 0x3cd   :  { %v10693_v2 = vld [vmem:[#allocation5 + $0x20] sm:$0xf]  ;;  %v13571_v16 = vld [vmem:[#allocation5 + $0x2c] sm:$0xf0]  ;;  %v11094_v39 = vor.u32 %v13671_v29, %v11093_v27  ;;  %4748 = vmatpush.bf16.msrb.mxu1 %v10838_v31  ;;  %v10775_v36 = vld [vmem:[#allocation5 + $0xd0] sm:$0xf0] }
 0x3ce   :  { %v10821_v38 = vld [vmem:[#allocation5 + $0x120] sm:$0xf]  ;;  %v13603_v40 = vld [vmem:[#allocation5 + $0x12c] sm:$0xf0]  ;;  %v10694_v32 = vor.u32 %v13571_v16, %v10693_v2  ;;  %4761 = vmatpush.bf16.msrb.mxu2 %v10966_v17  ;;  %v13621_v33 = vld [vmem:[#allocation5 + $0x1c4] sm:$0xf]  ;;  %v10778_v26 = vor.u32 %v13589_v10, %v10775_v36 }
 0x3cf   :  { %v10949_v41 = vld [vmem:[#allocation5 + $0x220] sm:$0xf]  ;;  %v13635_v42 = vld [vmem:[#allocation5 + $0x22c] sm:$0xf0]  ;;  %v10822_v45 = vor.u32 %v13603_v40, %v10821_v38  ;;  %4774 = vmatpush.bf16.msrb.mxu3 %v11094_v39  ;;  %v10903_v19 = vld [vmem:[#allocation5 + $0x1d0] sm:$0xf0] }
 0x3d0   :  { %v11077_v59 = vld [vmem:[#allocation5 + $0x320] sm:$0xf]  ;;  %v13667_v43 = vld [vmem:[#allocation5 + $0x32c] sm:$0xf0]  ;;  %v10950_v46 = vor.u32 %v13635_v42, %v10949_v41  ;;  %4736 = vmatpush.bf16.msrb.mxu0 %v10694_v32  ;;  %v13653_v53 = vld [vmem:[#allocation5 + $0x2c4] sm:$0xf]  ;;  %v10906_v27 = vor.u32 %v13621_v33, %v10903_v19 }
 0x3d1   :  { %v10677_v54 = vld [vmem:[#allocation5] sm:$0xf]  ;;  %v13567_v44 = vld [vmem:[#allocation5 + $0xc] sm:$0xf0]  ;;  %v11078_v51 = vor.u32 %v13667_v43, %v11077_v59  ;;  %4749 = vmatpush.bf16.msrb.mxu1 %v10822_v45  ;;  %v11031_v13 = vld [vmem:[#allocation5 + $0x2d0] sm:$0xf0] }
 0x3d2   :  { %v10805_v25 = vld [vmem:[#allocation5 + $0x100] sm:$0xf]  ;;  %v13599_v48 = vld [vmem:[#allocation5 + $0x10c] sm:$0xf0]  ;;  %v10678_v58 = vor.u32 %v13567_v44, %v10677_v54  ;;  %4762 = vmatpush.bf16.msrb.mxu2 %v10950_v46  ;;  %v13685_v14 = vld [vmem:[#allocation5 + $0x3c4] sm:$0xf]  ;;  %v11034_v29 = vor.u32 %v13653_v53, %v11031_v13 }
 0x3d3   :  { %v10933_v50 = vld [vmem:[#allocation5 + $0x200] sm:$0xf]  ;;  %v13631_v52 = vld [vmem:[#allocation5 + $0x20c] sm:$0xf0]  ;;  %v10806_v37 = vor.u32 %v13599_v48, %v10805_v25  ;;  %4775 = vmatpush.bf16.msrb.mxu3 %v11078_v51  ;;  %v11159_v15 = vld [vmem:[#allocation5 + $0x3d0] sm:$0xf0] }
 0x3d4   :  { %v11061_v55 = vld [vmem:[#allocation5 + $0x300] sm:$0xf]  ;;  %v13663_v56 = vld [vmem:[#allocation5 + $0x30c] sm:$0xf0]  ;;  %v10934_v63 = vor.u32 %v13631_v52, %v10933_v50  ;;  %4737 = vmatpush.bf16.msrb.mxu0 %v10678_v58  ;;  %v13585_v30 = vld [vmem:[#allocation5 + $0xa4] sm:$0xf]  ;;  %v11162_v2 = vor.u32 %v13685_v14, %v11159_v15 }
 0x3d5   :  { %v11062_v5 = vor.u32 %v13663_v56, %v11061_v55  ;;  %4750 = vmatpush.bf16.msrb.mxu1 %v10806_v37  ;;  %v10759_v31 = vld [vmem:[#allocation5 + $0xb0] sm:$0xf0]  ;;  %v13617_v17 = vld [vmem:[#allocation5 + $0x1a4] sm:$0xf] }
 0x3d6   :  { %4763 = vmatpush.bf16.msrb.mxu2 %v10934_v63  ;;  %v10887_v16 = vld [vmem:[#allocation5 + $0x1b0] sm:$0xf0]  ;;  %v13649_v38 = vld [vmem:[#allocation5 + $0x2a4] sm:$0xf]  ;;  %v10762_v42 = vor.u32 %v13585_v30, %v10759_v31 }
 0x3d7   :  { %4776 = vmatpush.bf16.msrb.mxu3 %v11062_v5  ;;  %v11015_v39 = vld [vmem:[#allocation5 + $0x2b0] sm:$0xf0]  ;;  %v13681_v40 = vld [vmem:[#allocation5 + $0x3a4] sm:$0xf]  ;;  %4738 = vmatmul.bf16.vlgmr.msrb.gmra.mxu0 %v14782_v6  ;;  %v10890_v59 = vor.u32 %v13617_v17, %v10887_v16 }
 0x3d8   :  { %4782 = vmatpush.bf16.msra.mxu0 %v10794_v7  ;;  %v11143_v41 = vld [vmem:[#allocation5 + $0x3b0] sm:$0xf0]  ;;  %4751 = vmatmul.bf16.vlgmr.msrb.gmra.mxu1 %v14790_v35  ;;  %v11018_v43 = vor.u32 %v13649_v38, %v11015_v39  ;;  %v13581_v32 = vld [vmem:[#allocation5 + $0x84] sm:$0xf] }
 0x3d9   :  { %4795 = vmatpush.bf16.msra.mxu1 %v10922_v8  ;;  %4764 = vmatmul.bf16.vlgmr.msrb.gmra.mxu2 %v14798_v49  ;;  %v10743_v54 = vld [vmem:[#allocation5 + $0x90] sm:$0xf0]  ;;  %v13613_v44 = vld [vmem:[#allocation5 + $0x184] sm:$0xf]  ;;  %v11146_v45 = vor.u32 %v13681_v40, %v11143_v41 }
 0x3da   :  { %4808 = vmatpush.bf16.msra.mxu2 %v11050_v9  ;;  %4777 = vmatmul.bf16.vlgmr.msrb.gmra.mxu3 %v14806_v1  ;;  %v10871_v46 = vld [vmem:[#allocation5 + $0x190] sm:$0xf0]  ;;  %v13645_v25 = vld [vmem:[#allocation5 + $0x284] sm:$0xf]  ;;  %v10746_v52 = vor.u32 %v13581_v32, %v10743_v54 }
 0x3db   :  { %4821 = vmatpush.bf16.msra.mxu3 %v11178_v12  ;;  %v10999_v48 = vld [vmem:[#allocation5 + $0x290] sm:$0xf0]  ;;  %v13677_v50 = vld [vmem:[#allocation5 + $0x384] sm:$0xf]  ;;  %v10874_v55 = vor.u32 %v13613_v44, %v10871_v46 }
 0x3dc   :  { %4783 = vmatpush.bf16.msra.mxu0 %v10778_v26  ;;  %v11127_v51 = vld [vmem:[#allocation5 + $0x390] sm:$0xf0]  ;;  %v11002_v56 = vor.u32 %v13645_v25, %v10999_v48  ;;  %v13577_v0 = vld [vmem:[#allocation5 + $0x64] sm:$0xf]  ;;  %v10797_v48 = vld [vmem:[#allocation5 + $0xe8] sm:$0xf] }
 0x3dd   :  { %4796 = vmatpush.bf16.msra.mxu1 %v10906_v27  ;;  %v10727_v57 = vld [vmem:[#allocation5 + $0x70] sm:$0xf0]  ;;  %v13609_v18 = vld [vmem:[#allocation5 + $0x164] sm:$0xf]  ;;  %v11130_v58 = vor.u32 %v13677_v50, %v11127_v51  ;;  %v13596_v50 = vld [vmem:[#allocation5 + $0xf4] sm:$0xf0] }
 0x3de   :  { %4809 = vmatpush.bf16.msra.mxu2 %v11034_v29  ;;  %v10855_v28 = vld [vmem:[#allocation5 + $0x170] sm:$0xf0]  ;;  %v13641_v60 = vld [vmem:[#allocation5 + $0x264] sm:$0xf]  ;;  %v10730_v3 = vor.u32 %v13577_v0, %v10727_v57  ;;  %v10925_v51 = vld [vmem:[#allocation5 + $0x1e8] sm:$0xf] }
 0x3df   :  { %4822 = vmatpush.bf16.msra.mxu3 %v11162_v2  ;;  %v10983_v61 = vld [vmem:[#allocation5 + $0x270] sm:$0xf0]  ;;  %v13673_v37 = vld [vmem:[#allocation5 + $0x364] sm:$0xf]  ;;  %v10858_v4 = vor.u32 %v13609_v18, %v10855_v28  ;;  %v13660_v0 = vld [vmem:[#allocation5 + $0x2f4] sm:$0xf0] }
 0x3e0   :  { %4784 = vmatpush.bf16.msra.mxu0 %v10762_v42  ;;  %v11111_v63 = vld [vmem:[#allocation5 + $0x370] sm:$0xf0]  ;;  %v10986_v5 = vor.u32 %v13641_v60, %v10983_v61  ;;  %v13573_v7 = vld [vmem:[#allocation5 + $0x44] sm:$0xf]  ;;  %v13692_v28 = vld [vmem:[#allocation5 + $0x3f4] sm:$0xf0]  ;;  %v10798_v61 = vor.u32 %v13596_v50, %v10797_v48 }
 0x3e1   :  { %4797 = vmatpush.bf16.msra.mxu1 %v10890_v59  ;;  %v10711_v8 = vld [vmem:[#allocation5 + $0x50] sm:$0xf0]  ;;  %v13605_v9 = vld [vmem:[#allocation5 + $0x144] sm:$0xf]  ;;  %v11114_v10 = vor.u32 %v13673_v37, %v11111_v63  ;;  %v10733_v48 = vld [vmem:[#allocation5 + $0x68] sm:$0xf] }
 0x3e2   :  { %4810 = vmatpush.bf16.msra.mxu2 %v11018_v43  ;;  %v10839_v36 = vld [vmem:[#allocation5 + $0x150] sm:$0xf0]  ;;  %v13637_v33 = vld [vmem:[#allocation5 + $0x244] sm:$0xf]  ;;  %v10714_v13 = vor.u32 %v13573_v7, %v10711_v8  ;;  %v13624_v8 = vld [vmem:[#allocation5 + $0x1d4] sm:$0xf0] }
 0x3e3   :  { %4823 = vmatpush.bf16.msra.mxu3 %v11146_v45  ;;  %v10967_v12 = vld [vmem:[#allocation5 + $0x250] sm:$0xf0]  ;;  %v13669_v19 = vld [vmem:[#allocation5 + $0x344] sm:$0xf]  ;;  %v10842_v14 = vor.u32 %v13605_v9, %v10839_v36  ;;  %v11037_v9 = vld [vmem:[#allocation5 + $0x2c8] sm:$0xf] }
 0x3e4   :  { %4785 = vmatpush.bf16.msra.mxu0 %v10746_v52  ;;  %v11095_v53 = vld [vmem:[#allocation5 + $0x350] sm:$0xf0]  ;;  %v10970_v15 = vor.u32 %v13637_v33, %v10967_v12  ;;  %v13569_v26 = vld [vmem:[#allocation5 + $0x24] sm:$0xf]  ;;  %v11165_v36 = vld [vmem:[#allocation5 + $0x3c8] sm:$0xf] }
 0x3e5   :  { %4798 = vmatpush.bf16.msra.mxu1 %v10874_v55  ;;  %v10695_v27 = vld [vmem:[#allocation5 + $0x30] sm:$0xf0]  ;;  %v13601_v29 = vld [vmem:[#allocation5 + $0x124] sm:$0xf]  ;;  %v11098_v30 = vor.u32 %v13669_v19, %v11095_v53  ;;  %v13628_v55 = vld [vmem:[#allocation5 + $0x1f4] sm:$0xf0] }
 0x3e6   :  { %4811 = vmatpush.bf16.msra.mxu2 %v11002_v56  ;;  %v10823_v31 = vld [vmem:[#allocation5 + $0x130] sm:$0xf0]  ;;  %v13633_v17 = vld [vmem:[#allocation5 + $0x224] sm:$0xf]  ;;  %v10698_v39 = vor.u32 %v13569_v26, %v10695_v27  ;;  %v11053_v56 = vld [vmem:[#allocation5 + $0x2e8] sm:$0xf]  ;;  %v10926_v37 = vor.u32 %v13628_v55, %v10925_v51 }
 0x3e7   :  { %4824 = vmatpush.bf16.msra.mxu3 %v11130_v58  ;;  %v10951_v2 = vld [vmem:[#allocation5 + $0x230] sm:$0xf0]  ;;  %v13665_v16 = vld [vmem:[#allocation5 + $0x324] sm:$0xf]  ;;  %v10826_v42 = vor.u32 %v13601_v29, %v10823_v31  ;;  %v11181_v58 = vld [vmem:[#allocation5 + $0x3e8] sm:$0xf]  ;;  %v11054_v63 = vor.u32 %v13660_v0, %v11053_v56 }
 0x3e8   :  { %4786 = vmatpush.bf16.msra.mxu0 %v10730_v3  ;;  %v11079_v38 = vld [vmem:[#allocation5 + $0x330] sm:$0xf0]  ;;  %v13565_v40 = vld [vmem:[#allocation5 + $0x4] sm:$0xf]  ;;  %v10954_v59 = vor.u32 %v13633_v17, %v10951_v2  ;;  %v10781_v3 = vld [vmem:[#allocation5 + $0xc8] sm:$0xf]  ;;  %v11182_v7 = vor.u32 %v13692_v28, %v11181_v58 }
 0x3e9   :  { %4799 = vmatpush.bf16.msra.mxu1 %v10858_v4  ;;  %v10679_v41 = vld [vmem:[#allocation5 + $0x10] sm:$0xf0]  ;;  %v13597_v43 = vld [vmem:[#allocation5 + $0x104] sm:$0xf]  ;;  %v11082_v44 = vor.u32 %v13665_v16, %v11079_v38  ;;  %v13592_v4 = vld [vmem:[#allocation5 + $0xd4] sm:$0xf0] }
 0x3ea   :  { %4812 = vmatpush.bf16.msra.mxu2 %v10986_v5  ;;  %v10807_v32 = vld [vmem:[#allocation5 + $0x110] sm:$0xf0]  ;;  %v13629_v54 = vld [vmem:[#allocation5 + $0x204] sm:$0xf]  ;;  %v10682_v52 = vor.u32 %v13565_v40, %v10679_v41  ;;  %v10909_v5 = vld [vmem:[#allocation5 + $0x1c8] sm:$0xf]  ;;  %v10782_v12 = vor.u32 %v13592_v4, %v10781_v3 }
 0x3eb   :  { %4825 = vmatpush.bf16.msra.mxu3 %v11114_v10  ;;  %v10935_v45 = vld [vmem:[#allocation5 + $0x210] sm:$0xf0]  ;;  %v13661_v46 = vld [vmem:[#allocation5 + $0x304] sm:$0xf]  ;;  %v10810_v57 = vor.u32 %v13597_v43, %v10807_v32  ;;  %v13656_v10 = vld [vmem:[#allocation5 + $0x2d4] sm:$0xf0]  ;;  %v10910_v19 = vor.u32 %v13624_v8, %v10909_v5 }
 0x3ec   :  { %4787 = vmatpush.bf16.msra.mxu0 %v10714_v13  ;;  %v11063_v25 = vld [vmem:[#allocation5 + $0x310] sm:$0xf0]  ;;  %v10938_v18 = vor.u32 %v13629_v54, %v10935_v45  ;;  %v13688_v33 = vld [vmem:[#allocation5 + $0x3d4] sm:$0xf0]  ;;  %v11038_v53 = vor.u32 %v13656_v10, %v11037_v9  ;;  %v10765_v13 = vld [vmem:[#allocation5 + $0xa8] sm:$0xf] }
 0x3ed   :  { %4800 = vmatpush.bf16.msra.mxu1 %v10842_v14  ;;  %v11066_v60 = vor.u32 %v13661_v46, %v11063_v25  ;;  %v13588_v14 = vld [vmem:[#allocation5 + $0xb4] sm:$0xf0]  ;;  %v11166_v26 = vor.u32 %v13688_v33, %v11165_v36  ;;  %v11021_v29 = vld [vmem:[#allocation5 + $0x2a8] sm:$0xf] }
 0x3ee   :  { %4813 = vmatpush.bf16.msra.mxu2 %v10970_v15  ;;  %v10893_v15 = vld [vmem:[#allocation5 + $0x1a8] sm:$0xf]  ;;  %v13620_v27 = vld [vmem:[#allocation5 + $0x1b4] sm:$0xf0]  ;;  %v10766_v2 = vor.u32 %v13588_v14, %v10765_v13 }
 0x3ef   :  { %4826 = vmatpush.bf16.msra.mxu3 %v11098_v30  ;;  %v13652_v30 = vld [vmem:[#allocation5 + $0x2b4] sm:$0xf0]  ;;  %v11149_v31 = vld [vmem:[#allocation5 + $0x3a8] sm:$0xf]  ;;  %v10894_v16 = vor.u32 %v13620_v27, %v10893_v15 }
 0x3f0   :  { %4788 = vmatpush.bf16.msra.mxu0 %v10698_v39  ;;  %v13684_v17 = vld [vmem:[#allocation5 + $0x3b4] sm:$0xf0]  ;;  %v11022_v38 = vor.u32 %v13652_v30, %v11021_v29  ;;  %v10749_v39 = vld [vmem:[#allocation5 + $0x88] sm:$0xf] }
 0x3f1   :  { %4801 = vmatpush.bf16.msra.mxu1 %v10826_v42  ;;  %v13584_v40 = vld [vmem:[#allocation5 + $0x94] sm:$0xf0]  ;;  %v10877_v41 = vld [vmem:[#allocation5 + $0x188] sm:$0xf]  ;;  %v11150_v42 = vor.u32 %v13684_v17, %v11149_v31 }
 0x3f2   :  { %4814 = vmatpush.bf16.msra.mxu2 %v10954_v59  ;;  %v13616_v59 = vld [vmem:[#allocation5 + $0x194] sm:$0xf0]  ;;  %v11005_v43 = vld [vmem:[#allocation5 + $0x288] sm:$0xf]  ;;  %v10750_v45 = vor.u32 %v13584_v40, %v10749_v39 }
 0x3f3   :  { %4827 = vmatpush.bf16.msra.mxu3 %v11082_v44  ;;  %v13648_v32 = vld [vmem:[#allocation5 + $0x294] sm:$0xf0]  ;;  %v11133_v54 = vld [vmem:[#allocation5 + $0x388] sm:$0xf]  ;;  %v10878_v46 = vor.u32 %v13616_v59, %v10877_v41 }
 0x3f4   :  { %4789 = vmatpush.bf16.msra.mxu0 %v10682_v52  ;;  %v13680_v44 = vld [vmem:[#allocation5 + $0x394] sm:$0xf0]  ;;  %v11006_v25 = vor.u32 %v13648_v32, %v11005_v43  ;;  %v10861_v51 = vld [vmem:[#allocation5 + $0x168] sm:$0xf]  ;;  %v13594_v32 = vld [vmem:[#allocation5 + $0xec] sm:$0xf] }
 0x3f5   :  { %4802 = vmatpush.bf16.msra.mxu1 %v10810_v57  ;;  %v13580_v50 = vld [vmem:[#allocation5 + $0x74] sm:$0xf0]  ;;  %v11134_v52 = vor.u32 %v13680_v44, %v11133_v54  ;;  %v10989_v56 = vld [vmem:[#allocation5 + $0x268] sm:$0xf]  ;;  %v10799_v54 = vld [vmem:[#allocation5 + $0xf8] sm:$0xf0] }
 0x3f6   :  { %4815 = vmatpush.bf16.msra.mxu2 %v10938_v18  ;;  %v13612_v55 = vld [vmem:[#allocation5 + $0x174] sm:$0xf0]  ;;  %v11117_v57 = vld [vmem:[#allocation5 + $0x368] sm:$0xf]  ;;  %v10734_v58 = vor.u32 %v13580_v50, %v10733_v48  ;;  %v13626_v44 = vld [vmem:[#allocation5 + $0x1ec] sm:$0xf] }
 0x3f7   :  { %4828 = vmatpush.bf16.msra.mxu3 %v11066_v60  ;;  %4790 = vmatmul.bf16.vlgmr.msra.gmra.mxu0 %v14782_v6  ;;  %v13644_v0 = vld [vmem:[#allocation5 + $0x274] sm:$0xf0]  ;;  %v10862_v28 = vor.u32 %v13612_v55, %v10861_v51  ;;  %v10973_v5 = vld [vmem:[#allocation5 + $0x248] sm:$0xf]  ;;  %v11055_v48 = vld [vmem:[#allocation5 + $0x2f8] sm:$0xf0] }
 0x3f8   :  { %4834 = vmatpush.bf16.msrb.mxu0 %v10798_v61  ;;  %4803 = vmatmul.bf16.vlgmr.msra.gmra.mxu1 %v14790_v35  ;;  %v13676_v18 = vld [vmem:[#allocation5 + $0x374] sm:$0xf0]  ;;  %v10990_v60 = vor.u32 %v13644_v0, %v10989_v56  ;;  %v10717_v61 = vld [vmem:[#allocation5 + $0x48] sm:$0xf]  ;;  %v11183_v55 = vld [vmem:[#allocation5 + $0x3f8] sm:$0xf0]  ;;  %v10802_v0 = vor.u32 %v13594_v32, %v10799_v54 }
 0x3f9   :  { %4847 = vmatpush.bf16.msrb.mxu1 %v10926_v37  ;;  %4816 = vmatmul.bf16.vlgmr.msra.gmra.mxu2 %v14798_v49  ;;  %v13576_v37 = vld [vmem:[#allocation5 + $0x54] sm:$0xf0]  ;;  %v11118_v3 = vor.u32 %v13676_v18, %v11117_v57  ;;  %v11101_v8 = vld [vmem:[#allocation5 + $0x348] sm:$0xf]  ;;  %v13578_v32 = vld [vmem:[#allocation5 + $0x6c] sm:$0xf] }
 0x3fa   :  { %4860 = vmatpush.bf16.msrb.mxu2 %v11054_v63  ;;  %4829 = vmatmul.bf16.vlgmr.msra.gmra.mxu3 %v14806_v1  ;;  %v10845_v63 = vld [vmem:[#allocation5 + $0x148] sm:$0xf]  ;;  %v13608_v4 = vld [vmem:[#allocation5 + $0x154] sm:$0xf0]  ;;  %v10718_v10 = vor.u32 %v13576_v37, %v10717_v61  ;;  %v10911_v37 = vld [vmem:[#allocation5 + $0x1d8] sm:$0xf0] }
 0x3fb   :  { %4873 = vmatpush.bf16.msrb.mxu3 %v11182_v7  ;;  %v13640_v7 = vld [vmem:[#allocation5 + $0x254] sm:$0xf0]  ;;  %v10846_v36 = vor.u32 %v13608_v4, %v10845_v63  ;;  %v10957_v15 = vld [vmem:[#allocation5 + $0x228] sm:$0xf]  ;;  %v13654_v63 = vld [vmem:[#allocation5 + $0x2cc] sm:$0xf] }
 0x3fc   :  { %4835 = vmatpush.bf16.msrb.mxu0 %v10782_v12  ;;  %v13672_v9 = vld [vmem:[#allocation5 + $0x354] sm:$0xf0]  ;;  %v10974_v33 = vor.u32 %v13640_v7, %v10973_v5  ;;  %v10701_v12 = vld [vmem:[#allocation5 + $0x28] sm:$0xf]  ;;  %v13686_v4 = vld [vmem:[#allocation5 + $0x3cc] sm:$0xf] }
 0x3fd   :  { %4848 = vmatpush.bf16.msrb.mxu1 %v10910_v19  ;;  %v13572_v19 = vld [vmem:[#allocation5 + $0x34] sm:$0xf0]  ;;  %v11102_v13 = vor.u32 %v13672_v9, %v11101_v8  ;;  %v11085_v27 = vld [vmem:[#allocation5 + $0x328] sm:$0xf]  ;;  %v11167_v5 = vld [vmem:[#allocation5 + $0x3d8] sm:$0xf0] }
 0x3fe   :  { %4861 = vmatpush.bf16.msrb.mxu2 %v11038_v53  ;;  %v10829_v53 = vld [vmem:[#allocation5 + $0x128] sm:$0xf]  ;;  %v13604_v14 = vld [vmem:[#allocation5 + $0x134] sm:$0xf0]  ;;  %v10702_v30 = vor.u32 %v13572_v19, %v10701_v12  ;;  %v11170_v12 = vor.u32 %v13686_v4, %v11167_v5  ;;  %v10895_v19 = vld [vmem:[#allocation5 + $0x1b8] sm:$0xf0] }
 0x3ff   :  { %4874 = vmatpush.bf16.msrb.mxu3 %v11166_v26  ;;  %v13636_v26 = vld [vmem:[#allocation5 + $0x234] sm:$0xf0]  ;;  %v10685_v31 = vld [vmem:[#allocation5 + $0x8] sm:$0xf]  ;;  %v10735_v54 = vld [vmem:[#allocation5 + $0x78] sm:$0xf0] }
 0x400   :  { %4836 = vmatpush.bf16.msrb.mxu0 %v10766_v2  ;;  %v13668_v29 = vld [vmem:[#allocation5 + $0x334] sm:$0xf0]  ;;  %v10830_v2 = vor.u32 %v13604_v14, %v10829_v53  ;;  %v10941_v40 = vld [vmem:[#allocation5 + $0x208] sm:$0xf]  ;;  %v13650_v53 = vld [vmem:[#allocation5 + $0x2ac] sm:$0xf] }
 0x401   :  { %4849 = vmatpush.bf16.msrb.mxu1 %v10894_v16  ;;  %v13568_v17 = vld [vmem:[#allocation5 + $0x14] sm:$0xf0]  ;;  %v10958_v16 = vor.u32 %v13636_v26, %v10957_v15  ;;  %v11086_v41 = vor.u32 %v13668_v29, %v11085_v27  ;;  %v11069_v59 = vld [vmem:[#allocation5 + $0x308] sm:$0xf]  ;;  %v13682_v14 = vld [vmem:[#allocation5 + $0x3ac] sm:$0xf] }
 0x402   :  { %4862 = vmatpush.bf16.msrb.mxu2 %v11022_v38  ;;  %v10813_v38 = vld [vmem:[#allocation5 + $0x108] sm:$0xf]  ;;  %v13600_v39 = vld [vmem:[#allocation5 + $0x114] sm:$0xf0]  ;;  %v11151_v15 = vld [vmem:[#allocation5 + $0x3b8] sm:$0xf0] }
 0x403   :  { %4875 = vmatpush.bf16.msrb.mxu3 %v11150_v42  ;;  %v13632_v42 = vld [vmem:[#allocation5 + $0x214] sm:$0xf0]  ;;  %v10814_v50 = vor.u32 %v13600_v39, %v10813_v38  ;;  %v13646_v38 = vld [vmem:[#allocation5 + $0x28c] sm:$0xf]  ;;  %v11007_v39 = vld [vmem:[#allocation5 + $0x298] sm:$0xf0] }
 0x404   :  { %4837 = vmatpush.bf16.msrb.mxu0 %v10750_v45  ;;  %v13664_v43 = vld [vmem:[#allocation5 + $0x314] sm:$0xf0]  ;;  %v10686_v45 = vor.u32 %v13568_v17, %v10685_v31  ;;  %v10942_v51 = vor.u32 %v13632_v42, %v10941_v40  ;;  %v10751_v31 = vld [vmem:[#allocation5 + $0x98] sm:$0xf0]  ;;  %v13614_v17 = vld [vmem:[#allocation5 + $0x18c] sm:$0xf] }
 0x405   :  { %4850 = vmatpush.bf16.msrb.mxu1 %v10878_v46  ;;  %v10927_v46 = vld [vmem:[#allocation5 + $0x1f8] sm:$0xf0]  ;;  %v11070_v56 = vor.u32 %v13664_v43, %v11069_v59  ;;  %v13678_v40 = vld [vmem:[#allocation5 + $0x38c] sm:$0xf]  ;;  %v11010_v43 = vor.u32 %v13646_v38, %v11007_v39 }
 0x406   :  { %4863 = vmatpush.bf16.msrb.mxu2 %v11006_v25  ;;  %v13658_v25 = vld [vmem:[#allocation5 + $0x2ec] sm:$0xf]  ;;  %v10930_v57 = vor.u32 %v13626_v44, %v10927_v46  ;;  %v10863_v46 = vld [vmem:[#allocation5 + $0x178] sm:$0xf0] }
 0x407   :  { %4876 = vmatpush.bf16.msrb.mxu3 %v11134_v52  ;;  %v13690_v52 = vld [vmem:[#allocation5 + $0x3ec] sm:$0xf]  ;;  %v11058_v18 = vor.u32 %v13658_v25, %v11055_v48  ;;  %v10991_v48 = vld [vmem:[#allocation5 + $0x278] sm:$0xf0] }
 0x408   :  { %4838 = vmatpush.bf16.msrb.mxu0 %v10734_v58  ;;  %v13590_v58 = vld [vmem:[#allocation5 + $0xcc] sm:$0xf]  ;;  %v11186_v61 = vor.u32 %v13690_v52, %v11183_v55  ;;  %v10738_v52 = vor.u32 %v13578_v32, %v10735_v54  ;;  %v11071_v38 = vld [vmem:[#allocation5 + $0x318] sm:$0xf0] }
 0x409   :  { %4851 = vmatpush.bf16.msrb.mxu1 %v10862_v28  ;;  %v10783_v28 = vld [vmem:[#allocation5 + $0xd8] sm:$0xf0]  ;;  %v13610_v44 = vld [vmem:[#allocation5 + $0x16c] sm:$0xf] }
 0x40a   :  { %4864 = vmatpush.bf16.msrb.mxu2 %v10990_v60  ;;  %v13622_v60 = vld [vmem:[#allocation5 + $0x1cc] sm:$0xf]  ;;  %v10786_v7 = vor.u32 %v13590_v58, %v10783_v28  ;;  %v10866_v55 = vor.u32 %v13610_v44, %v10863_v46  ;;  %v10847_v28 = vld [vmem:[#allocation5 + $0x158] sm:$0xf0] }
 0x40b   :  { %4877 = vmatpush.bf16.msrb.mxu3 %v11118_v3  ;;  %v11039_v3 = vld [vmem:[#allocation5 + $0x2d8] sm:$0xf0]  ;;  %v10914_v8 = vor.u32 %v13622_v60, %v10911_v37  ;;  %v13642_v25 = vld [vmem:[#allocation5 + $0x26c] sm:$0xf] }
 0x40c   :  { %4839 = vmatpush.bf16.msrb.mxu0 %v10718_v10  ;;  %v11042_v9 = vor.u32 %v13654_v63, %v11039_v3  ;;  %v13586_v10 = vld [vmem:[#allocation5 + $0xac] sm:$0xf]  ;;  %v11103_v63 = vld [vmem:[#allocation5 + $0x358] sm:$0xf0] }
 0x40d   :  { %4852 = vmatpush.bf16.msrb.mxu1 %v10846_v36  ;;  %v10767_v36 = vld [vmem:[#allocation5 + $0xb8] sm:$0xf0]  ;;  %v13638_v60 = vld [vmem:[#allocation5 + $0x24c] sm:$0xf] }
 0x40e   :  { %4865 = vmatpush.bf16.msrb.mxu2 %v10974_v33  ;;  %v13618_v33 = vld [vmem:[#allocation5 + $0x1ac] sm:$0xf]  ;;  %v10770_v26 = vor.u32 %v13586_v10, %v10767_v36  ;;  %v10831_v36 = vld [vmem:[#allocation5 + $0x138] sm:$0xf0] }
 0x40f   :  { %4878 = vmatpush.bf16.msrb.mxu3 %v11102_v13  ;;  %v11023_v13 = vld [vmem:[#allocation5 + $0x2b8] sm:$0xf0]  ;;  %v10898_v27 = vor.u32 %v13618_v33, %v10895_v19  ;;  %v13670_v37 = vld [vmem:[#allocation5 + $0x34c] sm:$0xf] }
 0x410   :  { %4840 = vmatpush.bf16.msrb.mxu0 %v10702_v30  ;;  %v11026_v29 = vor.u32 %v13650_v53, %v11023_v13  ;;  %v13582_v30 = vld [vmem:[#allocation5 + $0x8c] sm:$0xf]  ;;  %v11106_v10 = vor.u32 %v13670_v37, %v11103_v63  ;;  %v11087_v53 = vld [vmem:[#allocation5 + $0x338] sm:$0xf0] }
 0x411   :  { %4853 = vmatpush.bf16.msrb.mxu1 %v10830_v2  ;;  %v11154_v2 = vor.u32 %v13682_v14, %v11151_v15  ;;  %v10754_v42 = vor.u32 %v13582_v30, %v10751_v31  ;;  %v13634_v33 = vld [vmem:[#allocation5 + $0x22c] sm:$0xf]  ;;  %v10815_v31 = vld [vmem:[#allocation5 + $0x118] sm:$0xf0] }
 0x412   :  { %4866 = vmatpush.bf16.msrb.mxu2 %v10958_v16  ;;  %v10879_v16 = vld [vmem:[#allocation5 + $0x198] sm:$0xf0]  ;;  %v13666_v19 = vld [vmem:[#allocation5 + $0x32c] sm:$0xf] }
 0x413   :  { %4879 = vmatpush.bf16.msrb.mxu3 %v11086_v41  ;;  %v11135_v41 = vld [vmem:[#allocation5 + $0x398] sm:$0xf0]  ;;  %v10882_v59 = vor.u32 %v13614_v17, %v10879_v16  ;;  %v11090_v30 = vor.u32 %v13666_v19, %v11087_v53  ;;  %v13630_v17 = vld [vmem:[#allocation5 + $0x20c] sm:$0xf] }
 0x414   :  { %4841 = vmatpush.bf16.msrb.mxu0 %v10686_v45  ;;  %v11138_v45 = vor.u32 %v13678_v40, %v11135_v41  ;;  %v13662_v16 = vld [vmem:[#allocation5 + $0x30c] sm:$0xf] }
 0x415   :  { %4854 = vmatpush.bf16.msrb.mxu1 %v10814_v50  ;;  %v13674_v50 = vld [vmem:[#allocation5 + $0x36c] sm:$0xf] }
 0x416   :  { %4867 = vmatpush.bf16.msrb.mxu2 %v10942_v51  ;;  %v11119_v51 = vld [vmem:[#allocation5 + $0x378] sm:$0xf0] }
 0x417   :  { %4880 = vmatpush.bf16.msrb.mxu3 %v11070_v56  ;;  %4842 = vmatmul.bf16.vlgmr.msrb.gmra.mxu0 %v14782_v6  ;;  %v10994_v56 = vor.u32 %v13642_v25, %v10991_v48  ;;  %v11122_v58 = vor.u32 %v13674_v50, %v11119_v51 }
 0x418   :  { %4886 = vmatpush.bf16.msra.mxu0 %v10802_v0  ;;  %4855 = vmatmul.bf16.vlgmr.msrb.gmra.mxu1 %v14790_v35  ;;  %v13574_v0 = vld [vmem:[#allocation5 + $0x4c] sm:$0xf] }
 0x419   :  { %4899 = vmatpush.bf16.msra.mxu1 %v10930_v57  ;;  %4868 = vmatmul.bf16.vlgmr.msrb.gmra.mxu2 %v14798_v49  ;;  %v10719_v57 = vld [vmem:[#allocation5 + $0x58] sm:$0xf0] }
 0x41a   :  { %4912 = vmatpush.bf16.msra.mxu2 %v11058_v18  ;;  %4881 = vmatmul.bf16.vlgmr.msrb.gmra.mxu3 %v14806_v1  ;;  %v13606_v18 = vld [vmem:[#allocation5 + $0x14c] sm:$0xf]  ;;  %v10722_v3 = vor.u32 %v13574_v0, %v10719_v57 }
 0x41b   :  { %4925 = vmatpush.bf16.msra.mxu3 %v11186_v61  ;;  %v10975_v61 = vld [vmem:[#allocation5 + $0x258] sm:$0xf0]  ;;  %v10850_v4 = vor.u32 %v13606_v18, %v10847_v28 }
 0x41c   :  { %4887 = vmatpush.bf16.msra.mxu0 %v10786_v7  ;;  %v10978_v5 = vor.u32 %v13638_v60, %v10975_v61  ;;  %v13570_v7 = vld [vmem:[#allocation5 + $0x2c] sm:$0xf] }
 0x41d   :  { %4900 = vmatpush.bf16.msra.mxu1 %v10914_v8  ;;  %v10703_v8 = vld [vmem:[#allocation5 + $0x38] sm:$0xf0] }
 0x41e   :  { %4913 = vmatpush.bf16.msra.mxu2 %v11042_v9  ;;  %v13602_v9 = vld [vmem:[#allocation5 + $0x12c] sm:$0xf]  ;;  %v10706_v13 = vor.u32 %v13570_v7, %v10703_v8  ;;  %v4088_v7 = vperm.slane %v14646_v22, 3 }
 0x41f   :  { %4926 = vmatpush.bf16.msra.mxu3 %v11170_v12  ;;  %v10959_v12 = vld [vmem:[#allocation5 + $0x238] sm:$0xf0]  ;;  %v10834_v14 = vor.u32 %v13602_v9, %v10831_v36 }
 0x420   :  { %4888 = vmatpush.bf16.msra.mxu0 %v10770_v26  ;;  %v10962_v15 = vor.u32 %v13634_v33, %v10959_v12  ;;  %v13566_v26 = vld [vmem:[#allocation5 + $0xc] sm:$0xf] }
 0x421   :  { %4901 = vmatpush.bf16.msra.mxu1 %v10898_v27  ;;  %v10687_v27 = vld [vmem:[#allocation5 + $0x18] sm:$0xf0] }
 0x422   :  { %4914 = vmatpush.bf16.msra.mxu2 %v11026_v29  ;;  %v13598_v29 = vld [vmem:[#allocation5 + $0x10c] sm:$0xf]  ;;  %v10690_v39 = vor.u32 %v13566_v26, %v10687_v27 }
 0x423   :  { %4927 = vmatpush.bf16.msra.mxu3 %v11154_v2  ;;  %v10943_v2 = vld [vmem:[#allocation5 + $0x218] sm:$0xf0]  ;;  %v10818_v40 = vor.u32 %v13598_v29, %v10815_v31 }
 0x424   :  { %4889 = vmatpush.bf16.msra.mxu0 %v10754_v42  ;;  %v10946_v41 = vor.u32 %v13630_v17, %v10943_v2  ;;  %v11074_v42 = vor.u32 %v13662_v16, %v11071_v38 }
 0x425   :  { %4902 = vmatpush.bf16.msra.mxu1 %v10882_v59  ;;  %v4086_v59 = vperm.slane %v14642_v20, 3 }
 0x426   :  { %4915 = vmatpush.bf16.msra.mxu2 %v11010_v43 }
 0x427   :  { %4928 = vmatpush.bf16.msra.mxu3 %v11138_v45 }
 0x428   :  { %4890 = vmatpush.bf16.msra.mxu0 %v10738_v52 }
 0x429   :  { %4903 = vmatpush.bf16.msra.mxu1 %v10866_v55 }
 0x42a   :  { %4916 = vmatpush.bf16.msra.mxu2 %v10994_v56 }
 0x42b   :  { %4929 = vmatpush.bf16.msra.mxu3 %v11122_v58 }
 0x42c   :  { %4891 = vmatpush.bf16.msra.mxu0 %v10722_v3 }
 0x42d   :  { %4904 = vmatpush.bf16.msra.mxu1 %v10850_v4 }
 0x42e   :  { %4917 = vmatpush.bf16.msra.mxu2 %v10978_v5 }
 0x42f   :  { %4930 = vmatpush.bf16.msra.mxu3 %v11106_v10 }
 0x430   :  { %4892 = vmatpush.bf16.msra.mxu0 %v10706_v13 }
 0x431   :  { %4905 = vmatpush.bf16.msra.mxu1 %v10834_v14 }
 0x432   :  { %4918 = vmatpush.bf16.msra.mxu2 %v10962_v15 }
 0x433   :  { %4931 = vmatpush.bf16.msra.mxu3 %v11090_v30  ;;  %v4089_v30 = vperm.slane %v14648_v23, 3 }
 0x434   :  { %4893 = vmatpush.bf16.msra.mxu0 %v10690_v39 }
 0x435   :  { %4906 = vmatpush.bf16.msra.mxu1 %v10818_v40 }
 0x436   :  { %4919 = vmatpush.bf16.msra.mxu2 %v10946_v41 }
 0x437   :  { %4932 = vmatpush.bf16.msra.mxu3 %v11074_v42  ;;  %4894 = vmatmul.bf16.vlgmr.msra.gmra.mxu0 %v14782_v6 }
 0x438   :  { %4907 = vmatmul.bf16.vlgmr.msra.gmra.mxu1 %v14790_v35 }
 0x439   :  { %4920 = vmatmul.bf16.vlgmr.msra.gmra.mxu2 %v14798_v49  ;;  %v4087_v49 = vperm.slane %v14644_v21, 3 }
 0x43a   :  { %4933 = vmatmul.bf16.vlgmr.msra.gmra.mxu3 %v14806_v1 }
 0x454   :  { %v4739_v43 = vpop.f32.mrf.mxu0 }
 0x455   :  { %v4740_v32 = vadd.f32 %v4739_v43, %v4086_v59  ;;  %v4752_v54 = vpop.f32.mrf.mxu1 }
 0x457   :  { %v4753_v44 = vadd.f32 %v4752_v54, %v4740_v32 }
 0x45c   :  { %v4765_v45 = vpop.f32.mrf.mxu2  ;;  %v4741_v50 = vpop.f32.mrf.mxu0 }
 0x45d   :  { %v4766_v46 = vadd.f32 %v4765_v45, %v4753_v44  ;;  %v4778_v25 = vpop.f32.mrf.mxu3  ;;  %v4754_v51 = vpop.f32.mrf.mxu1 }
 0x45f   :  { %v4779_v48 = vadd.f32 %v4778_v25, %v4766_v46 }
 0x461   :  { %v4938_v52 = vmax.f32 %v4779_v48, 0.0 }
 0x463   :  { %v14825_v6 = vpack.c.bf16 %v4938_v52, %v4938_v52 }
 0x464   :  { %v4767_v35 = vpop.f32.mrf.mxu2 }
 0x465   :  { %v4780_v55 = vpop.f32.mrf.mxu3 }
 0x474   :  { %v4791_v1 = vpop.f32.mrf.mxu0 }
 0x475   :  { %v4792_v56 = vadd.f32 %v4791_v1, %v4087_v49  ;;  %v4804_v0 = vpop.f32.mrf.mxu1 }
 0x477   :  { %v4805_v57 = vadd.f32 %v4804_v0, %v4792_v56 }
 0x47c   :  { %v4817_v18 = vpop.f32.mrf.mxu2  ;;  %v4793_v61 = vpop.f32.mrf.mxu0 }
 0x47d   :  { %v4818_v58 = vadd.f32 %v4817_v18, %v4805_v57  ;;  %v4830_v28 = vpop.f32.mrf.mxu3  ;;  %v4806_v37 = vpop.f32.mrf.mxu1 }
 0x47f   :  { %v4831_v60 = vadd.f32 %v4830_v28, %v4818_v58 }
 0x481   :  { %v4939_v63 = vmax.f32 %v4831_v60, 0.0 }
 0x483   :  { %v14828_v3 = vpack.c.bf16 %v4939_v63, %v4939_v63 }
 0x484   :  { %v4819_v4 = vpop.f32.mrf.mxu2 }
 0x485   :  { %v4832_v5 = vpop.f32.mrf.mxu3 }
 0x494   :  { %v4843_v8 = vpop.f32.mrf.mxu0 }
 0x495   :  { %v4844_v9 = vadd.f32 %v4843_v8, %v4088_v7  ;;  %v4856_v10 = vpop.f32.mrf.mxu1 }
 0x497   :  { %v4857_v36 = vadd.f32 %v4856_v10, %v4844_v9 }
 0x49c   :  { %v4869_v33 = vpop.f32.mrf.mxu2  ;;  %v4845_v13 = vpop.f32.mrf.mxu0 }
 0x49d   :  { %v4870_v12 = vadd.f32 %v4869_v33, %v4857_v36  ;;  %v4882_v19 = vpop.f32.mrf.mxu3  ;;  %v4858_v14 = vpop.f32.mrf.mxu1 }
 0x49f   :  { %v4883_v53 = vadd.f32 %v4882_v19, %v4870_v12 }
 0x4a1   :  { %v4940_v15 = vmax.f32 %v4883_v53, 0.0 }
 0x4a3   :  { %v14831_v26 = vpack.c.bf16 %v4940_v15, %v4940_v15 }
 0x4a4   :  { %v4871_v27 = vpop.f32.mrf.mxu2 }
 0x4a5   :  { %v4884_v29 = vpop.f32.mrf.mxu3 }
 0x4b4   :  { %v4895_v31 = vpop.f32.mrf.mxu0 }
 0x4b5   :  { %v4896_v17 = vadd.f32 %v4895_v31, %v4089_v30  ;;  %v4908_v2 = vpop.f32.mrf.mxu1 }
 0x4b7   :  { %v4909_v16 = vadd.f32 %v4908_v2, %v4896_v17 }
 0x4bc   :  { %v4921_v38 = vpop.f32.mrf.mxu2  ;;  %v4897_v41 = vpop.f32.mrf.mxu0 }
 0x4bd   :  { %v4922_v39 = vadd.f32 %v4921_v38, %v4909_v16  ;;  %v4934_v40 = vpop.f32.mrf.mxu3  ;;  %v4910_v42 = vpop.f32.mrf.mxu1 }
 0x4bf   :  { %v4935_v59 = vadd.f32 %v4934_v40, %v4922_v39 }
 0x4c1   :  { %v4941_v43 = vmax.f32 %v4935_v59, 0.0 }
 0x4c3   :  { %v14834_v32 = vpack.c.bf16 %v4941_v43, %v4941_v43 }
 0x4c4   :  { %v4923_v54 = vpop.f32.mrf.mxu2 }
 0x4c5   :  { %v4936_v44 = vpop.f32.mrf.mxu3 }
 0x4c6   :  { %14452 = dma.done.wait [#allocation12 + $0x4], 16384 }
 0x4c7   :  { %14453 = vsyncadd [#allocation12 + $0x4], 4294950912  ;;  %v11301_v45 = vld [vmem:[#allocation6 + $0xe0] sm:$0xf]  ;;  %v13723_v46 = vld [vmem:[#allocation6 + $0xec] sm:$0xf0] }
 0x4c8   :  { %v11429_v25 = vld [vmem:[#allocation6 + $0x1e0] sm:$0xf]  ;;  %v11302_v48 = vor.u32 %v13723_v46, %v11301_v45  ;;  %v13755_v50 = vld [vmem:[#allocation6 + $0x1ec] sm:$0xf0] }
 0x4c9   :  { %v11557_v51 = vld [vmem:[#allocation6 + $0x2e0] sm:$0xf]  ;;  %v13787_v52 = vld [vmem:[#allocation6 + $0x2ec] sm:$0xf0]  ;;  %v11430_v35 = vor.u32 %v13755_v50, %v11429_v25 }
 0x4ca   :  { %v11558_v55 = vor.u32 %v13787_v52, %v11557_v51  ;;  %v11685_v49 = vld [vmem:[#allocation6 + $0x3e0] sm:$0xf]  ;;  %v13819_v1 = vld [vmem:[#allocation6 + $0x3ec] sm:$0xf0]  ;;  %5720 = vmatpush.bf16.msrb.mxu0 %v11302_v48 }
 0x4cb   :  { %v11285_v56 = vld [vmem:[#allocation6 + $0xc0] sm:$0xf]  ;;  %v11686_v0 = vor.u32 %v13819_v1, %v11685_v49  ;;  %v13719_v57 = vld [vmem:[#allocation6 + $0xcc] sm:$0xf0]  ;;  %5733 = vmatpush.bf16.msrb.mxu1 %v11430_v35 }
 0x4cc   :  { %v11413_v18 = vld [vmem:[#allocation6 + $0x1c0] sm:$0xf]  ;;  %v13751_v58 = vld [vmem:[#allocation6 + $0x1cc] sm:$0xf0]  ;;  %5746 = vmatpush.bf16.msrb.mxu2 %v11558_v55  ;;  %v11286_v28 = vor.u32 %v13719_v57, %v11285_v56 }
 0x4cd   :  { %v11414_v60 = vor.u32 %v13751_v58, %v11413_v18  ;;  %v11541_v61 = vld [vmem:[#allocation6 + $0x2c0] sm:$0xf]  ;;  %v13783_v37 = vld [vmem:[#allocation6 + $0x2cc] sm:$0xf0]  ;;  %5759 = vmatpush.bf16.msrb.mxu3 %v11686_v0 }
 0x4ce   :  { %v11669_v63 = vld [vmem:[#allocation6 + $0x3c0] sm:$0xf]  ;;  %v11542_v4 = vor.u32 %v13783_v37, %v11541_v61  ;;  %v13815_v5 = vld [vmem:[#allocation6 + $0x3cc] sm:$0xf0]  ;;  %5721 = vmatpush.bf16.msrb.mxu0 %v11286_v28 }
 0x4cf   :  { %v11269_v7 = vld [vmem:[#allocation6 + $0xa0] sm:$0xf]  ;;  %v13715_v8 = vld [vmem:[#allocation6 + $0xac] sm:$0xf0]  ;;  %v11670_v9 = vor.u32 %v13815_v5, %v11669_v63  ;;  %5734 = vmatpush.bf16.msrb.mxu1 %v11414_v60 }
 0x4d0   :  { %v11397_v10 = vld [vmem:[#allocation6 + $0x1a0] sm:$0xf]  ;;  %v13747_v36 = vld [vmem:[#allocation6 + $0x1ac] sm:$0xf0]  ;;  %v11270_v12 = vor.u32 %v13715_v8, %v11269_v7  ;;  %5747 = vmatpush.bf16.msrb.mxu2 %v11542_v4 }
 0x4d1   :  { %v11525_v33 = vld [vmem:[#allocation6 + $0x2a0] sm:$0xf]  ;;  %v13779_v19 = vld [vmem:[#allocation6 + $0x2ac] sm:$0xf0]  ;;  %v11398_v14 = vor.u32 %v13747_v36, %v11397_v10  ;;  %5760 = vmatpush.bf16.msrb.mxu3 %v11670_v9 }
 0x4d2   :  { %v11653_v53 = vld [vmem:[#allocation6 + $0x3a0] sm:$0xf]  ;;  %v13811_v13 = vld [vmem:[#allocation6 + $0x3ac] sm:$0xf0]  ;;  %v11526_v15 = vor.u32 %v13779_v19, %v11525_v33  ;;  %5722 = vmatpush.bf16.msrb.mxu0 %v11270_v12 }
 0x4d3   :  { %v11253_v27 = vld [vmem:[#allocation6 + $0x80] sm:$0xf]  ;;  %v13711_v29 = vld [vmem:[#allocation6 + $0x8c] sm:$0xf0]  ;;  %v11654_v31 = vor.u32 %v13811_v13, %v11653_v53  ;;  %5735 = vmatpush.bf16.msrb.mxu1 %v11398_v14 }
 0x4d4   :  { %v11381_v30 = vld [vmem:[#allocation6 + $0x180] sm:$0xf]  ;;  %v13743_v17 = vld [vmem:[#allocation6 + $0x18c] sm:$0xf0]  ;;  %v11254_v40 = vor.u32 %v13711_v29, %v11253_v27  ;;  %5748 = vmatpush.bf16.msrb.mxu2 %v11526_v15 }
 0x4d5   :  { %v11509_v2 = vld [vmem:[#allocation6 + $0x280] sm:$0xf]  ;;  %v13775_v16 = vld [vmem:[#allocation6 + $0x28c] sm:$0xf0]  ;;  %v11382_v41 = vor.u32 %v13743_v17, %v11381_v30  ;;  %5761 = vmatpush.bf16.msrb.mxu3 %v11654_v31 }
 0x4d6   :  { %v11637_v38 = vld [vmem:[#allocation6 + $0x380] sm:$0xf]  ;;  %v13807_v39 = vld [vmem:[#allocation6 + $0x38c] sm:$0xf0]  ;;  %v11510_v42 = vor.u32 %v13775_v16, %v11509_v2  ;;  %5723 = vmatpush.bf16.msrb.mxu0 %v11254_v40  ;;  %v13721_v16 = vld [vmem:[#allocation6 + $0xe4] sm:$0xf] }
 0x4d7   :  { %v11237_v59 = vld [vmem:[#allocation6 + $0x60] sm:$0xf]  ;;  %v13707_v43 = vld [vmem:[#allocation6 + $0x6c] sm:$0xf0]  ;;  %v11638_v44 = vor.u32 %v13807_v39, %v11637_v38  ;;  %5736 = vmatpush.bf16.msrb.mxu1 %v11382_v41  ;;  %v11303_v38 = vld [vmem:[#allocation6 + $0xf0] sm:$0xf0] }
 0x4d8   :  { %v11365_v54 = vld [vmem:[#allocation6 + $0x160] sm:$0xf]  ;;  %v13739_v45 = vld [vmem:[#allocation6 + $0x16c] sm:$0xf0]  ;;  %v11238_v51 = vor.u32 %v13707_v43, %v11237_v59  ;;  %5749 = vmatpush.bf16.msrb.mxu2 %v11510_v42  ;;  %v13753_v39 = vld [vmem:[#allocation6 + $0x1e4] sm:$0xf] }
 0x4d9   :  { %v11493_v46 = vld [vmem:[#allocation6 + $0x260] sm:$0xf]  ;;  %v13771_v25 = vld [vmem:[#allocation6 + $0x26c] sm:$0xf0]  ;;  %v11366_v52 = vor.u32 %v13739_v45, %v11365_v54  ;;  %5762 = vmatpush.bf16.msrb.mxu3 %v11638_v44  ;;  %v11431_v41 = vld [vmem:[#allocation6 + $0x1f0] sm:$0xf0] }
 0x4da   :  { %v11621_v48 = vld [vmem:[#allocation6 + $0x360] sm:$0xf]  ;;  %v13803_v50 = vld [vmem:[#allocation6 + $0x36c] sm:$0xf0]  ;;  %v11494_v35 = vor.u32 %v13771_v25, %v11493_v46  ;;  %5724 = vmatpush.bf16.msrb.mxu0 %v11238_v51  ;;  %v13785_v42 = vld [vmem:[#allocation6 + $0x2e4] sm:$0xf]  ;;  %v11306_v25 = vor.u32 %v13721_v16, %v11303_v38 }
 0x4db   :  { %v11221_v55 = vld [vmem:[#allocation6 + $0x40] sm:$0xf]  ;;  %v13703_v49 = vld [vmem:[#allocation6 + $0x4c] sm:$0xf0]  ;;  %v11622_v56 = vor.u32 %v13803_v50, %v11621_v48  ;;  %5737 = vmatpush.bf16.msrb.mxu1 %v11366_v52  ;;  %v11559_v59 = vld [vmem:[#allocation6 + $0x2f0] sm:$0xf0]  ;;  %v11434_v48 = vor.u32 %v13753_v39, %v11431_v41 }
 0x4dc   :  { %v11349_v1 = vld [vmem:[#allocation6 + $0x140] sm:$0xf]  ;;  %v13735_v0 = vld [vmem:[#allocation6 + $0x14c] sm:$0xf0]  ;;  %v11222_v60 = vor.u32 %v13703_v49, %v11221_v55  ;;  %5750 = vmatpush.bf16.msrb.mxu2 %v11494_v35  ;;  %v13817_v44 = vld [vmem:[#allocation6 + $0x3e4] sm:$0xf]  ;;  %v11562_v50 = vor.u32 %v13785_v42, %v11559_v59 }
 0x4dd   :  { %v11477_v57 = vld [vmem:[#allocation6 + $0x240] sm:$0xf]  ;;  %v13767_v18 = vld [vmem:[#allocation6 + $0x24c] sm:$0xf0]  ;;  %v11350_v61 = vor.u32 %v13735_v0, %v11349_v1  ;;  %5763 = vmatpush.bf16.msrb.mxu3 %v11622_v56  ;;  %v11687_v45 = vld [vmem:[#allocation6 + $0x3f0] sm:$0xf0] }
 0x4de   :  { %v11605_v58 = vld [vmem:[#allocation6 + $0x340] sm:$0xf]  ;;  %v13799_v28 = vld [vmem:[#allocation6 + $0x34c] sm:$0xf0]  ;;  %v11478_v37 = vor.u32 %v13767_v18, %v11477_v57  ;;  %5725 = vmatpush.bf16.msrb.mxu0 %v11222_v60  ;;  %v13717_v51 = vld [vmem:[#allocation6 + $0xc4] sm:$0xf]  ;;  %v11690_v55 = vor.u32 %v13817_v44, %v11687_v45 }
 0x4df   :  { %v11205_v63 = vld [vmem:[#allocation6 + $0x20] sm:$0xf]  ;;  %v13699_v4 = vld [vmem:[#allocation6 + $0x2c] sm:$0xf0]  ;;  %v11606_v7 = vor.u32 %v13799_v28, %v11605_v58  ;;  %5738 = vmatpush.bf16.msrb.mxu1 %v11350_v61  ;;  %v11287_v52 = vld [vmem:[#allocation6 + $0xd0] sm:$0xf0] }
 0x4e0   :  { %v11333_v5 = vld [vmem:[#allocation6 + $0x120] sm:$0xf]  ;;  %v13731_v8 = vld [vmem:[#allocation6 + $0x12c] sm:$0xf0]  ;;  %v11206_v12 = vor.u32 %v13699_v4, %v11205_v63  ;;  %5751 = vmatpush.bf16.msrb.mxu2 %v11478_v37  ;;  %v13749_v35 = vld [vmem:[#allocation6 + $0x1c4] sm:$0xf]  ;;  %v11290_v18 = vor.u32 %v13717_v51, %v11287_v52 }
 0x4e1   :  { %v11461_v9 = vld [vmem:[#allocation6 + $0x220] sm:$0xf]  ;;  %v13763_v10 = vld [vmem:[#allocation6 + $0x22c] sm:$0xf0]  ;;  %v11334_v13 = vor.u32 %v13731_v8, %v11333_v5  ;;  %5764 = vmatpush.bf16.msrb.mxu3 %v11606_v7  ;;  %v11415_v49 = vld [vmem:[#allocation6 + $0x1d0] sm:$0xf0] }
 0x4e2   :  { %v11589_v36 = vld [vmem:[#allocation6 + $0x320] sm:$0xf]  ;;  %v13795_v33 = vld [vmem:[#allocation6 + $0x32c] sm:$0xf0]  ;;  %v11462_v14 = vor.u32 %v13763_v10, %v11461_v9  ;;  %5726 = vmatpush.bf16.msrb.mxu0 %v11206_v12  ;;  %v13781_v1 = vld [vmem:[#allocation6 + $0x2c4] sm:$0xf]  ;;  %v11418_v58 = vor.u32 %v13749_v35, %v11415_v49 }
 0x4e3   :  { %v11189_v19 = vld [vmem:[#allocation6] sm:$0xf]  ;;  %v13695_v53 = vld [vmem:[#allocation6 + $0xc] sm:$0xf0]  ;;  %v11590_v30 = vor.u32 %v13795_v33, %v11589_v36  ;;  %5739 = vmatpush.bf16.msrb.mxu1 %v11334_v13  ;;  %v11543_v56 = vld [vmem:[#allocation6 + $0x2d0] sm:$0xf0] }
 0x4e4   :  { %v11317_v15 = vld [vmem:[#allocation6 + $0x100] sm:$0xf]  ;;  %v13727_v27 = vld [vmem:[#allocation6 + $0x10c] sm:$0xf0]  ;;  %v11190_v40 = vor.u32 %v13695_v53, %v11189_v19  ;;  %5752 = vmatpush.bf16.msrb.mxu2 %v11462_v14  ;;  %v13813_v0 = vld [vmem:[#allocation6 + $0x3c4] sm:$0xf]  ;;  %v11546_v28 = vor.u32 %v13781_v1, %v11543_v56 }
 0x4e5   :  { %v11445_v29 = vld [vmem:[#allocation6 + $0x200] sm:$0xf]  ;;  %v13759_v31 = vld [vmem:[#allocation6 + $0x20c] sm:$0xf0]  ;;  %v11318_v43 = vor.u32 %v13727_v27, %v11317_v15  ;;  %5765 = vmatpush.bf16.msrb.mxu3 %v11590_v30  ;;  %v11671_v57 = vld [vmem:[#allocation6 + $0x3d0] sm:$0xf0] }
 0x4e6   :  { %v11573_v17 = vld [vmem:[#allocation6 + $0x300] sm:$0xf]  ;;  %v13791_v2 = vld [vmem:[#allocation6 + $0x30c] sm:$0xf0]  ;;  %v11446_v54 = vor.u32 %v13759_v31, %v11445_v29  ;;  %5727 = vmatpush.bf16.msrb.mxu0 %v11190_v40  ;;  %v13713_v60 = vld [vmem:[#allocation6 + $0xa4] sm:$0xf]  ;;  %v11674_v63 = vor.u32 %v13813_v0, %v11671_v57 }
 0x4e7   :  { %v11574_v46 = vor.u32 %v13791_v2, %v11573_v17  ;;  %5740 = vmatpush.bf16.msrb.mxu1 %v11318_v43  ;;  %v11271_v61 = vld [vmem:[#allocation6 + $0xb0] sm:$0xf0]  ;;  %v13745_v37 = vld [vmem:[#allocation6 + $0x1a4] sm:$0xf] }
 0x4e8   :  { %5753 = vmatpush.bf16.msrb.mxu2 %v11446_v54  ;;  %v11399_v4 = vld [vmem:[#allocation6 + $0x1b0] sm:$0xf0]  ;;  %v13777_v5 = vld [vmem:[#allocation6 + $0x2a4] sm:$0xf]  ;;  %v11274_v10 = vor.u32 %v13713_v60, %v11271_v61 }
 0x4e9   :  { %5766 = vmatpush.bf16.msrb.mxu3 %v11574_v46  ;;  %v11527_v7 = vld [vmem:[#allocation6 + $0x2b0] sm:$0xf0]  ;;  %v13809_v8 = vld [vmem:[#allocation6 + $0x3a4] sm:$0xf]  ;;  %5728 = vmatmul.bf16.vlgmr.msrb.gmra.mxu0 %v14825_v6  ;;  %v11402_v36 = vor.u32 %v13745_v37, %v11399_v4 }
 0x4ea   :  { %5772 = vmatpush.bf16.msra.mxu0 %v11306_v25  ;;  %v11655_v9 = vld [vmem:[#allocation6 + $0x3b0] sm:$0xf0]  ;;  %5741 = vmatmul.bf16.vlgmr.msrb.gmra.mxu1 %v14828_v3  ;;  %v11530_v33 = vor.u32 %v13777_v5, %v11527_v7  ;;  %v13709_v12 = vld [vmem:[#allocation6 + $0x84] sm:$0xf] }
 0x4eb   :  { %5785 = vmatpush.bf16.msra.mxu1 %v11434_v48  ;;  %5754 = vmatmul.bf16.vlgmr.msrb.gmra.mxu2 %v14831_v26  ;;  %v11255_v19 = vld [vmem:[#allocation6 + $0x90] sm:$0xf0]  ;;  %v13741_v53 = vld [vmem:[#allocation6 + $0x184] sm:$0xf]  ;;  %v11658_v13 = vor.u32 %v13809_v8, %v11655_v9 }
 0x4ec   :  { %5798 = vmatpush.bf16.msra.mxu2 %v11562_v50  ;;  %5767 = vmatmul.bf16.vlgmr.msrb.gmra.mxu3 %v14834_v32  ;;  %v11383_v14 = vld [vmem:[#allocation6 + $0x190] sm:$0xf0]  ;;  %v13773_v15 = vld [vmem:[#allocation6 + $0x284] sm:$0xf]  ;;  %v11258_v31 = vor.u32 %v13709_v12, %v11255_v19 }
 0x4ed   :  { %5811 = vmatpush.bf16.msra.mxu3 %v11690_v55  ;;  %v11511_v27 = vld [vmem:[#allocation6 + $0x290] sm:$0xf0]  ;;  %v13805_v29 = vld [vmem:[#allocation6 + $0x384] sm:$0xf]  ;;  %v11386_v17 = vor.u32 %v13741_v53, %v11383_v14 }
 0x4ee   :  { %5773 = vmatpush.bf16.msra.mxu0 %v11290_v18  ;;  %v11639_v30 = vld [vmem:[#allocation6 + $0x390] sm:$0xf0]  ;;  %v11514_v2 = vor.u32 %v13773_v15, %v11511_v27  ;;  %v13705_v16 = vld [vmem:[#allocation6 + $0x64] sm:$0xf]  ;;  %v11309_v27 = vld [vmem:[#allocation6 + $0xe8] sm:$0xf] }
 0x4ef   :  { %5786 = vmatpush.bf16.msra.mxu1 %v11418_v58  ;;  %v11239_v38 = vld [vmem:[#allocation6 + $0x70] sm:$0xf0]  ;;  %v13737_v39 = vld [vmem:[#allocation6 + $0x164] sm:$0xf]  ;;  %v11642_v40 = vor.u32 %v13805_v29, %v11639_v30  ;;  %v13724_v29 = vld [vmem:[#allocation6 + $0xf4] sm:$0xf0] }
 0x4f0   :  { %5799 = vmatpush.bf16.msra.mxu2 %v11546_v28  ;;  %v11367_v41 = vld [vmem:[#allocation6 + $0x170] sm:$0xf0]  ;;  %v13769_v42 = vld [vmem:[#allocation6 + $0x264] sm:$0xf]  ;;  %v11242_v44 = vor.u32 %v13705_v16, %v11239_v38  ;;  %v11437_v30 = vld [vmem:[#allocation6 + $0x1e8] sm:$0xf] }
 0x4f1   :  { %5812 = vmatpush.bf16.msra.mxu3 %v11674_v63  ;;  %v11495_v59 = vld [vmem:[#allocation6 + $0x270] sm:$0xf0]  ;;  %v13801_v43 = vld [vmem:[#allocation6 + $0x364] sm:$0xf]  ;;  %v11370_v45 = vor.u32 %v13737_v39, %v11367_v41  ;;  %v13788_v16 = vld [vmem:[#allocation6 + $0x2f4] sm:$0xf0] }
 0x4f2   :  { %5774 = vmatpush.bf16.msra.mxu0 %v11274_v10  ;;  %v11623_v54 = vld [vmem:[#allocation6 + $0x370] sm:$0xf0]  ;;  %v11498_v46 = vor.u32 %v13769_v42, %v11495_v59  ;;  %v13701_v25 = vld [vmem:[#allocation6 + $0x44] sm:$0xf]  ;;  %v13820_v41 = vld [vmem:[#allocation6 + $0x3f4] sm:$0xf0]  ;;  %v11310_v59 = vor.u32 %v13724_v29, %v11309_v27 }
 0x4f3   :  { %5787 = vmatpush.bf16.msra.mxu1 %v11402_v36  ;;  %v11223_v48 = vld [vmem:[#allocation6 + $0x50] sm:$0xf0]  ;;  %v13733_v50 = vld [vmem:[#allocation6 + $0x144] sm:$0xf]  ;;  %v11626_v51 = vor.u32 %v13801_v43, %v11623_v54  ;;  %v11245_v27 = vld [vmem:[#allocation6 + $0x68] sm:$0xf] }
 0x4f4   :  { %5800 = vmatpush.bf16.msra.mxu2 %v11530_v33  ;;  %v11351_v52 = vld [vmem:[#allocation6 + $0x150] sm:$0xf0]  ;;  %v13765_v35 = vld [vmem:[#allocation6 + $0x244] sm:$0xf]  ;;  %v11226_v56 = vor.u32 %v13701_v25, %v11223_v48  ;;  %v13752_v48 = vld [vmem:[#allocation6 + $0x1d4] sm:$0xf0] }
 0x4f5   :  { %5813 = vmatpush.bf16.msra.mxu3 %v11658_v13  ;;  %v11479_v55 = vld [vmem:[#allocation6 + $0x250] sm:$0xf0]  ;;  %v13797_v49 = vld [vmem:[#allocation6 + $0x344] sm:$0xf]  ;;  %v11354_v0 = vor.u32 %v13733_v50, %v11351_v52  ;;  %v11549_v50 = vld [vmem:[#allocation6 + $0x2c8] sm:$0xf] }
 0x4f6   :  { %5775 = vmatpush.bf16.msra.mxu0 %v11258_v31  ;;  %v11607_v1 = vld [vmem:[#allocation6 + $0x350] sm:$0xf0]  ;;  %v11482_v57 = vor.u32 %v13765_v35, %v11479_v55  ;;  %v13697_v18 = vld [vmem:[#allocation6 + $0x24] sm:$0xf]  ;;  %v11677_v52 = vld [vmem:[#allocation6 + $0x3c8] sm:$0xf] }
 0x4f7   :  { %5788 = vmatpush.bf16.msra.mxu1 %v11386_v17  ;;  %v11207_v58 = vld [vmem:[#allocation6 + $0x30] sm:$0xf0]  ;;  %v13729_v28 = vld [vmem:[#allocation6 + $0x124] sm:$0xf]  ;;  %v11610_v60 = vor.u32 %v13797_v49, %v11607_v1  ;;  %v13756_v17 = vld [vmem:[#allocation6 + $0x1f4] sm:$0xf0] }
 0x4f8   :  { %5801 = vmatpush.bf16.msra.mxu2 %v11514_v2  ;;  %v11335_v61 = vld [vmem:[#allocation6 + $0x130] sm:$0xf0]  ;;  %v13761_v37 = vld [vmem:[#allocation6 + $0x224] sm:$0xf]  ;;  %v11210_v7 = vor.u32 %v13697_v18, %v11207_v58  ;;  %v11565_v2 = vld [vmem:[#allocation6 + $0x2e8] sm:$0xf]  ;;  %v11438_v43 = vor.u32 %v13756_v17, %v11437_v30 }
 0x4f9   :  { %5814 = vmatpush.bf16.msra.mxu3 %v11642_v40  ;;  %v11463_v63 = vld [vmem:[#allocation6 + $0x230] sm:$0xf0]  ;;  %v13793_v4 = vld [vmem:[#allocation6 + $0x324] sm:$0xf]  ;;  %v11338_v10 = vor.u32 %v13729_v28, %v11335_v61  ;;  %v11693_v40 = vld [vmem:[#allocation6 + $0x3e8] sm:$0xf]  ;;  %v11566_v54 = vor.u32 %v13788_v16, %v11565_v2 }
 0x4fa   :  { %5776 = vmatpush.bf16.msra.mxu0 %v11242_v44  ;;  %v11591_v5 = vld [vmem:[#allocation6 + $0x330] sm:$0xf0]  ;;  %v13693_v8 = vld [vmem:[#allocation6 + $0x4] sm:$0xf]  ;;  %v11466_v36 = vor.u32 %v13761_v37, %v11463_v63  ;;  %v11293_v44 = vld [vmem:[#allocation6 + $0xc8] sm:$0xf]  ;;  %v11694_v25 = vor.u32 %v13820_v41, %v11693_v40 }
 0x4fb   :  { %5789 = vmatpush.bf16.msra.mxu1 %v11370_v45  ;;  %v11191_v9 = vld [vmem:[#allocation6 + $0x10] sm:$0xf0]  ;;  %v13725_v33 = vld [vmem:[#allocation6 + $0x104] sm:$0xf]  ;;  %v11594_v53 = vor.u32 %v13793_v4, %v11591_v5  ;;  %v13720_v45 = vld [vmem:[#allocation6 + $0xd4] sm:$0xf0] }
 0x4fc   :  { %5802 = vmatpush.bf16.msra.mxu2 %v11498_v46  ;;  %v11319_v12 = vld [vmem:[#allocation6 + $0x110] sm:$0xf0]  ;;  %v13757_v19 = vld [vmem:[#allocation6 + $0x204] sm:$0xf]  ;;  %v11194_v31 = vor.u32 %v13693_v8, %v11191_v9  ;;  %v11421_v46 = vld [vmem:[#allocation6 + $0x1c8] sm:$0xf]  ;;  %v11294_v55 = vor.u32 %v13720_v45, %v11293_v44 }
 0x4fd   :  { %5815 = vmatpush.bf16.msra.mxu3 %v11626_v51  ;;  %v11447_v13 = vld [vmem:[#allocation6 + $0x210] sm:$0xf0]  ;;  %v13789_v14 = vld [vmem:[#allocation6 + $0x304] sm:$0xf]  ;;  %v11322_v38 = vor.u32 %v13725_v33, %v11319_v12  ;;  %v13784_v51 = vld [vmem:[#allocation6 + $0x2d4] sm:$0xf0]  ;;  %v11422_v49 = vor.u32 %v13752_v48, %v11421_v46 }
 0x4fe   :  { %5777 = vmatpush.bf16.msra.mxu0 %v11226_v56  ;;  %v11575_v15 = vld [vmem:[#allocation6 + $0x310] sm:$0xf0]  ;;  %v11450_v39 = vor.u32 %v13757_v19, %v11447_v13  ;;  %v13816_v35 = vld [vmem:[#allocation6 + $0x3d4] sm:$0xf0]  ;;  %v11550_v1 = vor.u32 %v13784_v51, %v11549_v50  ;;  %v11277_v56 = vld [vmem:[#allocation6 + $0xa8] sm:$0xf] }
 0x4ff   :  { %5790 = vmatpush.bf16.msra.mxu1 %v11354_v0  ;;  %v11578_v42 = vor.u32 %v13789_v14, %v11575_v15  ;;  %v13716_v0 = vld [vmem:[#allocation6 + $0xb4] sm:$0xf0]  ;;  %v11678_v18 = vor.u32 %v13816_v35, %v11677_v52  ;;  %v11533_v28 = vld [vmem:[#allocation6 + $0x2a8] sm:$0xf] }
 0x500   :  { %5803 = vmatpush.bf16.msra.mxu2 %v11482_v57  ;;  %v11405_v57 = vld [vmem:[#allocation6 + $0x1a8] sm:$0xf]  ;;  %v13748_v58 = vld [vmem:[#allocation6 + $0x1b4] sm:$0xf0]  ;;  %v11278_v63 = vor.u32 %v13716_v0, %v11277_v56 }
 0x501   :  { %5816 = vmatpush.bf16.msra.mxu3 %v11610_v60  ;;  %v13780_v60 = vld [vmem:[#allocation6 + $0x2b4] sm:$0xf0]  ;;  %v11661_v61 = vld [vmem:[#allocation6 + $0x3a8] sm:$0xf]  ;;  %v11406_v4 = vor.u32 %v13748_v58, %v11405_v57 }
 0x502   :  { %5778 = vmatpush.bf16.msra.mxu0 %v11210_v7  ;;  %v13812_v37 = vld [vmem:[#allocation6 + $0x3b4] sm:$0xf0]  ;;  %v11534_v5 = vor.u32 %v13780_v60, %v11533_v28  ;;  %v11261_v7 = vld [vmem:[#allocation6 + $0x88] sm:$0xf] }
 0x503   :  { %5791 = vmatpush.bf16.msra.mxu1 %v11338_v10  ;;  %v13712_v8 = vld [vmem:[#allocation6 + $0x94] sm:$0xf0]  ;;  %v11389_v9 = vld [vmem:[#allocation6 + $0x188] sm:$0xf]  ;;  %v11662_v10 = vor.u32 %v13812_v37, %v11661_v61 }
 0x504   :  { %5804 = vmatpush.bf16.msra.mxu2 %v11466_v36  ;;  %v13744_v36 = vld [vmem:[#allocation6 + $0x194] sm:$0xf0]  ;;  %v11517_v33 = vld [vmem:[#allocation6 + $0x288] sm:$0xf]  ;;  %v11262_v13 = vor.u32 %v13712_v8, %v11261_v7 }
 0x505   :  { %5817 = vmatpush.bf16.msra.mxu3 %v11594_v53  ;;  %v13776_v12 = vld [vmem:[#allocation6 + $0x294] sm:$0xf0]  ;;  %v11645_v19 = vld [vmem:[#allocation6 + $0x388] sm:$0xf]  ;;  %v11390_v14 = vor.u32 %v13744_v36, %v11389_v9 }
 0x506   :  { %5779 = vmatpush.bf16.msra.mxu0 %v11194_v31  ;;  %v13808_v53 = vld [vmem:[#allocation6 + $0x394] sm:$0xf0]  ;;  %v11518_v15 = vor.u32 %v13776_v12, %v11517_v33  ;;  %v11373_v30 = vld [vmem:[#allocation6 + $0x168] sm:$0xf]  ;;  %v13722_v12 = vld [vmem:[#allocation6 + $0xec] sm:$0xf] }
 0x507   :  { %5792 = vmatpush.bf16.msra.mxu1 %v11322_v38  ;;  %v13708_v29 = vld [vmem:[#allocation6 + $0x74] sm:$0xf0]  ;;  %v11646_v31 = vor.u32 %v13808_v53, %v11645_v19  ;;  %v11501_v2 = vld [vmem:[#allocation6 + $0x268] sm:$0xf]  ;;  %v11311_v19 = vld [vmem:[#allocation6 + $0xf8] sm:$0xf0] }
 0x508   :  { %5805 = vmatpush.bf16.msra.mxu2 %v11450_v39  ;;  %v13740_v17 = vld [vmem:[#allocation6 + $0x174] sm:$0xf0]  ;;  %v11629_v38 = vld [vmem:[#allocation6 + $0x368] sm:$0xf]  ;;  %v11246_v40 = vor.u32 %v13708_v29, %v11245_v27  ;;  %v13754_v53 = vld [vmem:[#allocation6 + $0x1ec] sm:$0xf] }
 0x509   :  { %5818 = vmatpush.bf16.msra.mxu3 %v11578_v42  ;;  %5780 = vmatmul.bf16.vlgmr.msra.gmra.mxu0 %v14825_v6  ;;  %v13772_v16 = vld [vmem:[#allocation6 + $0x274] sm:$0xf0]  ;;  %v11374_v41 = vor.u32 %v13740_v17, %v11373_v30  ;;  %v11485_v46 = vld [vmem:[#allocation6 + $0x248] sm:$0xf]  ;;  %v11567_v27 = vld [vmem:[#allocation6 + $0x2f8] sm:$0xf0] }
 0x50a   :  { %5824 = vmatpush.bf16.msrb.mxu0 %v11310_v59  ;;  %5793 = vmatmul.bf16.vlgmr.msra.gmra.mxu1 %v14828_v3  ;;  %v13804_v39 = vld [vmem:[#allocation6 + $0x374] sm:$0xf0]  ;;  %v11502_v42 = vor.u32 %v13772_v16, %v11501_v2  ;;  %v11229_v59 = vld [vmem:[#allocation6 + $0x48] sm:$0xf]  ;;  %v11695_v17 = vld [vmem:[#allocation6 + $0x3f8] sm:$0xf0]  ;;  %v11314_v16 = vor.u32 %v13722_v12, %v11311_v19 }
 0x50b   :  { %5837 = vmatpush.bf16.msrb.mxu1 %v11438_v43  ;;  %5806 = vmatmul.bf16.vlgmr.msra.gmra.mxu2 %v14831_v26  ;;  %v13704_v43 = vld [vmem:[#allocation6 + $0x54] sm:$0xf0]  ;;  %v11630_v44 = vor.u32 %v13804_v39, %v11629_v38  ;;  %v11613_v48 = vld [vmem:[#allocation6 + $0x348] sm:$0xf]  ;;  %v13706_v12 = vld [vmem:[#allocation6 + $0x6c] sm:$0xf] }
 0x50c   :  { %5850 = vmatpush.bf16.msrb.mxu2 %v11566_v54  ;;  %5819 = vmatmul.bf16.vlgmr.msra.gmra.mxu3 %v14834_v32  ;;  %v11357_v54 = vld [vmem:[#allocation6 + $0x148] sm:$0xf]  ;;  %v13736_v45 = vld [vmem:[#allocation6 + $0x154] sm:$0xf0]  ;;  %v11230_v51 = vor.u32 %v13704_v43, %v11229_v59  ;;  %v11423_v43 = vld [vmem:[#allocation6 + $0x1d8] sm:$0xf0] }
 0x50d   :  { %5863 = vmatpush.bf16.msrb.mxu3 %v11694_v25  ;;  %v13768_v25 = vld [vmem:[#allocation6 + $0x254] sm:$0xf0]  ;;  %v11358_v52 = vor.u32 %v13736_v45, %v11357_v54  ;;  %v11469_v57 = vld [vmem:[#allocation6 + $0x228] sm:$0xf]  ;;  %v13782_v54 = vld [vmem:[#allocation6 + $0x2cc] sm:$0xf] }
 0x50e   :  { %5825 = vmatpush.bf16.msrb.mxu0 %v11294_v55  ;;  %v13800_v50 = vld [vmem:[#allocation6 + $0x354] sm:$0xf0]  ;;  %v11486_v35 = vor.u32 %v13768_v25, %v11485_v46  ;;  %v11213_v55 = vld [vmem:[#allocation6 + $0x28] sm:$0xf]  ;;  %v13814_v45 = vld [vmem:[#allocation6 + $0x3cc] sm:$0xf] }
 0x50f   :  { %5838 = vmatpush.bf16.msrb.mxu1 %v11422_v49  ;;  %v13700_v49 = vld [vmem:[#allocation6 + $0x34] sm:$0xf0]  ;;  %v11614_v56 = vor.u32 %v13800_v50, %v11613_v48  ;;  %v11597_v58 = vld [vmem:[#allocation6 + $0x328] sm:$0xf]  ;;  %v11679_v46 = vld [vmem:[#allocation6 + $0x3d8] sm:$0xf0] }
 0x510   :  { %5851 = vmatpush.bf16.msrb.mxu2 %v11550_v1  ;;  %v11341_v1 = vld [vmem:[#allocation6 + $0x128] sm:$0xf]  ;;  %v13732_v0 = vld [vmem:[#allocation6 + $0x134] sm:$0xf0]  ;;  %v11214_v60 = vor.u32 %v13700_v49, %v11213_v55  ;;  %v11682_v55 = vor.u32 %v13814_v45, %v11679_v46  ;;  %v11407_v49 = vld [vmem:[#allocation6 + $0x1b8] sm:$0xf0] }
 0x511   :  { %5864 = vmatpush.bf16.msrb.mxu3 %v11678_v18  ;;  %v13764_v18 = vld [vmem:[#allocation6 + $0x234] sm:$0xf0]  ;;  %v11197_v61 = vld [vmem:[#allocation6 + $0x8] sm:$0xf]  ;;  %v11247_v19 = vld [vmem:[#allocation6 + $0x78] sm:$0xf0] }
 0x512   :  { %5826 = vmatpush.bf16.msrb.mxu0 %v11278_v63  ;;  %v13796_v28 = vld [vmem:[#allocation6 + $0x334] sm:$0xf0]  ;;  %v11342_v63 = vor.u32 %v13732_v0, %v11341_v1  ;;  %v11453_v8 = vld [vmem:[#allocation6 + $0x208] sm:$0xf]  ;;  %v13778_v1 = vld [vmem:[#allocation6 + $0x2ac] sm:$0xf] }
 0x513   :  { %5839 = vmatpush.bf16.msrb.mxu1 %v11406_v4  ;;  %v13696_v37 = vld [vmem:[#allocation6 + $0x14] sm:$0xf0]  ;;  %v11470_v4 = vor.u32 %v13764_v18, %v11469_v57  ;;  %v11598_v9 = vor.u32 %v13796_v28, %v11597_v58  ;;  %v11581_v36 = vld [vmem:[#allocation6 + $0x308] sm:$0xf]  ;;  %v13810_v0 = vld [vmem:[#allocation6 + $0x3ac] sm:$0xf] }
 0x514   :  { %5852 = vmatpush.bf16.msrb.mxu2 %v11534_v5  ;;  %v11325_v5 = vld [vmem:[#allocation6 + $0x108] sm:$0xf]  ;;  %v13728_v7 = vld [vmem:[#allocation6 + $0x114] sm:$0xf0]  ;;  %v11663_v57 = vld [vmem:[#allocation6 + $0x3b8] sm:$0xf0] }
 0x515   :  { %5865 = vmatpush.bf16.msrb.mxu3 %v11662_v10  ;;  %v13760_v10 = vld [vmem:[#allocation6 + $0x214] sm:$0xf0]  ;;  %v11326_v29 = vor.u32 %v13728_v7, %v11325_v5  ;;  %v13774_v5 = vld [vmem:[#allocation6 + $0x28c] sm:$0xf]  ;;  %v11519_v7 = vld [vmem:[#allocation6 + $0x298] sm:$0xf0] }
 0x516   :  { %5827 = vmatpush.bf16.msrb.mxu0 %v11262_v13  ;;  %v13792_v33 = vld [vmem:[#allocation6 + $0x314] sm:$0xf0]  ;;  %v11198_v13 = vor.u32 %v13696_v37, %v11197_v61  ;;  %v11454_v30 = vor.u32 %v13760_v10, %v11453_v8  ;;  %v11263_v61 = vld [vmem:[#allocation6 + $0x98] sm:$0xf0]  ;;  %v13742_v37 = vld [vmem:[#allocation6 + $0x18c] sm:$0xf] }
 0x517   :  { %5840 = vmatpush.bf16.msrb.mxu1 %v11390_v14  ;;  %v11439_v14 = vld [vmem:[#allocation6 + $0x1f8] sm:$0xf0]  ;;  %v11582_v2 = vor.u32 %v13792_v33, %v11581_v36  ;;  %v13806_v8 = vld [vmem:[#allocation6 + $0x38c] sm:$0xf]  ;;  %v11522_v33 = vor.u32 %v13774_v5, %v11519_v7 }
 0x518   :  { %5853 = vmatpush.bf16.msrb.mxu2 %v11518_v15  ;;  %v13786_v15 = vld [vmem:[#allocation6 + $0x2ec] sm:$0xf]  ;;  %v11442_v38 = vor.u32 %v13754_v53, %v11439_v14  ;;  %v11375_v14 = vld [vmem:[#allocation6 + $0x178] sm:$0xf0] }
 0x519   :  { %5866 = vmatpush.bf16.msrb.mxu3 %v11646_v31  ;;  %v13818_v31 = vld [vmem:[#allocation6 + $0x3ec] sm:$0xf]  ;;  %v11570_v39 = vor.u32 %v13786_v15, %v11567_v27  ;;  %v11503_v27 = vld [vmem:[#allocation6 + $0x278] sm:$0xf0] }
 0x51a   :  { %5828 = vmatpush.bf16.msrb.mxu0 %v11246_v40  ;;  %v13718_v40 = vld [vmem:[#allocation6 + $0xcc] sm:$0xf]  ;;  %v11698_v59 = vor.u32 %v13818_v31, %v11695_v17  ;;  %v11250_v31 = vor.u32 %v13706_v12, %v11247_v19  ;;  %v11583_v5 = vld [vmem:[#allocation6 + $0x318] sm:$0xf0] }
 0x51b   :  { %5841 = vmatpush.bf16.msrb.mxu1 %v11374_v41  ;;  %v11295_v41 = vld [vmem:[#allocation6 + $0xd8] sm:$0xf0]  ;;  %v13738_v53 = vld [vmem:[#allocation6 + $0x16c] sm:$0xf] }
 0x51c   :  { %5854 = vmatpush.bf16.msrb.mxu2 %v11502_v42  ;;  %v13750_v42 = vld [vmem:[#allocation6 + $0x1cc] sm:$0xf]  ;;  %v11298_v25 = vor.u32 %v13718_v40, %v11295_v41  ;;  %v11378_v17 = vor.u32 %v13738_v53, %v11375_v14  ;;  %v11359_v41 = vld [vmem:[#allocation6 + $0x158] sm:$0xf0] }
 0x51d   :  { %5867 = vmatpush.bf16.msrb.mxu3 %v11630_v44  ;;  %v11551_v44 = vld [vmem:[#allocation6 + $0x2d8] sm:$0xf0]  ;;  %v11426_v48 = vor.u32 %v13750_v42, %v11423_v43  ;;  %v13770_v15 = vld [vmem:[#allocation6 + $0x26c] sm:$0xf] }
 0x51e   :  { %5829 = vmatpush.bf16.msrb.mxu0 %v11230_v51  ;;  %v11554_v50 = vor.u32 %v13782_v54, %v11551_v44  ;;  %v13714_v51 = vld [vmem:[#allocation6 + $0xac] sm:$0xf]  ;;  %v11615_v54 = vld [vmem:[#allocation6 + $0x358] sm:$0xf0] }
 0x51f   :  { %5842 = vmatpush.bf16.msrb.mxu1 %v11358_v52  ;;  %v11279_v52 = vld [vmem:[#allocation6 + $0xb8] sm:$0xf0]  ;;  %v13766_v42 = vld [vmem:[#allocation6 + $0x24c] sm:$0xf] }
 0x520   :  { %5855 = vmatpush.bf16.msrb.mxu2 %v11486_v35  ;;  %v13746_v35 = vld [vmem:[#allocation6 + $0x1ac] sm:$0xf]  ;;  %v11282_v18 = vor.u32 %v13714_v51, %v11279_v52  ;;  %v11343_v52 = vld [vmem:[#allocation6 + $0x138] sm:$0xf0] }
 0x521   :  { %5868 = vmatpush.bf16.msrb.mxu3 %v11614_v56  ;;  %v11535_v56 = vld [vmem:[#allocation6 + $0x2b8] sm:$0xf0]  ;;  %v11410_v58 = vor.u32 %v13746_v35, %v11407_v49  ;;  %v13798_v43 = vld [vmem:[#allocation6 + $0x34c] sm:$0xf] }
 0x522   :  { %5830 = vmatpush.bf16.msrb.mxu0 %v11214_v60  ;;  %v11538_v28 = vor.u32 %v13778_v1, %v11535_v56  ;;  %v13710_v60 = vld [vmem:[#allocation6 + $0x8c] sm:$0xf]  ;;  %v11618_v51 = vor.u32 %v13798_v43, %v11615_v54  ;;  %v11599_v1 = vld [vmem:[#allocation6 + $0x338] sm:$0xf0] }
 0x523   :  { %5843 = vmatpush.bf16.msrb.mxu1 %v11342_v63  ;;  %v11666_v63 = vor.u32 %v13810_v0, %v11663_v57  ;;  %v11266_v10 = vor.u32 %v13710_v60, %v11263_v61  ;;  %v13762_v35 = vld [vmem:[#allocation6 + $0x22c] sm:$0xf]  ;;  %v11327_v61 = vld [vmem:[#allocation6 + $0x118] sm:$0xf0] }
 0x524   :  { %5856 = vmatpush.bf16.msrb.mxu2 %v11470_v4  ;;  %v11391_v4 = vld [vmem:[#allocation6 + $0x198] sm:$0xf0]  ;;  %v13794_v49 = vld [vmem:[#allocation6 + $0x32c] sm:$0xf] }
 0x525   :  { %5869 = vmatpush.bf16.msrb.mxu3 %v11598_v9  ;;  %v11647_v9 = vld [vmem:[#allocation6 + $0x398] sm:$0xf0]  ;;  %v11394_v36 = vor.u32 %v13742_v37, %v11391_v4  ;;  %v11602_v60 = vor.u32 %v13794_v49, %v11599_v1  ;;  %v13758_v37 = vld [vmem:[#allocation6 + $0x20c] sm:$0xf] }
 0x526   :  { %5831 = vmatpush.bf16.msrb.mxu0 %v11198_v13  ;;  %v11650_v13 = vor.u32 %v13806_v8, %v11647_v9  ;;  %v13790_v4 = vld [vmem:[#allocation6 + $0x30c] sm:$0xf] }
 0x527   :  { %5844 = vmatpush.bf16.msrb.mxu1 %v11326_v29  ;;  %v13802_v29 = vld [vmem:[#allocation6 + $0x36c] sm:$0xf] }
 0x528   :  { %5857 = vmatpush.bf16.msrb.mxu2 %v11454_v30  ;;  %v11631_v30 = vld [vmem:[#allocation6 + $0x378] sm:$0xf0] }
 0x529   :  { %5870 = vmatpush.bf16.msrb.mxu3 %v11582_v2  ;;  %5832 = vmatmul.bf16.vlgmr.msrb.gmra.mxu0 %v14825_v6  ;;  %v11506_v2 = vor.u32 %v13770_v15, %v11503_v27  ;;  %v11634_v40 = vor.u32 %v13802_v29, %v11631_v30 }
 0x52a   :  { %5876 = vmatpush.bf16.msra.mxu0 %v11314_v16  ;;  %5845 = vmatmul.bf16.vlgmr.msrb.gmra.mxu1 %v14828_v3  ;;  %v13702_v16 = vld [vmem:[#allocation6 + $0x4c] sm:$0xf] }
 0x52b   :  { %5889 = vmatpush.bf16.msra.mxu1 %v11442_v38  ;;  %5858 = vmatmul.bf16.vlgmr.msrb.gmra.mxu2 %v14831_v26  ;;  %v11231_v38 = vld [vmem:[#allocation6 + $0x58] sm:$0xf0] }
 0x52c   :  { %5902 = vmatpush.bf16.msra.mxu2 %v11570_v39  ;;  %5871 = vmatmul.bf16.vlgmr.msrb.gmra.mxu3 %v14834_v32  ;;  %v13734_v39 = vld [vmem:[#allocation6 + $0x14c] sm:$0xf]  ;;  %v11234_v44 = vor.u32 %v13702_v16, %v11231_v38 }
 0x52d   :  { %5915 = vmatpush.bf16.msra.mxu3 %v11698_v59  ;;  %v11487_v59 = vld [vmem:[#allocation6 + $0x258] sm:$0xf0]  ;;  %v11362_v45 = vor.u32 %v13734_v39, %v11359_v41 }
 0x52e   :  { %5877 = vmatpush.bf16.msra.mxu0 %v11298_v25  ;;  %v11490_v46 = vor.u32 %v13766_v42, %v11487_v59  ;;  %v13698_v25 = vld [vmem:[#allocation6 + $0x2c] sm:$0xf] }
 0x52f   :  { %5890 = vmatpush.bf16.msra.mxu1 %v11426_v48  ;;  %v11215_v48 = vld [vmem:[#allocation6 + $0x38] sm:$0xf0] }
 0x530   :  { %5903 = vmatpush.bf16.msra.mxu2 %v11554_v50  ;;  %v13730_v50 = vld [vmem:[#allocation6 + $0x12c] sm:$0xf]  ;;  %v11218_v56 = vor.u32 %v13698_v25, %v11215_v48  ;;  %v5078_v48 = vperm.slane %v14646_v22, 4 }
 0x531   :  { %5916 = vmatpush.bf16.msra.mxu3 %v11682_v55  ;;  %v11471_v55 = vld [vmem:[#allocation6 + $0x238] sm:$0xf0]  ;;  %v11346_v0 = vor.u32 %v13730_v50, %v11343_v52 }
 0x532   :  { %5878 = vmatpush.bf16.msra.mxu0 %v11282_v18  ;;  %v11474_v57 = vor.u32 %v13762_v35, %v11471_v55  ;;  %v13694_v18 = vld [vmem:[#allocation6 + $0xc] sm:$0xf] }
 0x533   :  { %5891 = vmatpush.bf16.msra.mxu1 %v11410_v58  ;;  %v11199_v58 = vld [vmem:[#allocation6 + $0x18] sm:$0xf0] }
 0x534   :  { %5904 = vmatpush.bf16.msra.mxu2 %v11538_v28  ;;  %v13726_v28 = vld [vmem:[#allocation6 + $0x10c] sm:$0xf]  ;;  %v11202_v7 = vor.u32 %v13694_v18, %v11199_v58 }
 0x535   :  { %5917 = vmatpush.bf16.msra.mxu3 %v11666_v63  ;;  %v11455_v63 = vld [vmem:[#allocation6 + $0x218] sm:$0xf0]  ;;  %v11330_v8 = vor.u32 %v13726_v28, %v11327_v61  ;;  %v5079_v61 = vperm.slane %v14648_v23, 4 }
 0x536   :  { %5879 = vmatpush.bf16.msra.mxu0 %v11266_v10  ;;  %v11458_v9 = vor.u32 %v13758_v37, %v11455_v63  ;;  %v11586_v10 = vor.u32 %v13790_v4, %v11583_v5 }
 0x537   :  { %5892 = vmatpush.bf16.msra.mxu1 %v11394_v36  ;;  %v5076_v36 = vperm.slane %v14642_v20, 4 }
 0x538   :  { %5905 = vmatpush.bf16.msra.mxu2 %v11522_v33 }
 0x539   :  { %5918 = vmatpush.bf16.msra.mxu3 %v11650_v13 }
 0x53a   :  { %5880 = vmatpush.bf16.msra.mxu0 %v11250_v31 }
 0x53b   :  { %5893 = vmatpush.bf16.msra.mxu1 %v11378_v17  ;;  %v5077_v17 = vperm.slane %v14644_v21, 4 }
 0x53c   :  { %5906 = vmatpush.bf16.msra.mxu2 %v11506_v2 }
 0x53d   :  { %5919 = vmatpush.bf16.msra.mxu3 %v11634_v40 }
 0x53e   :  { %5881 = vmatpush.bf16.msra.mxu0 %v11234_v44 }
 0x53f   :  { %5894 = vmatpush.bf16.msra.mxu1 %v11362_v45 }
 0x540   :  { %5907 = vmatpush.bf16.msra.mxu2 %v11490_v46 }
 0x541   :  { %5920 = vmatpush.bf16.msra.mxu3 %v11618_v51 }
 0x542   :  { %5882 = vmatpush.bf16.msra.mxu0 %v11218_v56 }
 0x543   :  { %5895 = vmatpush.bf16.msra.mxu1 %v11346_v0 }
 0x544   :  { %5908 = vmatpush.bf16.msra.mxu2 %v11474_v57 }
 0x545   :  { %5921 = vmatpush.bf16.msra.mxu3 %v11602_v60 }
 0x546   :  { %5883 = vmatpush.bf16.msra.mxu0 %v11202_v7 }
 0x547   :  { %5896 = vmatpush.bf16.msra.mxu1 %v11330_v8 }
 0x548   :  { %5909 = vmatpush.bf16.msra.mxu2 %v11458_v9 }
 0x549   :  { %5922 = vmatpush.bf16.msra.mxu3 %v11586_v10  ;;  %5884 = vmatmul.bf16.vlgmr.msra.gmra.mxu0 %v14825_v6 }
 0x54a   :  { %5897 = vmatmul.bf16.vlgmr.msra.gmra.mxu1 %v14828_v3 }
 0x54b   :  { %5910 = vmatmul.bf16.vlgmr.msra.gmra.mxu2 %v14831_v26 }
 0x54c   :  { %5923 = vmatmul.bf16.vlgmr.msra.gmra.mxu3 %v14834_v32 }
 0x566   :  { %v5729_v33 = vpop.f32.mrf.mxu0 }
 0x567   :  { %v5730_v12 = vadd.f32 %v5729_v33, %v5076_v36  ;;  %v5742_v19 = vpop.f32.mrf.mxu1 }
 0x569   :  { %v5743_v53 = vadd.f32 %v5742_v19, %v5730_v12 }
 0x56e   :  { %v5755_v13 = vpop.f32.mrf.mxu2  ;;  %v5731_v29 = vpop.f32.mrf.mxu0 }
 0x56f   :  { %v5756_v14 = vadd.f32 %v5755_v13, %v5743_v53  ;;  %v5768_v15 = vpop.f32.mrf.mxu3  ;;  %v5744_v30 = vpop.f32.mrf.mxu1 }
 0x571   :  { %v5769_v27 = vadd.f32 %v5768_v15, %v5756_v14 }
 0x573   :  { %v5928_v31 = vmax.f32 %v5769_v27, 0.0 }
 0x575   :  { %v14854_v6 = vadd.f32 %v5928_v31, %v14778_v11 }
 0x576   :  { %v5757_v3 = vpop.f32.mrf.mxu2 }
 0x577   :  { %v14858_v26 = vpack.c.bf16 %v14854_v6, %v14854_v6  ;;  %v5770_v32 = vpop.f32.mrf.mxu3 }
 0x586   :  { %v5781_v2 = vpop.f32.mrf.mxu0 }
 0x587   :  { %v5782_v16 = vadd.f32 %v5781_v2, %v5077_v17  ;;  %v5794_v38 = vpop.f32.mrf.mxu1 }
 0x589   :  { %v5795_v39 = vadd.f32 %v5794_v38, %v5782_v16 }
 0x58e   :  { %v5807_v40 = vpop.f32.mrf.mxu2  ;;  %v5783_v43 = vpop.f32.mrf.mxu0 }
 0x58f   :  { %v5808_v41 = vadd.f32 %v5807_v40, %v5795_v39  ;;  %v5820_v42 = vpop.f32.mrf.mxu3  ;;  %v5796_v54 = vpop.f32.mrf.mxu1 }
 0x591   :  { %v5821_v59 = vadd.f32 %v5820_v42, %v5808_v41 }
 0x593   :  { %v5929_v11 = vmax.f32 %v5821_v59, 0.0 }
 0x595   :  { %v14862_v44 = vadd.f32 %v5929_v11, %v14786_v34 }
 0x596   :  { %v5809_v45 = vpop.f32.mrf.mxu2 }
 0x597   :  { %v14866_v46 = vpack.c.bf16 %v14862_v44, %v14862_v44  ;;  %v5822_v25 = vpop.f32.mrf.mxu3 }
 0x5a6   :  { %v5833_v50 = vpop.f32.mrf.mxu0 }
 0x5a7   :  { %v5834_v51 = vadd.f32 %v5833_v50, %v5078_v48  ;;  %v5846_v52 = vpop.f32.mrf.mxu1 }
 0x5a9   :  { %v5847_v35 = vadd.f32 %v5846_v52, %v5834_v51 }
 0x5ae   :  { %v5859_v55 = vpop.f32.mrf.mxu2  ;;  %v5835_v0 = vpop.f32.mrf.mxu0 }
 0x5af   :  { %v5860_v49 = vadd.f32 %v5859_v55, %v5847_v35  ;;  %v5872_v1 = vpop.f32.mrf.mxu3  ;;  %v5848_v57 = vpop.f32.mrf.mxu1 }
 0x5b1   :  { %v5873_v56 = vadd.f32 %v5872_v1, %v5860_v49 }
 0x5b3   :  { %v5930_v34 = vmax.f32 %v5873_v56, 0.0 }
 0x5b5   :  { %v14870_v18 = vadd.f32 %v5930_v34, %v14794_v47 }
 0x5b6   :  { %v5861_v58 = vpop.f32.mrf.mxu2 }
 0x5b7   :  { %v14874_v28 = vpack.c.bf16 %v14870_v18, %v14870_v18  ;;  %v5874_v60 = vpop.f32.mrf.mxu3 }
 0x5c6   :  { %v5885_v37 = vpop.f32.mrf.mxu0 }
 0x5c7   :  { %v5886_v63 = vadd.f32 %v5885_v37, %v5079_v61  ;;  %v5898_v4 = vpop.f32.mrf.mxu1 }
 0x5c9   :  { %v5899_v5 = vadd.f32 %v5898_v4, %v5886_v63 }
 0x5ce   :  { %v5911_v7 = vpop.f32.mrf.mxu2  ;;  %v5887_v10 = vpop.f32.mrf.mxu0 }
 0x5cf   :  { %v5912_v8 = vadd.f32 %v5911_v7, %v5899_v5  ;;  %v5924_v9 = vpop.f32.mrf.mxu3  ;;  %v5900_v36 = vpop.f32.mrf.mxu1 }
 0x5d1   :  { %v5925_v33 = vadd.f32 %v5924_v9, %v5912_v8 }
 0x5d3   :  { %v5931_v47 = vmax.f32 %v5925_v33, 0.0 }
 0x5d5   :  { %v14878_v12 = vadd.f32 %v5931_v47, %v14802_v62 }
 0x5d6   :  { %v5913_v19 = vpop.f32.mrf.mxu2 }
 0x5d7   :  { %v14882_v53 = vpack.c.bf16 %v14878_v12, %v14878_v12  ;;  %v5926_v13 = vpop.f32.mrf.mxu3 }
 0x5d8   :  { %14454 = dma.done.wait [#allocation12 + $0x5], 16384 }
 0x5d9   :  { %14455 = vsyncadd [#allocation12 + $0x5], 4294950912  ;;  %v11813_v14 = vld [vmem:[#allocation7 + $0xe0] sm:$0xf]  ;;  %v13851_v15 = vld [vmem:[#allocation7 + $0xec] sm:$0xf0] }
 0x5da   :  { %v11941_v27 = vld [vmem:[#allocation7 + $0x1e0] sm:$0xf]  ;;  %v11814_v29 = vor.u32 %v13851_v15, %v11813_v14  ;;  %v13883_v30 = vld [vmem:[#allocation7 + $0x1ec] sm:$0xf0] }
 0x5db   :  { %v12069_v31 = vld [vmem:[#allocation7 + $0x2e0] sm:$0xf]  ;;  %v13915_v3 = vld [vmem:[#allocation7 + $0x2ec] sm:$0xf0]  ;;  %v11942_v32 = vor.u32 %v13883_v30, %v11941_v27 }
 0x5dc   :  { %v12070_v17 = vor.u32 %v13915_v3, %v12069_v31  ;;  %v12197_v2 = vld [vmem:[#allocation7 + $0x3e0] sm:$0xf]  ;;  %v13947_v62 = vld [vmem:[#allocation7 + $0x3ec] sm:$0xf0]  ;;  %6714 = vmatpush.bf16.msrb.mxu0 %v11814_v29 }
 0x5dd   :  { %v11797_v16 = vld [vmem:[#allocation7 + $0xc0] sm:$0xf]  ;;  %v12198_v38 = vor.u32 %v13947_v62, %v12197_v2  ;;  %v13847_v39 = vld [vmem:[#allocation7 + $0xcc] sm:$0xf0]  ;;  %6727 = vmatpush.bf16.msrb.mxu1 %v11942_v32 }
 0x5de   :  { %v11925_v40 = vld [vmem:[#allocation7 + $0x1c0] sm:$0xf]  ;;  %v13879_v41 = vld [vmem:[#allocation7 + $0x1cc] sm:$0xf0]  ;;  %6740 = vmatpush.bf16.msrb.mxu2 %v12070_v17  ;;  %v11798_v42 = vor.u32 %v13847_v39, %v11797_v16 }
 0x5df   :  { %v11926_v59 = vor.u32 %v13879_v41, %v11925_v40  ;;  %v12053_v43 = vld [vmem:[#allocation7 + $0x2c0] sm:$0xf]  ;;  %v13911_v54 = vld [vmem:[#allocation7 + $0x2cc] sm:$0xf0]  ;;  %6753 = vmatpush.bf16.msrb.mxu3 %v12198_v38 }
 0x5e0   :  { %v12181_v11 = vld [vmem:[#allocation7 + $0x3c0] sm:$0xf]  ;;  %v12054_v45 = vor.u32 %v13911_v54, %v12053_v43  ;;  %v13943_v25 = vld [vmem:[#allocation7 + $0x3cc] sm:$0xf0]  ;;  %6715 = vmatpush.bf16.msrb.mxu0 %v11798_v42 }
 0x5e1   :  { %v11781_v48 = vld [vmem:[#allocation7 + $0xa0] sm:$0xf]  ;;  %v13843_v50 = vld [vmem:[#allocation7 + $0xac] sm:$0xf0]  ;;  %v12182_v51 = vor.u32 %v13943_v25, %v12181_v11  ;;  %6728 = vmatpush.bf16.msrb.mxu1 %v11926_v59 }
 0x5e2   :  { %v11909_v52 = vld [vmem:[#allocation7 + $0x1a0] sm:$0xf]  ;;  %v13875_v35 = vld [vmem:[#allocation7 + $0x1ac] sm:$0xf0]  ;;  %v11782_v49 = vor.u32 %v13843_v50, %v11781_v48  ;;  %6741 = vmatpush.bf16.msrb.mxu2 %v12054_v45 }
 0x5e3   :  { %v12037_v55 = vld [vmem:[#allocation7 + $0x2a0] sm:$0xf]  ;;  %v13907_v1 = vld [vmem:[#allocation7 + $0x2ac] sm:$0xf0]  ;;  %v11910_v57 = vor.u32 %v13875_v35, %v11909_v52  ;;  %6754 = vmatpush.bf16.msrb.mxu3 %v12182_v51 }
 0x5e4   :  { %v12165_v56 = vld [vmem:[#allocation7 + $0x3a0] sm:$0xf]  ;;  %v13939_v0 = vld [vmem:[#allocation7 + $0x3ac] sm:$0xf0]  ;;  %v12038_v34 = vor.u32 %v13907_v1, %v12037_v55  ;;  %6716 = vmatpush.bf16.msrb.mxu0 %v11782_v49 }
 0x5e5   :  { %v11765_v58 = vld [vmem:[#allocation7 + $0x80] sm:$0xf]  ;;  %v13839_v60 = vld [vmem:[#allocation7 + $0x8c] sm:$0xf0]  ;;  %v12166_v37 = vor.u32 %v13939_v0, %v12165_v56  ;;  %6729 = vmatpush.bf16.msrb.mxu1 %v11910_v57 }
 0x5e6   :  { %v11893_v61 = vld [vmem:[#allocation7 + $0x180] sm:$0xf]  ;;  %v13871_v63 = vld [vmem:[#allocation7 + $0x18c] sm:$0xf0]  ;;  %v11766_v9 = vor.u32 %v13839_v60, %v11765_v58  ;;  %6742 = vmatpush.bf16.msrb.mxu2 %v12038_v34 }
 0x5e7   :  { %v12021_v4 = vld [vmem:[#allocation7 + $0x280] sm:$0xf]  ;;  %v13903_v5 = vld [vmem:[#allocation7 + $0x28c] sm:$0xf0]  ;;  %v11894_v10 = vor.u32 %v13871_v63, %v11893_v61  ;;  %6755 = vmatpush.bf16.msrb.mxu3 %v12166_v37 }
 0x5e8   :  { %v12149_v7 = vld [vmem:[#allocation7 + $0x380] sm:$0xf]  ;;  %v13935_v8 = vld [vmem:[#allocation7 + $0x38c] sm:$0xf0]  ;;  %v12022_v36 = vor.u32 %v13903_v5, %v12021_v4  ;;  %6717 = vmatpush.bf16.msrb.mxu0 %v11766_v9  ;;  %v13849_v5 = vld [vmem:[#allocation7 + $0xe4] sm:$0xf] }
 0x5e9   :  { %v11749_v33 = vld [vmem:[#allocation7 + $0x60] sm:$0xf]  ;;  %v13835_v47 = vld [vmem:[#allocation7 + $0x6c] sm:$0xf0]  ;;  %v12150_v13 = vor.u32 %v13935_v8, %v12149_v7  ;;  %6730 = vmatpush.bf16.msrb.mxu1 %v11894_v10  ;;  %v11815_v7 = vld [vmem:[#allocation7 + $0xf0] sm:$0xf0] }
 0x5ea   :  { %v11877_v19 = vld [vmem:[#allocation7 + $0x160] sm:$0xf]  ;;  %v13867_v14 = vld [vmem:[#allocation7 + $0x16c] sm:$0xf0]  ;;  %v11750_v31 = vor.u32 %v13835_v47, %v11749_v33  ;;  %6743 = vmatpush.bf16.msrb.mxu2 %v12022_v36  ;;  %v13881_v8 = vld [vmem:[#allocation7 + $0x1e4] sm:$0xf] }
 0x5eb   :  { %v12005_v15 = vld [vmem:[#allocation7 + $0x260] sm:$0xf]  ;;  %v13899_v27 = vld [vmem:[#allocation7 + $0x26c] sm:$0xf0]  ;;  %v11878_v3 = vor.u32 %v13867_v14, %v11877_v19  ;;  %6756 = vmatpush.bf16.msrb.mxu3 %v12150_v13  ;;  %v11943_v10 = vld [vmem:[#allocation7 + $0x1f0] sm:$0xf0] }
 0x5ec   :  { %v12133_v29 = vld [vmem:[#allocation7 + $0x360] sm:$0xf]  ;;  %v13931_v30 = vld [vmem:[#allocation7 + $0x36c] sm:$0xf0]  ;;  %v12006_v32 = vor.u32 %v13899_v27, %v12005_v15  ;;  %6718 = vmatpush.bf16.msrb.mxu0 %v11750_v31  ;;  %v13913_v36 = vld [vmem:[#allocation7 + $0x2e4] sm:$0xf]  ;;  %v11818_v27 = vor.u32 %v13849_v5, %v11815_v7 }
 0x5ed   :  { %v11733_v17 = vld [vmem:[#allocation7 + $0x40] sm:$0xf]  ;;  %v13831_v2 = vld [vmem:[#allocation7 + $0x4c] sm:$0xf0]  ;;  %v12134_v16 = vor.u32 %v13931_v30, %v12133_v29  ;;  %6731 = vmatpush.bf16.msrb.mxu1 %v11878_v3  ;;  %v12071_v33 = vld [vmem:[#allocation7 + $0x2f0] sm:$0xf0]  ;;  %v11946_v29 = vor.u32 %v13881_v8, %v11943_v10 }
 0x5ee   :  { %v11861_v62 = vld [vmem:[#allocation7 + $0x140] sm:$0xf]  ;;  %v13863_v38 = vld [vmem:[#allocation7 + $0x14c] sm:$0xf0]  ;;  %v11734_v59 = vor.u32 %v13831_v2, %v11733_v17  ;;  %6744 = vmatpush.bf16.msrb.mxu2 %v12006_v32  ;;  %v13945_v13 = vld [vmem:[#allocation7 + $0x3e4] sm:$0xf]  ;;  %v12074_v30 = vor.u32 %v13913_v36, %v12071_v33 }
 0x5ef   :  { %v11989_v39 = vld [vmem:[#allocation7 + $0x240] sm:$0xf]  ;;  %v13895_v40 = vld [vmem:[#allocation7 + $0x24c] sm:$0xf0]  ;;  %v11862_v43 = vor.u32 %v13863_v38, %v11861_v62  ;;  %6757 = vmatpush.bf16.msrb.mxu3 %v12134_v16  ;;  %v12199_v14 = vld [vmem:[#allocation7 + $0x3f0] sm:$0xf0] }
 0x5f0   :  { %v12117_v41 = vld [vmem:[#allocation7 + $0x340] sm:$0xf]  ;;  %v13927_v42 = vld [vmem:[#allocation7 + $0x34c] sm:$0xf0]  ;;  %v11990_v54 = vor.u32 %v13895_v40, %v11989_v39  ;;  %6719 = vmatpush.bf16.msrb.mxu0 %v11734_v59  ;;  %v13845_v31 = vld [vmem:[#allocation7 + $0xc4] sm:$0xf]  ;;  %v12202_v17 = vor.u32 %v13945_v13, %v12199_v14 }
 0x5f1   :  { %v11717_v11 = vld [vmem:[#allocation7 + $0x20] sm:$0xf]  ;;  %v13827_v45 = vld [vmem:[#allocation7 + $0x2c] sm:$0xf0]  ;;  %v12118_v48 = vor.u32 %v13927_v42, %v12117_v41  ;;  %6732 = vmatpush.bf16.msrb.mxu1 %v11862_v43  ;;  %v11799_v3 = vld [vmem:[#allocation7 + $0xd0] sm:$0xf0] }
 0x5f2   :  { %v11845_v25 = vld [vmem:[#allocation7 + $0x120] sm:$0xf]  ;;  %v13859_v50 = vld [vmem:[#allocation7 + $0x12c] sm:$0xf0]  ;;  %v11718_v49 = vor.u32 %v13827_v45, %v11717_v11  ;;  %6745 = vmatpush.bf16.msrb.mxu2 %v11990_v54  ;;  %v13877_v32 = vld [vmem:[#allocation7 + $0x1c4] sm:$0xf]  ;;  %v11802_v40 = vor.u32 %v13845_v31, %v11799_v3 }
 0x5f3   :  { %v11973_v51 = vld [vmem:[#allocation7 + $0x220] sm:$0xf]  ;;  %v13891_v52 = vld [vmem:[#allocation7 + $0x22c] sm:$0xf0]  ;;  %v11846_v0 = vor.u32 %v13859_v50, %v11845_v25  ;;  %6758 = vmatpush.bf16.msrb.mxu3 %v12118_v48  ;;  %v11927_v2 = vld [vmem:[#allocation7 + $0x1d0] sm:$0xf0] }
 0x5f4   :  { %v12101_v35 = vld [vmem:[#allocation7 + $0x320] sm:$0xf]  ;;  %v13923_v55 = vld [vmem:[#allocation7 + $0x32c] sm:$0xf0]  ;;  %v11974_v57 = vor.u32 %v13891_v52, %v11973_v51  ;;  %6720 = vmatpush.bf16.msrb.mxu0 %v11718_v49  ;;  %v13909_v62 = vld [vmem:[#allocation7 + $0x2c4] sm:$0xf]  ;;  %v11930_v41 = vor.u32 %v13877_v32, %v11927_v2 }
 0x5f5   :  { %v11701_v1 = vld [vmem:[#allocation7] sm:$0xf]  ;;  %v13823_v56 = vld [vmem:[#allocation7 + $0xc] sm:$0xf0]  ;;  %v12102_v61 = vor.u32 %v13923_v55, %v12101_v35  ;;  %6733 = vmatpush.bf16.msrb.mxu1 %v11846_v0  ;;  %v12055_v16 = vld [vmem:[#allocation7 + $0x2d0] sm:$0xf0] }
 0x5f6   :  { %v11829_v34 = vld [vmem:[#allocation7 + $0x100] sm:$0xf]  ;;  %v13855_v58 = vld [vmem:[#allocation7 + $0x10c] sm:$0xf0]  ;;  %v11702_v9 = vor.u32 %v13823_v56, %v11701_v1  ;;  %6746 = vmatpush.bf16.msrb.mxu2 %v11974_v57  ;;  %v13941_v38 = vld [vmem:[#allocation7 + $0x3c4] sm:$0xf]  ;;  %v12058_v42 = vor.u32 %v13909_v62, %v12055_v16 }
 0x5f7   :  { %v11957_v60 = vld [vmem:[#allocation7 + $0x200] sm:$0xf]  ;;  %v13887_v37 = vld [vmem:[#allocation7 + $0x20c] sm:$0xf0]  ;;  %v11830_v47 = vor.u32 %v13855_v58, %v11829_v34  ;;  %6759 = vmatpush.bf16.msrb.mxu3 %v12102_v61  ;;  %v12183_v39 = vld [vmem:[#allocation7 + $0x3d0] sm:$0xf0] }
 0x5f8   :  { %v12085_v63 = vld [vmem:[#allocation7 + $0x300] sm:$0xf]  ;;  %v13919_v4 = vld [vmem:[#allocation7 + $0x30c] sm:$0xf0]  ;;  %v11958_v19 = vor.u32 %v13887_v37, %v11957_v60  ;;  %6721 = vmatpush.bf16.msrb.mxu0 %v11702_v9  ;;  %v13841_v59 = vld [vmem:[#allocation7 + $0xa4] sm:$0xf]  ;;  %v12186_v11 = vor.u32 %v13941_v38, %v12183_v39 }
 0x5f9   :  { %v12086_v15 = vor.u32 %v13919_v4, %v12085_v63  ;;  %6734 = vmatpush.bf16.msrb.mxu1 %v11830_v47  ;;  %v11783_v43 = vld [vmem:[#allocation7 + $0xb0] sm:$0xf0]  ;;  %v13873_v54 = vld [vmem:[#allocation7 + $0x1a4] sm:$0xf] }
 0x5fa   :  { %6747 = vmatpush.bf16.msrb.mxu2 %v11958_v19  ;;  %v11911_v45 = vld [vmem:[#allocation7 + $0x1b0] sm:$0xf0]  ;;  %v13905_v25 = vld [vmem:[#allocation7 + $0x2a4] sm:$0xf]  ;;  %v11786_v52 = vor.u32 %v13841_v59, %v11783_v43 }
 0x5fb   :  { %6760 = vmatpush.bf16.msrb.mxu3 %v12086_v15  ;;  %v12039_v48 = vld [vmem:[#allocation7 + $0x2b0] sm:$0xf0]  ;;  %v13937_v50 = vld [vmem:[#allocation7 + $0x3a4] sm:$0xf]  ;;  %6722 = vmatmul.bf16.vlgmr.msrb.gmra.mxu0 %v14858_v26  ;;  %v11914_v35 = vor.u32 %v13873_v54, %v11911_v45 }
 0x5fc   :  { %6766 = vmatpush.bf16.msra.mxu0 %v11818_v27  ;;  %v12167_v51 = vld [vmem:[#allocation7 + $0x3b0] sm:$0xf0]  ;;  %6735 = vmatmul.bf16.vlgmr.msrb.gmra.mxu1 %v14866_v46  ;;  %v12042_v55 = vor.u32 %v13905_v25, %v12039_v48  ;;  %v13837_v49 = vld [vmem:[#allocation7 + $0x84] sm:$0xf] }
 0x5fd   :  { %6779 = vmatpush.bf16.msra.mxu1 %v11946_v29  ;;  %6748 = vmatmul.bf16.vlgmr.msrb.gmra.mxu2 %v14874_v28  ;;  %v11767_v1 = vld [vmem:[#allocation7 + $0x90] sm:$0xf0]  ;;  %v13869_v56 = vld [vmem:[#allocation7 + $0x184] sm:$0xf]  ;;  %v12170_v0 = vor.u32 %v13937_v50, %v12167_v51 }
 0x5fe   :  { %6792 = vmatpush.bf16.msra.mxu2 %v12074_v30  ;;  %6761 = vmatmul.bf16.vlgmr.msrb.gmra.mxu3 %v14882_v53  ;;  %v11895_v57 = vld [vmem:[#allocation7 + $0x190] sm:$0xf0]  ;;  %v13901_v34 = vld [vmem:[#allocation7 + $0x284] sm:$0xf]  ;;  %v11770_v37 = vor.u32 %v13837_v49, %v11767_v1 }
 0x5ff   :  { %6805 = vmatpush.bf16.msra.mxu3 %v12202_v17  ;;  %v12023_v58 = vld [vmem:[#allocation7 + $0x290] sm:$0xf0]  ;;  %v13933_v60 = vld [vmem:[#allocation7 + $0x384] sm:$0xf]  ;;  %v11898_v63 = vor.u32 %v13869_v56, %v11895_v57 }
 0x600   :  { %6767 = vmatpush.bf16.msra.mxu0 %v11802_v40  ;;  %v12151_v61 = vld [vmem:[#allocation7 + $0x390] sm:$0xf0]  ;;  %v12026_v4 = vor.u32 %v13901_v34, %v12023_v58  ;;  %v13833_v5 = vld [vmem:[#allocation7 + $0x64] sm:$0xf]  ;;  %v11821_v58 = vld [vmem:[#allocation7 + $0xe8] sm:$0xf] }
 0x601   :  { %6780 = vmatpush.bf16.msra.mxu1 %v11930_v41  ;;  %v11751_v7 = vld [vmem:[#allocation7 + $0x70] sm:$0xf0]  ;;  %v13865_v8 = vld [vmem:[#allocation7 + $0x164] sm:$0xf]  ;;  %v12154_v9 = vor.u32 %v13933_v60, %v12151_v61  ;;  %v13852_v60 = vld [vmem:[#allocation7 + $0xf4] sm:$0xf0] }
 0x602   :  { %6793 = vmatpush.bf16.msra.mxu2 %v12058_v42  ;;  %v11879_v10 = vld [vmem:[#allocation7 + $0x170] sm:$0xf0]  ;;  %v13897_v36 = vld [vmem:[#allocation7 + $0x264] sm:$0xf]  ;;  %v11754_v13 = vor.u32 %v13833_v5, %v11751_v7  ;;  %v11949_v61 = vld [vmem:[#allocation7 + $0x1e8] sm:$0xf] }
 0x603   :  { %6806 = vmatpush.bf16.msra.mxu3 %v12186_v11  ;;  %v12007_v33 = vld [vmem:[#allocation7 + $0x270] sm:$0xf0]  ;;  %v13929_v47 = vld [vmem:[#allocation7 + $0x364] sm:$0xf]  ;;  %v11882_v14 = vor.u32 %v13865_v8, %v11879_v10  ;;  %v13916_v5 = vld [vmem:[#allocation7 + $0x2f4] sm:$0xf0] }
 0x604   :  { %6768 = vmatpush.bf16.msra.mxu0 %v11786_v52  ;;  %v12135_v19 = vld [vmem:[#allocation7 + $0x370] sm:$0xf0]  ;;  %v12010_v15 = vor.u32 %v13897_v36, %v12007_v33  ;;  %v13829_v27 = vld [vmem:[#allocation7 + $0x44] sm:$0xf]  ;;  %v13948_v10 = vld [vmem:[#allocation7 + $0x3f4] sm:$0xf0]  ;;  %v11822_v33 = vor.u32 %v13852_v60, %v11821_v58 }
 0x605   :  { %6781 = vmatpush.bf16.msra.mxu1 %v11914_v35  ;;  %v11735_v29 = vld [vmem:[#allocation7 + $0x50] sm:$0xf0]  ;;  %v13861_v30 = vld [vmem:[#allocation7 + $0x144] sm:$0xf]  ;;  %v12138_v31 = vor.u32 %v13929_v47, %v12135_v19  ;;  %v11757_v58 = vld [vmem:[#allocation7 + $0x68] sm:$0xf] }
 0x606   :  { %6794 = vmatpush.bf16.msra.mxu2 %v12042_v55  ;;  %v11863_v3 = vld [vmem:[#allocation7 + $0x150] sm:$0xf0]  ;;  %v13893_v32 = vld [vmem:[#allocation7 + $0x244] sm:$0xf]  ;;  %v11738_v16 = vor.u32 %v13829_v27, %v11735_v29  ;;  %v13880_v29 = vld [vmem:[#allocation7 + $0x1d4] sm:$0xf0] }
 0x607   :  { %6807 = vmatpush.bf16.msra.mxu3 %v12170_v0  ;;  %v11991_v17 = vld [vmem:[#allocation7 + $0x250] sm:$0xf0]  ;;  %v13925_v2 = vld [vmem:[#allocation7 + $0x344] sm:$0xf]  ;;  %v11866_v38 = vor.u32 %v13861_v30, %v11863_v3  ;;  %v12061_v30 = vld [vmem:[#allocation7 + $0x2c8] sm:$0xf] }
 0x608   :  { %6769 = vmatpush.bf16.msra.mxu0 %v11770_v37  ;;  %v12119_v62 = vld [vmem:[#allocation7 + $0x350] sm:$0xf0]  ;;  %v11994_v39 = vor.u32 %v13893_v32, %v11991_v17  ;;  %v13825_v40 = vld [vmem:[#allocation7 + $0x24] sm:$0xf]  ;;  %v12189_v3 = vld [vmem:[#allocation7 + $0x3c8] sm:$0xf] }
 0x609   :  { %6782 = vmatpush.bf16.msra.mxu1 %v11898_v63  ;;  %v11719_v41 = vld [vmem:[#allocation7 + $0x30] sm:$0xf0]  ;;  %v13857_v42 = vld [vmem:[#allocation7 + $0x124] sm:$0xf]  ;;  %v12122_v59 = vor.u32 %v13925_v2, %v12119_v62  ;;  %v13884_v63 = vld [vmem:[#allocation7 + $0x1f4] sm:$0xf0] }
 0x60a   :  { %6795 = vmatpush.bf16.msra.mxu2 %v12026_v4  ;;  %v11847_v43 = vld [vmem:[#allocation7 + $0x130] sm:$0xf0]  ;;  %v13889_v54 = vld [vmem:[#allocation7 + $0x224] sm:$0xf]  ;;  %v11722_v48 = vor.u32 %v13825_v40, %v11719_v41  ;;  %v12077_v4 = vld [vmem:[#allocation7 + $0x2e8] sm:$0xf]  ;;  %v11950_v47 = vor.u32 %v13884_v63, %v11949_v61 }
 0x60b   :  { %6808 = vmatpush.bf16.msra.mxu3 %v12154_v9  ;;  %v11975_v11 = vld [vmem:[#allocation7 + $0x230] sm:$0xf0]  ;;  %v13921_v45 = vld [vmem:[#allocation7 + $0x324] sm:$0xf]  ;;  %v11850_v52 = vor.u32 %v13857_v42, %v11847_v43  ;;  %v12205_v9 = vld [vmem:[#allocation7 + $0x3e8] sm:$0xf]  ;;  %v12078_v19 = vor.u32 %v13916_v5, %v12077_v4 }
 0x60c   :  { %6770 = vmatpush.bf16.msra.mxu0 %v11754_v13  ;;  %v12103_v25 = vld [vmem:[#allocation7 + $0x330] sm:$0xf0]  ;;  %v13821_v50 = vld [vmem:[#allocation7 + $0x4] sm:$0xf]  ;;  %v11978_v35 = vor.u32 %v13889_v54, %v11975_v11  ;;  %v11805_v13 = vld [vmem:[#allocation7 + $0xc8] sm:$0xf]  ;;  %v12206_v27 = vor.u32 %v13948_v10, %v12205_v9 }
 0x60d   :  { %6783 = vmatpush.bf16.msra.mxu1 %v11882_v14  ;;  %v11703_v51 = vld [vmem:[#allocation7 + $0x10] sm:$0xf0]  ;;  %v13853_v55 = vld [vmem:[#allocation7 + $0x104] sm:$0xf]  ;;  %v12106_v56 = vor.u32 %v13921_v45, %v12103_v25  ;;  %v13848_v14 = vld [vmem:[#allocation7 + $0xd4] sm:$0xf0] }
 0x60e   :  { %6796 = vmatpush.bf16.msra.mxu2 %v12010_v15  ;;  %v11831_v49 = vld [vmem:[#allocation7 + $0x110] sm:$0xf0]  ;;  %v13885_v1 = vld [vmem:[#allocation7 + $0x204] sm:$0xf]  ;;  %v11706_v37 = vor.u32 %v13821_v50, %v11703_v51  ;;  %v11933_v15 = vld [vmem:[#allocation7 + $0x1c8] sm:$0xf]  ;;  %v11806_v17 = vor.u32 %v13848_v14, %v11805_v13 }
 0x60f   :  { %6809 = vmatpush.bf16.msra.mxu3 %v12138_v31  ;;  %v11959_v0 = vld [vmem:[#allocation7 + $0x210] sm:$0xf0]  ;;  %v13917_v57 = vld [vmem:[#allocation7 + $0x304] sm:$0xf]  ;;  %v11834_v7 = vor.u32 %v13853_v55, %v11831_v49  ;;  %v13912_v31 = vld [vmem:[#allocation7 + $0x2d4] sm:$0xf0]  ;;  %v11934_v2 = vor.u32 %v13880_v29, %v11933_v15 }
 0x610   :  { %6771 = vmatpush.bf16.msra.mxu0 %v11738_v16  ;;  %v12087_v34 = vld [vmem:[#allocation7 + $0x310] sm:$0xf0]  ;;  %v11962_v8 = vor.u32 %v13885_v1, %v11959_v0  ;;  %v13944_v32 = vld [vmem:[#allocation7 + $0x3d4] sm:$0xf0]  ;;  %v12062_v62 = vor.u32 %v13912_v31, %v12061_v30  ;;  %v11789_v16 = vld [vmem:[#allocation7 + $0xa8] sm:$0xf] }
 0x611   :  { %6784 = vmatpush.bf16.msra.mxu1 %v11866_v38  ;;  %v12090_v36 = vor.u32 %v13917_v57, %v12087_v34  ;;  %v13844_v38 = vld [vmem:[#allocation7 + $0xb4] sm:$0xf0]  ;;  %v12190_v40 = vor.u32 %v13944_v32, %v12189_v3  ;;  %v12045_v42 = vld [vmem:[#allocation7 + $0x2a8] sm:$0xf] }
 0x612   :  { %6797 = vmatpush.bf16.msra.mxu2 %v11994_v39  ;;  %v11917_v39 = vld [vmem:[#allocation7 + $0x1a8] sm:$0xf]  ;;  %v13876_v41 = vld [vmem:[#allocation7 + $0x1b4] sm:$0xf0]  ;;  %v11790_v11 = vor.u32 %v13844_v38, %v11789_v16 }
 0x613   :  { %6810 = vmatpush.bf16.msra.mxu3 %v12122_v59  ;;  %v13908_v59 = vld [vmem:[#allocation7 + $0x2b4] sm:$0xf0]  ;;  %v12173_v43 = vld [vmem:[#allocation7 + $0x3a8] sm:$0xf]  ;;  %v11918_v45 = vor.u32 %v13876_v41, %v11917_v39 }
 0x614   :  { %6772 = vmatpush.bf16.msra.mxu0 %v11722_v48  ;;  %v13940_v54 = vld [vmem:[#allocation7 + $0x3b4] sm:$0xf0]  ;;  %v12046_v25 = vor.u32 %v13908_v59, %v12045_v42  ;;  %v11773_v48 = vld [vmem:[#allocation7 + $0x88] sm:$0xf] }
 0x615   :  { %6785 = vmatpush.bf16.msra.mxu1 %v11850_v52  ;;  %v13840_v50 = vld [vmem:[#allocation7 + $0x94] sm:$0xf0]  ;;  %v11901_v51 = vld [vmem:[#allocation7 + $0x188] sm:$0xf]  ;;  %v12174_v52 = vor.u32 %v13940_v54, %v12173_v43 }
 0x616   :  { %6798 = vmatpush.bf16.msra.mxu2 %v11978_v35  ;;  %v13872_v35 = vld [vmem:[#allocation7 + $0x194] sm:$0xf0]  ;;  %v12029_v55 = vld [vmem:[#allocation7 + $0x288] sm:$0xf]  ;;  %v11774_v0 = vor.u32 %v13840_v50, %v11773_v48 }
 0x617   :  { %6811 = vmatpush.bf16.msra.mxu3 %v12106_v56  ;;  %v13904_v49 = vld [vmem:[#allocation7 + $0x294] sm:$0xf0]  ;;  %v12157_v1 = vld [vmem:[#allocation7 + $0x388] sm:$0xf]  ;;  %v11902_v57 = vor.u32 %v13872_v35, %v11901_v51 }
 0x618   :  { %6773 = vmatpush.bf16.msra.mxu0 %v11706_v37  ;;  %v13936_v56 = vld [vmem:[#allocation7 + $0x394] sm:$0xf0]  ;;  %v12030_v34 = vor.u32 %v13904_v49, %v12029_v55  ;;  %v11885_v61 = vld [vmem:[#allocation7 + $0x168] sm:$0xf]  ;;  %v13850_v49 = vld [vmem:[#allocation7 + $0xec] sm:$0xf] }
 0x619   :  { %6786 = vmatpush.bf16.msra.mxu1 %v11834_v7  ;;  %v13836_v60 = vld [vmem:[#allocation7 + $0x74] sm:$0xf0]  ;;  %v12158_v37 = vor.u32 %v13936_v56, %v12157_v1  ;;  %v12013_v4 = vld [vmem:[#allocation7 + $0x268] sm:$0xf]  ;;  %v11823_v1 = vld [vmem:[#allocation7 + $0xf8] sm:$0xf0] }
 0x61a   :  { %6799 = vmatpush.bf16.msra.mxu2 %v11962_v8  ;;  %v13868_v63 = vld [vmem:[#allocation7 + $0x174] sm:$0xf0]  ;;  %v12141_v7 = vld [vmem:[#allocation7 + $0x368] sm:$0xf]  ;;  %v11758_v9 = vor.u32 %v13836_v60, %v11757_v58  ;;  %v13882_v56 = vld [vmem:[#allocation7 + $0x1ec] sm:$0xf] }
 0x61b   :  { %6812 = vmatpush.bf16.msra.mxu3 %v12090_v36  ;;  %6774 = vmatmul.bf16.vlgmr.msra.gmra.mxu0 %v14858_v26  ;;  %v13900_v5 = vld [vmem:[#allocation7 + $0x274] sm:$0xf0]  ;;  %v11886_v10 = vor.u32 %v13868_v63, %v11885_v61  ;;  %v11997_v15 = vld [vmem:[#allocation7 + $0x248] sm:$0xf]  ;;  %v12079_v58 = vld [vmem:[#allocation7 + $0x2f8] sm:$0xf0] }
 0x61c   :  { %6818 = vmatpush.bf16.msrb.mxu0 %v11822_v33  ;;  %6787 = vmatmul.bf16.vlgmr.msra.gmra.mxu1 %v14866_v46  ;;  %v13932_v8 = vld [vmem:[#allocation7 + $0x374] sm:$0xf0]  ;;  %v12014_v36 = vor.u32 %v13900_v5, %v12013_v4  ;;  %v11741_v33 = vld [vmem:[#allocation7 + $0x48] sm:$0xf]  ;;  %v12207_v63 = vld [vmem:[#allocation7 + $0x3f8] sm:$0xf0]  ;;  %v11826_v5 = vor.u32 %v13850_v49, %v11823_v1 }
 0x61d   :  { %6831 = vmatpush.bf16.msrb.mxu1 %v11950_v47  ;;  %6800 = vmatmul.bf16.vlgmr.msra.gmra.mxu2 %v14874_v28  ;;  %v13832_v47 = vld [vmem:[#allocation7 + $0x54] sm:$0xf0]  ;;  %v12142_v13 = vor.u32 %v13932_v8, %v12141_v7  ;;  %v12125_v29 = vld [vmem:[#allocation7 + $0x348] sm:$0xf]  ;;  %v13834_v49 = vld [vmem:[#allocation7 + $0x6c] sm:$0xf] }
 0x61e   :  { %6844 = vmatpush.bf16.msrb.mxu2 %v12078_v19  ;;  %6813 = vmatmul.bf16.vlgmr.msra.gmra.mxu3 %v14882_v53  ;;  %v11869_v19 = vld [vmem:[#allocation7 + $0x148] sm:$0xf]  ;;  %v13864_v14 = vld [vmem:[#allocation7 + $0x154] sm:$0xf0]  ;;  %v11742_v31 = vor.u32 %v13832_v47, %v11741_v33  ;;  %v11935_v47 = vld [vmem:[#allocation7 + $0x1d8] sm:$0xf0] }
 0x61f   :  { %6857 = vmatpush.bf16.msrb.mxu3 %v12206_v27  ;;  %v13896_v27 = vld [vmem:[#allocation7 + $0x254] sm:$0xf0]  ;;  %v11870_v3 = vor.u32 %v13864_v14, %v11869_v19  ;;  %v11981_v39 = vld [vmem:[#allocation7 + $0x228] sm:$0xf]  ;;  %v13910_v19 = vld [vmem:[#allocation7 + $0x2cc] sm:$0xf] }
 0x620   :  { %6819 = vmatpush.bf16.msrb.mxu0 %v11806_v17  ;;  %v13928_v30 = vld [vmem:[#allocation7 + $0x354] sm:$0xf0]  ;;  %v11998_v32 = vor.u32 %v13896_v27, %v11997_v15  ;;  %v11725_v17 = vld [vmem:[#allocation7 + $0x28] sm:$0xf]  ;;  %v13942_v14 = vld [vmem:[#allocation7 + $0x3cc] sm:$0xf] }
 0x621   :  { %6832 = vmatpush.bf16.msrb.mxu1 %v11934_v2  ;;  %v13828_v2 = vld [vmem:[#allocation7 + $0x34] sm:$0xf0]  ;;  %v12126_v16 = vor.u32 %v13928_v30, %v12125_v29  ;;  %v12109_v41 = vld [vmem:[#allocation7 + $0x328] sm:$0xf]  ;;  %v12191_v15 = vld [vmem:[#allocation7 + $0x3d8] sm:$0xf0] }
 0x622   :  { %6845 = vmatpush.bf16.msrb.mxu2 %v12062_v62  ;;  %v11853_v62 = vld [vmem:[#allocation7 + $0x128] sm:$0xf]  ;;  %v13860_v38 = vld [vmem:[#allocation7 + $0x134] sm:$0xf0]  ;;  %v11726_v59 = vor.u32 %v13828_v2, %v11725_v17  ;;  %v12194_v17 = vor.u32 %v13942_v14, %v12191_v15  ;;  %v11919_v2 = vld [vmem:[#allocation7 + $0x1b8] sm:$0xf0] }
 0x623   :  { %6858 = vmatpush.bf16.msrb.mxu3 %v12190_v40  ;;  %v13892_v40 = vld [vmem:[#allocation7 + $0x234] sm:$0xf0]  ;;  %v11709_v43 = vld [vmem:[#allocation7 + $0x8] sm:$0xf]  ;;  %v11759_v1 = vld [vmem:[#allocation7 + $0x78] sm:$0xf0] }
 0x624   :  { %6820 = vmatpush.bf16.msrb.mxu0 %v11790_v11  ;;  %v13924_v42 = vld [vmem:[#allocation7 + $0x334] sm:$0xf0]  ;;  %v11854_v11 = vor.u32 %v13860_v38, %v11853_v62  ;;  %v11965_v50 = vld [vmem:[#allocation7 + $0x208] sm:$0xf]  ;;  %v13906_v62 = vld [vmem:[#allocation7 + $0x2ac] sm:$0xf] }
 0x625   :  { %6833 = vmatpush.bf16.msrb.mxu1 %v11918_v45  ;;  %v13824_v54 = vld [vmem:[#allocation7 + $0x14] sm:$0xf0]  ;;  %v11982_v45 = vor.u32 %v13892_v40, %v11981_v39  ;;  %v12110_v51 = vor.u32 %v13924_v42, %v12109_v41  ;;  %v12093_v35 = vld [vmem:[#allocation7 + $0x308] sm:$0xf]  ;;  %v13938_v38 = vld [vmem:[#allocation7 + $0x3ac] sm:$0xf] }
 0x626   :  { %6846 = vmatpush.bf16.msrb.mxu2 %v12046_v25  ;;  %v11837_v25 = vld [vmem:[#allocation7 + $0x108] sm:$0xf]  ;;  %v13856_v48 = vld [vmem:[#allocation7 + $0x114] sm:$0xf0]  ;;  %v12175_v39 = vld [vmem:[#allocation7 + $0x3b8] sm:$0xf0] }
 0x627   :  { %6859 = vmatpush.bf16.msrb.mxu3 %v12174_v52  ;;  %v13888_v52 = vld [vmem:[#allocation7 + $0x214] sm:$0xf0]  ;;  %v11838_v60 = vor.u32 %v13856_v48, %v11837_v25  ;;  %v13902_v25 = vld [vmem:[#allocation7 + $0x28c] sm:$0xf]  ;;  %v12031_v48 = vld [vmem:[#allocation7 + $0x298] sm:$0xf0] }
 0x628   :  { %6821 = vmatpush.bf16.msrb.mxu0 %v11774_v0  ;;  %v13920_v55 = vld [vmem:[#allocation7 + $0x314] sm:$0xf0]  ;;  %v11710_v0 = vor.u32 %v13824_v54, %v11709_v43  ;;  %v11966_v61 = vor.u32 %v13888_v52, %v11965_v50  ;;  %v11775_v43 = vld [vmem:[#allocation7 + $0x98] sm:$0xf0]  ;;  %v13870_v54 = vld [vmem:[#allocation7 + $0x18c] sm:$0xf] }
 0x629   :  { %6834 = vmatpush.bf16.msrb.mxu1 %v11902_v57  ;;  %v11951_v57 = vld [vmem:[#allocation7 + $0x1f8] sm:$0xf0]  ;;  %v12094_v4 = vor.u32 %v13920_v55, %v12093_v35  ;;  %v13934_v50 = vld [vmem:[#allocation7 + $0x38c] sm:$0xf]  ;;  %v12034_v55 = vor.u32 %v13902_v25, %v12031_v48 }
 0x62a   :  { %6847 = vmatpush.bf16.msrb.mxu2 %v12030_v34  ;;  %v13914_v34 = vld [vmem:[#allocation7 + $0x2ec] sm:$0xf]  ;;  %v11954_v7 = vor.u32 %v13882_v56, %v11951_v57  ;;  %v11887_v57 = vld [vmem:[#allocation7 + $0x178] sm:$0xf0] }
 0x62b   :  { %6860 = vmatpush.bf16.msrb.mxu3 %v12158_v37  ;;  %v13946_v37 = vld [vmem:[#allocation7 + $0x3ec] sm:$0xf]  ;;  %v12082_v8 = vor.u32 %v13914_v34, %v12079_v58  ;;  %v12015_v58 = vld [vmem:[#allocation7 + $0x278] sm:$0xf0] }
 0x62c   :  { %6822 = vmatpush.bf16.msrb.mxu0 %v11758_v9  ;;  %v13846_v9 = vld [vmem:[#allocation7 + $0xcc] sm:$0xf]  ;;  %v12210_v33 = vor.u32 %v13946_v37, %v12207_v63  ;;  %v11762_v37 = vor.u32 %v13834_v49, %v11759_v1  ;;  %v12095_v25 = vld [vmem:[#allocation7 + $0x318] sm:$0xf0] }
 0x62d   :  { %6835 = vmatpush.bf16.msrb.mxu1 %v11886_v10  ;;  %v11807_v10 = vld [vmem:[#allocation7 + $0xd8] sm:$0xf0]  ;;  %v13866_v56 = vld [vmem:[#allocation7 + $0x16c] sm:$0xf] }
 0x62e   :  { %6848 = vmatpush.bf16.msrb.mxu2 %v12014_v36  ;;  %v13878_v36 = vld [vmem:[#allocation7 + $0x1cc] sm:$0xf]  ;;  %v11810_v27 = vor.u32 %v13846_v9, %v11807_v10  ;;  %v11890_v63 = vor.u32 %v13866_v56, %v11887_v57  ;;  %v11871_v10 = vld [vmem:[#allocation7 + $0x158] sm:$0xf0] }
 0x62f   :  { %6861 = vmatpush.bf16.msrb.mxu3 %v12142_v13  ;;  %v12063_v13 = vld [vmem:[#allocation7 + $0x2d8] sm:$0xf0]  ;;  %v11938_v29 = vor.u32 %v13878_v36, %v11935_v47  ;;  %v13898_v34 = vld [vmem:[#allocation7 + $0x26c] sm:$0xf] }
 0x630   :  { %6823 = vmatpush.bf16.msrb.mxu0 %v11742_v31  ;;  %v12066_v30 = vor.u32 %v13910_v19, %v12063_v13  ;;  %v13842_v31 = vld [vmem:[#allocation7 + $0xac] sm:$0xf]  ;;  %v12127_v19 = vld [vmem:[#allocation7 + $0x358] sm:$0xf0] }
 0x631   :  { %6836 = vmatpush.bf16.msrb.mxu1 %v11870_v3  ;;  %v11791_v3 = vld [vmem:[#allocation7 + $0xb8] sm:$0xf0]  ;;  %v13894_v36 = vld [vmem:[#allocation7 + $0x24c] sm:$0xf] }
 0x632   :  { %6849 = vmatpush.bf16.msrb.mxu2 %v11998_v32  ;;  %v13874_v32 = vld [vmem:[#allocation7 + $0x1ac] sm:$0xf]  ;;  %v11794_v40 = vor.u32 %v13842_v31, %v11791_v3  ;;  %v11855_v3 = vld [vmem:[#allocation7 + $0x138] sm:$0xf0] }
 0x633   :  { %6862 = vmatpush.bf16.msrb.mxu3 %v12126_v16  ;;  %v12047_v16 = vld [vmem:[#allocation7 + $0x2b8] sm:$0xf0]  ;;  %v11922_v41 = vor.u32 %v13874_v32, %v11919_v2  ;;  %v13926_v47 = vld [vmem:[#allocation7 + $0x34c] sm:$0xf] }
 0x634   :  { %6824 = vmatpush.bf16.msrb.mxu0 %v11726_v59  ;;  %v12050_v42 = vor.u32 %v13906_v62, %v12047_v16  ;;  %v13838_v59 = vld [vmem:[#allocation7 + $0x8c] sm:$0xf]  ;;  %v12130_v31 = vor.u32 %v13926_v47, %v12127_v19  ;;  %v12111_v62 = vld [vmem:[#allocation7 + $0x338] sm:$0xf0] }
 0x635   :  { %6837 = vmatpush.bf16.msrb.mxu1 %v11854_v11  ;;  %v12178_v11 = vor.u32 %v13938_v38, %v12175_v39  ;;  %v11778_v52 = vor.u32 %v13838_v59, %v11775_v43  ;;  %v13890_v32 = vld [vmem:[#allocation7 + $0x22c] sm:$0xf]  ;;  %v11839_v43 = vld [vmem:[#allocation7 + $0x118] sm:$0xf0] }
 0x636   :  { %6850 = vmatpush.bf16.msrb.mxu2 %v11982_v45  ;;  %v11903_v45 = vld [vmem:[#allocation7 + $0x198] sm:$0xf0]  ;;  %v13922_v2 = vld [vmem:[#allocation7 + $0x32c] sm:$0xf] }
 0x637   :  { %6863 = vmatpush.bf16.msrb.mxu3 %v12110_v51  ;;  %v12159_v51 = vld [vmem:[#allocation7 + $0x398] sm:$0xf0]  ;;  %v11906_v35 = vor.u32 %v13870_v54, %v11903_v45  ;;  %v12114_v59 = vor.u32 %v13922_v2, %v12111_v62  ;;  %v13886_v54 = vld [vmem:[#allocation7 + $0x20c] sm:$0xf] }
 0x638   :  { %6825 = vmatpush.bf16.msrb.mxu0 %v11710_v0  ;;  %v12162_v0 = vor.u32 %v13934_v50, %v12159_v51  ;;  %v13918_v45 = vld [vmem:[#allocation7 + $0x30c] sm:$0xf] }
 0x639   :  { %6838 = vmatpush.bf16.msrb.mxu1 %v11838_v60  ;;  %v13930_v60 = vld [vmem:[#allocation7 + $0x36c] sm:$0xf] }
 0x63a   :  { %6851 = vmatpush.bf16.msrb.mxu2 %v11966_v61  ;;  %v12143_v61 = vld [vmem:[#allocation7 + $0x378] sm:$0xf0] }
 0x63b   :  { %6864 = vmatpush.bf16.msrb.mxu3 %v12094_v4  ;;  %6826 = vmatmul.bf16.vlgmr.msrb.gmra.mxu0 %v14858_v26  ;;  %v12018_v4 = vor.u32 %v13898_v34, %v12015_v58  ;;  %v12146_v9 = vor.u32 %v13930_v60, %v12143_v61 }
 0x63c   :  { %6870 = vmatpush.bf16.msra.mxu0 %v11826_v5  ;;  %6839 = vmatmul.bf16.vlgmr.msrb.gmra.mxu1 %v14866_v46  ;;  %v13830_v5 = vld [vmem:[#allocation7 + $0x4c] sm:$0xf] }
 0x63d   :  { %6883 = vmatpush.bf16.msra.mxu1 %v11954_v7  ;;  %6852 = vmatmul.bf16.vlgmr.msrb.gmra.mxu2 %v14874_v28  ;;  %v11743_v7 = vld [vmem:[#allocation7 + $0x58] sm:$0xf0] }
 0x63e   :  { %6896 = vmatpush.bf16.msra.mxu2 %v12082_v8  ;;  %6865 = vmatmul.bf16.vlgmr.msrb.gmra.mxu3 %v14882_v53  ;;  %v13862_v8 = vld [vmem:[#allocation7 + $0x14c] sm:$0xf]  ;;  %v11746_v13 = vor.u32 %v13830_v5, %v11743_v7 }
 0x63f   :  { %6909 = vmatpush.bf16.msra.mxu3 %v12210_v33  ;;  %v11999_v33 = vld [vmem:[#allocation7 + $0x258] sm:$0xf0]  ;;  %v11874_v14 = vor.u32 %v13862_v8, %v11871_v10 }
 0x640   :  { %6871 = vmatpush.bf16.msra.mxu0 %v11810_v27  ;;  %v12002_v15 = vor.u32 %v13894_v36, %v11999_v33  ;;  %v13826_v27 = vld [vmem:[#allocation7 + $0x2c] sm:$0xf] }
 0x641   :  { %6884 = vmatpush.bf16.msra.mxu1 %v11938_v29  ;;  %v11727_v29 = vld [vmem:[#allocation7 + $0x38] sm:$0xf0] }
 0x642   :  { %6897 = vmatpush.bf16.msra.mxu2 %v12066_v30  ;;  %v13858_v30 = vld [vmem:[#allocation7 + $0x12c] sm:$0xf]  ;;  %v11730_v16 = vor.u32 %v13826_v27, %v11727_v29  ;;  %v6072_v27 = vperm.slane %v14646_v22, 5 }
 0x643   :  { %6910 = vmatpush.bf16.msra.mxu3 %v12194_v17  ;;  %v11983_v17 = vld [vmem:[#allocation7 + $0x238] sm:$0xf0]  ;;  %v11858_v38 = vor.u32 %v13858_v30, %v11855_v3 }
 0x644   :  { %6872 = vmatpush.bf16.msra.mxu0 %v11794_v40  ;;  %v11986_v39 = vor.u32 %v13890_v32, %v11983_v17  ;;  %v13822_v40 = vld [vmem:[#allocation7 + $0xc] sm:$0xf] }
 0x645   :  { %6885 = vmatpush.bf16.msra.mxu1 %v11922_v41  ;;  %v11711_v41 = vld [vmem:[#allocation7 + $0x18] sm:$0xf0] }
 0x646   :  { %6898 = vmatpush.bf16.msra.mxu2 %v12050_v42  ;;  %v13854_v42 = vld [vmem:[#allocation7 + $0x10c] sm:$0xf]  ;;  %v11714_v48 = vor.u32 %v13822_v40, %v11711_v41 }
 0x647   :  { %6911 = vmatpush.bf16.msra.mxu3 %v12178_v11  ;;  %v11967_v11 = vld [vmem:[#allocation7 + $0x218] sm:$0xf0]  ;;  %v11842_v50 = vor.u32 %v13854_v42, %v11839_v43 }
 0x648   :  { %6873 = vmatpush.bf16.msra.mxu0 %v11778_v52  ;;  %v11970_v51 = vor.u32 %v13886_v54, %v11967_v11  ;;  %v12098_v52 = vor.u32 %v13918_v45, %v12095_v25 }
 0x649   :  { %6886 = vmatpush.bf16.msra.mxu1 %v11906_v35  ;;  %v6070_v35 = vperm.slane %v14642_v20, 5 }
 0x64a   :  { %6899 = vmatpush.bf16.msra.mxu2 %v12034_v55 }
 0x64b   :  { %6912 = vmatpush.bf16.msra.mxu3 %v12162_v0 }
 0x64c   :  { %6874 = vmatpush.bf16.msra.mxu0 %v11762_v37 }
 0x64d   :  { %6887 = vmatpush.bf16.msra.mxu1 %v11890_v63 }
 0x64e   :  { %6900 = vmatpush.bf16.msra.mxu2 %v12018_v4 }
 0x64f   :  { %6913 = vmatpush.bf16.msra.mxu3 %v12146_v9 }
 0x650   :  { %6875 = vmatpush.bf16.msra.mxu0 %v11746_v13 }
 0x651   :  { %6888 = vmatpush.bf16.msra.mxu1 %v11874_v14 }
 0x652   :  { %6901 = vmatpush.bf16.msra.mxu2 %v12002_v15 }
 0x653   :  { %6914 = vmatpush.bf16.msra.mxu3 %v12130_v31 }
 0x654   :  { %6876 = vmatpush.bf16.msra.mxu0 %v11730_v16 }
 0x655   :  { %6889 = vmatpush.bf16.msra.mxu1 %v11858_v38 }
 0x656   :  { %6902 = vmatpush.bf16.msra.mxu2 %v11986_v39 }
 0x657   :  { %6915 = vmatpush.bf16.msra.mxu3 %v12114_v59  ;;  %v6073_v59 = vperm.slane %v14648_v23, 5 }
 0x658   :  { %6877 = vmatpush.bf16.msra.mxu0 %v11714_v48 }
 0x659   :  { %6890 = vmatpush.bf16.msra.mxu1 %v11842_v50 }
 0x65a   :  { %6903 = vmatpush.bf16.msra.mxu2 %v11970_v51 }
 0x65b   :  { %6916 = vmatpush.bf16.msra.mxu3 %v12098_v52  ;;  %6878 = vmatmul.bf16.vlgmr.msra.gmra.mxu0 %v14858_v26 }
 0x65c   :  { %6891 = vmatmul.bf16.vlgmr.msra.gmra.mxu1 %v14866_v46 }
 0x65d   :  { %6904 = vmatmul.bf16.vlgmr.msra.gmra.mxu2 %v14874_v28  ;;  %v6071_v28 = vperm.slane %v14644_v21, 5 }
 0x65e   :  { %6917 = vmatmul.bf16.vlgmr.msra.gmra.mxu3 %v14882_v53 }
 0x678   :  { %v6723_v55 = vpop.f32.mrf.mxu0 }
 0x679   :  { %v6724_v49 = vadd.f32 %v6723_v55, %v6070_v35  ;;  %v6736_v1 = vpop.f32.mrf.mxu1 }
 0x67b   :  { %v6737_v56 = vadd.f32 %v6736_v1, %v6724_v49 }
 0x680   :  { %v6749_v0 = vpop.f32.mrf.mxu2  ;;  %v6725_v60 = vpop.f32.mrf.mxu0 }
 0x681   :  { %v6750_v57 = vadd.f32 %v6749_v0, %v6737_v56  ;;  %v6762_v34 = vpop.f32.mrf.mxu3  ;;  %v6738_v61 = vpop.f32.mrf.mxu1 }
 0x683   :  { %v6763_v58 = vadd.f32 %v6762_v34, %v6750_v57 }
 0x685   :  { %v6922_v37 = vmax.f32 %v6763_v58, 0.0 }
 0x687   :  { %v14901_v26 = vpack.c.bf16 %v6922_v37, %v6922_v37 }
 0x688   :  { %v6751_v46 = vpop.f32.mrf.mxu2 }
 0x689   :  { %v6764_v63 = vpop.f32.mrf.mxu3 }
 0x698   :  { %v6775_v53 = vpop.f32.mrf.mxu0 }
 0x699   :  { %v6776_v4 = vadd.f32 %v6775_v53, %v6071_v28  ;;  %v6788_v5 = vpop.f32.mrf.mxu1 }
 0x69b   :  { %v6789_v7 = vadd.f32 %v6788_v5, %v6776_v4 }
 0x6a0   :  { %v6801_v8 = vpop.f32.mrf.mxu2  ;;  %v6777_v33 = vpop.f32.mrf.mxu0 }
 0x6a1   :  { %v6802_v9 = vadd.f32 %v6801_v8, %v6789_v7  ;;  %v6814_v10 = vpop.f32.mrf.mxu3  ;;  %v6790_v47 = vpop.f32.mrf.mxu1 }
 0x6a3   :  { %v6815_v36 = vadd.f32 %v6814_v10, %v6802_v9 }
 0x6a5   :  { %v6923_v19 = vmax.f32 %v6815_v36, 0.0 }
 0x6a7   :  { %v14904_v13 = vpack.c.bf16 %v6923_v19, %v6923_v19 }
 0x6a8   :  { %v6803_v14 = vpop.f32.mrf.mxu2 }
 0x6a9   :  { %v6816_v15 = vpop.f32.mrf.mxu3 }
 0x6b8   :  { %v6827_v29 = vpop.f32.mrf.mxu0 }
 0x6b9   :  { %v6828_v30 = vadd.f32 %v6827_v29, %v6072_v27  ;;  %v6840_v31 = vpop.f32.mrf.mxu1 }
 0x6bb   :  { %v6841_v3 = vadd.f32 %v6840_v31, %v6828_v30 }
 0x6c0   :  { %v6853_v32 = vpop.f32.mrf.mxu2  ;;  %v6829_v16 = vpop.f32.mrf.mxu0 }
 0x6c1   :  { %v6854_v17 = vadd.f32 %v6853_v32, %v6841_v3  ;;  %v6866_v2 = vpop.f32.mrf.mxu3  ;;  %v6842_v38 = vpop.f32.mrf.mxu1 }
 0x6c3   :  { %v6867_v62 = vadd.f32 %v6866_v2, %v6854_v17 }
 0x6c5   :  { %v6924_v39 = vmax.f32 %v6867_v62, 0.0 }
 0x6c7   :  { %v14907_v40 = vpack.c.bf16 %v6924_v39, %v6924_v39 }
 0x6c8   :  { %v6855_v41 = vpop.f32.mrf.mxu2 }
 0x6c9   :  { %v6868_v42 = vpop.f32.mrf.mxu3 }
 0x6d8   :  { %v6879_v43 = vpop.f32.mrf.mxu0 }
 0x6d9   :  { %v6880_v54 = vadd.f32 %v6879_v43, %v6073_v59  ;;  %v6892_v11 = vpop.f32.mrf.mxu1 }
 0x6db   :  { %v6893_v45 = vadd.f32 %v6892_v11, %v6880_v54 }
 0x6e0   :  { %v6905_v25 = vpop.f32.mrf.mxu2  ;;  %v6881_v51 = vpop.f32.mrf.mxu0 }
 0x6e1   :  { %v6906_v48 = vadd.f32 %v6905_v25, %v6893_v45  ;;  %v6918_v50 = vpop.f32.mrf.mxu3  ;;  %v6894_v52 = vpop.f32.mrf.mxu1 }
 0x6e3   :  { %v6919_v35 = vadd.f32 %v6918_v50, %v6906_v48 }
 0x6e5   :  { %v6925_v55 = vmax.f32 %v6919_v35, 0.0 }
 0x6e7   :  { %v14910_v49 = vpack.c.bf16 %v6925_v55, %v6925_v55 }
 0x6e8   :  { %v6907_v1 = vpop.f32.mrf.mxu2 }
 0x6e9   :  { %v6920_v56 = vpop.f32.mrf.mxu3 }
 0x6ea   :  { %14456 = dma.done.wait [#allocation12 + $0x6], 16384 }
 0x6eb   :  { %14457 = vsyncadd [#allocation12 + $0x6], 4294950912  ;;  %v12325_v0 = vld [vmem:[#allocation8 + $0xe0] sm:$0xf]  ;;  %v13979_v57 = vld [vmem:[#allocation8 + $0xec] sm:$0xf0] }
 0x6ec   :  { %v12453_v34 = vld [vmem:[#allocation8 + $0x1e0] sm:$0xf]  ;;  %v12326_v58 = vor.u32 %v13979_v57, %v12325_v0  ;;  %v14011_v60 = vld [vmem:[#allocation8 + $0x1ec] sm:$0xf0] }
 0x6ed   :  { %v12581_v61 = vld [vmem:[#allocation8 + $0x2e0] sm:$0xf]  ;;  %v14043_v37 = vld [vmem:[#allocation8 + $0x2ec] sm:$0xf0]  ;;  %v12454_v46 = vor.u32 %v14011_v60, %v12453_v34 }
 0x6ee   :  { %v12582_v63 = vor.u32 %v14043_v37, %v12581_v61  ;;  %v12709_v28 = vld [vmem:[#allocation8 + $0x3e0] sm:$0xf]  ;;  %v14075_v53 = vld [vmem:[#allocation8 + $0x3ec] sm:$0xf0]  ;;  %7704 = vmatpush.bf16.msrb.mxu0 %v12326_v58 }
 0x6ef   :  { %v12309_v4 = vld [vmem:[#allocation8 + $0xc0] sm:$0xf]  ;;  %v12710_v5 = vor.u32 %v14075_v53, %v12709_v28  ;;  %v13975_v7 = vld [vmem:[#allocation8 + $0xcc] sm:$0xf0]  ;;  %7717 = vmatpush.bf16.msrb.mxu1 %v12454_v46 }
 0x6f0   :  { %v12437_v8 = vld [vmem:[#allocation8 + $0x1c0] sm:$0xf]  ;;  %v14007_v9 = vld [vmem:[#allocation8 + $0x1cc] sm:$0xf0]  ;;  %7730 = vmatpush.bf16.msrb.mxu2 %v12582_v63  ;;  %v12310_v10 = vor.u32 %v13975_v7, %v12309_v4 }
 0x6f1   :  { %v12438_v36 = vor.u32 %v14007_v9, %v12437_v8  ;;  %v12565_v33 = vld [vmem:[#allocation8 + $0x2c0] sm:$0xf]  ;;  %v14039_v47 = vld [vmem:[#allocation8 + $0x2cc] sm:$0xf0]  ;;  %7743 = vmatpush.bf16.msrb.mxu3 %v12710_v5 }
 0x6f2   :  { %v12693_v19 = vld [vmem:[#allocation8 + $0x3c0] sm:$0xf]  ;;  %v12566_v14 = vor.u32 %v14039_v47, %v12565_v33  ;;  %v14071_v15 = vld [vmem:[#allocation8 + $0x3cc] sm:$0xf0]  ;;  %7705 = vmatpush.bf16.msrb.mxu0 %v12310_v10 }
 0x6f3   :  { %v12293_v27 = vld [vmem:[#allocation8 + $0xa0] sm:$0xf]  ;;  %v13971_v29 = vld [vmem:[#allocation8 + $0xac] sm:$0xf0]  ;;  %v12694_v30 = vor.u32 %v14071_v15, %v12693_v19  ;;  %7718 = vmatpush.bf16.msrb.mxu1 %v12438_v36 }
 0x6f4   :  { %v12421_v31 = vld [vmem:[#allocation8 + $0x1a0] sm:$0xf]  ;;  %v14003_v3 = vld [vmem:[#allocation8 + $0x1ac] sm:$0xf0]  ;;  %v12294_v17 = vor.u32 %v13971_v29, %v12293_v27  ;;  %7731 = vmatpush.bf16.msrb.mxu2 %v12566_v14 }
 0x6f5   :  { %v12549_v32 = vld [vmem:[#allocation8 + $0x2a0] sm:$0xf]  ;;  %v14035_v2 = vld [vmem:[#allocation8 + $0x2ac] sm:$0xf0]  ;;  %v12422_v38 = vor.u32 %v14003_v3, %v12421_v31  ;;  %7744 = vmatpush.bf16.msrb.mxu3 %v12694_v30 }
 0x6f6   :  { %v12677_v62 = vld [vmem:[#allocation8 + $0x3a0] sm:$0xf]  ;;  %v14067_v16 = vld [vmem:[#allocation8 + $0x3ac] sm:$0xf0]  ;;  %v12550_v39 = vor.u32 %v14035_v2, %v12549_v32  ;;  %7706 = vmatpush.bf16.msrb.mxu0 %v12294_v17 }
 0x6f7   :  { %v12277_v41 = vld [vmem:[#allocation8 + $0x80] sm:$0xf]  ;;  %v13967_v42 = vld [vmem:[#allocation8 + $0x8c] sm:$0xf0]  ;;  %v12678_v43 = vor.u32 %v14067_v16, %v12677_v62  ;;  %7719 = vmatpush.bf16.msrb.mxu1 %v12422_v38 }
 0x6f8   :  { %v12405_v59 = vld [vmem:[#allocation8 + $0x180] sm:$0xf]  ;;  %v13999_v54 = vld [vmem:[#allocation8 + $0x18c] sm:$0xf0]  ;;  %v12278_v50 = vor.u32 %v13967_v42, %v12277_v41  ;;  %7732 = vmatpush.bf16.msrb.mxu2 %v12550_v39 }
 0x6f9   :  { %v12533_v11 = vld [vmem:[#allocation8 + $0x280] sm:$0xf]  ;;  %v14031_v45 = vld [vmem:[#allocation8 + $0x28c] sm:$0xf0]  ;;  %v12406_v51 = vor.u32 %v13999_v54, %v12405_v59  ;;  %7745 = vmatpush.bf16.msrb.mxu3 %v12678_v43 }
 0x6fa   :  { %v12661_v25 = vld [vmem:[#allocation8 + $0x380] sm:$0xf]  ;;  %v14063_v48 = vld [vmem:[#allocation8 + $0x38c] sm:$0xf0]  ;;  %v12534_v52 = vor.u32 %v14031_v45, %v12533_v11  ;;  %7707 = vmatpush.bf16.msrb.mxu0 %v12278_v50  ;;  %v13977_v45 = vld [vmem:[#allocation8 + $0xe4] sm:$0xf] }
 0x6fb   :  { %v12261_v35 = vld [vmem:[#allocation8 + $0x60] sm:$0xf]  ;;  %v13963_v55 = vld [vmem:[#allocation8 + $0x6c] sm:$0xf0]  ;;  %v12662_v56 = vor.u32 %v14063_v48, %v12661_v25  ;;  %7720 = vmatpush.bf16.msrb.mxu1 %v12406_v51  ;;  %v12327_v25 = vld [vmem:[#allocation8 + $0xf0] sm:$0xf0] }
 0x6fc   :  { %v12389_v1 = vld [vmem:[#allocation8 + $0x160] sm:$0xf]  ;;  %v13995_v0 = vld [vmem:[#allocation8 + $0x16c] sm:$0xf0]  ;;  %v12262_v61 = vor.u32 %v13963_v55, %v12261_v35  ;;  %7733 = vmatpush.bf16.msrb.mxu2 %v12534_v52  ;;  %v14009_v48 = vld [vmem:[#allocation8 + $0x1e4] sm:$0xf] }
 0x6fd   :  { %v12517_v57 = vld [vmem:[#allocation8 + $0x260] sm:$0xf]  ;;  %v14027_v34 = vld [vmem:[#allocation8 + $0x26c] sm:$0xf0]  ;;  %v12390_v37 = vor.u32 %v13995_v0, %v12389_v1  ;;  %7746 = vmatpush.bf16.msrb.mxu3 %v12662_v56  ;;  %v12455_v51 = vld [vmem:[#allocation8 + $0x1f0] sm:$0xf0] }
 0x6fe   :  { %v12645_v58 = vld [vmem:[#allocation8 + $0x360] sm:$0xf]  ;;  %v14059_v60 = vld [vmem:[#allocation8 + $0x36c] sm:$0xf0]  ;;  %v12518_v46 = vor.u32 %v14027_v34, %v12517_v57  ;;  %7708 = vmatpush.bf16.msrb.mxu0 %v12262_v61  ;;  %v14041_v52 = vld [vmem:[#allocation8 + $0x2e4] sm:$0xf]  ;;  %v12330_v34 = vor.u32 %v13977_v45, %v12327_v25 }
 0x6ff   :  { %v12245_v63 = vld [vmem:[#allocation8 + $0x40] sm:$0xf]  ;;  %v13959_v28 = vld [vmem:[#allocation8 + $0x4c] sm:$0xf0]  ;;  %v12646_v4 = vor.u32 %v14059_v60, %v12645_v58  ;;  %7721 = vmatpush.bf16.msrb.mxu1 %v12390_v37  ;;  %v12583_v35 = vld [vmem:[#allocation8 + $0x2f0] sm:$0xf0]  ;;  %v12458_v58 = vor.u32 %v14009_v48, %v12455_v51 }
 0x700   :  { %v12373_v53 = vld [vmem:[#allocation8 + $0x140] sm:$0xf]  ;;  %v13991_v5 = vld [vmem:[#allocation8 + $0x14c] sm:$0xf0]  ;;  %v12246_v36 = vor.u32 %v13959_v28, %v12245_v63  ;;  %7734 = vmatpush.bf16.msrb.mxu2 %v12518_v46  ;;  %v14073_v56 = vld [vmem:[#allocation8 + $0x3e4] sm:$0xf]  ;;  %v12586_v60 = vor.u32 %v14041_v52, %v12583_v35 }
 0x701   :  { %v12501_v7 = vld [vmem:[#allocation8 + $0x240] sm:$0xf]  ;;  %v14023_v8 = vld [vmem:[#allocation8 + $0x24c] sm:$0xf0]  ;;  %v12374_v33 = vor.u32 %v13991_v5, %v12373_v53  ;;  %7747 = vmatpush.bf16.msrb.mxu3 %v12646_v4  ;;  %v12711_v0 = vld [vmem:[#allocation8 + $0x3f0] sm:$0xf0] }
 0x702   :  { %v12629_v9 = vld [vmem:[#allocation8 + $0x340] sm:$0xf]  ;;  %v14055_v10 = vld [vmem:[#allocation8 + $0x34c] sm:$0xf0]  ;;  %v12502_v47 = vor.u32 %v14023_v8, %v12501_v7  ;;  %7709 = vmatpush.bf16.msrb.mxu0 %v12246_v36  ;;  %v13973_v61 = vld [vmem:[#allocation8 + $0xc4] sm:$0xf]  ;;  %v12714_v63 = vor.u32 %v14073_v56, %v12711_v0 }
 0x703   :  { %v12229_v19 = vld [vmem:[#allocation8 + $0x20] sm:$0xf]  ;;  %v13955_v14 = vld [vmem:[#allocation8 + $0x2c] sm:$0xf0]  ;;  %v12630_v27 = vor.u32 %v14055_v10, %v12629_v9  ;;  %7722 = vmatpush.bf16.msrb.mxu1 %v12374_v33  ;;  %v12311_v37 = vld [vmem:[#allocation8 + $0xd0] sm:$0xf0] }
 0x704   :  { %v12357_v15 = vld [vmem:[#allocation8 + $0x120] sm:$0xf]  ;;  %v13987_v29 = vld [vmem:[#allocation8 + $0x12c] sm:$0xf0]  ;;  %v12230_v17 = vor.u32 %v13955_v14, %v12229_v19  ;;  %7735 = vmatpush.bf16.msrb.mxu2 %v12502_v47  ;;  %v14005_v46 = vld [vmem:[#allocation8 + $0x1c4] sm:$0xf]  ;;  %v12314_v8 = vor.u32 %v13973_v61, %v12311_v37 }
 0x705   :  { %v12485_v30 = vld [vmem:[#allocation8 + $0x220] sm:$0xf]  ;;  %v14019_v31 = vld [vmem:[#allocation8 + $0x22c] sm:$0xf0]  ;;  %v12358_v16 = vor.u32 %v13987_v29, %v12357_v15  ;;  %7748 = vmatpush.bf16.msrb.mxu3 %v12630_v27  ;;  %v12439_v28 = vld [vmem:[#allocation8 + $0x1d0] sm:$0xf0] }
 0x706   :  { %v12613_v3 = vld [vmem:[#allocation8 + $0x320] sm:$0xf]  ;;  %v14051_v32 = vld [vmem:[#allocation8 + $0x32c] sm:$0xf0]  ;;  %v12486_v38 = vor.u32 %v14019_v31, %v12485_v30  ;;  %7710 = vmatpush.bf16.msrb.mxu0 %v12230_v17  ;;  %v14037_v53 = vld [vmem:[#allocation8 + $0x2c4] sm:$0xf]  ;;  %v12442_v9 = vor.u32 %v14005_v46, %v12439_v28 }
 0x707   :  { %v12213_v2 = vld [vmem:[#allocation8] sm:$0xf]  ;;  %v13951_v62 = vld [vmem:[#allocation8 + $0xc] sm:$0xf0]  ;;  %v12614_v59 = vor.u32 %v14051_v32, %v12613_v3  ;;  %7723 = vmatpush.bf16.msrb.mxu1 %v12358_v16  ;;  %v12567_v4 = vld [vmem:[#allocation8 + $0x2d0] sm:$0xf0] }
 0x708   :  { %v12341_v39 = vld [vmem:[#allocation8 + $0x100] sm:$0xf]  ;;  %v13983_v41 = vld [vmem:[#allocation8 + $0x10c] sm:$0xf0]  ;;  %v12214_v50 = vor.u32 %v13951_v62, %v12213_v2  ;;  %7736 = vmatpush.bf16.msrb.mxu2 %v12486_v38  ;;  %v14069_v5 = vld [vmem:[#allocation8 + $0x3c4] sm:$0xf]  ;;  %v12570_v10 = vor.u32 %v14037_v53, %v12567_v4 }
 0x709   :  { %v12469_v42 = vld [vmem:[#allocation8 + $0x200] sm:$0xf]  ;;  %v14015_v43 = vld [vmem:[#allocation8 + $0x20c] sm:$0xf0]  ;;  %v12342_v55 = vor.u32 %v13983_v41, %v12341_v39  ;;  %7749 = vmatpush.bf16.msrb.mxu3 %v12614_v59  ;;  %v12695_v7 = vld [vmem:[#allocation8 + $0x3d0] sm:$0xf0] }
 0x70a   :  { %v12597_v54 = vld [vmem:[#allocation8 + $0x300] sm:$0xf]  ;;  %v14047_v11 = vld [vmem:[#allocation8 + $0x30c] sm:$0xf0]  ;;  %v12470_v1 = vor.u32 %v14015_v43, %v12469_v42  ;;  %7711 = vmatpush.bf16.msrb.mxu0 %v12214_v50  ;;  %v13969_v36 = vld [vmem:[#allocation8 + $0xa4] sm:$0xf]  ;;  %v12698_v19 = vor.u32 %v14069_v5, %v12695_v7 }
 0x70b   :  { %v12598_v57 = vor.u32 %v14047_v11, %v12597_v54  ;;  %7724 = vmatpush.bf16.msrb.mxu1 %v12342_v55  ;;  %v12295_v33 = vld [vmem:[#allocation8 + $0xb0] sm:$0xf0]  ;;  %v14001_v47 = vld [vmem:[#allocation8 + $0x1a4] sm:$0xf] }
 0x70c   :  { %7737 = vmatpush.bf16.msrb.mxu2 %v12470_v1  ;;  %v12423_v14 = vld [vmem:[#allocation8 + $0x1b0] sm:$0xf0]  ;;  %v14033_v15 = vld [vmem:[#allocation8 + $0x2a4] sm:$0xf]  ;;  %v12298_v31 = vor.u32 %v13969_v36, %v12295_v33 }
 0x70d   :  { %7750 = vmatpush.bf16.msrb.mxu3 %v12598_v57  ;;  %v12551_v27 = vld [vmem:[#allocation8 + $0x2b0] sm:$0xf0]  ;;  %v14065_v29 = vld [vmem:[#allocation8 + $0x3a4] sm:$0xf]  ;;  %7712 = vmatmul.bf16.vlgmr.msrb.gmra.mxu0 %v14901_v26  ;;  %v12426_v3 = vor.u32 %v14001_v47, %v12423_v14 }
 0x70e   :  { %7756 = vmatpush.bf16.msra.mxu0 %v12330_v34  ;;  %v12679_v30 = vld [vmem:[#allocation8 + $0x3b0] sm:$0xf0]  ;;  %7725 = vmatmul.bf16.vlgmr.msrb.gmra.mxu1 %v14904_v13  ;;  %v12554_v32 = vor.u32 %v14033_v15, %v12551_v27  ;;  %v13965_v17 = vld [vmem:[#allocation8 + $0x84] sm:$0xf] }
 0x70f   :  { %7769 = vmatpush.bf16.msra.mxu1 %v12458_v58  ;;  %7738 = vmatmul.bf16.vlgmr.msrb.gmra.mxu2 %v14907_v40  ;;  %v12279_v2 = vld [vmem:[#allocation8 + $0x90] sm:$0xf0]  ;;  %v13997_v62 = vld [vmem:[#allocation8 + $0x184] sm:$0xf]  ;;  %v12682_v16 = vor.u32 %v14065_v29, %v12679_v30 }
 0x710   :  { %7782 = vmatpush.bf16.msra.mxu2 %v12586_v60  ;;  %7751 = vmatmul.bf16.vlgmr.msrb.gmra.mxu3 %v14910_v49  ;;  %v12407_v38 = vld [vmem:[#allocation8 + $0x190] sm:$0xf0]  ;;  %v14029_v39 = vld [vmem:[#allocation8 + $0x284] sm:$0xf]  ;;  %v12282_v43 = vor.u32 %v13965_v17, %v12279_v2 }
 0x711   :  { %7795 = vmatpush.bf16.msra.mxu3 %v12714_v63  ;;  %v12535_v41 = vld [vmem:[#allocation8 + $0x290] sm:$0xf0]  ;;  %v14061_v42 = vld [vmem:[#allocation8 + $0x384] sm:$0xf]  ;;  %v12410_v54 = vor.u32 %v13997_v62, %v12407_v38 }
 0x712   :  { %7757 = vmatpush.bf16.msra.mxu0 %v12314_v8  ;;  %v12663_v59 = vld [vmem:[#allocation8 + $0x390] sm:$0xf0]  ;;  %v12538_v11 = vor.u32 %v14029_v39, %v12535_v41  ;;  %v13961_v45 = vld [vmem:[#allocation8 + $0x64] sm:$0xf]  ;;  %v12333_v41 = vld [vmem:[#allocation8 + $0xe8] sm:$0xf] }
 0x713   :  { %7770 = vmatpush.bf16.msra.mxu1 %v12442_v9  ;;  %v12263_v25 = vld [vmem:[#allocation8 + $0x70] sm:$0xf0]  ;;  %v13993_v48 = vld [vmem:[#allocation8 + $0x164] sm:$0xf]  ;;  %v12666_v50 = vor.u32 %v14061_v42, %v12663_v59  ;;  %v13980_v42 = vld [vmem:[#allocation8 + $0xf4] sm:$0xf0] }
 0x714   :  { %7783 = vmatpush.bf16.msra.mxu2 %v12570_v10  ;;  %v12391_v51 = vld [vmem:[#allocation8 + $0x170] sm:$0xf0]  ;;  %v14025_v52 = vld [vmem:[#allocation8 + $0x264] sm:$0xf]  ;;  %v12266_v56 = vor.u32 %v13961_v45, %v12263_v25  ;;  %v12461_v59 = vld [vmem:[#allocation8 + $0x1e8] sm:$0xf] }
 0x715   :  { %7796 = vmatpush.bf16.msra.mxu3 %v12698_v19  ;;  %v12519_v35 = vld [vmem:[#allocation8 + $0x270] sm:$0xf0]  ;;  %v14057_v55 = vld [vmem:[#allocation8 + $0x364] sm:$0xf]  ;;  %v12394_v0 = vor.u32 %v13993_v48, %v12391_v51  ;;  %v14044_v45 = vld [vmem:[#allocation8 + $0x2f4] sm:$0xf0] }
 0x716   :  { %7758 = vmatpush.bf16.msra.mxu0 %v12298_v31  ;;  %v12647_v1 = vld [vmem:[#allocation8 + $0x370] sm:$0xf0]  ;;  %v12522_v57 = vor.u32 %v14025_v52, %v12519_v35  ;;  %v13957_v34 = vld [vmem:[#allocation8 + $0x44] sm:$0xf]  ;;  %v14076_v51 = vld [vmem:[#allocation8 + $0x3f4] sm:$0xf0]  ;;  %v12334_v35 = vor.u32 %v13980_v42, %v12333_v41 }
 0x717   :  { %7771 = vmatpush.bf16.msra.mxu1 %v12426_v3  ;;  %v12247_v58 = vld [vmem:[#allocation8 + $0x50] sm:$0xf0]  ;;  %v13989_v60 = vld [vmem:[#allocation8 + $0x144] sm:$0xf]  ;;  %v12650_v61 = vor.u32 %v14057_v55, %v12647_v1  ;;  %v12269_v41 = vld [vmem:[#allocation8 + $0x68] sm:$0xf] }
 0x718   :  { %7784 = vmatpush.bf16.msra.mxu2 %v12554_v32  ;;  %v12375_v37 = vld [vmem:[#allocation8 + $0x150] sm:$0xf0]  ;;  %v14021_v46 = vld [vmem:[#allocation8 + $0x244] sm:$0xf]  ;;  %v12250_v4 = vor.u32 %v13957_v34, %v12247_v58  ;;  %v14008_v58 = vld [vmem:[#allocation8 + $0x1d4] sm:$0xf0] }
 0x719   :  { %7797 = vmatpush.bf16.msra.mxu3 %v12682_v16  ;;  %v12503_v63 = vld [vmem:[#allocation8 + $0x250] sm:$0xf0]  ;;  %v14053_v28 = vld [vmem:[#allocation8 + $0x344] sm:$0xf]  ;;  %v12378_v5 = vor.u32 %v13989_v60, %v12375_v37  ;;  %v12573_v60 = vld [vmem:[#allocation8 + $0x2c8] sm:$0xf] }
 0x71a   :  { %7759 = vmatpush.bf16.msra.mxu0 %v12282_v43  ;;  %v12631_v53 = vld [vmem:[#allocation8 + $0x350] sm:$0xf0]  ;;  %v12506_v7 = vor.u32 %v14021_v46, %v12503_v63  ;;  %v13953_v8 = vld [vmem:[#allocation8 + $0x24] sm:$0xf]  ;;  %v12701_v37 = vld [vmem:[#allocation8 + $0x3c8] sm:$0xf] }
 0x71b   :  { %7772 = vmatpush.bf16.msra.mxu1 %v12410_v54  ;;  %v12231_v9 = vld [vmem:[#allocation8 + $0x30] sm:$0xf0]  ;;  %v13985_v10 = vld [vmem:[#allocation8 + $0x124] sm:$0xf]  ;;  %v12634_v36 = vor.u32 %v14053_v28, %v12631_v53  ;;  %v14012_v54 = vld [vmem:[#allocation8 + $0x1f4] sm:$0xf0] }
 0x71c   :  { %7785 = vmatpush.bf16.msra.mxu2 %v12538_v11  ;;  %v12359_v33 = vld [vmem:[#allocation8 + $0x130] sm:$0xf0]  ;;  %v14017_v47 = vld [vmem:[#allocation8 + $0x224] sm:$0xf]  ;;  %v12234_v27 = vor.u32 %v13953_v8, %v12231_v9  ;;  %v12589_v11 = vld [vmem:[#allocation8 + $0x2e8] sm:$0xf]  ;;  %v12462_v55 = vor.u32 %v14012_v54, %v12461_v59 }
 0x71d   :  { %7798 = vmatpush.bf16.msra.mxu3 %v12666_v50  ;;  %v12487_v19 = vld [vmem:[#allocation8 + $0x230] sm:$0xf0]  ;;  %v14049_v14 = vld [vmem:[#allocation8 + $0x324] sm:$0xf]  ;;  %v12362_v31 = vor.u32 %v13985_v10, %v12359_v33  ;;  %v12717_v50 = vld [vmem:[#allocation8 + $0x3e8] sm:$0xf]  ;;  %v12590_v1 = vor.u32 %v14044_v45, %v12589_v11 }
 0x71e   :  { %7760 = vmatpush.bf16.msra.mxu0 %v12266_v56  ;;  %v12615_v15 = vld [vmem:[#allocation8 + $0x330] sm:$0xf0]  ;;  %v13949_v29 = vld [vmem:[#allocation8 + $0x4] sm:$0xf]  ;;  %v12490_v3 = vor.u32 %v14017_v47, %v12487_v19  ;;  %v12317_v56 = vld [vmem:[#allocation8 + $0xc8] sm:$0xf]  ;;  %v12718_v34 = vor.u32 %v14076_v51, %v12717_v50 }
 0x71f   :  { %7773 = vmatpush.bf16.msra.mxu1 %v12394_v0  ;;  %v12215_v30 = vld [vmem:[#allocation8 + $0x10] sm:$0xf0]  ;;  %v13981_v32 = vld [vmem:[#allocation8 + $0x104] sm:$0xf]  ;;  %v12618_v62 = vor.u32 %v14049_v14, %v12615_v15  ;;  %v13976_v0 = vld [vmem:[#allocation8 + $0xd4] sm:$0xf0] }
 0x720   :  { %7786 = vmatpush.bf16.msra.mxu2 %v12522_v57  ;;  %v12343_v17 = vld [vmem:[#allocation8 + $0x110] sm:$0xf0]  ;;  %v14013_v2 = vld [vmem:[#allocation8 + $0x204] sm:$0xf]  ;;  %v12218_v43 = vor.u32 %v13949_v29, %v12215_v30  ;;  %v12445_v57 = vld [vmem:[#allocation8 + $0x1c8] sm:$0xf]  ;;  %v12318_v63 = vor.u32 %v13976_v0, %v12317_v56 }
 0x721   :  { %7799 = vmatpush.bf16.msra.mxu3 %v12650_v61  ;;  %v12471_v16 = vld [vmem:[#allocation8 + $0x210] sm:$0xf0]  ;;  %v14045_v38 = vld [vmem:[#allocation8 + $0x304] sm:$0xf]  ;;  %v12346_v25 = vor.u32 %v13981_v32, %v12343_v17  ;;  %v14040_v61 = vld [vmem:[#allocation8 + $0x2d4] sm:$0xf0]  ;;  %v12446_v28 = vor.u32 %v14008_v58, %v12445_v57 }
 0x722   :  { %7761 = vmatpush.bf16.msra.mxu0 %v12250_v4  ;;  %v12599_v39 = vld [vmem:[#allocation8 + $0x310] sm:$0xf0]  ;;  %v12474_v48 = vor.u32 %v14013_v2, %v12471_v16  ;;  %v14072_v46 = vld [vmem:[#allocation8 + $0x3d4] sm:$0xf0]  ;;  %v12574_v53 = vor.u32 %v14040_v61, %v12573_v60  ;;  %v12301_v4 = vld [vmem:[#allocation8 + $0xa8] sm:$0xf] }
 0x723   :  { %7774 = vmatpush.bf16.msra.mxu1 %v12378_v5  ;;  %v12602_v52 = vor.u32 %v14045_v38, %v12599_v39  ;;  %v13972_v5 = vld [vmem:[#allocation8 + $0xb4] sm:$0xf0]  ;;  %v12702_v8 = vor.u32 %v14072_v46, %v12701_v37  ;;  %v12557_v10 = vld [vmem:[#allocation8 + $0x2a8] sm:$0xf] }
 0x724   :  { %7787 = vmatpush.bf16.msra.mxu2 %v12506_v7  ;;  %v12429_v7 = vld [vmem:[#allocation8 + $0x1a8] sm:$0xf]  ;;  %v14004_v9 = vld [vmem:[#allocation8 + $0x1b4] sm:$0xf0]  ;;  %v12302_v19 = vor.u32 %v13972_v5, %v12301_v4 }
 0x725   :  { %7800 = vmatpush.bf16.msra.mxu3 %v12634_v36  ;;  %v14036_v36 = vld [vmem:[#allocation8 + $0x2b4] sm:$0xf0]  ;;  %v12685_v33 = vld [vmem:[#allocation8 + $0x3a8] sm:$0xf]  ;;  %v12430_v14 = vor.u32 %v14004_v9, %v12429_v7 }
 0x726   :  { %7762 = vmatpush.bf16.msra.mxu0 %v12234_v27  ;;  %v14068_v47 = vld [vmem:[#allocation8 + $0x3b4] sm:$0xf0]  ;;  %v12558_v15 = vor.u32 %v14036_v36, %v12557_v10  ;;  %v12285_v27 = vld [vmem:[#allocation8 + $0x88] sm:$0xf] }
 0x727   :  { %7775 = vmatpush.bf16.msra.mxu1 %v12362_v31  ;;  %v13968_v29 = vld [vmem:[#allocation8 + $0x94] sm:$0xf0]  ;;  %v12413_v30 = vld [vmem:[#allocation8 + $0x188] sm:$0xf]  ;;  %v12686_v31 = vor.u32 %v14068_v47, %v12685_v33 }
 0x728   :  { %7788 = vmatpush.bf16.msra.mxu2 %v12490_v3  ;;  %v14000_v3 = vld [vmem:[#allocation8 + $0x194] sm:$0xf0]  ;;  %v12541_v32 = vld [vmem:[#allocation8 + $0x288] sm:$0xf]  ;;  %v12286_v16 = vor.u32 %v13968_v29, %v12285_v27 }
 0x729   :  { %7801 = vmatpush.bf16.msra.mxu3 %v12618_v62  ;;  %v14032_v17 = vld [vmem:[#allocation8 + $0x294] sm:$0xf0]  ;;  %v12669_v2 = vld [vmem:[#allocation8 + $0x388] sm:$0xf]  ;;  %v12414_v38 = vor.u32 %v14000_v3, %v12413_v30 }
 0x72a   :  { %7763 = vmatpush.bf16.msra.mxu0 %v12218_v43  ;;  %v14064_v62 = vld [vmem:[#allocation8 + $0x394] sm:$0xf0]  ;;  %v12542_v39 = vor.u32 %v14032_v17, %v12541_v32  ;;  %v12397_v59 = vld [vmem:[#allocation8 + $0x168] sm:$0xf]  ;;  %v13978_v17 = vld [vmem:[#allocation8 + $0xec] sm:$0xf] }
 0x72b   :  { %7776 = vmatpush.bf16.msra.mxu1 %v12346_v25  ;;  %v13964_v42 = vld [vmem:[#allocation8 + $0x74] sm:$0xf0]  ;;  %v12670_v43 = vor.u32 %v14064_v62, %v12669_v2  ;;  %v12525_v11 = vld [vmem:[#allocation8 + $0x268] sm:$0xf]  ;;  %v12335_v2 = vld [vmem:[#allocation8 + $0xf8] sm:$0xf0] }
 0x72c   :  { %7789 = vmatpush.bf16.msra.mxu2 %v12474_v48  ;;  %v13996_v54 = vld [vmem:[#allocation8 + $0x174] sm:$0xf0]  ;;  %v12653_v25 = vld [vmem:[#allocation8 + $0x368] sm:$0xf]  ;;  %v12270_v50 = vor.u32 %v13964_v42, %v12269_v41  ;;  %v14010_v62 = vld [vmem:[#allocation8 + $0x1ec] sm:$0xf] }
 0x72d   :  { %7802 = vmatpush.bf16.msra.mxu3 %v12602_v52  ;;  %7764 = vmatmul.bf16.vlgmr.msra.gmra.mxu0 %v14901_v26  ;;  %v14028_v45 = vld [vmem:[#allocation8 + $0x274] sm:$0xf0]  ;;  %v12398_v51 = vor.u32 %v13996_v54, %v12397_v59  ;;  %v12509_v57 = vld [vmem:[#allocation8 + $0x248] sm:$0xf]  ;;  %v12591_v41 = vld [vmem:[#allocation8 + $0x2f8] sm:$0xf0] }
 0x72e   :  { %7808 = vmatpush.bf16.msrb.mxu0 %v12334_v35  ;;  %7777 = vmatmul.bf16.vlgmr.msra.gmra.mxu1 %v14904_v13  ;;  %v14060_v48 = vld [vmem:[#allocation8 + $0x374] sm:$0xf0]  ;;  %v12526_v52 = vor.u32 %v14028_v45, %v12525_v11  ;;  %v12253_v35 = vld [vmem:[#allocation8 + $0x48] sm:$0xf]  ;;  %v12719_v54 = vld [vmem:[#allocation8 + $0x3f8] sm:$0xf0]  ;;  %v12338_v45 = vor.u32 %v13978_v17, %v12335_v2 }
 0x72f   :  { %7821 = vmatpush.bf16.msrb.mxu1 %v12462_v55  ;;  %7790 = vmatmul.bf16.vlgmr.msra.gmra.mxu2 %v14907_v40  ;;  %v13960_v55 = vld [vmem:[#allocation8 + $0x54] sm:$0xf0]  ;;  %v12654_v56 = vor.u32 %v14060_v48, %v12653_v25  ;;  %v12637_v58 = vld [vmem:[#allocation8 + $0x348] sm:$0xf]  ;;  %v13962_v17 = vld [vmem:[#allocation8 + $0x6c] sm:$0xf] }
 0x730   :  { %7834 = vmatpush.bf16.msrb.mxu2 %v12590_v1  ;;  %7803 = vmatmul.bf16.vlgmr.msra.gmra.mxu3 %v14910_v49  ;;  %v12381_v1 = vld [vmem:[#allocation8 + $0x148] sm:$0xf]  ;;  %v13992_v0 = vld [vmem:[#allocation8 + $0x154] sm:$0xf0]  ;;  %v12254_v61 = vor.u32 %v13960_v55, %v12253_v35  ;;  %v12447_v55 = vld [vmem:[#allocation8 + $0x1d8] sm:$0xf0] }
 0x731   :  { %7847 = vmatpush.bf16.msrb.mxu3 %v12718_v34  ;;  %v14024_v34 = vld [vmem:[#allocation8 + $0x254] sm:$0xf0]  ;;  %v12382_v37 = vor.u32 %v13992_v0, %v12381_v1  ;;  %v12493_v7 = vld [vmem:[#allocation8 + $0x228] sm:$0xf]  ;;  %v14038_v1 = vld [vmem:[#allocation8 + $0x2cc] sm:$0xf] }
 0x732   :  { %7809 = vmatpush.bf16.msrb.mxu0 %v12318_v63  ;;  %v14056_v60 = vld [vmem:[#allocation8 + $0x354] sm:$0xf0]  ;;  %v12510_v46 = vor.u32 %v14024_v34, %v12509_v57  ;;  %v12237_v63 = vld [vmem:[#allocation8 + $0x28] sm:$0xf]  ;;  %v14070_v0 = vld [vmem:[#allocation8 + $0x3cc] sm:$0xf] }
 0x733   :  { %7822 = vmatpush.bf16.msrb.mxu1 %v12446_v28  ;;  %v13956_v28 = vld [vmem:[#allocation8 + $0x34] sm:$0xf0]  ;;  %v12638_v4 = vor.u32 %v14056_v60, %v12637_v58  ;;  %v12621_v9 = vld [vmem:[#allocation8 + $0x328] sm:$0xf]  ;;  %v12703_v57 = vld [vmem:[#allocation8 + $0x3d8] sm:$0xf0] }
 0x734   :  { %7835 = vmatpush.bf16.msrb.mxu2 %v12574_v53  ;;  %v12365_v53 = vld [vmem:[#allocation8 + $0x128] sm:$0xf]  ;;  %v13988_v5 = vld [vmem:[#allocation8 + $0x134] sm:$0xf0]  ;;  %v12238_v36 = vor.u32 %v13956_v28, %v12237_v63  ;;  %v12706_v63 = vor.u32 %v14070_v0, %v12703_v57  ;;  %v12431_v28 = vld [vmem:[#allocation8 + $0x1b8] sm:$0xf0] }
 0x735   :  { %7848 = vmatpush.bf16.msrb.mxu3 %v12702_v8  ;;  %v14020_v8 = vld [vmem:[#allocation8 + $0x234] sm:$0xf0]  ;;  %v12221_v33 = vld [vmem:[#allocation8 + $0x8] sm:$0xf]  ;;  %v12271_v2 = vld [vmem:[#allocation8 + $0x78] sm:$0xf0] }
 0x736   :  { %7810 = vmatpush.bf16.msrb.mxu0 %v12302_v19  ;;  %v14052_v10 = vld [vmem:[#allocation8 + $0x334] sm:$0xf0]  ;;  %v12366_v19 = vor.u32 %v13988_v5, %v12365_v53  ;;  %v12477_v29 = vld [vmem:[#allocation8 + $0x208] sm:$0xf]  ;;  %v14034_v53 = vld [vmem:[#allocation8 + $0x2ac] sm:$0xf] }
 0x737   :  { %7823 = vmatpush.bf16.msrb.mxu1 %v12430_v14  ;;  %v13952_v47 = vld [vmem:[#allocation8 + $0x14] sm:$0xf0]  ;;  %v12494_v14 = vor.u32 %v14020_v8, %v12493_v7  ;;  %v12622_v30 = vor.u32 %v14052_v10, %v12621_v9  ;;  %v12605_v3 = vld [vmem:[#allocation8 + $0x308] sm:$0xf]  ;;  %v14066_v5 = vld [vmem:[#allocation8 + $0x3ac] sm:$0xf] }
 0x738   :  { %7836 = vmatpush.bf16.msrb.mxu2 %v12558_v15  ;;  %v12349_v15 = vld [vmem:[#allocation8 + $0x108] sm:$0xf]  ;;  %v13984_v27 = vld [vmem:[#allocation8 + $0x114] sm:$0xf0]  ;;  %v12687_v7 = vld [vmem:[#allocation8 + $0x3b8] sm:$0xf0] }
 0x739   :  { %7849 = vmatpush.bf16.msrb.mxu3 %v12686_v31  ;;  %v14016_v31 = vld [vmem:[#allocation8 + $0x214] sm:$0xf0]  ;;  %v12350_v42 = vor.u32 %v13984_v27, %v12349_v15  ;;  %v14030_v15 = vld [vmem:[#allocation8 + $0x28c] sm:$0xf]  ;;  %v12543_v27 = vld [vmem:[#allocation8 + $0x298] sm:$0xf0] }
 0x73a   :  { %7811 = vmatpush.bf16.msrb.mxu0 %v12286_v16  ;;  %v14048_v32 = vld [vmem:[#allocation8 + $0x314] sm:$0xf0]  ;;  %v12222_v16 = vor.u32 %v13952_v47, %v12221_v33  ;;  %v12478_v59 = vor.u32 %v14016_v31, %v12477_v29  ;;  %v12287_v33 = vld [vmem:[#allocation8 + $0x98] sm:$0xf0]  ;;  %v13998_v47 = vld [vmem:[#allocation8 + $0x18c] sm:$0xf] }
 0x73b   :  { %7824 = vmatpush.bf16.msrb.mxu1 %v12414_v38  ;;  %v12463_v38 = vld [vmem:[#allocation8 + $0x1f8] sm:$0xf0]  ;;  %v12606_v11 = vor.u32 %v14048_v32, %v12605_v3  ;;  %v14062_v29 = vld [vmem:[#allocation8 + $0x38c] sm:$0xf]  ;;  %v12546_v32 = vor.u32 %v14030_v15, %v12543_v27 }
 0x73c   :  { %7837 = vmatpush.bf16.msrb.mxu2 %v12542_v39  ;;  %v14042_v39 = vld [vmem:[#allocation8 + $0x2ec] sm:$0xf]  ;;  %v12466_v25 = vor.u32 %v14010_v62, %v12463_v38  ;;  %v12399_v38 = vld [vmem:[#allocation8 + $0x178] sm:$0xf0] }
 0x73d   :  { %7850 = vmatpush.bf16.msrb.mxu3 %v12670_v43  ;;  %v14074_v43 = vld [vmem:[#allocation8 + $0x3ec] sm:$0xf]  ;;  %v12594_v48 = vor.u32 %v14042_v39, %v12591_v41  ;;  %v12527_v41 = vld [vmem:[#allocation8 + $0x278] sm:$0xf0] }
 0x73e   :  { %7812 = vmatpush.bf16.msrb.mxu0 %v12270_v50  ;;  %v13974_v50 = vld [vmem:[#allocation8 + $0xcc] sm:$0xf]  ;;  %v12722_v35 = vor.u32 %v14074_v43, %v12719_v54  ;;  %v12274_v43 = vor.u32 %v13962_v17, %v12271_v2  ;;  %v12607_v15 = vld [vmem:[#allocation8 + $0x318] sm:$0xf0] }
 0x73f   :  { %7825 = vmatpush.bf16.msrb.mxu1 %v12398_v51  ;;  %v12319_v51 = vld [vmem:[#allocation8 + $0xd8] sm:$0xf0]  ;;  %v13994_v62 = vld [vmem:[#allocation8 + $0x16c] sm:$0xf] }
 0x740   :  { %7838 = vmatpush.bf16.msrb.mxu2 %v12526_v52  ;;  %v14006_v52 = vld [vmem:[#allocation8 + $0x1cc] sm:$0xf]  ;;  %v12322_v34 = vor.u32 %v13974_v50, %v12319_v51  ;;  %v12402_v54 = vor.u32 %v13994_v62, %v12399_v38  ;;  %v12383_v51 = vld [vmem:[#allocation8 + $0x158] sm:$0xf0] }
 0x741   :  { %7851 = vmatpush.bf16.msrb.mxu3 %v12654_v56  ;;  %v12575_v56 = vld [vmem:[#allocation8 + $0x2d8] sm:$0xf0]  ;;  %v12450_v58 = vor.u32 %v14006_v52, %v12447_v55  ;;  %v14026_v39 = vld [vmem:[#allocation8 + $0x26c] sm:$0xf] }
 0x742   :  { %7813 = vmatpush.bf16.msrb.mxu0 %v12254_v61  ;;  %v12578_v60 = vor.u32 %v14038_v1, %v12575_v56  ;;  %v13970_v61 = vld [vmem:[#allocation8 + $0xac] sm:$0xf]  ;;  %v12639_v1 = vld [vmem:[#allocation8 + $0x358] sm:$0xf0] }
 0x743   :  { %7826 = vmatpush.bf16.msrb.mxu1 %v12382_v37  ;;  %v12303_v37 = vld [vmem:[#allocation8 + $0xb8] sm:$0xf0]  ;;  %v14022_v52 = vld [vmem:[#allocation8 + $0x24c] sm:$0xf] }
 0x744   :  { %7839 = vmatpush.bf16.msrb.mxu2 %v12510_v46  ;;  %v14002_v46 = vld [vmem:[#allocation8 + $0x1ac] sm:$0xf]  ;;  %v12306_v8 = vor.u32 %v13970_v61, %v12303_v37  ;;  %v12367_v37 = vld [vmem:[#allocation8 + $0x138] sm:$0xf0] }
 0x745   :  { %7852 = vmatpush.bf16.msrb.mxu3 %v12638_v4  ;;  %v12559_v4 = vld [vmem:[#allocation8 + $0x2b8] sm:$0xf0]  ;;  %v12434_v9 = vor.u32 %v14002_v46, %v12431_v28  ;;  %v14054_v55 = vld [vmem:[#allocation8 + $0x34c] sm:$0xf] }
 0x746   :  { %7814 = vmatpush.bf16.msrb.mxu0 %v12238_v36  ;;  %v12562_v10 = vor.u32 %v14034_v53, %v12559_v4  ;;  %v13966_v36 = vld [vmem:[#allocation8 + $0x8c] sm:$0xf]  ;;  %v12642_v61 = vor.u32 %v14054_v55, %v12639_v1  ;;  %v12623_v53 = vld [vmem:[#allocation8 + $0x338] sm:$0xf0] }
 0x747   :  { %7827 = vmatpush.bf16.msrb.mxu1 %v12366_v19  ;;  %v12690_v19 = vor.u32 %v14066_v5, %v12687_v7  ;;  %v12290_v31 = vor.u32 %v13966_v36, %v12287_v33  ;;  %v14018_v46 = vld [vmem:[#allocation8 + $0x22c] sm:$0xf]  ;;  %v12351_v33 = vld [vmem:[#allocation8 + $0x118] sm:$0xf0] }
 0x748   :  { %7840 = vmatpush.bf16.msrb.mxu2 %v12494_v14  ;;  %v12415_v14 = vld [vmem:[#allocation8 + $0x198] sm:$0xf0]  ;;  %v14050_v28 = vld [vmem:[#allocation8 + $0x32c] sm:$0xf] }
 0x749   :  { %7853 = vmatpush.bf16.msrb.mxu3 %v12622_v30  ;;  %v12671_v30 = vld [vmem:[#allocation8 + $0x398] sm:$0xf0]  ;;  %v12418_v3 = vor.u32 %v13998_v47, %v12415_v14  ;;  %v12626_v36 = vor.u32 %v14050_v28, %v12623_v53  ;;  %v14014_v47 = vld [vmem:[#allocation8 + $0x20c] sm:$0xf] }
 0x74a   :  { %7815 = vmatpush.bf16.msrb.mxu0 %v12222_v16  ;;  %v12674_v16 = vor.u32 %v14062_v29, %v12671_v30  ;;  %v14046_v14 = vld [vmem:[#allocation8 + $0x30c] sm:$0xf] }
 0x74b   :  { %7828 = vmatpush.bf16.msrb.mxu1 %v12350_v42  ;;  %v14058_v42 = vld [vmem:[#allocation8 + $0x36c] sm:$0xf] }
 0x74c   :  { %7841 = vmatpush.bf16.msrb.mxu2 %v12478_v59  ;;  %v12655_v59 = vld [vmem:[#allocation8 + $0x378] sm:$0xf0] }
 0x74d   :  { %7854 = vmatpush.bf16.msrb.mxu3 %v12606_v11  ;;  %7816 = vmatmul.bf16.vlgmr.msrb.gmra.mxu0 %v14901_v26  ;;  %v12530_v11 = vor.u32 %v14026_v39, %v12527_v41  ;;  %v12658_v50 = vor.u32 %v14058_v42, %v12655_v59 }
 0x74e   :  { %7860 = vmatpush.bf16.msra.mxu0 %v12338_v45  ;;  %7829 = vmatmul.bf16.vlgmr.msrb.gmra.mxu1 %v14904_v13  ;;  %v13958_v45 = vld [vmem:[#allocation8 + $0x4c] sm:$0xf] }
 0x74f   :  { %7873 = vmatpush.bf16.msra.mxu1 %v12466_v25  ;;  %7842 = vmatmul.bf16.vlgmr.msrb.gmra.mxu2 %v14907_v40  ;;  %v12255_v25 = vld [vmem:[#allocation8 + $0x58] sm:$0xf0] }
 0x750   :  { %7886 = vmatpush.bf16.msra.mxu2 %v12594_v48  ;;  %7855 = vmatmul.bf16.vlgmr.msrb.gmra.mxu3 %v14910_v49  ;;  %v13990_v48 = vld [vmem:[#allocation8 + $0x14c] sm:$0xf]  ;;  %v12258_v56 = vor.u32 %v13958_v45, %v12255_v25 }
 0x751   :  { %7899 = vmatpush.bf16.msra.mxu3 %v12722_v35  ;;  %v12511_v35 = vld [vmem:[#allocation8 + $0x258] sm:$0xf0]  ;;  %v12386_v0 = vor.u32 %v13990_v48, %v12383_v51 }
 0x752   :  { %7861 = vmatpush.bf16.msra.mxu0 %v12322_v34  ;;  %v12514_v57 = vor.u32 %v14022_v52, %v12511_v35  ;;  %v13954_v34 = vld [vmem:[#allocation8 + $0x2c] sm:$0xf] }
 0x753   :  { %7874 = vmatpush.bf16.msra.mxu1 %v12450_v58  ;;  %v12239_v58 = vld [vmem:[#allocation8 + $0x38] sm:$0xf0] }
 0x754   :  { %7887 = vmatpush.bf16.msra.mxu2 %v12578_v60  ;;  %v13986_v60 = vld [vmem:[#allocation8 + $0x12c] sm:$0xf]  ;;  %v12242_v4 = vor.u32 %v13954_v34, %v12239_v58  ;;  %v7062_v58 = vperm.slane %v14646_v22, 6 }
 0x755   :  { %7900 = vmatpush.bf16.msra.mxu3 %v12706_v63  ;;  %v12495_v63 = vld [vmem:[#allocation8 + $0x238] sm:$0xf0]  ;;  %v12370_v5 = vor.u32 %v13986_v60, %v12367_v37 }
 0x756   :  { %7862 = vmatpush.bf16.msra.mxu0 %v12306_v8  ;;  %v12498_v7 = vor.u32 %v14018_v46, %v12495_v63  ;;  %v13950_v8 = vld [vmem:[#allocation8 + $0xc] sm:$0xf] }
 0x757   :  { %7875 = vmatpush.bf16.msra.mxu1 %v12434_v9  ;;  %v12223_v9 = vld [vmem:[#allocation8 + $0x18] sm:$0xf0] }
 0x758   :  { %7888 = vmatpush.bf16.msra.mxu2 %v12562_v10  ;;  %v13982_v10 = vld [vmem:[#allocation8 + $0x10c] sm:$0xf]  ;;  %v12226_v27 = vor.u32 %v13950_v8, %v12223_v9 }
 0x759   :  { %7901 = vmatpush.bf16.msra.mxu3 %v12690_v19  ;;  %v12479_v19 = vld [vmem:[#allocation8 + $0x218] sm:$0xf0]  ;;  %v12354_v29 = vor.u32 %v13982_v10, %v12351_v33  ;;  %v7063_v33 = vperm.slane %v14648_v23, 6 }
 0x75a   :  { %7863 = vmatpush.bf16.msra.mxu0 %v12290_v31  ;;  %v12482_v30 = vor.u32 %v14014_v47, %v12479_v19  ;;  %v12610_v31 = vor.u32 %v14046_v14, %v12607_v15 }
 0x75b   :  { %7876 = vmatpush.bf16.msra.mxu1 %v12418_v3  ;;  %v7060_v3 = vperm.slane %v14642_v20, 6 }
 0x75c   :  { %7889 = vmatpush.bf16.msra.mxu2 %v12546_v32 }
 0x75d   :  { %7902 = vmatpush.bf16.msra.mxu3 %v12674_v16 }
 0x75e   :  { %7864 = vmatpush.bf16.msra.mxu0 %v12274_v43 }
 0x75f   :  { %7877 = vmatpush.bf16.msra.mxu1 %v12402_v54 }
 0x760   :  { %7890 = vmatpush.bf16.msra.mxu2 %v12530_v11 }
 0x761   :  { %7903 = vmatpush.bf16.msra.mxu3 %v12658_v50 }
 0x762   :  { %7865 = vmatpush.bf16.msra.mxu0 %v12258_v56 }
 0x763   :  { %7878 = vmatpush.bf16.msra.mxu1 %v12386_v0 }
 0x764   :  { %7891 = vmatpush.bf16.msra.mxu2 %v12514_v57 }
 0x765   :  { %7904 = vmatpush.bf16.msra.mxu3 %v12642_v61 }
 0x766   :  { %7866 = vmatpush.bf16.msra.mxu0 %v12242_v4 }
 0x767   :  { %7879 = vmatpush.bf16.msra.mxu1 %v12370_v5 }
 0x768   :  { %7892 = vmatpush.bf16.msra.mxu2 %v12498_v7 }
 0x769   :  { %7905 = vmatpush.bf16.msra.mxu3 %v12626_v36 }
 0x76a   :  { %7867 = vmatpush.bf16.msra.mxu0 %v12226_v27 }
 0x76b   :  { %7880 = vmatpush.bf16.msra.mxu1 %v12354_v29 }
 0x76c   :  { %7893 = vmatpush.bf16.msra.mxu2 %v12482_v30 }
 0x76d   :  { %7906 = vmatpush.bf16.msra.mxu3 %v12610_v31  ;;  %7868 = vmatmul.bf16.vlgmr.msra.gmra.mxu0 %v14901_v26 }
 0x76e   :  { %7881 = vmatmul.bf16.vlgmr.msra.gmra.mxu1 %v14904_v13 }
 0x76f   :  { %7894 = vmatmul.bf16.vlgmr.msra.gmra.mxu2 %v14907_v40 }
 0x770   :  { %7907 = vmatmul.bf16.vlgmr.msra.gmra.mxu3 %v14910_v49  ;;  %v7061_v49 = vperm.slane %v14644_v21, 6 }
 0x78a   :  { %v7713_v32 = vpop.f32.mrf.mxu0 }
 0x78b   :  { %v7714_v17 = vadd.f32 %v7713_v32, %v7060_v3  ;;  %v7726_v2 = vpop.f32.mrf.mxu1 }
 0x78d   :  { %v7727_v62 = vadd.f32 %v7726_v2, %v7714_v17 }
 0x792   :  { %v7739_v16 = vpop.f32.mrf.mxu2  ;;  %v7715_v42 = vpop.f32.mrf.mxu0 }
 0x793   :  { %v7740_v38 = vadd.f32 %v7739_v16, %v7727_v62  ;;  %v7752_v39 = vpop.f32.mrf.mxu3  ;;  %v7728_v59 = vpop.f32.mrf.mxu1 }
 0x795   :  { %v7753_v41 = vadd.f32 %v7752_v39, %v7740_v38 }
 0x797   :  { %v7912_v43 = vmax.f32 %v7753_v41, 0.0 }
 0x799   :  { %v7916_v26 = vadd.f32 %v7912_v43, %v14854_v6 }
 0x79a   :  { %v7741_v13 = vpop.f32.mrf.mxu2 }
 0x79b   :  { %v14930_v54 = vpack.c.bf16 %v7916_v26, %v7916_v26  ;;  %v7754_v40 = vpop.f32.mrf.mxu3 }
 0x7aa   :  { %v7765_v11 = vpop.f32.mrf.mxu0 }
 0x7ab   :  { %v7766_v45 = vadd.f32 %v7765_v11, %v7061_v49  ;;  %v7778_v25 = vpop.f32.mrf.mxu1 }
 0x7ad   :  { %v7779_v48 = vadd.f32 %v7778_v25, %v7766_v45 }
 0x7b2   :  { %v7791_v50 = vpop.f32.mrf.mxu2  ;;  %v7767_v55 = vpop.f32.mrf.mxu0 }
 0x7b3   :  { %v7792_v51 = vadd.f32 %v7791_v50, %v7779_v48  ;;  %v7804_v52 = vpop.f32.mrf.mxu3  ;;  %v7780_v1 = vpop.f32.mrf.mxu1 }
 0x7b5   :  { %v7805_v35 = vadd.f32 %v7804_v52, %v7792_v51 }
 0x7b7   :  { %v7913_v56 = vmax.f32 %v7805_v35, 0.0 }
 0x7b9   :  { %v7917_v0 = vadd.f32 %v7913_v56, %v14862_v44 }
 0x7ba   :  { %v7793_v6 = vpop.f32.mrf.mxu2 }
 0x7bb   :  { %v14934_v57 = vpack.c.bf16 %v7917_v0, %v7917_v0  ;;  %v7806_v34 = vpop.f32.mrf.mxu3 }
 0x7ca   :  { %v7817_v60 = vpop.f32.mrf.mxu0 }
 0x7cb   :  { %v7818_v61 = vadd.f32 %v7817_v60, %v7062_v58  ;;  %v7830_v37 = vpop.f32.mrf.mxu1 }
 0x7cd   :  { %v7831_v46 = vadd.f32 %v7830_v37, %v7818_v61 }
 0x7d2   :  { %v7843_v63 = vpop.f32.mrf.mxu2  ;;  %v7819_v5 = vpop.f32.mrf.mxu0 }
 0x7d3   :  { %v7844_v28 = vadd.f32 %v7843_v63, %v7831_v46  ;;  %v7856_v53 = vpop.f32.mrf.mxu3  ;;  %v7832_v7 = vpop.f32.mrf.mxu1 }
 0x7d5   :  { %v7857_v4 = vadd.f32 %v7856_v53, %v7844_v28 }
 0x7d7   :  { %v7914_v8 = vmax.f32 %v7857_v4, 0.0 }
 0x7d9   :  { %v7918_v9 = vadd.f32 %v7914_v8, %v14870_v18 }
 0x7da   :  { %v7845_v44 = vpop.f32.mrf.mxu2 }
 0x7db   :  { %v14938_v10 = vpack.c.bf16 %v7918_v9, %v7918_v9  ;;  %v7858_v36 = vpop.f32.mrf.mxu3 }
 0x7ea   :  { %v7869_v22 = vpop.f32.mrf.mxu0 }
 0x7eb   :  { %v7870_v47 = vadd.f32 %v7869_v22, %v7063_v33  ;;  %v7882_v19 = vpop.f32.mrf.mxu1 }
 0x7ed   :  { %v7883_v14 = vadd.f32 %v7882_v19, %v7870_v47 }
 0x7f2   :  { %v7895_v15 = vpop.f32.mrf.mxu2  ;;  %v7871_v30 = vpop.f32.mrf.mxu0 }
 0x7f3   :  { %v7896_v27 = vadd.f32 %v7895_v15, %v7883_v14  ;;  %v7908_v29 = vpop.f32.mrf.mxu3  ;;  %v7884_v31 = vpop.f32.mrf.mxu1 }
 0x7f5   :  { %v7909_v3 = vadd.f32 %v7908_v29, %v7896_v27 }
 0x7f7   :  { %v7915_v32 = vmax.f32 %v7909_v3, 0.0 }
 0x7f9   :  { %v7919_v17 = vadd.f32 %v7915_v32, %v14878_v12 }
 0x7fa   :  { %v7897_v18 = vpop.f32.mrf.mxu2 }
 0x7fb   :  { %v14942_v2 = vpack.c.bf16 %v7919_v17, %v7919_v17  ;;  %v7910_v62 = vpop.f32.mrf.mxu3 }
 0x7fc   :  { %14458 = dma.done.wait [#allocation12 + $0x7], 8192 }
 0x7fd   :  { %14459 = vsyncadd [#allocation12 + $0x7], 4294959104  ;;  %v12781_v23 = vld [vmem:[#allocation9 + $0x70] sm:$0xf]  ;;  %v14092_v16 = vld [vmem:[#allocation9 + $0x74] sm:$0xf0] }
 0x7fe   :  { %v12845_v38 = vld [vmem:[#allocation9 + $0xf0] sm:$0xf]  ;;  %v12782_v39 = vor.u32 %v14092_v16, %v12781_v23  ;;  %v14108_v41 = vld [vmem:[#allocation9 + $0xf4] sm:$0xf0]  ;;  %v12773_v49 = vld [vmem:[#allocation9 + $0x60] sm:$0xf] }
 0x7ff   :  { %v12909_v42 = vld [vmem:[#allocation9 + $0x170] sm:$0xf]  ;;  %v14124_v59 = vld [vmem:[#allocation9 + $0x174] sm:$0xf0]  ;;  %v12846_v43 = vor.u32 %v14108_v41, %v12845_v38  ;;  %v14090_v11 = vld [vmem:[#allocation9 + $0x64] sm:$0xf0] }
 0x800   :  { %v12910_v26 = vor.u32 %v14124_v59, %v12909_v42  ;;  %v12973_v13 = vld [vmem:[#allocation9 + $0x1f0] sm:$0xf]  ;;  %v14140_v40 = vld [vmem:[#allocation9 + $0x1f4] sm:$0xf0]  ;;  %8313 = vmatpush.bf16.msrb.mxu0 %v12782_v39  ;;  %v12837_v45 = vld [vmem:[#allocation9 + $0xe0] sm:$0xf]  ;;  %v12774_v48 = vor.u32 %v14090_v11, %v12773_v49 }
 0x801   :  { %v12974_v12 = vor.u32 %v14140_v40, %v12973_v13  ;;  %v14106_v25 = vld [vmem:[#allocation9 + $0xe4] sm:$0xf0]  ;;  %8326 = vmatpush.bf16.msrb.mxu1 %v12846_v43  ;;  %v12901_v51 = vld [vmem:[#allocation9 + $0x160] sm:$0xf]  ;;  %v12765_v56 = vld [vmem:[#allocation9 + $0x50] sm:$0xf] }
 0x802   :  { %8339 = vmatpush.bf16.msrb.mxu2 %v12910_v26  ;;  %v12838_v50 = vor.u32 %v14106_v25, %v12837_v45  ;;  %v14122_v52 = vld [vmem:[#allocation9 + $0x164] sm:$0xf0]  ;;  %v12965_v35 = vld [vmem:[#allocation9 + $0x1e0] sm:$0xf]  ;;  %v14088_v0 = vld [vmem:[#allocation9 + $0x54] sm:$0xf0] }
 0x803   :  { %8352 = vmatpush.bf16.msrb.mxu3 %v12974_v12  ;;  %v12902_v55 = vor.u32 %v14122_v52, %v12901_v51  ;;  %v14138_v1 = vld [vmem:[#allocation9 + $0x1e4] sm:$0xf0]  ;;  %v12829_v34 = vld [vmem:[#allocation9 + $0xd0] sm:$0xf]  ;;  %v14104_v58 = vld [vmem:[#allocation9 + $0xd4] sm:$0xf0]  ;;  %v12766_v61 = vor.u32 %v14088_v0, %v12765_v56 }
 0x804   :  { %v12966_v6 = vor.u32 %v14138_v1, %v12965_v35  ;;  %v12893_v60 = vld [vmem:[#allocation9 + $0x150] sm:$0xf]  ;;  %8314 = vmatpush.bf16.msrb.mxu0 %v12774_v48  ;;  %v14120_v37 = vld [vmem:[#allocation9 + $0x154] sm:$0xf0]  ;;  %v12830_v28 = vor.u32 %v14104_v58, %v12829_v34  ;;  %v12757_v4 = vld [vmem:[#allocation9 + $0x40] sm:$0xf] }
 0x805   :  { %v12957_v46 = vld [vmem:[#allocation9 + $0x1d0] sm:$0xf]  ;;  %v14136_v63 = vld [vmem:[#allocation9 + $0x1d4] sm:$0xf0]  ;;  %8327 = vmatpush.bf16.msrb.mxu1 %v12838_v50  ;;  %v12894_v53 = vor.u32 %v14120_v37, %v12893_v60  ;;  %v14086_v5 = vld [vmem:[#allocation9 + $0x44] sm:$0xf0] }
 0x806   :  { %8340 = vmatpush.bf16.msrb.mxu2 %v12902_v55  ;;  %v12821_v7 = vld [vmem:[#allocation9 + $0xc0] sm:$0xf]  ;;  %v12958_v8 = vor.u32 %v14136_v63, %v12957_v46  ;;  %v14102_v9 = vld [vmem:[#allocation9 + $0xc4] sm:$0xf0]  ;;  %v12758_v47 = vor.u32 %v14086_v5, %v12757_v4  ;;  %v12749_v15 = vld [vmem:[#allocation9 + $0x30] sm:$0xf] }
 0x807   :  { %8353 = vmatpush.bf16.msrb.mxu3 %v12966_v6  ;;  %v12885_v44 = vld [vmem:[#allocation9 + $0x140] sm:$0xf]  ;;  %v14118_v36 = vld [vmem:[#allocation9 + $0x144] sm:$0xf0]  ;;  %v12822_v19 = vor.u32 %v14102_v9, %v12821_v7  ;;  %v14084_v27 = vld [vmem:[#allocation9 + $0x34] sm:$0xf0] }
 0x808   :  { %v12949_v33 = vld [vmem:[#allocation9 + $0x1c0] sm:$0xf]  ;;  %v14134_v22 = vld [vmem:[#allocation9 + $0x1c4] sm:$0xf0]  ;;  %8315 = vmatpush.bf16.msrb.mxu0 %v12766_v61  ;;  %v12886_v14 = vor.u32 %v14118_v36, %v12885_v44  ;;  %v12813_v29 = vld [vmem:[#allocation9 + $0xb0] sm:$0xf]  ;;  %v12750_v62 = vor.u32 %v14084_v27, %v12749_v15 }
 0x809   :  { %8328 = vmatpush.bf16.msrb.mxu1 %v12830_v28  ;;  %v12950_v30 = vor.u32 %v14134_v22, %v12949_v33  ;;  %v14100_v31 = vld [vmem:[#allocation9 + $0xb4] sm:$0xf0]  ;;  %v12877_v3 = vld [vmem:[#allocation9 + $0x130] sm:$0xf]  ;;  %v12741_v38 = vld [vmem:[#allocation9 + $0x20] sm:$0xf] }
 0x80a   :  { %8341 = vmatpush.bf16.msrb.mxu2 %v12894_v53  ;;  %v14116_v32 = vld [vmem:[#allocation9 + $0x134] sm:$0xf0]  ;;  %v12941_v17 = vld [vmem:[#allocation9 + $0x1b0] sm:$0xf]  ;;  %v12814_v23 = vor.u32 %v14100_v31, %v12813_v29  ;;  %v14082_v39 = vld [vmem:[#allocation9 + $0x24] sm:$0xf0] }
 0x80b   :  { %8354 = vmatpush.bf16.msrb.mxu3 %v12958_v8  ;;  %v14132_v18 = vld [vmem:[#allocation9 + $0x1b4] sm:$0xf0]  ;;  %v12878_v16 = vor.u32 %v14116_v32, %v12877_v3  ;;  %v12805_v41 = vld [vmem:[#allocation9 + $0xa0] sm:$0xf]  ;;  %v14098_v59 = vld [vmem:[#allocation9 + $0xa4] sm:$0xf0]  ;;  %v12742_v49 = vor.u32 %v14082_v39, %v12741_v38 }
 0x80c   :  { %8316 = vmatpush.bf16.msrb.mxu0 %v12758_v47  ;;  %v12942_v42 = vor.u32 %v14132_v18, %v12941_v17  ;;  %v12869_v43 = vld [vmem:[#allocation9 + $0x120] sm:$0xf]  ;;  %v14114_v26 = vld [vmem:[#allocation9 + $0x124] sm:$0xf0]  ;;  %v12806_v12 = vor.u32 %v14098_v59, %v12805_v41  ;;  %v12733_v45 = vld [vmem:[#allocation9 + $0x10] sm:$0xf] }
 0x80d   :  { %8329 = vmatpush.bf16.msrb.mxu1 %v12822_v19  ;;  %v12933_v13 = vld [vmem:[#allocation9 + $0x1a0] sm:$0xf]  ;;  %v14130_v40 = vld [vmem:[#allocation9 + $0x1a4] sm:$0xf0]  ;;  %v12870_v11 = vor.u32 %v14114_v26, %v12869_v43  ;;  %v14080_v25 = vld [vmem:[#allocation9 + $0x14] sm:$0xf0] }
 0x80e   :  { %8342 = vmatpush.bf16.msrb.mxu2 %v12886_v14  ;;  %v12797_v48 = vld [vmem:[#allocation9 + $0x90] sm:$0xf]  ;;  %v12934_v50 = vor.u32 %v14130_v40, %v12933_v13  ;;  %v14096_v51 = vld [vmem:[#allocation9 + $0x94] sm:$0xf0]  ;;  %v12734_v56 = vor.u32 %v14080_v25, %v12733_v45  ;;  %v12725_v0 = vld [vmem:[#allocation9] sm:$0xf] }
 0x80f   :  { %8355 = vmatpush.bf16.msrb.mxu3 %v12950_v30  ;;  %v12861_v52 = vld [vmem:[#allocation9 + $0x110] sm:$0xf]  ;;  %v14112_v35 = vld [vmem:[#allocation9 + $0x114] sm:$0xf0]  ;;  %v14078_v6 = vld [vmem:[#allocation9 + $0x4] sm:$0xf0]  ;;  %v12798_v34 = vor.u32 %v14096_v51, %v12797_v48 }
 0x810   :  { %8317 = vmatpush.bf16.msrb.mxu0 %v12750_v62  ;;  %v12925_v55 = vld [vmem:[#allocation9 + $0x190] sm:$0xf]  ;;  %v14128_v1 = vld [vmem:[#allocation9 + $0x194] sm:$0xf0]  ;;  %v12862_v58 = vor.u32 %v14112_v35, %v12861_v52  ;;  %v12789_v60 = vld [vmem:[#allocation9 + $0x80] sm:$0xf]  ;;  %v12726_v8 = vor.u32 %v14078_v6, %v12725_v0 }
 0x811   :  { %8330 = vmatpush.bf16.msrb.mxu1 %v12814_v23  ;;  %v14094_v61 = vld [vmem:[#allocation9 + $0x84] sm:$0xf0]  ;;  %v12853_v37 = vld [vmem:[#allocation9 + $0x100] sm:$0xf]  ;;  %v12926_v46 = vor.u32 %v14128_v1, %v12925_v55  ;;  %v14091_v4 = vld [vmem:[#allocation9 + $0x74] sm:$0xf] }
 0x812   :  { %8343 = vmatpush.bf16.msrb.mxu2 %v12878_v16  ;;  %v14110_v63 = vld [vmem:[#allocation9 + $0x104] sm:$0xf0]  ;;  %v12917_v28 = vld [vmem:[#allocation9 + $0x180] sm:$0xf]  ;;  %v12783_v5 = vld [vmem:[#allocation9 + $0x78] sm:$0xf0]  ;;  %v12790_v33 = vor.u32 %v14094_v61, %v12789_v60 }
 0x813   :  { %8356 = vmatpush.bf16.msrb.mxu3 %v12942_v42  ;;  %v14126_v53 = vld [vmem:[#allocation9 + $0x184] sm:$0xf0]  ;;  %v14107_v7 = vld [vmem:[#allocation9 + $0xf4] sm:$0xf]  ;;  %v12847_v9 = vld [vmem:[#allocation9 + $0xf8] sm:$0xf0]  ;;  %v12854_v22 = vor.u32 %v14110_v63, %v12853_v37  ;;  %v12786_v15 = vor.u32 %v14091_v4, %v12783_v5 }
 0x814   :  { %8318 = vmatpush.bf16.msrb.mxu0 %v12742_v49  ;;  %v14123_v44 = vld [vmem:[#allocation9 + $0x174] sm:$0xf]  ;;  %v12911_v36 = vld [vmem:[#allocation9 + $0x178] sm:$0xf0]  ;;  %v12918_v14 = vor.u32 %v14126_v53, %v12917_v28  ;;  %v12850_v27 = vor.u32 %v14107_v7, %v12847_v9  ;;  %v14089_v30 = vld [vmem:[#allocation9 + $0x64] sm:$0xf] }
 0x815   :  { %8331 = vmatpush.bf16.msrb.mxu1 %v12806_v12  ;;  %v14139_v47 = vld [vmem:[#allocation9 + $0x1f4] sm:$0xf]  ;;  %v12975_v19 = vld [vmem:[#allocation9 + $0x1f8] sm:$0xf0]  ;;  %v12914_v29 = vor.u32 %v14123_v44, %v12911_v36  ;;  %v12775_v31 = vld [vmem:[#allocation9 + $0x68] sm:$0xf0] }
 0x816   :  { %8344 = vmatpush.bf16.msrb.mxu2 %v12870_v11  ;;  %v14105_v3 = vld [vmem:[#allocation9 + $0xe4] sm:$0xf]  ;;  %v12978_v32 = vor.u32 %v14139_v47, %v12975_v19  ;;  %v12839_v17 = vld [vmem:[#allocation9 + $0xe8] sm:$0xf0]  ;;  %v12778_v38 = vor.u32 %v14089_v30, %v12775_v31  ;;  %v14087_v42 = vld [vmem:[#allocation9 + $0x54] sm:$0xf] }
 0x817   :  { %8357 = vmatpush.bf16.msrb.mxu3 %v12934_v50  ;;  %v14121_v18 = vld [vmem:[#allocation9 + $0x164] sm:$0xf]  ;;  %v12903_v62 = vld [vmem:[#allocation9 + $0x168] sm:$0xf0]  ;;  %v12842_v39 = vor.u32 %v14105_v3, %v12839_v17  ;;  %v12767_v59 = vld [vmem:[#allocation9 + $0x58] sm:$0xf0] }
 0x818   :  { %8319 = vmatpush.bf16.msrb.mxu0 %v12734_v56  ;;  %v14137_v23 = vld [vmem:[#allocation9 + $0x1e4] sm:$0xf]  ;;  %v12967_v16 = vld [vmem:[#allocation9 + $0x1e8] sm:$0xf0]  ;;  %v12906_v41 = vor.u32 %v14121_v18, %v12903_v62  ;;  %v14103_v43 = vld [vmem:[#allocation9 + $0xd4] sm:$0xf]  ;;  %v12770_v45 = vor.u32 %v14087_v42, %v12767_v59 }
 0x819   :  { %8332 = vmatpush.bf16.msrb.mxu1 %v12798_v34  ;;  %v12970_v26 = vor.u32 %v14137_v23, %v12967_v16  ;;  %v12831_v13 = vld [vmem:[#allocation9 + $0xd8] sm:$0xf0]  ;;  %v14119_v40 = vld [vmem:[#allocation9 + $0x154] sm:$0xf]  ;;  %v14085_v50 = vld [vmem:[#allocation9 + $0x44] sm:$0xf] }
 0x81a   :  { %8345 = vmatpush.bf16.msrb.mxu2 %v12862_v58  ;;  %v12895_v49 = vld [vmem:[#allocation9 + $0x158] sm:$0xf0]  ;;  %v14135_v12 = vld [vmem:[#allocation9 + $0x1d4] sm:$0xf]  ;;  %v12834_v25 = vor.u32 %v14103_v43, %v12831_v13  ;;  %v12759_v51 = vld [vmem:[#allocation9 + $0x48] sm:$0xf0] }
 0x81b   :  { %8358 = vmatpush.bf16.msrb.mxu3 %v12926_v46  ;;  %v12959_v11 = vld [vmem:[#allocation9 + $0x1d8] sm:$0xf0]  ;;  %v12898_v48 = vor.u32 %v14119_v40, %v12895_v49  ;;  %v14101_v52 = vld [vmem:[#allocation9 + $0xc4] sm:$0xf]  ;;  %v12823_v55 = vld [vmem:[#allocation9 + $0xc8] sm:$0xf0]  ;;  %v12762_v34 = vor.u32 %v14085_v50, %v12759_v51 }
 0x81c   :  { %8320 = vmatpush.bf16.msrb.mxu0 %v12726_v8  ;;  %v12962_v35 = vor.u32 %v14135_v12, %v12959_v11  ;;  %v14117_v1 = vld [vmem:[#allocation9 + $0x144] sm:$0xf]  ;;  %v12887_v56 = vld [vmem:[#allocation9 + $0x148] sm:$0xf0]  ;;  %v12826_v58 = vor.u32 %v14101_v52, %v12823_v55  ;;  %v14083_v61 = vld [vmem:[#allocation9 + $0x34] sm:$0xf] }
 0x81d   :  { %8333 = vmatpush.bf16.msrb.mxu1 %v12790_v33  ;;  %v14133_v0 = vld [vmem:[#allocation9 + $0x1c4] sm:$0xf]  ;;  %v12951_v6 = vld [vmem:[#allocation9 + $0x1c8] sm:$0xf0]  ;;  %v12890_v60 = vor.u32 %v14117_v1, %v12887_v56  ;;  %v12751_v37 = vld [vmem:[#allocation9 + $0x38] sm:$0xf0] }
 0x81e   :  { %8346 = vmatpush.bf16.msrb.mxu2 %v12854_v22  ;;  %v14099_v46 = vld [vmem:[#allocation9 + $0xb4] sm:$0xf]  ;;  %v12954_v63 = vor.u32 %v14133_v0, %v12951_v6  ;;  %v12815_v28 = vld [vmem:[#allocation9 + $0xb8] sm:$0xf0]  ;;  %v12754_v8 = vor.u32 %v14083_v61, %v12751_v37  ;;  %v14081_v36 = vld [vmem:[#allocation9 + $0x24] sm:$0xf] }
 0x81f   :  { %8359 = vmatpush.bf16.msrb.mxu3 %v12918_v14  ;;  %8321 = vmatmul.bf16.vlgmr.msrb.gmra.mxu0 %v14930_v54  ;;  %v14115_v53 = vld [vmem:[#allocation9 + $0x134] sm:$0xf]  ;;  %v12879_v4 = vld [vmem:[#allocation9 + $0x138] sm:$0xf0]  ;;  %v12818_v9 = vor.u32 %v14099_v46, %v12815_v28  ;;  %v12743_v33 = vld [vmem:[#allocation9 + $0x28] sm:$0xf0] }
 0x820   :  { %8365 = vmatpush.bf16.msra.mxu0 %v12786_v15  ;;  %8334 = vmatmul.bf16.vlgmr.msrb.gmra.mxu1 %v14934_v57  ;;  %v14131_v5 = vld [vmem:[#allocation9 + $0x1b4] sm:$0xf]  ;;  %v12943_v7 = vld [vmem:[#allocation9 + $0x1b8] sm:$0xf0]  ;;  %v12882_v44 = vor.u32 %v14115_v53, %v12879_v4  ;;  %v14097_v22 = vld [vmem:[#allocation9 + $0xa4] sm:$0xf]  ;;  %v12746_v30 = vor.u32 %v14081_v36, %v12743_v33 }
 0x821   :  { %8378 = vmatpush.bf16.msra.mxu1 %v12850_v27  ;;  %8347 = vmatmul.bf16.vlgmr.msrb.gmra.mxu2 %v14938_v10  ;;  %v12946_v47 = vor.u32 %v14131_v5, %v12943_v7  ;;  %v12807_v19 = vld [vmem:[#allocation9 + $0xa8] sm:$0xf0]  ;;  %v14113_v14 = vld [vmem:[#allocation9 + $0x124] sm:$0xf]  ;;  %v12735_v17 = vld [vmem:[#allocation9 + $0x18] sm:$0xf0] }
 0x822   :  { %8391 = vmatpush.bf16.msra.mxu2 %v12914_v29  ;;  %8360 = vmatmul.bf16.vlgmr.msrb.gmra.mxu3 %v14942_v2  ;;  %v12871_v15 = vld [vmem:[#allocation9 + $0x128] sm:$0xf0]  ;;  %v14129_v27 = vld [vmem:[#allocation9 + $0x1a4] sm:$0xf]  ;;  %v12810_v31 = vor.u32 %v14097_v22, %v12807_v19  ;;  %v14095_v18 = vld [vmem:[#allocation9 + $0x94] sm:$0xf] }
 0x823   :  { %8404 = vmatpush.bf16.msra.mxu3 %v12978_v32  ;;  %v12935_v29 = vld [vmem:[#allocation9 + $0x1a8] sm:$0xf0]  ;;  %v12874_v3 = vor.u32 %v14113_v14, %v12871_v15  ;;  %v14079_v32 = vld [vmem:[#allocation9 + $0x14] sm:$0xf]  ;;  %v12799_v23 = vld [vmem:[#allocation9 + $0x98] sm:$0xf0] }
 0x824   :  { %8366 = vmatpush.bf16.msra.mxu0 %v12778_v38  ;;  %v12938_v62 = vor.u32 %v14129_v27, %v12935_v29  ;;  %v14111_v16 = vld [vmem:[#allocation9 + $0x114] sm:$0xf]  ;;  %v12863_v38 = vld [vmem:[#allocation9 + $0x118] sm:$0xf0]  ;;  %v12738_v42 = vor.u32 %v14079_v32, %v12735_v17  ;;  %v12802_v59 = vor.u32 %v14095_v18, %v12799_v23  ;;  %v12727_v13 = vld [vmem:[#allocation9 + $0x8] sm:$0xf0] }
 0x825   :  { %8379 = vmatpush.bf16.msra.mxu1 %v12842_v39  ;;  %v14127_v39 = vld [vmem:[#allocation9 + $0x194] sm:$0xf]  ;;  %v12866_v43 = vor.u32 %v14111_v16, %v12863_v38  ;;  %v14093_v40 = vld [vmem:[#allocation9 + $0x84] sm:$0xf]  ;;  %v12791_v12 = vld [vmem:[#allocation9 + $0x88] sm:$0xf0] }
 0x826   :  { %8392 = vmatpush.bf16.msra.mxu2 %v12906_v41  ;;  %v12927_v41 = vld [vmem:[#allocation9 + $0x198] sm:$0xf0]  ;;  %v14109_v11 = vld [vmem:[#allocation9 + $0x104] sm:$0xf]  ;;  %v12794_v51 = vor.u32 %v14093_v40, %v12791_v12  ;;  %v7991_v55 = vperm.slane %v14642_v20, 7 }
 0x827   :  { %8405 = vmatpush.bf16.msra.mxu3 %v12970_v26  ;;  %v14077_v26 = vld [vmem:[#allocation9 + $0x4] sm:$0xf]  ;;  %v12930_v49 = vor.u32 %v14127_v39, %v12927_v41 }
 0x828   :  { %8367 = vmatpush.bf16.msra.mxu0 %v12770_v45  ;;  %v12855_v45 = vld [vmem:[#allocation9 + $0x108] sm:$0xf0]  ;;  %v12730_v50 = vor.u32 %v14077_v26, %v12727_v13 }
 0x829   :  { %8380 = vmatpush.bf16.msra.mxu1 %v12834_v25  ;;  %v14125_v25 = vld [vmem:[#allocation9 + $0x184] sm:$0xf]  ;;  %v12858_v52 = vor.u32 %v14109_v11, %v12855_v45 }
 0x82a   :  { %8393 = vmatpush.bf16.msra.mxu2 %v12898_v48  ;;  %v12919_v48 = vld [vmem:[#allocation9 + $0x188] sm:$0xf0] }
 0x82b   :  { %8406 = vmatpush.bf16.msra.mxu3 %v12962_v35  ;;  %v12922_v35 = vor.u32 %v14125_v25, %v12919_v48 }
 0x82c   :  { %8368 = vmatpush.bf16.msra.mxu0 %v12762_v34 }
 0x82d   :  { %8381 = vmatpush.bf16.msra.mxu1 %v12826_v58 }
 0x82e   :  { %8394 = vmatpush.bf16.msra.mxu2 %v12890_v60 }
 0x82f   :  { %8407 = vmatpush.bf16.msra.mxu3 %v12954_v63 }
 0x830   :  { %8369 = vmatpush.bf16.msra.mxu0 %v12754_v8 }
 0x831   :  { %8382 = vmatpush.bf16.msra.mxu1 %v12818_v9 }
 0x832   :  { %8395 = vmatpush.bf16.msra.mxu2 %v12882_v44 }
 0x833   :  { %8408 = vmatpush.bf16.msra.mxu3 %v12946_v47 }
 0x834   :  { %8370 = vmatpush.bf16.msra.mxu0 %v12746_v30 }
 0x835   :  { %8383 = vmatpush.bf16.msra.mxu1 %v12810_v31 }
 0x836   :  { %8396 = vmatpush.bf16.msra.mxu2 %v12874_v3 }
 0x837   :  { %8409 = vmatpush.bf16.msra.mxu3 %v12938_v62 }
 0x838   :  { %8371 = vmatpush.bf16.msra.mxu0 %v12738_v42 }
 0x839   :  { %8384 = vmatpush.bf16.msra.mxu1 %v12802_v59 }
 0x83a   :  { %8397 = vmatpush.bf16.msra.mxu2 %v12866_v43 }
 0x83b   :  { %8410 = vmatpush.bf16.msra.mxu3 %v12930_v49 }
 0x83c   :  { %8372 = vmatpush.bf16.msra.mxu0 %v12730_v50 }
 0x83d   :  { %8385 = vmatpush.bf16.msra.mxu1 %v12794_v51 }
 0x83e   :  { %8398 = vmatpush.bf16.msra.mxu2 %v12858_v52 }
 0x83f   :  { %8411 = vmatpush.bf16.msra.mxu3 %v12922_v35  ;;  %8373 = vmatmul.bf16.vlgmr.msra.gmra.mxu0 %v14930_v54 }
 0x840   :  { %8386 = vmatmul.bf16.vlgmr.msra.gmra.mxu1 %v14934_v57 }
 0x841   :  { %8399 = vmatmul.bf16.vlgmr.msra.gmra.mxu2 %v14938_v10  ;;  %v7992_v10 = vperm.slane %v14644_v21, 7 }
 0x842   :  { %8412 = vmatmul.bf16.vlgmr.msra.gmra.mxu3 %v14942_v2 }
 0x89c   :  { %v8322_v1 = vpop.f32.mrf.mxu0 }
 0x89d   :  { %v8323_v56 = vadd.f32 %v8322_v1, %v7991_v55  ;;  %v8335_v0 = vpop.f32.mrf.mxu1 }
 0x89f   :  { %v8336_v6 = vadd.f32 %v8335_v0, %v8323_v56 }
 0x8a4   :  { %v8348_v34 = vpop.f32.mrf.mxu2  ;;  %v8324_v37 = vpop.f32.mrf.mxu0 }
 0x8a5   :  { %v8349_v58 = vadd.f32 %v8348_v34, %v8336_v6  ;;  %v8361_v60 = vpop.f32.mrf.mxu3  ;;  %v8337_v46 = vpop.f32.mrf.mxu1 }
 0x8a7   :  { %v8362_v61 = vadd.f32 %v8361_v60, %v8349_v58 }
 0x8a9   :  { %v8417_v63 = vmax.f32 %v8362_v61, 0.0 }
 0x8ab   :  { %v8419_v54 = vpack.c.bf16 %v8417_v63, %v8417_v63 }
 0x8ac   :  { %v8350_v28 = vpop.f32.mrf.mxu2 }
 0x8ad   :  { %v8363_v57 = vpop.f32.mrf.mxu3 }
 0x8bc   :  { %v8374_v53 = vpop.f32.mrf.mxu0 }
 0x8bd   :  { %v8375_v2 = vadd.f32 %v8374_v53, %v7992_v10  ;;  %v8387_v4 = vpop.f32.mrf.mxu1 }
 0x8bf   :  { %v8388_v20 = vadd.f32 %v8387_v4, %v8375_v2 }
 0x8c4   :  { %v8400_v5 = vpop.f32.mrf.mxu2  ;;  %v8376_v9 = vpop.f32.mrf.mxu0 }
 0x8c5   :  { %v8401_v7 = vadd.f32 %v8400_v5, %v8388_v20  ;;  %v8413_v8 = vpop.f32.mrf.mxu3  ;;  %v8389_v44 = vpop.f32.mrf.mxu1 }
 0x8c7   :  { %v8414_v36 = vadd.f32 %v8413_v8, %v8401_v7 }
 0x8c9   :  { %v8418_v33 = vmax.f32 %v8414_v36, 0.0 }
 0x8cb   :  { %v8420_v22 = vpack.c.bf16 %v8418_v33, %v8418_v33 }
 0x8cc   :  { %v8402_v47 = vpop.f32.mrf.mxu2 }
 0x8cd   :  { %v8415_v19 = vpop.f32.mrf.mxu3 }
 0x8ce   :  { %14460 = dma.done.wait [#allocation12 + $0x8], 2048 }
 0x8cf   :  { %14461 = vsyncadd [#allocation12 + $0x8], 4294965248  ;;  %v14148_v14 = vld [vmem:[#allocation10 + $0x48] sm:$0xff]  ;;  %v14155_v27 = vld [vmem:[#allocation10 + $0x78] sm:$0xff]  ;;  %v8457_v41 = vperm.slane %v14650_v24, 0 }
 0x8d0   :  { %v14156_v15 = vld [vmem:[#allocation10 + $0x28] sm:$0xff]  ;;  %8554 = vmatpush.bf16.msrb.mxu0 %v14148_v14  ;;  %v14154_v30 = vld [vmem:[#allocation10 + $0x70] sm:$0xff]  ;;  %v14153_v3 = vld [vmem:[#allocation10 + $0x60] sm:$0xff] }
 0x8d1   :  { %8567 = vmatpush.bf16.msrb.mxu1 %v14156_v15  ;;  %v14147_v21 = vld [vmem:[#allocation10 + $0x8] sm:$0xff]  ;;  %v14145_v31 = vld [vmem:[#allocation10 + $0x50] sm:$0xff]  ;;  %v14144_v32 = vld [vmem:[#allocation10 + $0x18] sm:$0xff] }
 0x8d2   :  { %v14146_v29 = vld [vmem:[#allocation10 + $0x68] sm:$0xff]  ;;  %v14152_v17 = vld [vmem:[#allocation10 + $0x38] sm:$0xff]  ;;  %v14151_v62 = vld [vmem:[#allocation10 + $0x10] sm:$0xff] }
 0x8d3   :  { %v14143_v18 = vld [vmem:[#allocation10 + $0x58] sm:$0xff]  ;;  %v14142_v23 = vld [vmem:[#allocation10] sm:$0xff]  ;;  %v14141_v38 = vld [vmem:[#allocation10 + $0x30] sm:$0xff] }
 0x8d4   :  { %8555 = vmatpush.bf16.msrb.mxu0 %v14147_v21  ;;  %v14150_v16 = vld [vmem:[#allocation10 + $0x20] sm:$0xff] }
 0x8d5   :  { %8568 = vmatpush.bf16.msrb.mxu1 %v14155_v27  ;;  %v14149_v39 = vld [vmem:[#allocation10 + $0x40] sm:$0xff] }
 0x8d8   :  { %8556 = vmatpush.bf16.msrb.mxu0 %v14146_v29 }
 0x8d9   :  { %8569 = vmatpush.bf16.msrb.mxu1 %v14154_v30 }
 0x8dc   :  { %8557 = vmatpush.bf16.msrb.mxu0 %v14145_v31 }
 0x8dd   :  { %8570 = vmatpush.bf16.msrb.mxu1 %v14153_v3 }
 0x8e0   :  { %8558 = vmatpush.bf16.msrb.mxu0 %v14144_v32 }
 0x8e1   :  { %8571 = vmatpush.bf16.msrb.mxu1 %v14152_v17 }
 0x8e4   :  { %8559 = vmatpush.bf16.msrb.mxu0 %v14143_v18 }
 0x8e5   :  { %8572 = vmatpush.bf16.msrb.mxu1 %v14151_v62 }
 0x8e8   :  { %8560 = vmatpush.bf16.msrb.mxu0 %v14142_v23 }
 0x8e9   :  { %8573 = vmatpush.bf16.msrb.mxu1 %v14150_v16 }
 0x8ec   :  { %8561 = vmatpush.bf16.msrb.mxu0 %v14141_v38 }
 0x8ed   :  { %8574 = vmatpush.bf16.msrb.mxu1 %v14149_v39 }
 0x8ef   :  { %8562 = vmatmul.bf16.vlgmr.msrb.gmra.mxu0 %v8419_v54 }
 0x8f0   :  { %8575 = vmatmul.bf16.vlgmr.msrb.gmra.mxu1 %v8420_v22 }
 0x96c   :  { %v8563_v42 = vpop.f32.mrf.mxu0 }
 0x96d   :  { %v8576_v59 = vpop.f32.mrf.mxu1  ;;  %v8564_v43 = vadd.f32 %v8563_v42, %v8457_v41 }
 0x96f   :  { %v8577_v26 = vadd.f32 %v8576_v59, %v8564_v43 }
 0x971   :  { %v8580_v13 = vmax.f32 %v8577_v26, 0.0 }
 0x973   :  { %v8581_v40 = vpack.c.bf16 %v8580_v13, %v8580_v13 }
 0x974   :  { %v8565_v49 = vpop.f32.mrf.mxu0 }
 0x975   :  { %v8578_v12 = vpop.f32.mrf.mxu1 }
 0x976   :  { %14462 = dma.done.wait [#allocation12 + $0x9], 1024 }
 0x977   :  { %14463 = vsyncadd [#allocation12 + $0x9], 4294966272  ;;  %v14164_v11 = vld [vmem:[#allocation11 + $0x38] sm:$0xff]  ;;  %v14163_v45 = vld [vmem:[#allocation11 + $0x30] sm:$0xff]  ;;  %v8602_v55 = vperm.slane %v14650_v24, 1  ;;  %s14478_s0 = smov [#allocation16]  }
 0x978   :  { %8651 = vmatpush.bf16.msrb.mxu2 %v14164_v11  ;;  %v14162_v25 = vld [vmem:[#allocation11 + $0x28] sm:$0xff]  ;;  %v14161_v48 = vld [vmem:[#allocation11 + $0x20] sm:$0xff]  ;;  %v14160_v50 = vld [vmem:[#allocation11 + $0x18] sm:$0xff]  ;;  %s8670_s17 = sshll.u32 %s14478_s0, 4  ;;  %s8672_s20 = sshll.u32 %s14971_s12, 4  ;;  %s8671_s17 = int_to_ptr.vmem [resolvable:$true] %s8670_s17  ;;  %s8673_s20 = int_to_ptr.hbm [resolvable:$true] %s8672_s20 }
 0x979   :  { %v14159_v51 = vld [vmem:[#allocation11 + $0x10] sm:$0xff]  ;;  %v14158_v52 = vld [vmem:[#allocation11 + $0x8] sm:$0xff]  ;;  %v14157_v35 = vld [vmem:[#allocation11] sm:$0xff] }
 0x97c   :  { %8652 = vmatpush.bf16.msrb.mxu2 %v14163_v45 }
 0x980   :  { %8653 = vmatpush.bf16.msrb.mxu2 %v14162_v25 }
 0x984   :  { %8654 = vmatpush.bf16.msrb.mxu2 %v14161_v48 }
 0x988   :  { %8655 = vmatpush.bf16.msrb.mxu2 %v14160_v50 }
 0x98c   :  { %8656 = vmatpush.bf16.msrb.mxu2 %v14159_v51 }
 0x990   :  { %8657 = vmatpush.bf16.msrb.mxu2 %v14158_v52 }
 0x994   :  { %8658 = vmatpush.bf16.msrb.mxu2 %v14157_v35 }
 0x997   :  { %8659 = vmatmul.bf16.vlgmr.msrb.gmra.mxu2 %v8581_v40 }
 0xa1a   :  { %v8660_v1 = vpop.f32.mrf.mxu2 }
 0xa1b   :  { %v8661_v56 = vadd.f32 %v8660_v1, %v8602_v55 }
 0xa1d   :  { %8664 = vst [vmem:[#allocation16] sm:$0xff] %v8661_v56 }
 0xa1e   :  { %8675 = dma.vmem_to_hbm [thread:$0]  %s8671_s17, 128, %s8673_s20, [#allocation15]  }
 0xa22   :  { %v8662_v0 = vpop.f32.mrf.mxu2 }
 0xa23   :  { %14464 = dma.done.wait [#allocation15], 128  }
 0xa24   :  { %14465 = vsyncadd [#allocation15], 4294967168 }
 0xa25   :  { %8680 = vsyncpa [#allocation14], 1 }
 0xa26   :  { %8681 = vsyncpa [#allocation15], 1 }
 0xa27   :  { %8682 = vsyncmov [#allocation12] }
 0xa2a   :  { %s8683_s2 = vpop.sfrf %8682 }
 0xa2b   :  { %p13075_p0 = scmp.ne.s32.totalorder %s8683_s2, 0 }
 0xa2d   :  { %8687 = shalt.err (%p13075_p0)  }
 0xa2e   :  { %8689 = vsyncmov [#allocation12 + $0x1] }
 0xa31   :  { %s8690_s23 = vpop.sfrf %8689 }
 0xa32   :  { %p13076_p1 = scmp.ne.s32.totalorder %s8690_s23, 0 }
 0xa34   :  { %8694 = shalt.err (%p13076_p1)  }
 0xa35   :  { %8696 = vsyncmov [#allocation12 + $0x2] }
 0xa38   :  { %s8697_s12 = vpop.sfrf %8696 }
 0xa39   :  { %p13077_p2 = scmp.ne.s32.totalorder %s8697_s12, 0 }
 0xa3b   :  { %8701 = shalt.err (%p13077_p2)  }
 0xa3c   :  { %8703 = vsyncmov [#allocation12 + $0x3] }
 0xa3f   :  { %s8704_s24 = vpop.sfrf %8703 }
 0xa40   :  { %p13078_p3 = scmp.ne.s32.totalorder %s8704_s24, 0 }
 0xa42   :  { %8708 = shalt.err (%p13078_p3)  }
 0xa43   :  { %8710 = vsyncmov [#allocation12 + $0x4] }
 0xa46   :  { %s8711_s22 = vpop.sfrf %8710 }
 0xa47   :  { %p13079_p4 = scmp.ne.s32.totalorder %s8711_s22, 0 }
 0xa49   :  { %8715 = shalt.err (%p13079_p4)  }
 0xa4a   :  { %8717 = vsyncmov [#allocation12 + $0x5] }
 0xa4d   :  { %s8718_s21 = vpop.sfrf %8717 }
 0xa4e   :  { %p13080_p5 = scmp.ne.s32.totalorder %s8718_s21, 0 }
 0xa50   :  { %8722 = shalt.err (%p13080_p5)  }
 0xa51   :  { %8724 = vsyncmov [#allocation12 + $0x6] }
 0xa54   :  { %s8725_s3 = vpop.sfrf %8724 }
 0xa55   :  { %p13081_p6 = scmp.ne.s32.totalorder %s8725_s3, 0 }
 0xa57   :  { %8729 = shalt.err (%p13081_p6)  }
 0xa58   :  { %8731 = vsyncmov [#allocation12 + $0x7] }
 0xa5b   :  { %s8732_s25 = vpop.sfrf %8731 }
 0xa5c   :  { %p13082_p7 = scmp.ne.s32.totalorder %s8732_s25, 0 }
 0xa5e   :  { %8736 = shalt.err (%p13082_p7)  }
 0xa5f   :  { %8738 = vsyncmov [#allocation12 + $0x8] }
 0xa62   :  { %s8739_s26 = vpop.sfrf %8738 }
 0xa63   :  { %p13083_p8 = scmp.ne.s32.totalorder %s8739_s26, 0 }
 0xa65   :  { %8743 = shalt.err (%p13083_p8)  }
 0xa66   :  { %8745 = vsyncmov [#allocation12 + $0x9] }
 0xa69   :  { %s8746_s8 = vpop.sfrf %8745 }
 0xa6a   :  { %p13084_p9 = scmp.ne.s32.totalorder %s8746_s8, 0 }
 0xa6c   :  { %8750 = shalt.err (%p13084_p9)  }

</bundles_post_ra>
